<compile_context>
chip_gen: v6e
topology: v6e:2x2x1
jax: 0.10.0
libtpu: 0.0.40
codegen_flags: <defaults>
</compile_context>

<pallas_src>
import functools
import math

import jax
import jax.numpy as jnp
from jax import lax
from jax.experimental import pallas as pl
from jax.experimental.pallas import tpu as pltpu

EPS = 1e-5  # torch.nn.LayerNorm default eps


# ----------------------------------------------------------------------------- helpers
def _layernorm(x, g, b):
    mu = jnp.mean(x, axis=-1, keepdims=True)
    var = jnp.mean((x - mu) ** 2, axis=-1, keepdims=True)
    return (x - mu) * lax.rsqrt(var + EPS) * g + b


def _proj(x, w):
    """Contract the last dim of x against rows of w; f32 accumulate."""
    return lax.dot_general(
        x, w,
        dimension_numbers=(((x.ndim - 1,), (0,)), ((), ())),
        preferred_element_type=jnp.float32)


# ----------------------------------------------------------------------------- kernel
def fused_layer_kernel(
    x_ref,      # (B, S, in_hand) f32  (row 0 of S is zeros: cls slot)
    y_ref,      # (B, S, in_obj)  f32
    add_ref,    # (B, S, D)       f32  cls-token + pos-embed + label cols + proj biases
    rw_ref,     # (in_hand, 100)  bf16 right_linear weight
    ow_ref,     # (in_obj, 100)   bf16 obj_linear weight
    wqkv_ref,   # (3, D, inner)   bf16 per-layer block (leading depth dim squeezed)
    wo_ref,     # (inner, D)      bf16
    w1_ref,     # (D, mlp)        bf16
    b1_ref,     # (1, mlp)        f32
    w2_ref,     # (mlp, D)        bf16
    lvec_ref,   # (6, D) f32 rows: ln1_g, ln1_b, to_out_b, ln2_g, ln2_b, ff2_b
    hvec_ref,   # (4, D) f32 rows: final_norm_g/b, head_ln_g/b
    hw_ref,     # (D, nc)         bf16
    hb_ref,     # (1, nc)         f32
    o_ref,      # (B, nc)         f32
    seq_ref,    # scratch (B, S, D) f32, carried across the depth grid
    *, heads, dim_head,
):
    f32 = jnp.float32
    l = pl.program_id(0)
    B, S, D = seq_ref.shape

    # ---- prologue (layer 0): input projections + concat + cls token + pos embed ----
    @pl.when(l == 0)
    def _():
        right = _proj(x_ref[...], rw_ref[...].astype(f32))       # (B, S, 100)
        obj = _proj(y_ref[...], ow_ref[...].astype(f32))         # (B, S, 100)
        tail = jnp.zeros((B, S, D - 200), f32)                   # label cols come via add_ref
        seq_ref[...] = jnp.concatenate([right, obj, tail], axis=-1) + add_ref[...]

    # ---- per-layer vectors, read once per grid step ----
    ln1_g, ln1_b = lvec_ref[0], lvec_ref[1]
    bo = lvec_ref[2]
    ln2_g, ln2_b = lvec_ref[3], lvec_ref[4]
    b2 = lvec_ref[5]

    seq = seq_ref[...]                                           # (B, S, D) f32

    # ---- PreNorm + multi-head self-attention + residual ----
    h = _layernorm(seq, ln1_g, ln1_b)
    q = _proj(h, wqkv_ref[0].astype(f32))                        # (B, S, inner)
    k = _proj(h, wqkv_ref[1].astype(f32))
    v = _proj(h, wqkv_ref[2].astype(f32))
    scale = dim_head ** -0.5
    outs = []
    for hd in range(heads):                                      # heads small & static
        lo, hi = hd * dim_head, (hd + 1) * dim_head
        q_h, k_h, v_h = q[..., lo:hi], k[..., lo:hi], v[..., lo:hi]
        dots = jnp.einsum("bqd,bkd->bqk", q_h, k_h,
                          preferred_element_type=f32) * scale    # (B, S, S)
        dots = dots - jnp.max(dots, axis=-1, keepdims=True)
        p = jnp.exp(dots)
        p = p / jnp.sum(p, axis=-1, keepdims=True)               # exact softmax (torch parity)
        outs.append(jnp.einsum("bqk,bkd->bqd", p, v_h,
                               preferred_element_type=f32))      # (B, S, Dh)
    attn = _proj(jnp.concatenate(outs, axis=-1), wo_ref[...].astype(f32)) + bo
    seq = seq + attn

    # ---- PreNorm + feed-forward (Linear -> GELU -> Linear) + residual ----
    h2 = _layernorm(seq, ln2_g, ln2_b)
    f = _proj(h2, w1_ref[...].astype(f32)) + b1_ref[...]
    f = 0.5 * f * (1.0 + lax.erf(f * (1.0 / math.sqrt(2.0))))    # exact GELU
    f = _proj(f, w2_ref[...].astype(f32)) + b2
    seq = seq + f
    seq_ref[...] = seq
    # TODO(synk): nn.Dropout(p=0.2) layers are eval-mode identities here.

    # ---- epilogue (last layer): pool='cls', Transformer.norm, mlp_head (LN+Linear) ----
    @pl.when(l == pl.num_programs(0) - 1)
    def _():
        cls = seq[:, 0, :]                                       # (B, D)
        cls = _layernorm(cls, hvec_ref[0], hvec_ref[1])          # Transformer final LN
        cls = _layernorm(cls, hvec_ref[2], hvec_ref[3])          # mlp_head LayerNorm
        o_ref[...] = (jnp.dot(cls, hw_ref[...].astype(f32),
                              preferred_element_type=f32) + hb_ref[...])


# ----------------------------------------------------------------------------- wrapper
def interaction_recognizer_forward(x, y, label, params, cfg):
    """x: (B,T,hand_points,4), y: (B,T,sample_points,4), label: (B,T,dim-200) -> (B, nc)."""
    T, D = cfg["num_frames"], cfg["dim"]
    S = T + 1
    H, Dh = cfg["heads"], cfg["dim_head"]
    mlp, nc, depth = cfg["mlp_dim"], cfg["num_classes"], cfg["depth"]
    inner = H * Dh
    B = x.shape[0]
    assert label.shape[-1] == D - 200, "label width must equal dim - 200"

    x_flat = x.reshape(B, T, -1).astype(jnp.float32)
    y_flat = y.reshape(B, T, -1).astype(jnp.float32)
    in_hand, in_obj = x_flat.shape[-1], y_flat.shape[-1]

    # Layout plumbing (exact algebraic rewrite of the torch forward):
    #  - prepend a zero row so the cls slot flows through the input matmuls as zero,
    #  - fold temporal_token, pos_embedding, label columns [200:D] and the two linear
    #    biases into one additive (B, S, D) term.
    x_aug = jnp.concatenate([jnp.zeros((B, 1, in_hand), jnp.float32), x_flat], axis=1)
    y_aug = jnp.concatenate([jnp.zeros((B, 1, in_obj), jnp.float32), y_flat], axis=1)
    label_pad = jnp.zeros((B, T, D), jnp.float32).at[..., 200:].set(label.astype(jnp.float32))
    add_term = jnp.concatenate(
        [jnp.broadcast_to(params["temporal_token"], (B, 1, D)),
         label_pad + params["feat_bias"]], axis=1) + params["pos_embedding"]   # (B, S, D)

    args = (x_aug, y_aug, add_term,
            params["right_w"], params["obj_w"],
            params["wqkv"], params["wo"], params["w1"], params["b1"], params["w2"],
            params["layer_vecs"], params["head_vecs"], params["head_w"], params["head_b"])

    in_specs = [
        # constant blocks: index never changes -> DMA'd once, not re-fetched per layer
        pl.BlockSpec((B, S, in_hand), lambda l: (0, 0, 0)),
        pl.BlockSpec((B, S, in_obj), lambda l: (0, 0, 0)),
        pl.BlockSpec((B, S, D), lambda l: (0, 0, 0)),
        pl.BlockSpec((in_hand, 100), lambda l: (0, 0)),
        pl.BlockSpec((in_obj, 100), lambda l: (0, 0)),
        # per-layer weight slabs: pipelined (double-buffered) over the depth grid
        pl.BlockSpec((None, 3, D, inner), lambda l: (l, 0, 0, 0)),
        pl.BlockSpec((None, inner, D), lambda l: (l, 0, 0)),
        pl.BlockSpec((None, D, mlp), lambda l: (l, 0, 0)),
        pl.BlockSpec((None, 1, mlp), lambda l: (l, 0, 0)),
        pl.BlockSpec((None, mlp, D), lambda l: (l, 0, 0)),
        pl.BlockSpec((None, 6, D), lambda l: (l, 0, 0)),
        # head params: constant blocks
        pl.BlockSpec((4, D), lambda l: (0, 0)),
        pl.BlockSpec((D, nc), lambda l: (0, 0)),
        pl.BlockSpec((1, nc), lambda l: (0, 0)),
    ]

    flops = (2 * B * S * (in_hand + in_obj) * 100
             + depth * B * (2 * S * D * 3 * inner + 4 * S * S * inner
                            + 2 * S * inner * D + 4 * S * D * mlp)
             + 2 * B * D * nc)
    transcendentals = depth * B * (H * S * S + S * mlp)
    bytes_accessed = sum(int(a.size) * a.dtype.itemsize for a in args) + 4 * B * nc
    ce = pl.CostEstimate(flops=int(flops), transcendentals=int(transcendentals),
                         bytes_accessed=int(bytes_accessed))

    kernel = functools.partial(fused_layer_kernel, heads=H, dim_head=Dh)
    return pl.pallas_call(
        kernel,
        out_shape=jax.ShapeDtypeStruct((B, nc), jnp.float32),
        grid=(depth,),
        in_specs=in_specs,
        out_specs=pl.BlockSpec((B, nc), lambda l: (0, 0)),
        scratch_shapes=[pltpu.VMEM((B, S, D), jnp.float32)],
        compiler_params=pltpu.CompilerParams(
            dimension_semantics=("arbitrary",),          # seq scratch carried across layers
            vmem_limit_bytes=32 * 1024 * 1024),          # ~2 layers of weights + activations
        cost_estimate=ce,
    )(*args)


# ----------------------------------------------------------------------------- params
def init_params(key, cfg):
    d, depth, heads, dim_head = cfg["dim"], cfg["depth"], cfg["heads"], cfg["dim_head"]
    inner = heads * dim_head
    mlp, nc, T = cfg["mlp_dim"], cfg["num_classes"], cfg["num_frames"]
    in_hand = cfg["hand_points"] * 4
    in_obj = cfg["sample_points"] * 4

    keys = iter(jax.random.split(key, 16 + 8 * depth))

    def w(shape, scale=0.02):
        return (scale * jax.random.normal(next(keys), shape)).astype(jnp.float32)

    # Input projections kept un-padded (no zero-byte streaming); downstream
    # torch.cat([right(x), obj(y), label], -1) becomes an in-kernel lane concat,
    # with the biases folded into feat_bias cols [0:100] / [100:200].
    right_w, right_b = w((in_hand, 100)), w((1, 100), 0.01)
    obj_w, obj_b = w((in_obj, 100)), w((1, 100), 0.01)
    feat_bias = (jnp.zeros((1, d), jnp.float32)
                 .at[:, 0:100].set(right_b).at[:, 100:200].set(obj_b))

    wqkv_l, wo_l, w1_l, b1_l, w2_l, vec_l = [], [], [], [], [], []
    for _ in range(depth):
        wqkv = w((d, 3 * inner))                      # to_qkv (bias=False), cols = [q | k | v]
        wqkv_l.append(wqkv.reshape(d, 3, inner).transpose(1, 0, 2))   # (3, d, inner) lane-dense
        wo_l.append(w((inner, d)))                    # to_out Linear weight (transposed)
        w1_l.append(w((d, mlp)))
        b1_l.append(w((1, mlp), 0.01))
        w2_l.append(w((mlp, d)))
        vec_l.append(jnp.stack([
            jnp.ones((d,), jnp.float32), jnp.zeros((d,), jnp.float32),   # ln1 gamma/beta
            w((d,), 0.01),                                               # to_out bias
            jnp.ones((d,), jnp.float32), jnp.zeros((d,), jnp.float32),   # ln2 gamma/beta
            w((d,), 0.01),                                               # ff second bias
        ], axis=0))

    return {
        "right_w": right_w.astype(jnp.bfloat16),
        "obj_w": obj_w.astype(jnp.bfloat16),
        "feat_bias": feat_bias,
        "pos_embedding": w((T + 1, d), 1.0),          # torch.randn
        "temporal_token": w((1, d), 1.0),             # torch.randn
        "wqkv": jnp.stack(wqkv_l).astype(jnp.bfloat16),   # (depth, 3, d, inner)
        "wo": jnp.stack(wo_l).astype(jnp.bfloat16),       # (depth, inner, d)
        "w1": jnp.stack(w1_l).astype(jnp.bfloat16),       # (depth, d, mlp)
        "b1": jnp.stack(b1_l),                            # (depth, 1, mlp) f32
        "w2": jnp.stack(w2_l).astype(jnp.bfloat16),       # (depth, mlp, d)
        "layer_vecs": jnp.stack(vec_l),                   # (depth, 6, d) f32
        "head_vecs": jnp.stack([jnp.ones((d,), jnp.float32), jnp.zeros((d,), jnp.float32),
                                jnp.ones((d,), jnp.float32), jnp.zeros((d,), jnp.float32)]),
        "head_w": w((d, nc)).astype(jnp.bfloat16),
        "head_b": w((1, nc), 0.01),
    }


# ----------------------------------------------------------------------------- main
if __name__ == "__main__":
    # Small config consistent with the module's forward (dataset=None branch):
    #   right_linear(hand_points*4 -> 100), obj_linear(sample_points*4 -> 100),
    #   concat with label (dim-200 cols) -> dim, prepend cls token, pos-embed,
    #   depth-layer transformer, 'cls' pooling, LayerNorm + Linear head.
    cfg = dict(
        num_classes=37, num_frames=8, dim=308, depth=4, heads=3, dim_head=64,
        mlp_dim=308 * 4, hand_points=16, sample_points=32,  # 16/32 stand in for 778/2000
        batch=2,                                            # B samples amortize the weight stream
    )
    label_dim = cfg["dim"] - 200  # 108

    root = jax.random.PRNGKey(0)
    k_param, k_x, k_y, k_l = jax.random.split(root, 4)
    params = init_params(k_param, cfg)

    B, T = cfg["batch"], cfg["num_frames"]
    x = jax.random.normal(k_x, (B, T, cfg["hand_points"], 4), jnp.float32)
    y = jax.random.normal(k_y, (B, T, cfg["sample_points"], 4), jnp.float32)
    label = jax.random.normal(k_l, (B, T, label_dim), jnp.float32)

    @jax.jit
    def fwd(x, y, label, params):
        return interaction_recognizer_forward(x, y, label, params, cfg)

    logits = jax.block_until_ready(fwd(x, y, label, params))
    assert logits.shape == (B, cfg["num_classes"])
    assert bool(jnp.all(jnp.isfinite(logits)))
    print("KERNEL_OK")
</pallas_src>

<mosaic_0001>
module attributes {stable_mosaic.version = 11 : i64} {
  func.func @fused_layer_kernel(%arg0: i32, %arg1: memref<2x9x64xf32, #tpu.memory_space<vmem>>, %arg2: memref<2x9x128xf32, #tpu.memory_space<vmem>>, %arg3: memref<2x9x308xf32, #tpu.memory_space<vmem>>, %arg4: memref<64x100xbf16, #tpu.memory_space<vmem>>, %arg5: memref<128x100xbf16, #tpu.memory_space<vmem>>, %arg6: memref<1x3x308x192xbf16, #tpu.memory_space<vmem>>, %arg7: memref<1x192x308xbf16, #tpu.memory_space<vmem>>, %arg8: memref<1x308x1232xbf16, #tpu.memory_space<vmem>>, %arg9: memref<1x1x1232xf32, #tpu.memory_space<vmem>>, %arg10: memref<1x1232x308xbf16, #tpu.memory_space<vmem>>, %arg11: memref<1x6x308xf32, #tpu.memory_space<vmem>>, %arg12: memref<4x308xf32, #tpu.memory_space<vmem>>, %arg13: memref<308x37xbf16, #tpu.memory_space<vmem>>, %arg14: memref<1x37xf32, #tpu.memory_space<vmem>>, %arg15: memref<2x37xf32, #tpu.memory_space<vmem>>, %arg16: memref<2x9x308xf32, #tpu.memory_space<vmem>>) attributes {dimension_semantics = [#tpu.dimension_semantics<arbitrary>], iteration_bounds = array<i64: 4>, scalar_prefetch = 0 : i64, scratch_operands = 1 : i64, tpu.core_type = #tpu.core_type<tc>, window_params = [{pipeline_mode = #tpu.pipeline_mode<synchronous>, transform_indices = @transform_0, window_bounds = array<i64: 2, 9, 64>}, {pipeline_mode = #tpu.pipeline_mode<synchronous>, transform_indices = @transform_1, window_bounds = array<i64: 2, 9, 128>}, {pipeline_mode = #tpu.pipeline_mode<synchronous>, transform_indices = @transform_2, window_bounds = array<i64: 2, 9, 308>}, {pipeline_mode = #tpu.pipeline_mode<synchronous>, transform_indices = @transform_3, window_bounds = array<i64: 64, 100>}, {pipeline_mode = #tpu.pipeline_mode<synchronous>, transform_indices = @transform_4, window_bounds = array<i64: 128, 100>}, {transform_indices = @transform_5, window_bounds = array<i64: 1, 3, 308, 192>}, {transform_indices = @transform_6, window_bounds = array<i64: 1, 192, 308>}, {transform_indices = @transform_7, window_bounds = array<i64: 1, 308, 1232>}, {transform_indices = @transform_8, window_bounds = array<i64: 1, 1, 1232>}, {transform_indices = @transform_9, window_bounds = array<i64: 1, 1232, 308>}, {transform_indices = @transform_10, window_bounds = array<i64: 1, 6, 308>}, {pipeline_mode = #tpu.pipeline_mode<synchronous>, transform_indices = @transform_11, window_bounds = array<i64: 4, 308>}, {pipeline_mode = #tpu.pipeline_mode<synchronous>, transform_indices = @transform_12, window_bounds = array<i64: 308, 37>}, {pipeline_mode = #tpu.pipeline_mode<synchronous>, transform_indices = @transform_13, window_bounds = array<i64: 1, 37>}, {pipeline_mode = #tpu.pipeline_mode<synchronous>, transform_indices = @transform_14, window_bounds = array<i64: 2, 37>}]} {
    %c0_i32 = arith.constant 0 : i32
    %0 = arith.cmpi eq, %arg0, %c0_i32 : i32
    %1 = arith.extui %0 : i1 to i32
    %c0_i32_0 = arith.constant 0 : i32
    %2 = arith.cmpi ne, %1, %c0_i32_0 : i32
    scf.if %2 {
      %c0_77 = arith.constant 0 : index
      %c0_78 = arith.constant 0 : index
      %c0_79 = arith.constant 0 : index
      %162 = vector.load %arg1[%c0_77, %c0_78, %c0_79] : memref<2x9x64xf32, #tpu.memory_space<vmem>>, vector<2x9x64xf32>
      %c0_80 = arith.constant 0 : index
      %c0_81 = arith.constant 0 : index
      %163 = vector.load %arg4[%c0_80, %c0_81] : memref<64x100xbf16, #tpu.memory_space<vmem>>, vector<64x100xbf16>
      %164 = arith.extf %163 : vector<64x100xbf16> to vector<64x100xf32>
      %cst_82 = arith.constant dense<0.000000e+00> : vector<2x9x100xf32>
      %165 = tpu.matmul %162, %164, %cst_82 {dimension_numbers = #tpu.dot_dimension_numbers<[2], [0], [0, 1], [1], [0, 0, 0, 1, 1, 1], [], []>} : vector<2x9x64xf32>, vector<64x100xf32>, vector<2x9x100xf32> -> vector<2x9x100xf32>
      %c0_83 = arith.constant 0 : index
      %c0_84 = arith.constant 0 : index
      %c0_85 = arith.constant 0 : index
      %166 = vector.load %arg2[%c0_83, %c0_84, %c0_85] : memref<2x9x128xf32, #tpu.memory_space<vmem>>, vector<2x9x128xf32>
      %c0_86 = arith.constant 0 : index
      %c0_87 = arith.constant 0 : index
      %167 = vector.load %arg5[%c0_86, %c0_87] : memref<128x100xbf16, #tpu.memory_space<vmem>>, vector<128x100xbf16>
      %168 = arith.extf %167 : vector<128x100xbf16> to vector<128x100xf32>
      %cst_88 = arith.constant dense<0.000000e+00> : vector<2x9x100xf32>
      %169 = tpu.matmul %166, %168, %cst_88 {dimension_numbers = #tpu.dot_dimension_numbers<[2], [0], [0, 1], [1], [0, 0, 0, 1, 1, 1], [], []>} : vector<2x9x128xf32>, vector<128x100xf32>, vector<2x9x100xf32> -> vector<2x9x100xf32>
      %cst_89 = arith.constant 0.000000e+00 : f32
      %170 = vector.broadcast %cst_89 : f32 to vector<2x9x108xf32>
      %171 = tpu.concatenate %165, %169, %170 in 2 : vector<2x9x100xf32>, vector<2x9x100xf32>, vector<2x9x108xf32> -> vector<2x9x308xf32>
      %c0_90 = arith.constant 0 : index
      %c0_91 = arith.constant 0 : index
      %c0_92 = arith.constant 0 : index
      %172 = vector.load %arg3[%c0_90, %c0_91, %c0_92] : memref<2x9x308xf32, #tpu.memory_space<vmem>>, vector<2x9x308xf32>
      %173 = arith.addf %171, %172 : vector<2x9x308xf32>
      %c0_93 = arith.constant 0 : index
      %c0_94 = arith.constant 0 : index
      %c0_95 = arith.constant 0 : index
      %174 = vector.load %arg16[%c0_93, %c0_94, %c0_95] : memref<2x9x308xf32, #tpu.memory_space<vmem>>, vector<2x9x308xf32>
      tpu.vector_store %arg16[%c0_93, %c0_94, %c0_95], %173 {strides = array<i32>} : memref<2x9x308xf32, #tpu.memory_space<vmem>>, vector<2x9x308xf32>,
    } else {
    }
    %c0 = arith.constant 0 : index
    %c0_1 = arith.constant 0 : index
    %c0_2 = arith.constant 0 : index
    %3 = vector.load %arg11[%c0, %c0_1, %c0_2] : memref<1x6x308xf32, #tpu.memory_space<vmem>>, vector<1x1x308xf32>
    %4 = vector.shape_cast %3 : vector<1x1x308xf32> to vector<308xf32>
    %c0_3 = arith.constant 0 : index
    %c1 = arith.constant 1 : index
    %c0_4 = arith.constant 0 : index
    %5 = vector.load %arg11[%c0_3, %c1, %c0_4] : memref<1x6x308xf32, #tpu.memory_space<vmem>>, vector<1x1x308xf32>
    %6 = vector.shape_cast %5 : vector<1x1x308xf32> to vector<308xf32>
    %c0_5 = arith.constant 0 : index
    %c2 = arith.constant 2 : index
    %c0_6 = arith.constant 0 : index
    %7 = vector.load %arg11[%c0_5, %c2, %c0_6] : memref<1x6x308xf32, #tpu.memory_space<vmem>>, vector<1x1x308xf32>
    %8 = vector.shape_cast %7 : vector<1x1x308xf32> to vector<308xf32>
    %c0_7 = arith.constant 0 : index
    %c3 = arith.constant 3 : index
    %c0_8 = arith.constant 0 : index
    %9 = vector.load %arg11[%c0_7, %c3, %c0_8] : memref<1x6x308xf32, #tpu.memory_space<vmem>>, vector<1x1x308xf32>
    %10 = vector.shape_cast %9 : vector<1x1x308xf32> to vector<308xf32>
    %c0_9 = arith.constant 0 : index
    %c4 = arith.constant 4 : index
    %c0_10 = arith.constant 0 : index
    %11 = vector.load %arg11[%c0_9, %c4, %c0_10] : memref<1x6x308xf32, #tpu.memory_space<vmem>>, vector<1x1x308xf32>
    %12 = vector.shape_cast %11 : vector<1x1x308xf32> to vector<308xf32>
    %c0_11 = arith.constant 0 : index
    %c5 = arith.constant 5 : index
    %c0_12 = arith.constant 0 : index
    %13 = vector.load %arg11[%c0_11, %c5, %c0_12] : memref<1x6x308xf32, #tpu.memory_space<vmem>>, vector<1x1x308xf32>
    %14 = vector.shape_cast %13 : vector<1x1x308xf32> to vector<308xf32>
    %c0_13 = arith.constant 0 : index
    %c0_14 = arith.constant 0 : index
    %c0_15 = arith.constant 0 : index
    %15 = vector.load %arg16[%c0_13, %c0_14, %c0_15] : memref<2x9x308xf32, #tpu.memory_space<vmem>>, vector<2x9x308xf32>
    %cst = arith.constant dense<0.000000e+00> : vector<2x9xf32>
    %16 = vector.multi_reduction <add>, %15, %cst [2] : vector<2x9x308xf32> to vector<2x9xf32>
    %17 = vector.shape_cast %16 : vector<2x9xf32> to vector<2x9x1xf32>
    %cst_16 = arith.constant 3.080000e+02 : f32
    %18 = vector.broadcast %cst_16 : f32 to vector<2x9x1xf32>
    %19 = arith.divf %17, %18 : vector<2x9x1xf32>
    %20 = vector.broadcast %19 : vector<2x9x1xf32> to vector<2x9x308xf32>
    %21 = arith.subf %15, %20 : vector<2x9x308xf32>
    %22 = arith.mulf %21, %21 : vector<2x9x308xf32>
    %cst_17 = arith.constant dense<0.000000e+00> : vector<2x9xf32>
    %23 = vector.multi_reduction <add>, %22, %cst_17 [2] : vector<2x9x308xf32> to vector<2x9xf32>
    %24 = vector.shape_cast %23 : vector<2x9xf32> to vector<2x9x1xf32>
    %cst_18 = arith.constant 3.080000e+02 : f32
    %25 = vector.broadcast %cst_18 : f32 to vector<2x9x1xf32>
    %26 = arith.divf %24, %25 : vector<2x9x1xf32>
    %27 = vector.broadcast %19 : vector<2x9x1xf32> to vector<2x9x308xf32>
    %28 = arith.subf %15, %27 : vector<2x9x308xf32>
    %cst_19 = arith.constant 9.99999974E-6 : f32
    %29 = vector.broadcast %cst_19 : f32 to vector<2x9x1xf32>
    %30 = arith.addf %26, %29 : vector<2x9x1xf32>
    %31 = math.rsqrt %30 : vector<2x9x1xf32>
    %32 = vector.broadcast %31 : vector<2x9x1xf32> to vector<2x9x308xf32>
    %33 = arith.mulf %28, %32 : vector<2x9x308xf32>
    %34 = vector.shape_cast %4 : vector<308xf32> to vector<1x1x308xf32>
    %35 = vector.broadcast %34 : vector<1x1x308xf32> to vector<2x9x308xf32>
    %36 = arith.mulf %33, %35 : vector<2x9x308xf32>
    %37 = vector.shape_cast %6 : vector<308xf32> to vector<1x1x308xf32>
    %38 = vector.broadcast %37 : vector<1x1x308xf32> to vector<2x9x308xf32>
    %39 = arith.addf %36, %38 : vector<2x9x308xf32>
    %c0_20 = arith.constant 0 : index
    %c0_21 = arith.constant 0 : index
    %c0_22 = arith.constant 0 : index
    %c0_23 = arith.constant 0 : index
    %40 = vector.load %arg6[%c0_20, %c0_21, %c0_22, %c0_23] : memref<1x3x308x192xbf16, #tpu.memory_space<vmem>>, vector<1x1x308x192xbf16>
    %41 = vector.shape_cast %40 : vector<1x1x308x192xbf16> to vector<308x192xbf16>
    %42 = arith.extf %41 : vector<308x192xbf16> to vector<308x192xf32>
    %cst_24 = arith.constant dense<0.000000e+00> : vector<2x9x192xf32>
    %43 = tpu.matmul %39, %42, %cst_24 {dimension_numbers = #tpu.dot_dimension_numbers<[2], [0], [0, 1], [1], [0, 0, 0, 1, 1, 1], [], []>} : vector<2x9x308xf32>, vector<308x192xf32>, vector<2x9x192xf32> -> vector<2x9x192xf32>
    %c0_25 = arith.constant 0 : index
    %c1_26 = arith.constant 1 : index
    %c0_27 = arith.constant 0 : index
    %c0_28 = arith.constant 0 : index
    %44 = vector.load %arg6[%c0_25, %c1_26, %c0_27, %c0_28] : memref<1x3x308x192xbf16, #tpu.memory_space<vmem>>, vector<1x1x308x192xbf16>
    %45 = vector.shape_cast %44 : vector<1x1x308x192xbf16> to vector<308x192xbf16>
    %46 = arith.extf %45 : vector<308x192xbf16> to vector<308x192xf32>
    %cst_29 = arith.constant dense<0.000000e+00> : vector<2x9x192xf32>
    %47 = tpu.matmul %39, %46, %cst_29 {dimension_numbers = #tpu.dot_dimension_numbers<[2], [0], [0, 1], [1], [0, 0, 0, 1, 1, 1], [], []>} : vector<2x9x308xf32>, vector<308x192xf32>, vector<2x9x192xf32> -> vector<2x9x192xf32>
    %c0_30 = arith.constant 0 : index
    %c2_31 = arith.constant 2 : index
    %c0_32 = arith.constant 0 : index
    %c0_33 = arith.constant 0 : index
    %48 = vector.load %arg6[%c0_30, %c2_31, %c0_32, %c0_33] : memref<1x3x308x192xbf16, #tpu.memory_space<vmem>>, vector<1x1x308x192xbf16>
    %49 = vector.shape_cast %48 : vector<1x1x308x192xbf16> to vector<308x192xbf16>
    %50 = arith.extf %49 : vector<308x192xbf16> to vector<308x192xf32>
    %cst_34 = arith.constant dense<0.000000e+00> : vector<2x9x192xf32>
    %51 = tpu.matmul %39, %50, %cst_34 {dimension_numbers = #tpu.dot_dimension_numbers<[2], [0], [0, 1], [1], [0, 0, 0, 1, 1, 1], [], []>} : vector<2x9x308xf32>, vector<308x192xf32>, vector<2x9x192xf32> -> vector<2x9x192xf32>
    %52 = vector.extract_strided_slice %43 {offsets = [0, 0, 0], sizes = [2, 9, 64], strides = [1, 1, 1]} : vector<2x9x192xf32> to vector<2x9x64xf32>
    %53 = vector.extract_strided_slice %47 {offsets = [0, 0, 0], sizes = [2, 9, 64], strides = [1, 1, 1]} : vector<2x9x192xf32> to vector<2x9x64xf32>
    %54 = vector.extract_strided_slice %51 {offsets = [0, 0, 0], sizes = [2, 9, 64], strides = [1, 1, 1]} : vector<2x9x192xf32> to vector<2x9x64xf32>
    "tpu.trace_start"() <{level = 10 : i32, message = "bqd,bkd->bqk"}> : () -> ()
    %cst_35 = arith.constant dense<0.000000e+00> : vector<2x9x9xf32>
    %55 = tpu.matmul %52, %53, %cst_35 {dimension_numbers = #tpu.dot_dimension_numbers<[2], [2], [1], [1], [0, 0, 0, 1, 1, 1], [0], [0]>} : vector<2x9x64xf32>, vector<2x9x64xf32>, vector<2x9x9xf32> -> vector<2x9x9xf32>
    "tpu.trace_stop"() : () -> ()
    %cst_36 = arith.constant 1.250000e-01 : f32
    %56 = vector.broadcast %cst_36 : f32 to vector<2x9x9xf32>
    %57 = arith.mulf %55, %56 : vector<2x9x9xf32>
    %cst_37 = arith.constant dense<0xFF800000> : vector<2x9xf32>
    %58 = vector.multi_reduction <maximumf>, %57, %cst_37 [2] : vector<2x9x9xf32> to vector<2x9xf32>
    %59 = vector.shape_cast %58 : vector<2x9xf32> to vector<2x9x1xf32>
    %60 = vector.broadcast %59 : vector<2x9x1xf32> to vector<2x9x9xf32>
    %61 = arith.subf %57, %60 : vector<2x9x9xf32>
    %62 = math.exp %61 : vector<2x9x9xf32>
    %cst_38 = arith.constant dense<0.000000e+00> : vector<2x9xf32>
    %63 = vector.multi_reduction <add>, %62, %cst_38 [2] : vector<2x9x9xf32> to vector<2x9xf32>
    %64 = vector.shape_cast %63 : vector<2x9xf32> to vector<2x9x1xf32>
    %65 = vector.broadcast %64 : vector<2x9x1xf32> to vector<2x9x9xf32>
    %66 = arith.divf %62, %65 : vector<2x9x9xf32>
    "tpu.trace_start"() <{level = 10 : i32, message = "bqk,bkd->bqd"}> : () -> ()
    %cst_39 = arith.constant dense<0.000000e+00> : vector<2x9x64xf32>
    %67 = tpu.matmul %66, %54, %cst_39 {dimension_numbers = #tpu.dot_dimension_numbers<[2], [1], [1], [2], [0, 0, 0, 1, 1, 2], [0], [0]>} : vector<2x9x9xf32>, vector<2x9x64xf32>, vector<2x9x64xf32> -> vector<2x9x64xf32>
    "tpu.trace_stop"() : () -> ()
    %68 = vector.extract_strided_slice %43 {offsets = [0, 0, 64], sizes = [2, 9, 64], strides = [1, 1, 1]} : vector<2x9x192xf32> to vector<2x9x64xf32>
    %69 = vector.extract_strided_slice %47 {offsets = [0, 0, 64], sizes = [2, 9, 64], strides = [1, 1, 1]} : vector<2x9x192xf32> to vector<2x9x64xf32>
    %70 = vector.extract_strided_slice %51 {offsets = [0, 0, 64], sizes = [2, 9, 64], strides = [1, 1, 1]} : vector<2x9x192xf32> to vector<2x9x64xf32>
    "tpu.trace_start"() <{level = 10 : i32, message = "bqd,bkd->bqk"}> : () -> ()
    %cst_40 = arith.constant dense<0.000000e+00> : vector<2x9x9xf32>
    %71 = tpu.matmul %68, %69, %cst_40 {dimension_numbers = #tpu.dot_dimension_numbers<[2], [2], [1], [1], [0, 0, 0, 1, 1, 1], [0], [0]>} : vector<2x9x64xf32>, vector<2x9x64xf32>, vector<2x9x9xf32> -> vector<2x9x9xf32>
    "tpu.trace_stop"() : () -> ()
    %cst_41 = arith.constant 1.250000e-01 : f32
    %72 = vector.broadcast %cst_41 : f32 to vector<2x9x9xf32>
    %73 = arith.mulf %71, %72 : vector<2x9x9xf32>
    %cst_42 = arith.constant dense<0xFF800000> : vector<2x9xf32>
    %74 = vector.multi_reduction <maximumf>, %73, %cst_42 [2] : vector<2x9x9xf32> to vector<2x9xf32>
    %75 = vector.shape_cast %74 : vector<2x9xf32> to vector<2x9x1xf32>
    %76 = vector.broadcast %75 : vector<2x9x1xf32> to vector<2x9x9xf32>
    %77 = arith.subf %73, %76 : vector<2x9x9xf32>
    %78 = math.exp %77 : vector<2x9x9xf32>
    %cst_43 = arith.constant dense<0.000000e+00> : vector<2x9xf32>
    %79 = vector.multi_reduction <add>, %78, %cst_43 [2] : vector<2x9x9xf32> to vector<2x9xf32>
    %80 = vector.shape_cast %79 : vector<2x9xf32> to vector<2x9x1xf32>
    %81 = vector.broadcast %80 : vector<2x9x1xf32> to vector<2x9x9xf32>
    %82 = arith.divf %78, %81 : vector<2x9x9xf32>
    "tpu.trace_start"() <{level = 10 : i32, message = "bqk,bkd->bqd"}> : () -> ()
    %cst_44 = arith.constant dense<0.000000e+00> : vector<2x9x64xf32>
    %83 = tpu.matmul %82, %70, %cst_44 {dimension_numbers = #tpu.dot_dimension_numbers<[2], [1], [1], [2], [0, 0, 0, 1, 1, 2], [0], [0]>} : vector<2x9x9xf32>, vector<2x9x64xf32>, vector<2x9x64xf32> -> vector<2x9x64xf32>
    "tpu.trace_stop"() : () -> ()
    %84 = vector.extract_strided_slice %43 {offsets = [0, 0, 128], sizes = [2, 9, 64], strides = [1, 1, 1]} : vector<2x9x192xf32> to vector<2x9x64xf32>
    %85 = vector.extract_strided_slice %47 {offsets = [0, 0, 128], sizes = [2, 9, 64], strides = [1, 1, 1]} : vector<2x9x192xf32> to vector<2x9x64xf32>
    %86 = vector.extract_strided_slice %51 {offsets = [0, 0, 128], sizes = [2, 9, 64], strides = [1, 1, 1]} : vector<2x9x192xf32> to vector<2x9x64xf32>
    "tpu.trace_start"() <{level = 10 : i32, message = "bqd,bkd->bqk"}> : () -> ()
    %cst_45 = arith.constant dense<0.000000e+00> : vector<2x9x9xf32>
    %87 = tpu.matmul %84, %85, %cst_45 {dimension_numbers = #tpu.dot_dimension_numbers<[2], [2], [1], [1], [0, 0, 0, 1, 1, 1], [0], [0]>} : vector<2x9x64xf32>, vector<2x9x64xf32>, vector<2x9x9xf32> -> vector<2x9x9xf32>
    "tpu.trace_stop"() : () -> ()
    %cst_46 = arith.constant 1.250000e-01 : f32
    %88 = vector.broadcast %cst_46 : f32 to vector<2x9x9xf32>
    %89 = arith.mulf %87, %88 : vector<2x9x9xf32>
    %cst_47 = arith.constant dense<0xFF800000> : vector<2x9xf32>
    %90 = vector.multi_reduction <maximumf>, %89, %cst_47 [2] : vector<2x9x9xf32> to vector<2x9xf32>
    %91 = vector.shape_cast %90 : vector<2x9xf32> to vector<2x9x1xf32>
    %92 = vector.broadcast %91 : vector<2x9x1xf32> to vector<2x9x9xf32>
    %93 = arith.subf %89, %92 : vector<2x9x9xf32>
    %94 = math.exp %93 : vector<2x9x9xf32>
    %cst_48 = arith.constant dense<0.000000e+00> : vector<2x9xf32>
    %95 = vector.multi_reduction <add>, %94, %cst_48 [2] : vector<2x9x9xf32> to vector<2x9xf32>
    %96 = vector.shape_cast %95 : vector<2x9xf32> to vector<2x9x1xf32>
    %97 = vector.broadcast %96 : vector<2x9x1xf32> to vector<2x9x9xf32>
    %98 = arith.divf %94, %97 : vector<2x9x9xf32>
    "tpu.trace_start"() <{level = 10 : i32, message = "bqk,bkd->bqd"}> : () -> ()
    %cst_49 = arith.constant dense<0.000000e+00> : vector<2x9x64xf32>
    %99 = tpu.matmul %98, %86, %cst_49 {dimension_numbers = #tpu.dot_dimension_numbers<[2], [1], [1], [2], [0, 0, 0, 1, 1, 2], [0], [0]>} : vector<2x9x9xf32>, vector<2x9x64xf32>, vector<2x9x64xf32> -> vector<2x9x64xf32>
    "tpu.trace_stop"() : () -> ()
    %100 = tpu.concatenate %67, %83, %99 in 2 : vector<2x9x64xf32>, vector<2x9x64xf32>, vector<2x9x64xf32> -> vector<2x9x192xf32>
    %c0_50 = arith.constant 0 : index
    %c0_51 = arith.constant 0 : index
    %c0_52 = arith.constant 0 : index
    %101 = vector.load %arg7[%c0_50, %c0_51, %c0_52] : memref<1x192x308xbf16, #tpu.memory_space<vmem>>, vector<1x192x308xbf16>
    %102 = vector.shape_cast %101 : vector<1x192x308xbf16> to vector<192x308xbf16>
    %103 = arith.extf %102 : vector<192x308xbf16> to vector<192x308xf32>
    %cst_53 = arith.constant dense<0.000000e+00> : vector<2x9x308xf32>
    %104 = tpu.matmul %100, %103, %cst_53 {dimension_numbers = #tpu.dot_dimension_numbers<[2], [0], [0, 1], [1], [0, 0, 0, 1, 1, 1], [], []>} : vector<2x9x192xf32>, vector<192x308xf32>, vector<2x9x308xf32> -> vector<2x9x308xf32>
    %105 = vector.shape_cast %8 : vector<308xf32> to vector<1x1x308xf32>
    %106 = vector.broadcast %105 : vector<1x1x308xf32> to vector<2x9x308xf32>
    %107 = arith.addf %104, %106 : vector<2x9x308xf32>
    %108 = arith.addf %15, %107 : vector<2x9x308xf32>
    %cst_54 = arith.constant dense<0.000000e+00> : vector<2x9xf32>
    %109 = vector.multi_reduction <add>, %108, %cst_54 [2] : vector<2x9x308xf32> to vector<2x9xf32>
    %110 = vector.shape_cast %109 : vector<2x9xf32> to vector<2x9x1xf32>
    %cst_55 = arith.constant 3.080000e+02 : f32
    %111 = vector.broadcast %cst_55 : f32 to vector<2x9x1xf32>
    %112 = arith.divf %110, %111 : vector<2x9x1xf32>
    %113 = vector.broadcast %112 : vector<2x9x1xf32> to vector<2x9x308xf32>
    %114 = arith.subf %108, %113 : vector<2x9x308xf32>
    %115 = arith.mulf %114, %114 : vector<2x9x308xf32>
    %cst_56 = arith.constant dense<0.000000e+00> : vector<2x9xf32>
    %116 = vector.multi_reduction <add>, %115, %cst_56 [2] : vector<2x9x308xf32> to vector<2x9xf32>
    %117 = vector.shape_cast %116 : vector<2x9xf32> to vector<2x9x1xf32>
    %cst_57 = arith.constant 3.080000e+02 : f32
    %118 = vector.broadcast %cst_57 : f32 to vector<2x9x1xf32>
    %119 = arith.divf %117, %118 : vector<2x9x1xf32>
    %120 = vector.broadcast %112 : vector<2x9x1xf32> to vector<2x9x308xf32>
    %121 = arith.subf %108, %120 : vector<2x9x308xf32>
    %cst_58 = arith.constant 9.99999974E-6 : f32
    %122 = vector.broadcast %cst_58 : f32 to vector<2x9x1xf32>
    %123 = arith.addf %119, %122 : vector<2x9x1xf32>
    %124 = math.rsqrt %123 : vector<2x9x1xf32>
    %125 = vector.broadcast %124 : vector<2x9x1xf32> to vector<2x9x308xf32>
    %126 = arith.mulf %121, %125 : vector<2x9x308xf32>
    %127 = vector.shape_cast %10 : vector<308xf32> to vector<1x1x308xf32>
    %128 = vector.broadcast %127 : vector<1x1x308xf32> to vector<2x9x308xf32>
    %129 = arith.mulf %126, %128 : vector<2x9x308xf32>
    %130 = vector.shape_cast %12 : vector<308xf32> to vector<1x1x308xf32>
    %131 = vector.broadcast %130 : vector<1x1x308xf32> to vector<2x9x308xf32>
    %132 = arith.addf %129, %131 : vector<2x9x308xf32>
    %c0_59 = arith.constant 0 : index
    %c0_60 = arith.constant 0 : index
    %c0_61 = arith.constant 0 : index
    %133 = vector.load %arg8[%c0_59, %c0_60, %c0_61] : memref<1x308x1232xbf16, #tpu.memory_space<vmem>>, vector<1x308x1232xbf16>
    %134 = vector.shape_cast %133 : vector<1x308x1232xbf16> to vector<308x1232xbf16>
    %135 = arith.extf %134 : vector<308x1232xbf16> to vector<308x1232xf32>
    %cst_62 = arith.constant dense<0.000000e+00> : vector<2x9x1232xf32>
    %136 = tpu.matmul %132, %135, %cst_62 {dimension_numbers = #tpu.dot_dimension_numbers<[2], [0], [0, 1], [1], [0, 0, 0, 1, 1, 1], [], []>} : vector<2x9x308xf32>, vector<308x1232xf32>, vector<2x9x1232xf32> -> vector<2x9x1232xf32>
    %c0_63 = arith.constant 0 : index
    %c0_64 = arith.constant 0 : index
    %c0_65 = arith.constant 0 : index
    %137 = vector.load %arg9[%c0_63, %c0_64, %c0_65] : memref<1x1x1232xf32, #tpu.memory_space<vmem>>, vector<1x1x1232xf32>
    %138 = vector.shape_cast %137 : vector<1x1x1232xf32> to vector<1x1232xf32>
    %139 = vector.shape_cast %138 : vector<1x1232xf32> to vector<1x1x1232xf32>
    %140 = vector.broadcast %139 : vector<1x1x1232xf32> to vector<2x9x1232xf32>
    %141 = arith.addf %136, %140 : vector<2x9x1232xf32>
    %cst_66 = arith.constant 5.000000e-01 : f32
    %142 = vector.broadcast %cst_66 : f32 to vector<2x9x1232xf32>
    %143 = arith.mulf %142, %141 : vector<2x9x1232xf32>
    %cst_67 = arith.constant 0.707106769 : f32
    %144 = vector.broadcast %cst_67 : f32 to vector<2x9x1232xf32>
    %145 = arith.mulf %141, %144 : vector<2x9x1232xf32>
    %146 = math.erf %145 : vector<2x9x1232xf32>
    %cst_68 = arith.constant 1.000000e+00 : f32
    %147 = vector.broadcast %cst_68 : f32 to vector<2x9x1232xf32>
    %148 = arith.addf %147, %146 : vector<2x9x1232xf32>
    %149 = arith.mulf %143, %148 : vector<2x9x1232xf32>
    %c0_69 = arith.constant 0 : index
    %c0_70 = arith.constant 0 : index
    %c0_71 = arith.constant 0 : index
    %150 = vector.load %arg10[%c0_69, %c0_70, %c0_71] : memref<1x1232x308xbf16, #tpu.memory_space<vmem>>, vector<1x1232x308xbf16>
    %151 = vector.shape_cast %150 : vector<1x1232x308xbf16> to vector<1232x308xbf16>
    %152 = arith.extf %151 : vector<1232x308xbf16> to vector<1232x308xf32>
    %cst_72 = arith.constant dense<0.000000e+00> : vector<2x9x308xf32>
    %153 = tpu.matmul %149, %152, %cst_72 {dimension_numbers = #tpu.dot_dimension_numbers<[2], [0], [0, 1], [1], [0, 0, 0, 1, 1, 1], [], []>} : vector<2x9x1232xf32>, vector<1232x308xf32>, vector<2x9x308xf32> -> vector<2x9x308xf32>
    %154 = vector.shape_cast %14 : vector<308xf32> to vector<1x1x308xf32>
    %155 = vector.broadcast %154 : vector<1x1x308xf32> to vector<2x9x308xf32>
    %156 = arith.addf %153, %155 : vector<2x9x308xf32>
    %157 = arith.addf %108, %156 : vector<2x9x308xf32>
    %c0_73 = arith.constant 0 : index
    %c0_74 = arith.constant 0 : index
    %c0_75 = arith.constant 0 : index
    %158 = vector.load %arg16[%c0_73, %c0_74, %c0_75] : memref<2x9x308xf32, #tpu.memory_space<vmem>>, vector<2x9x308xf32>
    tpu.vector_store %arg16[%c0_73, %c0_74, %c0_75], %157 {strides = array<i32>} : memref<2x9x308xf32, #tpu.memory_space<vmem>>, vector<2x9x308xf32>,
    %c3_i32 = arith.constant 3 : i32
    %159 = arith.cmpi eq, %arg0, %c3_i32 : i32
    %160 = arith.extui %159 : i1 to i32
    %c0_i32_76 = arith.constant 0 : i32
    %161 = arith.cmpi ne, %160, %c0_i32_76 : i32
    scf.if %161 {
      %162 = vector.extract_strided_slice %157 {offsets = [0, 0, 0], sizes = [2, 1, 308], strides = [1, 1, 1]} : vector<2x9x308xf32> to vector<2x1x308xf32>
      %163 = vector.shape_cast %162 : vector<2x1x308xf32> to vector<2x308xf32>
      %c0_77 = arith.constant 0 : index
      %c0_78 = arith.constant 0 : index
      %164 = vector.load %arg12[%c0_77, %c0_78] : memref<4x308xf32, #tpu.memory_space<vmem>>, vector<1x308xf32>
      %165 = vector.shape_cast %164 : vector<1x308xf32> to vector<308xf32>
      %c1_79 = arith.constant 1 : index
      %c0_80 = arith.constant 0 : index
      %166 = vector.load %arg12[%c1_79, %c0_80] : memref<4x308xf32, #tpu.memory_space<vmem>>, vector<1x308xf32>
      %167 = vector.shape_cast %166 : vector<1x308xf32> to vector<308xf32>
      %cst_81 = arith.constant dense<0.000000e+00> : vector<2xf32>
      %168 = vector.multi_reduction <add>, %163, %cst_81 [1] : vector<2x308xf32> to vector<2xf32>
      %169 = vector.shape_cast %168 : vector<2xf32> to vector<2x1xf32>
      %cst_82 = arith.constant 3.080000e+02 : f32
      %170 = vector.broadcast %cst_82 : f32 to vector<2x1xf32>
      %171 = arith.divf %169, %170 : vector<2x1xf32>
      %172 = vector.broadcast %171 : vector<2x1xf32> to vector<2x308xf32>
      %173 = arith.subf %163, %172 : vector<2x308xf32>
      %174 = arith.mulf %173, %173 : vector<2x308xf32>
      %cst_83 = arith.constant dense<0.000000e+00> : vector<2xf32>
      %175 = vector.multi_reduction <add>, %174, %cst_83 [1] : vector<2x308xf32> to vector<2xf32>
      %176 = vector.shape_cast %175 : vector<2xf32> to vector<2x1xf32>
      %cst_84 = arith.constant 3.080000e+02 : f32
      %177 = vector.broadcast %cst_84 : f32 to vector<2x1xf32>
      %178 = arith.divf %176, %177 : vector<2x1xf32>
      %179 = vector.broadcast %171 : vector<2x1xf32> to vector<2x308xf32>
      %180 = arith.subf %163, %179 : vector<2x308xf32>
      %cst_85 = arith.constant 9.99999974E-6 : f32
      %181 = vector.broadcast %cst_85 : f32 to vector<2x1xf32>
      %182 = arith.addf %178, %181 : vector<2x1xf32>
      %183 = math.rsqrt %182 : vector<2x1xf32>
      %184 = vector.broadcast %183 : vector<2x1xf32> to vector<2x308xf32>
      %185 = arith.mulf %180, %184 : vector<2x308xf32>
      %186 = vector.shape_cast %165 : vector<308xf32> to vector<1x308xf32>
      %187 = vector.broadcast %186 : vector<1x308xf32> to vector<2x308xf32>
      %188 = arith.mulf %185, %187 : vector<2x308xf32>
      %189 = vector.shape_cast %167 : vector<308xf32> to vector<1x308xf32>
      %190 = vector.broadcast %189 : vector<1x308xf32> to vector<2x308xf32>
      %191 = arith.addf %188, %190 : vector<2x308xf32>
      %c2_86 = arith.constant 2 : index
      %c0_87 = arith.constant 0 : index
      %192 = vector.load %arg12[%c2_86, %c0_87] : memref<4x308xf32, #tpu.memory_space<vmem>>, vector<1x308xf32>
      %193 = vector.shape_cast %192 : vector<1x308xf32> to vector<308xf32>
      %c3_88 = arith.constant 3 : index
      %c0_89 = arith.constant 0 : index
      %194 = vector.load %arg12[%c3_88, %c0_89] : memref<4x308xf32, #tpu.memory_space<vmem>>, vector<1x308xf32>
      %195 = vector.shape_cast %194 : vector<1x308xf32> to vector<308xf32>
      %cst_90 = arith.constant dense<0.000000e+00> : vector<2xf32>
      %196 = vector.multi_reduction <add>, %191, %cst_90 [1] : vector<2x308xf32> to vector<2xf32>
      %197 = vector.shape_cast %196 : vector<2xf32> to vector<2x1xf32>
      %cst_91 = arith.constant 3.080000e+02 : f32
      %198 = vector.broadcast %cst_91 : f32 to vector<2x1xf32>
      %199 = arith.divf %197, %198 : vector<2x1xf32>
      %200 = vector.broadcast %199 : vector<2x1xf32> to vector<2x308xf32>
      %201 = arith.subf %191, %200 : vector<2x308xf32>
      %202 = arith.mulf %201, %201 : vector<2x308xf32>
      %cst_92 = arith.constant dense<0.000000e+00> : vector<2xf32>
      %203 = vector.multi_reduction <add>, %202, %cst_92 [1] : vector<2x308xf32> to vector<2xf32>
      %204 = vector.shape_cast %203 : vector<2xf32> to vector<2x1xf32>
      %cst_93 = arith.constant 3.080000e+02 : f32
      %205 = vector.broadcast %cst_93 : f32 to vector<2x1xf32>
      %206 = arith.divf %204, %205 : vector<2x1xf32>
      %207 = vector.broadcast %199 : vector<2x1xf32> to vector<2x308xf32>
      %208 = arith.subf %191, %207 : vector<2x308xf32>
      %cst_94 = arith.constant 9.99999974E-6 : f32
      %209 = vector.broadcast %cst_94 : f32 to vector<2x1xf32>
      %210 = arith.addf %206, %209 : vector<2x1xf32>
      %211 = math.rsqrt %210 : vector<2x1xf32>
      %212 = vector.broadcast %211 : vector<2x1xf32> to vector<2x308xf32>
      %213 = arith.mulf %208, %212 : vector<2x308xf32>
      %214 = vector.shape_cast %193 : vector<308xf32> to vector<1x308xf32>
      %215 = vector.broadcast %214 : vector<1x308xf32> to vector<2x308xf32>
      %216 = arith.mulf %213, %215 : vector<2x308xf32>
      %217 = vector.shape_cast %195 : vector<308xf32> to vector<1x308xf32>
      %218 = vector.broadcast %217 : vector<1x308xf32> to vector<2x308xf32>
      %219 = arith.addf %216, %218 : vector<2x308xf32>
      %c0_95 = arith.constant 0 : index
      %c0_96 = arith.constant 0 : index
      %220 = vector.load %arg13[%c0_95, %c0_96] : memref<308x37xbf16, #tpu.memory_space<vmem>>, vector<308x37xbf16>
      %221 = arith.extf %220 : vector<308x37xbf16> to vector<308x37xf32>
      %cst_97 = arith.constant dense<0.000000e+00> : vector<2x37xf32>
      %222 = tpu.matmul %219, %221, %cst_97 {dimension_numbers = #tpu.dot_dimension_numbers<[1], [0], [0], [1], [0, 0, 1, 1], [], []>} : vector<2x308xf32>, vector<308x37xf32>, vector<2x37xf32> -> vector<2x37xf32>
      %c0_98 = arith.constant 0 : index
      %c0_99 = arith.constant 0 : index
      %223 = vector.load %arg14[%c0_98, %c0_99] : memref<1x37xf32, #tpu.memory_space<vmem>>, vector<1x37xf32>
      %224 = vector.broadcast %223 : vector<1x37xf32> to vector<2x37xf32>
      %225 = arith.addf %222, %224 : vector<2x37xf32>
      %c0_100 = arith.constant 0 : index
      %c0_101 = arith.constant 0 : index
      %226 = vector.load %arg15[%c0_100, %c0_101] : memref<2x37xf32, #tpu.memory_space<vmem>>, vector<2x37xf32>
      tpu.vector_store %arg15[%c0_100, %c0_101], %225 {strides = array<i32>} : memref<2x37xf32, #tpu.memory_space<vmem>>, vector<2x37xf32>,
    } else {
    }
    return
  }
  func.func @transform_0(%arg0: i32) -> (i32, i32, i32) {
    %c0_i32 = arith.constant 0 : i32
    %c0_i32_0 = arith.constant 0 : i32
    %c0_i32_1 = arith.constant 0 : i32
    %c0_i32_2 = arith.constant 0 : i32
    return %c0_i32, %c0_i32_0, %c0_i32_1 : i32, i32, i32
  }
  func.func @transform_1(%arg0: i32) -> (i32, i32, i32) {
    %c0_i32 = arith.constant 0 : i32
    %c0_i32_0 = arith.constant 0 : i32
    %c0_i32_1 = arith.constant 0 : i32
    %c0_i32_2 = arith.constant 0 : i32
    return %c0_i32, %c0_i32_0, %c0_i32_1 : i32, i32, i32
  }
  func.func @transform_2(%arg0: i32) -> (i32, i32, i32) {
    %c0_i32 = arith.constant 0 : i32
    %c0_i32_0 = arith.constant 0 : i32
    %c0_i32_1 = arith.constant 0 : i32
    %c0_i32_2 = arith.constant 0 : i32
    return %c0_i32, %c0_i32_0, %c0_i32_1 : i32, i32, i32
  }
  func.func @transform_3(%arg0: i32) -> (i32, i32) {
    %c0_i32 = arith.constant 0 : i32
    %c0_i32_0 = arith.constant 0 : i32
    %c0_i32_1 = arith.constant 0 : i32
    return %c0_i32, %c0_i32_0 : i32, i32
  }
  func.func @transform_4(%arg0: i32) -> (i32, i32) {
    %c0_i32 = arith.constant 0 : i32
    %c0_i32_0 = arith.constant 0 : i32
    %c0_i32_1 = arith.constant 0 : i32
    return %c0_i32, %c0_i32_0 : i32, i32
  }
  func.func @transform_5(%arg0: i32) -> (i32, i32, i32, i32) {
    %c0_i32 = arith.constant 0 : i32
    %c0_i32_0 = arith.constant 0 : i32
    %c0_i32_1 = arith.constant 0 : i32
    %c0_i32_2 = arith.constant 0 : i32
    return %arg0, %c0_i32, %c0_i32_0, %c0_i32_1 : i32, i32, i32, i32
  }
  func.func @transform_6(%arg0: i32) -> (i32, i32, i32) {
    %c0_i32 = arith.constant 0 : i32
    %c0_i32_0 = arith.constant 0 : i32
    %c0_i32_1 = arith.constant 0 : i32
    return %arg0, %c0_i32, %c0_i32_0 : i32, i32, i32
  }
  func.func @transform_7(%arg0: i32) -> (i32, i32, i32) {
    %c0_i32 = arith.constant 0 : i32
    %c0_i32_0 = arith.constant 0 : i32
    %c0_i32_1 = arith.constant 0 : i32
    return %arg0, %c0_i32, %c0_i32_0 : i32, i32, i32
  }
  func.func @transform_8(%arg0: i32) -> (i32, i32, i32) {
    %c0_i32 = arith.constant 0 : i32
    %c0_i32_0 = arith.constant 0 : i32
    %c0_i32_1 = arith.constant 0 : i32
    return %arg0, %c0_i32, %c0_i32_0 : i32, i32, i32
  }
  func.func @transform_9(%arg0: i32) -> (i32, i32, i32) {
    %c0_i32 = arith.constant 0 : i32
    %c0_i32_0 = arith.constant 0 : i32
    %c0_i32_1 = arith.constant 0 : i32
    return %arg0, %c0_i32, %c0_i32_0 : i32, i32, i32
  }
  func.func @transform_10(%arg0: i32) -> (i32, i32, i32) {
    %c0_i32 = arith.constant 0 : i32
    %c0_i32_0 = arith.constant 0 : i32
    %c0_i32_1 = arith.constant 0 : i32
    return %arg0, %c0_i32, %c0_i32_0 : i32, i32, i32
  }
  func.func @transform_11(%arg0: i32) -> (i32, i32) {
    %c0_i32 = arith.constant 0 : i32
    %c0_i32_0 = arith.constant 0 : i32
    %c0_i32_1 = arith.constant 0 : i32
    return %c0_i32, %c0_i32_0 : i32, i32
  }
  func.func @transform_12(%arg0: i32) -> (i32, i32) {
    %c0_i32 = arith.constant 0 : i32
    %c0_i32_0 = arith.constant 0 : i32
    %c0_i32_1 = arith.constant 0 : i32
    return %c0_i32, %c0_i32_0 : i32, i32
  }
  func.func @transform_13(%arg0: i32) -> (i32, i32) {
    %c0_i32 = arith.constant 0 : i32
    %c0_i32_0 = arith.constant 0 : i32
    %c0_i32_1 = arith.constant 0 : i32
    return %c0_i32, %c0_i32_0 : i32, i32
  }
  func.func @transform_14(%arg0: i32) -> (i32, i32) {
    %c0_i32 = arith.constant 0 : i32
    %c0_i32_0 = arith.constant 0 : i32
    %c0_i32_1 = arith.constant 0 : i32
    return %c0_i32, %c0_i32_0 : i32, i32
  }
}

</mosaic_0001>

<bundles_post_ra>
// kernel: fwd.1
= control target key start
LH: loop header
LB: loop body
LE: loop exit
PB: predicated region body
PF: predicated region fallthrough
CT: control target
= control target key end

     0   :  { %s18773_s0 = inlined_call_operand.vmem [shape: f32[2,9,64], index: 0, kind: input, shape index: {}]   ;;  %s18774_s1 = inlined_call_operand.vmem [shape: f32[2,9,128], index: 1, kind: input, shape index: {}]   ;;  %s18775_s2 = inlined_call_operand.vmem [shape: f32[2,9,308], index: 2, kind: input, shape index: {}]   ;;  %s18776_s3 = inlined_call_operand.vmem [shape: bf16[64,100], index: 3, kind: input, shape index: {}]   ;;  %s18777_s4 = inlined_call_operand.vmem [shape: bf16[128,100], index: 4, kind: input, shape index: {}]   ;;  %s18778_s5 = inlined_call_operand.vmem [shape: bf16[4,3,308,192], index: 5, kind: input, shape index: {}]   ;;  %s18779_s6 = inlined_call_operand.vmem [shape: bf16[4,192,308], index: 6, kind: input, shape index: {}]   ;;  %s18780_s7 = inlined_call_operand.vmem [shape: bf16[4,308,1232], index: 7, kind: input, shape index: {}]   ;;  %s18781_s8 = inlined_call_operand.vmem [shape: f32[4,1,1232], index: 8, kind: input, shape index: {}]   ;;  %s18782_s9 = inlined_call_operand.vmem [shape: bf16[4,1232,308], index: 9, kind: input, shape index: {}]   ;;  %s18783_s10 = inlined_call_operand.vmem [shape: f32[4,6,308], index: 10, kind: input, shape index: {}]   ;;  %s18784_s11 = inlined_call_operand.vmem [shape: f32[4,308], index: 11, kind: input, shape index: {}]   ;;  %s18785_s12 = inlined_call_operand.vmem [shape: bf16[308,37], index: 12, kind: input, shape index: {}]   ;;  %s18786_s13 = inlined_call_operand.vmem [shape: f32[1,37], index: 13, kind: input, shape index: {}]   ;;  %s18787_s14 = inlined_call_operand.hbm [shape: f32[2,37], index: 14, kind: output, shape index: {}]  }
   0x1   :  { %18832 = sst [smem:[#allocation37_spill]] %s18778_s5 }
   0x2   :  { %18833 = sst [smem:[#allocation38_spill]] %s18785_s12 }
   0x3   :  { %18834 = sst [smem:[#allocation39_spill]] %s18786_s13 }
   0x4   :  { %18835 = sst [smem:[#allocation40_spill]] %s18787_s14 }
   0x5   :  { %19 = vsyncpa [#allocation4], 0  ;;  %s14786_s29 = smov 0  }
   0x6 LB: > { %18836 = sst [smem:[#allocation6_spill]] %s14699_s29  ;;  %s14792_s30 = sadd.s32 4294967295, %s14699_s29   ;;  %s14699_s29 = sphi %s14786_s29, %s25_s29  }
   0x7   : > { %p13625_p0 = scmp.ge.s32.totalorder %s14699_s29, 1  ;;  %p457_p1 = scmp.lt.s32.totalorder %s14699_s29, 5 }
   0x9   : > { %p458_p2 = pnand %p13625_p0, %p457_p1 }
   0xb   : > { %461 = sbr.rel (%p458_p2) target bundleno = 5145 (0x1419), region = 76 }
  0x10   : > { %p522_p3 = scmp.lt.s32.totalorder %s14792_s30, 3  ;;  %s18837_s5 = sld [smem:[#allocation37_spill]] }
  0x11   : > { %p13631_p4 = scmp.ne.s32.totalorder %s14792_s30, 0 }
  0x12   : > { %s523_s15 = scalar_select %p522_p3, %s14792_s30, 3 }
  0x13   : > { %s14704_s26 = smov (!%p13631_p4), 100  }
  0x14   : > { %s14479_s16 = smul.u32 936, %s523_s15 }
  0x15   : > { %s14480_s17 = smul.u32 288, %s523_s15 }
  0x16   : > { %s14801_s20 = scalar_lea.vmem %s18837_s5, %s14479_s16  ;;  %s14481_s21 = smul.u32 1560, %s523_s15 }
  0x17   : > { %s14806_s24 = scalar_lea.vmem %s18779_s6, %s14480_s17  ;;  %s14482_s25 = smul.u32 10, %s523_s15 }
  0x18   : > { %s14811_s28 = scalar_lea.vmem %s18780_s7, %s14481_s21  ;;  %s14483_s29 = smul.u32 1848, %s523_s15 }
  0x19   : > { %s14816_s12 = scalar_lea.vmem %s18781_s8, %s14482_s25  ;;  %s14484_s16 = smul.u32 24, %s523_s15 }
  0x1a   : > { %s14821_s5 = scalar_lea.vmem %s18782_s9, %s14483_s29  ;;  %554 = sbr.rel (%p13631_p4) target bundleno = 405 (0x195), region = 80 }
  0x1b   : > { %s14826_s23 = scalar_lea.vmem %s18783_s10, %s14484_s16 }
  0x1f   : > { %v14008_v0 = vld [vmem:[%s18777_s4 + $0x38] sm:$0xff]   ;;  %v14007_v1 = vld [vmem:[%s18777_s4 + $0x30] sm:$0xff]   ;;  %v14701_v2 = vmov 0.0   ;;  %vm14702_vm0 = vmmov 0   ;;  %v583_v5 = vlaneseq  ;;  %v14006_v8 = vld [vmem:[%s18777_s4 + $0x28] sm:$0xff]   ;;  %vm818_vm1 = vcmask 523264  }
  0x20   : > { %14337 = vmatprep.subr.mxu1 %v14701_v2  ;;  %v13921_v3 = vunpack.c.l.bf16 %v14008_v0  ;;  %v13922_v4 = vunpack.c.h.bf16 %v14008_v0  ;;  %14369 = vmatprep.mubr.msk.f32.mxu1 %vm14702_vm0, %v14701_v2  ;;  %v13918_v6 = vunpack.c.h.bf16 %v14007_v1  ;;  %v14001_v7 = vld [vmem:[%s18776_s3 + $0x18] sm:$0xff]   ;;  %v13917_v9 = vunpack.c.l.bf16 %v14007_v1  ;;  %v1028_v10 = vld [vmem:[%s18774_s1] sm:$0xff]  ;;  %v1030_v14 = vld [vmem:[%s18774_s1 + $0x10] sm:$0xff] }
  0x21   : > { %14312 = vmatprep.subr.mxu0 %v14701_v2  ;;  %14328 = vmatprep.mubr.msk.f32.mxu0 %vm14702_vm0, %v14701_v2  ;;  %v14703_v11 = vmov 1966171168   ;;  %v584_v13 = vshrl.u32 %v583_v5, 7  ;;  %v13889_v15 = vunpack.c.l.bf16 %v14001_v7  ;;  %v13890_v16 = vunpack.c.h.bf16 %v14001_v7  ;;  %v14858_v17 = vld [vmem:[%s18776_s3 + $0x10] sm:$0xff]   ;;  %v14005_v19 = vld [vmem:[%s18777_s4 + $0x20] sm:$0xff]   ;;  %v14866_v20 = vld [vmem:[%s18777_s4 + $0x18] sm:$0xff]  }
  0x22   : > { %14338 = vmatpush3.msra.mxu1 %v13922_v4  ;;  %v581_v12 = vunpack.c.l.s4 %v14703_v11  ;;  %v13914_v18 = vunpack.c.h.bf16 %v14006_v8  ;;  %v14872_v21 = vld [vmem:[%s18777_s4 + $0x10] sm:$0xff]   ;;  %v1068_v23 = vcombine.high %v1028_v10, %v1028_v10  ;;  %v555_v24 = vld [vmem:[%s18773_s0] sm:$0xff]  ;;  %v13913_v25 = vunpack.c.l.bf16 %v14006_v8  ;;  %v13639_v26 = vld.sshfl [vmem:[%s18774_s1 + $0x8] sm:$0x1 pattern:$0x75316420] }
  0x23   : > { %14339 = vmatprep.subr.mxu1 %v14701_v2  ;;  %14313 = vmatpush3.msra.mxu0 %v13890_v16  ;;  %v1131_v27 = vcombine.high %v1030_v14, %v1030_v14  ;;  %v13886_v28 = vunpack.c.h.bf16 %v14858_v17  ;;  %v13910_v29 = vunpack.c.h.bf16 %v14005_v19  ;;  %v13909_v30 = vunpack.c.l.bf16 %v14005_v19  ;;  %v14889_v33 = vld.sshfl [vmem:[%s18774_s1 + $0x18] sm:$0x1 pattern:$0x75316420]  ;;  %v14907_v45 = vld [vmem:[%s18776_s3 + $0x8] sm:$0xff]  }
  0x24   : > { %14340 = vmatpush3.msra.mxu1 %v13921_v3  ;;  %v582_v22 = vunpack.c.0.s8 %v581_v12  ;;  %14314 = vmatprep.subr.mxu0 %v14701_v2  ;;  %v13906_v31 = vunpack.c.h.bf16 %v14866_v20  ;;  %v13905_v34 = vunpack.c.l.bf16 %v14866_v20  ;;  %v13902_v35 = vunpack.c.h.bf16 %v14872_v21  ;;  %v14002_v8 = vld [vmem:[%s18777_s4 + $0x8] sm:$0xff]  }
  0x25   : > { %14341 = vmatprep.subr.mxu1 %v14701_v2  ;;  %14315 = vmatpush3.msra.mxu0 %v13889_v15  ;;  %v13901_v36 = vunpack.c.l.bf16 %v14872_v21  ;;  %v579_v37 = vcombine.high %v555_v24, %v555_v24  ;;  %v13885_v44 = vunpack.c.l.bf16 %v14858_v17  ;;  %v13882_v57 = vunpack.c.h.bf16 %v14907_v45  ;;  %v13876_v17 = vld [vmem:[%s18776_s3] sm:$0xff]  }
  0x26   : > { %14342 = vmatpush3.msra.mxu1 %v13918_v6  ;;  %v14884_v32 = vsub.s32 %v582_v22, %v584_v13  ;;  %14316 = vmatprep.subr.mxu0 %v14701_v2  ;;  %v13881_v22 = vunpack.c.l.bf16 %v14907_v45  ;;  %vm1817_vm2 = vcmask 424960   ;;  %vm1821_vm3 = vcmask 417792  }
  0x27   : > { %14343 = vmatprep.subr.mxu1 %v14701_v2  ;;  %14317 = vmatpush3.msra.mxu0 %v13886_v28  ;;  %v13892_v28 = vld [vmem:[%s18777_s4] sm:$0xff]   ;;  %vm1781_vm4 = vcmask 818176   ;;  %vm1786_vm5 = vcmask 588800  }
  0x28   : > { %14344 = vmatpush3.msra.mxu1 %v13917_v9  ;;  %v1075_v38 = vrot.slane %v1028_v10, %v14884_v32  ;;  %v1082_v39 = vrot.slane %v1068_v23, %v14884_v32  ;;  %v1130_v40 = vrot.slane %v13639_v26, %v14884_v32  ;;  %v1138_v41 = vrot.slane %v1030_v14, %v14884_v32 }
  0x29   : > { %14345 = vmatprep.subr.mxu1 %v14701_v2  ;;  %v1145_v42 = vrot.slane %v1131_v27, %v14884_v32  ;;  %v1193_v43 = vrot.slane %v14889_v33, %v14884_v32  ;;  %v14910_v46 = vrot.slane %v555_v24, %v14884_v32  ;;  %14318 = vmatprep.subr.mxu0 %v14701_v2  ;;  %v13898_v23 = vunpack.c.h.bf16 %v14002_v8  ;;  %v557_v27 = vld [vmem:[%s18773_s0 + $0x10] sm:$0xff] }
  0x2a   : > { %14346 = vmatpush3.msra.mxu1 %v13914_v18  ;;  %v1083_v47 = vcombine.high %v1075_v38, %v1075_v38  ;;  %v1084_v48 = vcombine.high %v1082_v39, %v1082_v39  ;;  %v1091_v49 = vrot.slane %v1075_v38, %v14884_v32  ;;  %v1098_v50 = vrot.slane %v1082_v39, %v14884_v32 }
  0x2b   : > { %14347 = vmatprep.subr.mxu1 %v14701_v2  ;;  %v1146_v51 = vcombine.high %v1138_v41, %v1138_v41  ;;  %v1147_v52 = vcombine.high %v1145_v42, %v1145_v42  ;;  %v1154_v53 = vrot.slane %v1138_v41, %v14884_v32  ;;  %v1161_v54 = vrot.slane %v1145_v42, %v14884_v32 }
  0x2c   : > { %14348 = vmatpush3.msra.mxu1 %v13913_v25  ;;  %v1105_v55 = vrot.slane %v1083_v47, %v14884_v32  ;;  %v1112_v56 = vrot.slane %v1084_v48, %v14884_v32  ;;  %v14923_v58 = vrot.slane %v579_v37, %v14884_v32  ;;  %14319 = vmatpush3.msra.mxu0 %v13885_v44  ;;  %v13877_v39 = vunpack.c.l.bf16 %v13876_v17 }
  0x2d   : > { %14349 = vmatprep.subr.mxu1 %v14701_v2  ;;  %v1168_v59 = vrot.slane %v1146_v51, %v14884_v32  ;;  %v1175_v60 = vrot.slane %v1147_v52, %v14884_v32  ;;  %v1176_v61 = vcombine.high %v1154_v53, %v1154_v53  ;;  %v1177_v62 = vcombine.high %v1161_v54, %v1161_v54 }
  0x2e   : > { %14350 = vmatpush3.msra.mxu1 %v13910_v29  ;;  %v1194_v63 = vcombine.low %v1091_v49, %v1105_v55  ;;  %v13641_v0 = vcombine.high %v1091_v49, %v1105_v55  ;;  %v1196_v1 = vcombine.low %v1098_v50, %v1112_v56  ;;  %v13642_v3 = vcombine.high %v1098_v50, %v1112_v56 }
  0x2f   : > { %14351 = vmatprep.subr.mxu1 %v14701_v2  ;;  %v1178_v4 = vcombine.high %v1168_v59, %v1168_v59  ;;  %v1243_v5 = vcombine.low %v1130_v40, %v1154_v53  ;;  %v1244_v6 = vcombine.low %v1168_v59, %v1176_v61  ;;  %v1246_v7 = vcombine.low %v1175_v60, %v1177_v62  ;;  %v13633_v62 = vld.sshfl [vmem:[%s18773_s0 + $0x18] sm:$0x1 pattern:$0x75316420] }
  0x30   : > { %14352 = vmatpush3.msra.mxu1 %v13909_v30  ;;  %v1204_v9 = vrot.slane %v1194_v63, %v14884_v32  ;;  %v1211_v10 = vrot.slane %v13641_v0, %v14884_v32  ;;  %v1218_v11 = vrot.slane %v1196_v1, %v14884_v32  ;;  %v1225_v12 = vrot.slane %v13642_v3, %v14884_v32 }
  0x31   : > { %14353 = vmatprep.subr.mxu1 %v14701_v2  ;;  %v1245_v13 = vcombine.low %v1178_v4, %v1161_v54  ;;  %v1253_v14 = vrot.slane %v1243_v5, %v14884_v32  ;;  %v1260_v15 = vrot.slane %v1244_v6, %v14884_v32  ;;  %v1274_v16 = vrot.slane %v1246_v7, %v14884_v32 }
  0x32   : > { %14354 = vmatpush3.msra.mxu1 %v13906_v31  ;;  %v1226_v18 = vcombine.low %v1204_v9, %v1211_v10  ;;  %v1227_v19 = vcombine.low %v1218_v11, %v1225_v12  ;;  %v1179_v20 = vcombine.high %v1175_v60, %v1175_v60  ;;  %14320 = vmatprep.subr.mxu0 %v14701_v2  ;;  %v13878_v31 = vunpack.c.h.bf16 %v13876_v17 }
  0x33   : > { %14355 = vmatprep.subr.mxu1 %v14701_v2  ;;  %v1267_v24 = vrot.slane %v1245_v13, %v14884_v32  ;;  %v1275_v25 = vcombine.low %v1253_v14, %v1260_v15  ;;  %v594_v26 = vcombine.high %v14910_v46, %v14910_v46  ;;  %14321 = vmatpush3.msra.mxu0 %v13882_v57  ;;  %v13894_v41 = vunpack.c.h.bf16 %v13892_v28 }
  0x34   : > { %14356 = vmatpush3.msra.mxu1 %v13905_v34  ;;  %v1234_v29 = vrot.slane %v1226_v18, %v14884_v32  ;;  %v1241_v30 = vrot.slane %v1227_v19, %v14884_v32  ;;  %v13897_v34 = vunpack.c.l.bf16 %v14002_v8  ;;  %14322 = vmatprep.subr.mxu0 %v14701_v2  ;;  %v595_v37 = vcombine.high %v14923_v58, %v14923_v58 }
  0x35   : > { %14357 = vmatprep.subr.mxu1 %v14701_v2  ;;  %v14968_v38 = vcombine.low %v1179_v20, %v1193_v43  ;;  %14323 = vmatpush3.msra.mxu0 %v13881_v22  ;;  %v602_v21 = vrot.slane %v14910_v46, %v14884_v32  ;;  %v642_v40 = vcombine.high %v557_v27, %v557_v27  ;;  %v13893_v47 = vunpack.c.l.bf16 %v13892_v28 }
  0x36   : > { %14358 = vmatpush3.msra.mxu1 %v13902_v35  ;;  %v1276_v35 = vcombine.low %v1267_v24, %v1274_v16  ;;  %v1283_v42 = vrot.slane %v1275_v25, %v14884_v32  ;;  %14324 = vmatprep.subr.mxu0 %v14701_v2  ;;  %v609_v33 = vrot.slane %v14923_v58, %v14884_v32 }
  0x37   : > { %14359 = vmatprep.subr.mxu1 %v14701_v2  ;;  %v616_v43 = vrot.slane %v594_v26, %v14884_v32  ;;  %v1242_v44 = vcombine.low %v1234_v29, %v1241_v30  ;;  %14325 = vmatpush3.msra.mxu0 %v13878_v31  ;;  %v623_v46 = vrot.slane %v595_v37, %v14884_v32 }
  0x38   : > { %14360 = vmatpush3.msra.mxu1 %v13901_v36  ;;  %v13632_v36 = vld.sshfl [vmem:[%s18773_s0 + $0x8] sm:$0x1 pattern:$0x75316420]  ;;  %v1290_v45 = vrot.slane %v1276_v35, %v14884_v32  ;;  %14326 = vmatprep.subr.mxu0 %v14701_v2  ;;  %v649_v53 = vrot.slane %v557_v27, %v14884_v32  ;;  %v1299_v54 = vrot.slane %v14968_v38, %v14884_v32 }
  0x39   : > { %14361 = vmatprep.subr.mxu1 %v14701_v2  ;;  %v705_v48 = vcombine.low %v602_v21, %v616_v43  ;;  %v13634_v49 = vcombine.high %v602_v21, %v616_v43  ;;  %v641_v50 = vrot.slane %v13632_v36, %v14884_v32  ;;  %14327 = vmatpush3.msra.mxu0 %v13877_v39 }
  0x3a   : > { %14362 = vmatpush3.msra.mxu1 %v13898_v23  ;;  %v707_v51 = vcombine.low %v609_v33, %v623_v46  ;;  %v13635_v52 = vcombine.high %v609_v33, %v623_v46  ;;  %v656_v57 = vrot.slane %v642_v40, %v14884_v32  ;;  %v657_v60 = vcombine.high %v649_v53, %v649_v53 }
  0x3b   : > { %14363 = vmatprep.subr.mxu1 %v14701_v2  ;;  %v715_v55 = vrot.slane %v705_v48, %v14884_v32  ;;  %v722_v56 = vrot.slane %v13634_v49, %v14884_v32  ;;  %v665_v61 = vrot.slane %v649_v53, %v14884_v32  ;;  %v1291_v63 = vcombine.low %v1283_v42, %v1290_v45 }
  0x3c   : > { %14364 = vmatpush3.msra.mxu1 %v13897_v34  ;;  %v729_v58 = vrot.slane %v707_v51, %v14884_v32  ;;  %v736_v59 = vrot.slane %v13635_v52, %v14884_v32  ;;  %v658_v1 = vcombine.high %v656_v57, %v656_v57  ;;  %v672_v3 = vrot.slane %v656_v57, %v14884_v32 }
  0x3d   : > { %14365 = vmatprep.subr.mxu1 %v14701_v2  ;;  %v737_v0 = vcombine.low %v715_v55, %v722_v56  ;;  %v679_v5 = vrot.slane %v657_v60, %v14884_v32  ;;  %v687_v6 = vcombine.high %v665_v61, %v665_v61  ;;  %v754_v7 = vcombine.low %v641_v50, %v665_v61 }
  0x3e   : > { %14366 = vmatpush3.msra.mxu1 %v13894_v41  ;;  %v738_v4 = vcombine.low %v729_v58, %v736_v59  ;;  %v686_v9 = vrot.slane %v658_v1, %v14884_v32  ;;  %v688_v10 = vcombine.high %v672_v3, %v672_v3  ;;  %v704_v11 = vrot.slane %v13633_v62, %v14884_v32 }
  0x3f   : > { %14367 = vmatprep.subr.mxu1 %v14701_v2  ;;  %v745_v8 = vrot.slane %v737_v0, %v14884_v32  ;;  %v689_v13 = vcombine.high %v679_v5, %v679_v5  ;;  %v755_v14 = vcombine.low %v679_v5, %v687_v6  ;;  %v764_v15 = vrot.slane %v754_v7, %v14884_v32 }
  0x40   : > { %14368 = vmatpush3.msra.mxu1 %v13893_v47  ;;  %v752_v12 = vrot.slane %v738_v4, %v14884_v32  ;;  %v757_v16 = vcombine.low %v686_v9, %v688_v10  ;;  %v690_v17 = vcombine.high %v686_v9, %v686_v9  ;;  %v1306_v18 = vrot.slane %v1299_v54, %v14884_v32 }
  0x41   : > { %14370 = vmatmul.mubr.f32.vlgmr.msra.gmra.mxu1 %v1242_v44  ;;  %v756_v20 = vcombine.low %v689_v13, %v672_v3  ;;  %v771_v22 = vrot.slane %v755_v14, %v14884_v32 }
  0x42   : > { %14372 = vmatprep.mubr.msk.f32.mxu1 %vm14702_vm0, %v14701_v2  ;;  %v753_v19 = vcombine.low %v745_v8, %v752_v12  ;;  %v785_v23 = vrot.slane %v757_v16, %v14884_v32  ;;  %v803_v26 = vcombine.low %v690_v17, %v704_v11 }
  0x43   : > { %v778_v24 = vrot.slane %v756_v20, %v14884_v32  ;;  %v786_v25 = vcombine.low %v764_v15, %v771_v22 }
  0x44   : > { %14329 = vmatmul.mubr.msk.f32.vlgmr.msra.gmra.mxu0 %vm818_vm1, %v753_v19  ;;  %v810_v30 = vrot.slane %v803_v26, %v14884_v32 }
  0x45   : > { %14373 = vmatmul.mubr.f32.gmra.mxu1 %v1291_v63  ;;  %14331 = vmatprep.mubr.msk.f32.mxu0 %vm14702_vm0, %v14701_v2  ;;  %v787_v27 = vcombine.low %v778_v24, %v785_v23  ;;  %v794_v28 = vrot.slane %v786_v25, %v14884_v32 }
  0x46   : > { %14375 = vmatprep.mubr.msk.f32.mxu1 %vm14702_vm0, %v14701_v2  ;;  %v817_v34 = vrot.slane %v810_v30, %v14884_v32 }
  0x47   : > { %v801_v29 = vrot.slane %v787_v27, %v14884_v32 }
  0x49   : > { %14376 = vmatmul.mubr.f32.gmra.mxu1 %v1306_v18  ;;  %v802_v31 = vcombine.low %v794_v28, %v801_v29 }
  0x4b   : > { %14332 = vmatmul.mubr.msk.f32.gmra.mxu0 %vm818_vm1, %v802_v31 }
  0x4c   : > { %14334 = vmatprep.mubr.msk.f32.mxu0 %vm14702_vm0, %v14701_v2 }
  0x4f   : > { %14335 = vmatmul.mubr.msk.f32.gmra.mxu0 %vm818_vm1, %v817_v34 }
 0x101   : > { %v1376_v35 = vpop.f32.mrf.mxu1 }
 0x102   : > { %v1393_v37 = vcombine.high %v1376_v35, %v1376_v35  ;;  %v1400_v38 = vrot.slane %v1376_v35, %v14884_v32 }
 0x103   : > { %v14371_v39 = vpop.f32.mrf.mxu1 }
 0x104   : > { %v1407_v21 = vrot.slane %v1393_v37, %v14884_v32  ;;  %v1408_v36 = vcombine.high %v1400_v38, %v1400_v38  ;;  %v1416_v42 = vrot.slane %v1400_v38, %v14884_v32  ;;  %v15031_v46 = vpop.f32.mrf.mxu0 }
 0x105   : > { %v1381_v40 = vpop.f32.mrf.mxu1 }
 0x106   : > { %v1409_v41 = vcombine.high %v1407_v21, %v1407_v21  ;;  %v1430_v33 = vrot.slane %v1408_v36, %v14884_v32  ;;  %v1442_v43 = vcombine.high %v1381_v40, %v1381_v40  ;;  %v1423_v44 = vrot.slane %v1407_v21, %v14884_v32  ;;  %v14330_v54 = vpop.f32.mrf.mxu0 }
 0x107   : > { %v1449_v2 = vrot.slane %v1381_v40, %v14884_v32  ;;  %v14374_v45 = vpop.f32.mrf.mxu1 }
 0x108   : > { %v1437_v47 = vrot.slane %v1409_v41, %v14884_v32  ;;  %v1643_v48 = vcombine.low %v1416_v42, %v1430_v33  ;;  %v13645_v49 = vcombine.high %v1416_v42, %v1430_v33  ;;  %v1456_v50 = vrot.slane %v1442_v43, %v14884_v32 }
 0x109   : > { %v1457_v51 = vcombine.high %v1449_v2, %v1449_v2  ;;  %v1465_v52 = vrot.slane %v1449_v2, %v14884_v32  ;;  %v1386_v53 = vpop.f32.mrf.mxu1  ;;  %v1799_v2 = vld [vmem:[%s18775_s2 + $0x40] sm:$0xff] }
 0x10a   : > { %v1645_v55 = vcombine.low %v1423_v44, %v1437_v47  ;;  %v13646_v56 = vcombine.high %v1423_v44, %v1437_v47  ;;  %v1458_v57 = vcombine.high %v1456_v50, %v1456_v50  ;;  %v1472_v58 = vrot.slane %v1456_v50, %v14884_v32  ;;  %v1793_v44 = vld [vmem:[%s18775_s2 + $0x10] sm:$0xff]  ;;  %1825 = vst.msk [vmem:[#allocation2 + $0x40] sm:$0xff] %vm1817_vm2, %v1799_v2 }
 0x10b   : > { %v1479_v59 = vrot.slane %v1457_v51, %v14884_v32  ;;  %v1487_v60 = vcombine.high %v1465_v52, %v1465_v52  ;;  %v1497_v61 = vrot.slane %v1386_v53, %v14884_v32  ;;  %v14377_v62 = vpop.f32.mrf.mxu1  ;;  %v1653_v1 = vrot.slane %v1643_v48, %v14884_v32  ;;  %v896_v13 = vpop.f32.mrf.mxu0  ;;  %1818 = vst.msk [vmem:[#allocation2 + $0x10] sm:$0xff] %vm1817_vm2, %v1793_v44  ;;  %v1798_v44 = vld [vmem:[%s18775_s2 + $0x38] sm:$0xff] }
 0x10c   : > { %v1486_v63 = vrot.slane %v1458_v57, %v14884_v32  ;;  %v1488_v0 = vcombine.high %v1472_v58, %v1472_v58  ;;  %v1660_v3 = vrot.slane %v13645_v49, %v14884_v32  ;;  %v1667_v8 = vrot.slane %v1645_v55, %v14884_v32 }
 0x10d   : > { %v1489_v4 = vcombine.high %v1479_v59, %v1479_v59  ;;  %v1706_v5 = vcombine.low %v1479_v59, %v1487_v60  ;;  %v1505_v6 = vrot.slane %v1497_v61, %v14884_v32  ;;  %v1674_v9 = vrot.slane %v13646_v56, %v14884_v32  ;;  %v14333_v19 = vpop.f32.mrf.mxu0  ;;  %v1802_v59 = vld [vmem:[%s18775_s2 + $0x58] sm:$0x1] }
 0x10e   : > { %v1490_v7 = vcombine.high %v1486_v63, %v1486_v63  ;;  %v1675_v10 = vcombine.low %v1653_v1, %v1660_v3  ;;  %v1708_v12 = vcombine.low %v1486_v63, %v1488_v0  ;;  %v1498_v14 = vcombine.high %v1497_v61, %v1497_v61  ;;  %1828 = vst.msk [vmem:[#allocation2 + $0x58] sm:$0x1] %vm1821_vm3, %v1802_v59 }
 0x10f   : > { %v1707_v11 = vcombine.low %v1489_v4, %v1472_v58  ;;  %v1676_v16 = vcombine.low %v1667_v8, %v1674_v9  ;;  %v1716_v17 = vrot.slane %v1706_v5, %v14884_v32  ;;  %v1698_v25 = vrot.slane %v1465_v52, %v14884_v32  ;;  %v901_v27 = vpop.f32.mrf.mxu0  ;;  %v1796_v58 = vld [vmem:[%s18775_s2 + $0x28] sm:$0x1] }
 0x110   : > { %v1709_v15 = vcombine.low %v1490_v7, %v1505_v6  ;;  %v1683_v22 = vrot.slane %v1675_v10, %v14884_v32  ;;  %v1730_v24 = vrot.slane %v1708_v12, %v14884_v32  ;;  %v1512_v28 = vrot.slane %v1498_v14, %v14884_v32  ;;  %1822 = vst.msk [vmem:[#allocation2 + $0x28] sm:$0x1] %vm1821_vm3, %v1796_v58 }
 0x111   : > { %v1723_v18 = vrot.slane %v1707_v11, %v14884_v32  ;;  %v1690_v23 = vrot.slane %v1676_v16, %v14884_v32  ;;  %v957_v31 = vcombine.high %v896_v13, %v896_v13  ;;  %v964_v34 = vrot.slane %v896_v13, %v14884_v32  ;;  %v14336_v35 = vpop.f32.mrf.mxu0 }
 0x112   : > { %v1737_v20 = vrot.slane %v1709_v15, %v14884_v32  ;;  %v1705_v21 = vrot.slane %v1698_v25, %v14884_v32  ;;  %v1761_v42 = vrot.slane %v1512_v28, %v14884_v32  ;;  %v15064_v43 = vrot.slane %v901_v27, %v14884_v32  ;;  %v1792_v35 = vld [vmem:[%s18775_s2 + $0x8] sm:$0xff] }
 0x113   : > { %v1738_v26 = vcombine.low %v1716_v17, %v1723_v18  ;;  %v1691_v29 = vcombine.low %v1683_v22, %v1690_v23  ;;  %v971_v39 = vrot.slane %v957_v31, %v14884_v32  ;;  %v972_v36 = vcombine.high %v964_v34, %v964_v34 }
 0x114   : > { %v1739_v30 = vcombine.low %v1730_v24, %v1737_v20  ;;  %v15060_v40 = vrot.slane %v964_v34, %v14884_v32  ;;  %v1768_v52 = vrot.slane %v1761_v42, %v14884_v32  ;;  %v1020_v55 = vrot.slane %v15064_v43, %v14884_v32  ;;  %v1791_v34 = vld [vmem:[%s18775_s2] sm:$0xff] }
 0x115   : > { %1769 = vrot.lane.b32.xlu0 %v1691_v29, %s14704_s26  ;;  %v1746_v37 = vrot.slane %v1738_v26, %v14884_v32  ;;  %v973_v33 = vcombine.high %v971_v39, %v971_v39  ;;  %v987_v45 = vrot.slane %v971_v39, %v14884_v32  ;;  %v994_v47 = vrot.slane %v972_v36, %v14884_v32  ;;  %v1795_v42 = vld [vmem:[%s18775_s2 + $0x20] sm:$0x1] }
 0x116   : > { %v1753_v38 = vrot.slane %v1739_v30, %v14884_v32  ;;  %v1002_v49 = vcombine.high %v15060_v40, %v15060_v40  ;;  %v908_v7 = vcombine.high %v15031_v46, %v15031_v46  ;;  %v915_v8 = vrot.slane %v15031_v46, %v14884_v32 }
 0x117   : > { %v1001_v48 = vrot.slane %v973_v33, %v14884_v32  ;;  %v1003_v50 = vcombine.high %v987_v45, %v987_v45  ;;  %v1004_v51 = vcombine.high %v994_v47, %v994_v47  ;;  %v1013_v28 = vcombine.high %v15064_v43, %v15064_v43  ;;  %v1797_v43 = vld [vmem:[%s18775_s2 + $0x30] sm:$0xff] }
 0x118   : > { %v1754_v41 = vcombine.low %v1746_v37, %v1753_v38  ;;  %v1576_v53 = vcombine.low %v994_v47, %v1002_v49  ;;  %v922_v9 = vrot.slane %v908_v7, %v14884_v32  ;;  %v923_v10 = vcombine.high %v915_v8, %v915_v8 }
 0x119   : > { %1771 = vrot.lane.b32.xlu0 %v1705_v21, %s14704_s26  ;;  %v1005_v54 = vcombine.high %v1001_v48, %v1001_v48  ;;  %v1577_v56 = vcombine.low %v1004_v51, %v987_v45  ;;  %v1578_v57 = vcombine.low %v1001_v48, %v1003_v50  ;;  %v931_v12 = vrot.slane %v915_v8, %v14884_v32 }
 0x11a   : > { %1773 = vrot.lane.b32.xlu1 %v1754_v41, %s14704_s26  ;;  %v1586_v60 = vrot.slane %v1576_v53, %v14884_v32  ;;  %v924_v11 = vcombine.high %v922_v9, %v922_v9  ;;  %v938_v13 = vrot.slane %v922_v9, %v14884_v32  ;;  %v945_v14 = vrot.slane %v923_v10, %v14884_v32 }
 0x11b   : > { %v1579_v61 = vcombine.low %v1005_v54, %v1020_v55  ;;  %v1593_v62 = vrot.slane %v1577_v56, %v14884_v32  ;;  %v1600_v63 = vrot.slane %v1578_v57, %v14884_v32  ;;  %v1568_v30 = vrot.slane %v15060_v40, %v14884_v32  ;;  %v1794_v40 = vld [vmem:[%s18775_s2 + $0x18] sm:$0x1]  ;;  %v1800_v55 = vld [vmem:[%s18775_s2 + $0x48] sm:$0x1]  ;;  %v1801_v56 = vld [vmem:[%s18775_s2 + $0x50] sm:$0x1] }
 0x11c   : > { %v952_v15 = vrot.slane %v924_v11, %v14884_v32  ;;  %v1513_v16 = vcombine.low %v931_v12, %v945_v14  ;;  %v13643_v17 = vcombine.high %v931_v12, %v945_v14  ;;  %v1027_v31 = vrot.slane %v1013_v28, %v14884_v32 }
 0x11d   : > { %v1607_v0 = vrot.slane %v1579_v61, %v14884_v32  ;;  %v1608_v1 = vcombine.low %v1586_v60, %v1593_v62  ;;  %v1575_v33 = vrot.slane %v1568_v30, %v14884_v32 }
 0x11e   : > { %1775 = vrot.lane.b32.xlu1 %v1768_v52, %s14704_s26  ;;  %v1515_v18 = vcombine.low %v938_v13, %v952_v15  ;;  %v13644_v19 = vcombine.high %v938_v13, %v952_v15  ;;  %v1523_v20 = vrot.slane %v1513_v16, %v14884_v32  ;;  %v1530_v46 = vrot.slane %v13643_v17, %v14884_v32 }
 0x11f   : > { %v1609_v3 = vcombine.low %v1600_v63, %v1607_v0  ;;  %v1616_v4 = vrot.slane %v1608_v1, %v14884_v32  ;;  %v1631_v41 = vrot.slane %v1027_v31, %v14884_v32 }
 0x120   : > { %v1537_v22 = vrot.slane %v1515_v18, %v14884_v32  ;;  %v1544_v23 = vrot.slane %v13644_v19, %v14884_v32  ;;  %v1545_v24 = vcombine.low %v1523_v20, %v1530_v46 }
 0x121   : > { %v1623_v5 = vrot.slane %v1609_v3, %v14884_v32  ;;  %v1638_v57 = vrot.slane %v1631_v41, %v14884_v32 }
 0x122   : > { %v1546_v25 = vcombine.low %v1537_v22, %v1544_v23  ;;  %v1553_v26 = vrot.slane %v1545_v24, %v14884_v32 }
 0x123   : > { %v1624_v6 = vcombine.low %v1616_v4, %v1623_v5 }
 0x124   : > { %v1560_v27 = vrot.slane %v1546_v25, %v14884_v32 }
 0x126   : > { %v1561_v29 = vcombine.low %v1553_v26, %v1560_v27 }
 0x187   : > { %v1770_v37 = vpop.permute.xlu0 %1769 }
 0x188   : > { %v1782_v38 = vsel %vm1781_vm4, %v1561_v29, %v1770_v37  ;;  %v1787_v39 = vsel %vm1786_vm5, %v1770_v37, 0.0 }
 0x189   : > { %v1803_v21 = vadd.f32 %v1791_v34, %v1782_v38  ;;  %v1804_v36 = vadd.f32 %v1792_v35, %v1787_v39 }
 0x18b   : > { %1815 = vst [vmem:[#allocation2] sm:$0xff] %v1803_v21  ;;  %1816 = vst [vmem:[#allocation2 + $0x8] sm:$0xff] %v1804_v36  ;;  %v1772_v2 = vpop.permute.xlu0 %1771 }
 0x18c   : > { %v1774_v45 = vpop.permute.xlu1 %1773  ;;  %v1783_v47 = vsel %vm1781_vm4, %v1575_v33, %v1772_v2  ;;  %v1788_v48 = vsel %vm1786_vm5, %v1772_v2, 0.0 }
 0x18d   : > { %v1784_v49 = vsel %vm1781_vm4, %v1624_v6, %v1774_v45  ;;  %v1789_v50 = vsel %vm1786_vm5, %v1774_v45, 0.0  ;;  %v1806_v51 = vadd.f32 %v1794_v40, %v1783_v47  ;;  %v1807_v52 = vadd.f32 %v1795_v42, %v1788_v48 }
 0x18e   : > { %v1809_v53 = vadd.f32 %v1797_v43, %v1784_v49  ;;  %v1810_v54 = vadd.f32 %v1798_v44, %v1789_v50 }
 0x18f   : > { %1819 = vst [vmem:[#allocation2 + $0x18] sm:$0x1] %v1806_v51  ;;  %1820 = vst [vmem:[#allocation2 + $0x20] sm:$0x1] %v1807_v52 }
 0x190   : > { %1823 = vst [vmem:[#allocation2 + $0x30] sm:$0xff] %v1809_v53  ;;  %1824 = vst [vmem:[#allocation2 + $0x38] sm:$0xff] %v1810_v54  ;;  %v1776_v58 = vpop.permute.xlu1 %1775 }
 0x191   : > { %v1785_v59 = vsel %vm1781_vm4, %v1638_v57, %v1776_v58  ;;  %v1790_v60 = vsel %vm1786_vm5, %v1776_v58, 0.0 }
 0x192   : > { %v1812_v61 = vadd.f32 %v1800_v55, %v1785_v59  ;;  %v1813_v62 = vadd.f32 %v1801_v56, %v1790_v60 }
 0x194   : > { %1826 = vst [vmem:[#allocation2 + $0x48] sm:$0x1] %v1812_v61  ;;  %1827 = vst [vmem:[#allocation2 + $0x50] sm:$0x1] %v1813_v62 }
 0x195 PF: > { %v15150_v63 = vld [vmem:[#allocation2] sm:$0xff]  ;;  %v15152_v0 = vld [vmem:[#allocation2 + $0x8] sm:$0xff]  ;;  %v15154_v1 = vld [vmem:[#allocation2 + $0x10] sm:$0xff]  ;;  %vm1853_vm6 = vcmask 424960   ;;  %vm1858_vm7 = vcmask 1040384   ;;  %vm1862_vm8 = vcmask 417792  }
 0x196   : > { %v1852_v32 = vadd.f32 %v15152_v0, %v15150_v63  ;;  %v1854_v3 = vsel %vm1853_vm6, %v15154_v1, 0.0  ;;  %v15160_v4 = vld [vmem:[#allocation2 + $0x18] sm:$0x1]  ;;  %v15162_v5 = vld [vmem:[#allocation2 + $0x20] sm:$0x1]  ;;  %v2026_v28 = vld [vmem:[%s14801_s20 + $0x70] sm:$0xff] }
 0x197   : > { %v15164_v6 = vld [vmem:[#allocation2 + $0x30] sm:$0xff]  ;;  %v15166_v7 = vld [vmem:[#allocation2 + $0x28] sm:$0x1]  ;;  %v1859_v8 = vsel %vm1858_vm7, %v15160_v4, 0.0  ;;  %v1860_v9 = vsel %vm1858_vm7, %v15162_v5, 0.0  ;;  %v15172_v10 = vld [vmem:[#allocation2 + $0x38] sm:$0xff]  ;;  %v2080_v34 = vunpack.c.h.bf16 %v2026_v28  ;;  %v2079_v35 = vunpack.c.l.bf16 %v2026_v28 }
 0x198   : > { %v15174_v11 = vld [vmem:[#allocation2 + $0x40] sm:$0xff]  ;;  %v1855_v12 = vadd.f32 %v1854_v3, %v1852_v32  ;;  %v1861_v13 = vadd.f32 %v1860_v9, %v1859_v8  ;;  %v1863_v14 = vsel %vm1862_vm8, %v15166_v7, 0.0  ;;  %v1867_v15 = vadd.f32 %v15172_v10, %v15164_v6  ;;  %v15186_v19 = vld [vmem:[#allocation2 + $0x58] sm:$0x1]  ;;  %v2025_v29 = vld [vmem:[%s14801_s20 + $0x68] sm:$0xff]  ;;  %p13864_p5 = scmp.ne.s32.totalorder %s14792_s30, 3 }
 0x199   : > { %v1868_v18 = vsel %vm1853_vm6, %v15174_v11, 0.0  ;;  %v1875_v25 = vsel %vm1862_vm8, %v15186_v19, 0.0  ;;  %v2027_v27 = vld [vmem:[%s14801_s20 + $0x78] sm:$0xff]  ;;  %v2024_v37 = vld [vmem:[%s14801_s20 + $0x60] sm:$0xff]  ;;  %v2078_v38 = vunpack.c.h.bf16 %v2025_v29  ;;  %v2077_v39 = vunpack.c.l.bf16 %v2025_v29  ;;  %v2022_v41 = vld [vmem:[%s14801_s20 + $0x50] sm:$0xff]  ;;  %s18981_s26 = sld [smem:[#allocation38_spill]] (!%p13864_p5) }
 0x19a   : > { %1856 = vadd.xlane.f32.xlu0 %v1855_v12  ;;  %v1864_v22 = vadd.f32 %v1863_v14, %v1861_v13  ;;  %v1869_v23 = vadd.f32 %v1868_v18, %v1867_v15  ;;  %v2082_v30 = vunpack.c.h.bf16 %v2027_v27  ;;  %v2081_v31 = vunpack.c.l.bf16 %v2027_v27  ;;  %v2023_v21 = vld [vmem:[%s14801_s20 + $0x58] sm:$0xff]  ;;  %v2021_v43 = vld [vmem:[%s14801_s20 + $0x48] sm:$0xff]  ;;  %v2020_v45 = vld [vmem:[%s14801_s20 + $0x40] sm:$0xff]  ;;  %s18982_s19 = sld [smem:[#allocation39_spill]] (!%p13864_p5) }
 0x19b   : > { %v15180_v16 = vld [vmem:[#allocation2 + $0x48] sm:$0x1]  ;;  %v15182_v17 = vld [vmem:[#allocation2 + $0x50] sm:$0x1]  ;;  %v2076_v36 = vunpack.c.h.bf16 %v2024_v37  ;;  %v2075_v40 = vunpack.c.l.bf16 %v2024_v37  ;;  %v2074_v42 = vunpack.c.h.bf16 %v2023_v21  ;;  %v2073_v33 = vunpack.c.l.bf16 %v2023_v21  ;;  %v2019_v49 = vld [vmem:[%s14801_s20 + $0x38] sm:$0xff] }
 0x19c   : > { %v1872_v20 = vsel %vm1858_vm7, %v15180_v16, 0.0  ;;  %v1873_v46 = vsel %vm1858_vm7, %v15182_v17, 0.0  ;;  %1865 = vadd.xlane.f32.xlu1 %v1864_v22  ;;  %2498 = vmatprep.subr.mxu0 %v2082_v30  ;;  %v2072_v44 = vunpack.c.h.bf16 %v2022_v41  ;;  %v2071_v2 = vunpack.c.l.bf16 %v2022_v41  ;;  %v2018_v52 = vld [vmem:[%s14801_s20 + $0x30] sm:$0xff]  ;;  %v2017_v55 = vld [vmem:[%s14801_s20 + $0x28] sm:$0xff] }
 0x19d   : > { %v1874_v24 = vadd.f32 %v1873_v46, %v1872_v20  ;;  %2499 = vmatpush1.msra.mxu0 %v2081_v31  ;;  %v2070_v47 = vunpack.c.h.bf16 %v2021_v43  ;;  %v2069_v48 = vunpack.c.l.bf16 %v2021_v43  ;;  %v2068_v50 = vunpack.c.h.bf16 %v2020_v45 }
 0x19e   : > { %1870 = vadd.xlane.f32.xlu0 %v1869_v23  ;;  %2500 = vmatprep.subr.mxu0 %v2080_v34  ;;  %v2067_v51 = vunpack.c.l.bf16 %v2020_v45  ;;  %v2066_v53 = vunpack.c.h.bf16 %v2019_v49  ;;  %v2065_v54 = vunpack.c.l.bf16 %v2019_v49  ;;  %v2064_v56 = vunpack.c.h.bf16 %v2018_v52 }
 0x19f   : > { %v1876_v26 = vadd.f32 %v1875_v25, %v1874_v24  ;;  %2501 = vmatpush1.msra.mxu0 %v2079_v35  ;;  %v2063_v57 = vunpack.c.l.bf16 %v2018_v52  ;;  %v2062_v58 = vunpack.c.h.bf16 %v2017_v55  ;;  %v2061_v59 = vunpack.c.l.bf16 %v2017_v55 }
 0x1a0   : > { %2502 = vmatprep.subr.mxu0 %v2078_v38  ;;  %vm2491_vm9 = vcmask 1043456   ;;  %vm3757_vm10 = vcmask 523264   ;;  %vm4058_vm11 = vcmask 65536   ;;  %vm4054_vm12 = vcmask 72704  }
 0x1a1   : > { %1877 = vadd.xlane.f32.xlu1 %v1876_v26  ;;  %2503 = vmatpush1.msra.mxu0 %v2077_v39  ;;  %vm11808_vm13 = vcmask 654336  }
 0x1a2   : > { %2504 = vmatprep.subr.mxu0 %v2076_v36 }
 0x1a3   : > { %2505 = vmatpush1.msra.mxu0 %v2075_v40 }
 0x1a4   : > { %2506 = vmatprep.subr.mxu0 %v2074_v42 }
 0x1a5   : > { %2507 = vmatpush1.msra.mxu0 %v2073_v33 }
 0x1a6   : > { %2508 = vmatprep.subr.mxu0 %v2072_v44  ;;  %v2016_v44 = vld [vmem:[%s14801_s20 + $0x20] sm:$0xff] }
 0x1a7   : > { %2509 = vmatpush1.msra.mxu0 %v2071_v2  ;;  %v2060_v2 = vunpack.c.h.bf16 %v2016_v44  ;;  %v2059_v45 = vunpack.c.l.bf16 %v2016_v44 }
 0x1a8   : > { %2510 = vmatprep.subr.mxu0 %v2070_v47  ;;  %v2015_v47 = vld [vmem:[%s14801_s20 + $0x18] sm:$0xff] }
 0x1a9   : > { %2511 = vmatpush1.msra.mxu0 %v2069_v48  ;;  %v2058_v48 = vunpack.c.h.bf16 %v2015_v47  ;;  %v2057_v49 = vunpack.c.l.bf16 %v2015_v47  ;;  %v2045_v47 = vld [vmem:[%s14801_s20 + $0x108] sm:$0xff] }
 0x1aa   : > { %2512 = vmatprep.subr.mxu0 %v2068_v50  ;;  %v2014_v50 = vld [vmem:[%s14801_s20 + $0x10] sm:$0xff] }
 0x1ab   : > { %2513 = vmatpush1.msra.mxu0 %v2067_v51  ;;  %v2056_v51 = vunpack.c.h.bf16 %v2014_v50  ;;  %v2055_v52 = vunpack.c.l.bf16 %v2014_v50 }
 0x1ac   : > { %2514 = vmatprep.subr.mxu0 %v2066_v53  ;;  %v2013_v53 = vld [vmem:[%s14801_s20 + $0x8] sm:$0xff] }
 0x1ad   : > { %2515 = vmatpush1.msra.mxu0 %v2065_v54  ;;  %v2054_v54 = vunpack.c.h.bf16 %v2013_v53  ;;  %v2053_v55 = vunpack.c.l.bf16 %v2013_v53  ;;  %v2044_v53 = vld [vmem:[%s14801_s20 + $0x100] sm:$0xff] }
 0x1ae   : > { %2516 = vmatprep.subr.mxu0 %v2064_v56  ;;  %v2012_v56 = vld [vmem:[%s14801_s20] sm:$0xff] }
 0x1af   : > { %2517 = vmatpush1.msra.mxu0 %v2063_v57  ;;  %v2052_v57 = vunpack.c.h.bf16 %v2012_v56 }
 0x1b0   : > { %2518 = vmatprep.subr.mxu0 %v2062_v58  ;;  %v2051_v58 = vunpack.c.l.bf16 %v2012_v56 }
 0x1b1   : > { %2519 = vmatpush1.msra.mxu0 %v2061_v59  ;;  %v2043_v59 = vld [vmem:[%s14801_s20 + $0xf8] sm:$0xff] }
 0x1b2   : > { %2520 = vmatprep.subr.mxu0 %v2060_v2  ;;  %v2034_v2 = vld [vmem:[%s14801_s20 + $0xb0] sm:$0xff] }
 0x1b3   : > { %2521 = vmatpush1.msra.mxu0 %v2059_v45  ;;  %v2095_v56 = vunpack.c.l.bf16 %v2034_v2 }
 0x1b4   : > { %2522 = vmatprep.subr.mxu0 %v2058_v48 }
 0x1b5   : > { %2523 = vmatpush1.msra.mxu0 %v2057_v49 }
 0x1b6   : > { %2524 = vmatprep.subr.mxu0 %v2056_v51  ;;  %v2033_v51 = vld [vmem:[%s14801_s20 + $0xa8] sm:$0xff] }
 0x1b7   : > { %2525 = vmatpush1.msra.mxu0 %v2055_v52 }
 0x1b8   : > { %2526 = vmatprep.subr.mxu0 %v2054_v54  ;;  %v2096_v54 = vunpack.c.h.bf16 %v2034_v2 }
 0x1b9   : > { %2527 = vmatpush1.msra.mxu0 %v2053_v55  ;;  %v2118_v55 = vunpack.c.h.bf16 %v2045_v47 }
 0x1ba   : > { %2528 = vmatprep.subr.mxu0 %v2052_v57  ;;  %v2032_v57 = vld [vmem:[%s14801_s20 + $0xa0] sm:$0xff] }
 0x1bb   : > { %2529 = vmatpush1.msra.mxu0 %v2051_v58  ;;  %v2117_v58 = vunpack.c.l.bf16 %v2045_v47 }
 0x223   : > { %v1857_v60 = vpop.xlane.xlu0 %1856 }
 0x224   : > { %v1880_v61 = vmul.f32 0.0032467532, %v1857_v60  ;;  %v2114_v60 = vunpack.c.h.bf16 %v2043_v59 }
 0x225   : > { %v1866_v62 = vpop.xlane.xlu1 %1865 }
 0x226   : > { %v15206_v32 = vsub.f32 %v15150_v63, %v1880_v61  ;;  %v15209_v3 = vsub.f32 %v15152_v0, %v1880_v61  ;;  %v15212_v8 = vsub.f32 %v15154_v1, %v1880_v61  ;;  %v1881_v9 = vmul.f32 0.0032467532, %v1866_v62  ;;  %v2042_v62 = vld [vmem:[%s14801_s20 + $0xf0] sm:$0xff]  ;;  %2530 = vmatprep.subr.mxu0 %v2114_v60 }
 0x227   : > { %v1871_v12 = vpop.xlane.xlu0 %1870  ;;  %v2113_v61 = vunpack.c.l.bf16 %v2043_v59  ;;  %v15301_v59 = vld [vmem:[%s14801_s20 + $0x1b0] sm:$0xff]  ;;  %v2094_v60 = vunpack.c.h.bf16 %v2033_v51 }
 0x228   : > { %v15215_v13 = vsub.f32 %v15160_v4, %v1881_v9  ;;  %v15218_v14 = vsub.f32 %v15162_v5, %v1881_v9  ;;  %v15221_v15 = vsub.f32 %v15166_v7, %v1881_v9  ;;  %v1882_v18 = vmul.f32 0.0032467532, %v1871_v12 }
 0x229   : > { %v1896_v0 = vmul.f32 %v15206_v32, %v15206_v32  ;;  %v1897_v1 = vmul.f32 %v15209_v3, %v15209_v3  ;;  %v1898_v20 = vmul.f32 %v15212_v8, %v15212_v8  ;;  %v2112_v9 = vunpack.c.h.bf16 %v2042_v62  ;;  %2531 = vmatpush2.msra.mxu0 %v2113_v61 }
 0x22a   : > { %v1878_v63 = vpop.xlane.xlu1 %1877  ;;  %v15230_v4 = vsub.f32 %v15164_v6, %v1882_v18  ;;  %v15233_v5 = vsub.f32 %v15172_v10, %v1882_v18  ;;  %v15236_v7 = vsub.f32 %v15174_v11, %v1882_v18  ;;  %v1899_v24 = vmul.f32 %v15215_v13, %v15215_v13  ;;  %v2041_v18 = vld [vmem:[%s14801_s20 + $0xe8] sm:$0xff] }
 0x22b   : > { %v1883_v46 = vmul.f32 0.0032467532, %v1878_v63  ;;  %v1908_v22 = vadd.f32 %v1897_v1, %v1896_v0  ;;  %v1909_v23 = vsel %vm1853_vm6, %v1898_v20, 0.0  ;;  %v1900_v25 = vmul.f32 %v15218_v14, %v15218_v14  ;;  %2532 = vmatprep.subr.mxu0 %v2112_v9  ;;  %v2040_v1 = vld [vmem:[%s14801_s20 + $0xe0] sm:$0xff]  ;;  %v2039_v20 = vld [vmem:[%s14801_s20 + $0xd8] sm:$0xff] }
 0x22c   : > { %v1901_v11 = vmul.f32 %v15221_v15, %v15221_v15  ;;  %v1913_v28 = vsel %vm1858_vm7, %v1899_v24, 0.0  ;;  %v1902_v30 = vmul.f32 %v15230_v4, %v15230_v4  ;;  %v2111_v12 = vunpack.c.l.bf16 %v2042_v62  ;;  %v2031_v9 = vld [vmem:[%s14801_s20 + $0x98] sm:$0xff] }
 0x22d   : > { %v15244_v26 = vsub.f32 %v15180_v16, %v1883_v46  ;;  %v15247_v6 = vsub.f32 %v15182_v17, %v1883_v46  ;;  %v15250_v10 = vsub.f32 %v15186_v19, %v1883_v46  ;;  %v1910_v27 = vadd.f32 %v1909_v23, %v1908_v22  ;;  %v2038_v23 = vld [vmem:[%s14801_s20 + $0xd0] sm:$0xff] }
 0x22e   : > { %v1914_v29 = vsel %vm1858_vm7, %v1900_v25, 0.0  ;;  %v1916_v16 = vsel %vm1862_vm8, %v1901_v11, 0.0  ;;  %v1903_v17 = vmul.f32 %v15233_v5, %v15233_v5  ;;  %v1904_v19 = vmul.f32 %v15236_v7, %v15236_v7  ;;  %2533 = vmatpush2.msra.mxu0 %v2111_v12  ;;  %v2050_v11 = vld [vmem:[%s14801_s20 + $0x130] sm:$0x33] }
 0x22f   : > { %v1915_v31 = vadd.f32 %v1914_v29, %v1913_v28  ;;  %1911 = vadd.xlane.f32.xlu0 %v1910_v27  ;;  %v1905_v34 = vmul.f32 %v15244_v26, %v15244_v26  ;;  %v1906_v35 = vmul.f32 %v15247_v6, %v15247_v6  ;;  %v1907_v37 = vmul.f32 %v15250_v10, %v15250_v10  ;;  %v2049_v27 = vld [vmem:[%s14801_s20 + $0x128] sm:$0xff] }
 0x230   : > { %v1920_v39 = vadd.f32 %v1903_v17, %v1902_v30  ;;  %v1921_v21 = vsel %vm1853_vm6, %v1904_v19, 0.0  ;;  %v2110_v63 = vunpack.c.h.bf16 %v2041_v18  ;;  %v2109_v0 = vunpack.c.l.bf16 %v2041_v18  ;;  %v2037_v29 = vld [vmem:[%s14801_s20 + $0xc8] sm:$0xff]  ;;  %v2048_v30 = vld [vmem:[%s14801_s20 + $0x120] sm:$0xff] }
 0x231   : > { %v1917_v38 = vadd.f32 %v1916_v16, %v1915_v31  ;;  %v1925_v36 = vsel %vm1858_vm7, %v1905_v34, 0.0  ;;  %v1926_v40 = vsel %vm1858_vm7, %v1906_v35, 0.0  ;;  %v1928_v41 = vsel %vm1862_vm8, %v1907_v37, 0.0  ;;  %v2036_v34 = vld [vmem:[%s14801_s20 + $0xc0] sm:$0xff] }
 0x232   : > { %v1922_v42 = vadd.f32 %v1921_v21, %v1920_v39  ;;  %v1927_v33 = vadd.f32 %v1926_v40, %v1925_v36  ;;  %v2108_v46 = vunpack.c.h.bf16 %v2040_v1  ;;  %v2107_v22 = vunpack.c.l.bf16 %v2040_v1  ;;  %2534 = vmatprep.subr.mxu0 %v2110_v63  ;;  %v2035_v40 = vld [vmem:[%s14801_s20 + $0xb8] sm:$0xff]  ;;  %v2030_v1 = vld [vmem:[%s14801_s20 + $0x90] sm:$0xff] }
 0x233   : > { %1918 = vadd.xlane.f32.xlu0 %v1917_v38  ;;  %v18790_v24 = vmov 0.0   ;;  %v2106_v25 = vunpack.c.h.bf16 %v2039_v20  ;;  %2535 = vmatpush2.msra.mxu0 %v2109_v0  ;;  %v2105_v28 = vunpack.c.l.bf16 %v2039_v20  ;;  %v2104_v31 = vunpack.c.h.bf16 %v2038_v23  ;;  %v2047_v38 = vld [vmem:[%s14801_s20 + $0x118] sm:$0xff] }
 0x234   : > { %1923 = vadd.xlane.f32.xlu1 %v1922_v42  ;;  %v1929_v43 = vadd.f32 %v1928_v41, %v1927_v33  ;;  %2645 = vmatprep.mubr.f32.mxu1 %v18790_v24  ;;  %v2127_v16 = vunpack.c.l.bf16 %v2050_v11  ;;  %v2128_v17 = vunpack.c.h.bf16 %v2050_v11  ;;  %v2103_v19 = vunpack.c.l.bf16 %v2038_v23  ;;  %v2046_v42 = vld [vmem:[%s14801_s20 + $0x110] sm:$0xff]  ;;  %v2028_v11 = vld [vmem:[%s14801_s20 + $0x80] sm:$0xff] }
 0x235   : > { %2536 = vmatprep.subr.mxu0 %v2108_v46  ;;  %v2126_v35 = vunpack.c.h.bf16 %v2049_v27  ;;  %v2125_v37 = vunpack.c.l.bf16 %v2049_v27  ;;  %v2102_v39 = vunpack.c.h.bf16 %v2037_v29  ;;  %v2124_v21 = vunpack.c.h.bf16 %v2048_v30 }
 0x236   : > { %2537 = vmatpush2.msra.mxu0 %v2107_v22  ;;  %13654 = vmatprep.subr.msk.mxu1 %vm2491_vm9, %v2128_v17  ;;  %v2101_v36 = vunpack.c.l.bf16 %v2037_v29  ;;  %v2123_v41 = vunpack.c.l.bf16 %v2048_v30  ;;  %v2100_v33 = vunpack.c.h.bf16 %v2036_v34  ;;  %v2099_v44 = vunpack.c.l.bf16 %v2036_v34  ;;  %v2029_v22 = vld [vmem:[%s14801_s20 + $0x88] sm:$0xff] }
 0x237   : > { %2538 = vmatprep.subr.mxu0 %v2106_v25  ;;  %13655 = vmatpush1.msk.msra.mxu1 %vm2491_vm9, %v2127_v16  ;;  %v2121_v45 = vunpack.c.l.bf16 %v2047_v38  ;;  %v2098_v48 = vunpack.c.h.bf16 %v2035_v40  ;;  %v2120_v49 = vunpack.c.h.bf16 %v2046_v42  ;;  %v2097_v50 = vunpack.c.l.bf16 %v2035_v40 }
 0x238   : > { %1930 = vadd.xlane.f32.xlu1 %v1929_v43  ;;  %2539 = vmatpush2.msra.mxu0 %v2105_v28  ;;  %v2122_v43 = vunpack.c.h.bf16 %v2047_v38  ;;  %v2119_v52 = vunpack.c.l.bf16 %v2046_v42  ;;  %v2116_v61 = vunpack.c.h.bf16 %v2044_v53  ;;  %v2093_v62 = vunpack.c.l.bf16 %v2033_v51 }
 0x239   : > { %2540 = vmatprep.subr.mxu0 %v2104_v31  ;;  %2601 = vmatprep.subr.mxu1 %v2126_v35  ;;  %v2115_v12 = vunpack.c.l.bf16 %v2044_v53  ;;  %v2092_v18 = vunpack.c.h.bf16 %v2032_v57  ;;  %v2864_v63 = vunpack.c.h.bf16 %v15301_v59  ;;  %v2091_v0 = vunpack.c.l.bf16 %v2032_v57  ;;  %v15309_v31 = vld [vmem:[%s14801_s20 + $0x268] sm:$0x33]  ;;  %v15340_v57 = vld [vmem:[%s14801_s20 + $0x260] sm:$0xff] }
 0x23a   : > { %2541 = vmatpush2.msra.mxu0 %v2103_v19  ;;  %2602 = vmatpush1.msra.mxu1 %v2125_v37  ;;  %v2090_v20 = vunpack.c.h.bf16 %v2031_v9  ;;  %v2089_v46 = vunpack.c.l.bf16 %v2031_v9  ;;  %v2088_v23 = vunpack.c.h.bf16 %v2030_v1  ;;  %v2087_v25 = vunpack.c.l.bf16 %v2030_v1  ;;  %v15359_v1 = vld [vmem:[%s14801_s20 + $0x1a0] sm:$0xff] }
 0x23b   : > { %2542 = vmatprep.subr.mxu0 %v2102_v39  ;;  %2603 = vmatprep.subr.mxu1 %v2124_v21  ;;  %v2086_v27 = vunpack.c.h.bf16 %v2029_v22  ;;  %v2085_v28 = vunpack.c.l.bf16 %v2029_v22  ;;  %v2084_v29 = vunpack.c.h.bf16 %v2028_v11  ;;  %v2083_v30 = vunpack.c.l.bf16 %v2028_v11 }
 0x23c   : > { %2543 = vmatpush2.msra.mxu0 %v2101_v36  ;;  %2604 = vmatpush1.msra.mxu1 %v2123_v41  ;;  %v2910_v16 = vunpack.c.h.bf16 %v15309_v31  ;;  %v1957_v39 = vlaneseq }
 0x23d   : > { %2544 = vmatprep.subr.mxu0 %v2100_v33  ;;  %2605 = vmatprep.subr.mxu1 %v2122_v43  ;;  %v14706_v33 = vmov 1966171168  }
 0x23e   : > { %2545 = vmatpush2.msra.mxu0 %v2099_v44  ;;  %2606 = vmatpush1.msra.mxu1 %v2121_v45  ;;  %v15313_v42 = vshrl.u32 %v1957_v39, 7  ;;  %v2145_v43 = vunpack.c.l.s4 %v14706_v33 }
 0x23f   : > { %2546 = vmatprep.subr.mxu0 %v2098_v48  ;;  %2607 = vmatprep.subr.mxu1 %v2120_v49  ;;  %v1829_v48 = vld [vmem:[%s14826_s23] ss:$8 sm:$0x7] }
 0x240   : > { %2547 = vmatpush2.msra.mxu0 %v2097_v50  ;;  %2608 = vmatpush1.msra.mxu1 %v2119_v52  ;;  %v15316_v2 = vsub.s32 0, %v15313_v42  ;;  %v15319_v45 = vsub.s32 1, %v15313_v42  ;;  %v15322_v47 = vsub.s32 2, %v15313_v42  ;;  %v2146_v49 = vunpack.c.0.s8 %v2145_v43  ;;  %v13647_v50 = vld [vmem:[%s14826_s23 + $0x1] ss:$8 sm:$0x7] }
 0x241   : > { %2548 = vmatprep.subr.mxu0 %v2096_v54  ;;  %2609 = vmatprep.subr.mxu1 %v2118_v55  ;;  %v2863_v52 = vunpack.c.l.bf16 %v15301_v59 }
 0x242   : > { %2549 = vmatpush2.msra.mxu0 %v2095_v56  ;;  %2610 = vmatpush1.msra.mxu1 %v2117_v58  ;;  %18838 = vst [vmem:[#allocation7_spill] sm:$0xff] %v15316_v2  ;;  %18839 = vst [vmem:[#allocation8_spill] sm:$0xff] %v15319_v45  ;;  %v15328_v53 = vrot.slane %v1829_v48, %v15316_v2  ;;  %v15331_v54 = vrot.slane %v1829_v48, %v15319_v45  ;;  %v15337_v56 = vld [vmem:[%s14801_s20 + $0x1a8] sm:$0xff] }
 0x243   : > { %2550 = vmatprep.subr.mxu0 %v2094_v60  ;;  %2611 = vmatprep.subr.mxu1 %v2116_v61  ;;  %18840 = vst [vmem:[#allocation9_spill] sm:$0xff] %v15322_v47  ;;  %v15334_v55 = vrot.slane %v1829_v48, %v15322_v47  ;;  %v15343_v60 = vrot.slane %v13647_v50, %v15316_v2  ;;  %v2862_v22 = vunpack.c.h.bf16 %v15337_v56 }
 0x244   : > { %2551 = vmatpush2.msra.mxu0 %v2093_v62  ;;  %2612 = vmatpush1.msra.mxu1 %v2115_v12  ;;  %v15346_v61 = vrot.slane %v13647_v50, %v15319_v45  ;;  %v15349_v62 = vrot.slane %v13647_v50, %v15322_v47  ;;  %v15352_v9 = vsub.s32 %v2146_v49, %v15313_v42 }
 0x245   : > { %2552 = vmatprep.subr.mxu0 %v2092_v18  ;;  %2917 = vmatprep.subr.mxu1 %v2864_v63 }
 0x246   : > { %2553 = vmatpush2.msra.mxu0 %v2091_v0  ;;  %v2909_v0 = vunpack.c.l.bf16 %v15309_v31 }
 0x247   : > { %2554 = vmatprep.subr.mxu0 %v2090_v20  ;;  %v15362_v20 = vld [vmem:[%s14801_s20 + $0x258] sm:$0xff] }
 0x248   : > { %2555 = vmatpush2.msra.mxu0 %v2089_v46  ;;  %v2861_v46 = vunpack.c.l.bf16 %v15337_v56 }
 0x249   : > { %2556 = vmatprep.subr.mxu0 %v2088_v23  ;;  %v2908_v23 = vunpack.c.h.bf16 %v15340_v57 }
 0x24a   : > { %2557 = vmatpush2.msra.mxu0 %v2087_v25 }
 0x24b   : > { %2558 = vmatprep.subr.mxu0 %v2086_v27  ;;  %v2859_v27 = vunpack.c.l.bf16 %v15359_v1 }
 0x24c   : > { %2559 = vmatpush2.msra.mxu0 %v2085_v28  ;;  %v2860_v28 = vunpack.c.h.bf16 %v15359_v1 }
 0x24d   : > { %2560 = vmatprep.subr.mxu0 %v2084_v29  ;;  %v2905_v29 = vunpack.c.l.bf16 %v15362_v20 }
 0x24e   : > { %2561 = vmatpush2.msra.mxu0 %v2083_v30  ;;  %v2906_v30 = vunpack.c.h.bf16 %v15362_v20 }
 0x24f   : > { %13698 = vmatprep.subr.msk.mxu0 %vm2491_vm9, %v2910_v16 }
 0x2b8   : > { %v1912_v17 = vpop.xlane.xlu0 %1911 }
 0x2b9   : > { %v1932_v19 = vmul.f32 0.0032467532, %v1912_v17 }
 0x2bb   : > { %v1936_v34 = vadd.f32 1e-05, %v1932_v19 }
 0x2bc   : > { %v1919_v35 = vpop.xlane.xlu0 %1918 }
 0x2bd   : > { %14513 = vrsqrt.f32 %v1936_v34  ;;  %v1924_v37 = vpop.xlane.xlu1 %1923  ;;  %v1933_v38 = vmul.f32 0.0032467532, %v1919_v35 }
 0x2be   : > { %v1934_v21 = vmul.f32 0.0032467532, %v1924_v37 }
 0x2bf   : > { %v1937_v36 = vadd.f32 1e-05, %v1933_v38 }
 0x2c0   : > { %v1938_v40 = vadd.f32 1e-05, %v1934_v21 }
 0x2c1   : > { %14515 = vrsqrt.f32 %v1937_v36  ;;  %v1931_v41 = vpop.xlane.xlu1 %1930 }
 0x2c2   : > { %14517 = vrsqrt.f32 %v1938_v40  ;;  %v1935_v44 = vmul.f32 0.0032467532, %v1931_v41 }
 0x2c4   : > { %v1939_v51 = vadd.f32 1e-05, %v1935_v44 }
 0x2c6   : > { %14519 = vrsqrt.f32 %v1939_v51 }
 0x2ca   : > { %v14514_v58 = vpop.eup %14513 }
 0x2cb   : > { %v1944_v12 = vmul.f32 %v14514_v58, %v15206_v32  ;;  %v1945_v18 = vmul.f32 %v14514_v58, %v15209_v3  ;;  %v1946_v63 = vmul.f32 %v14514_v58, %v15212_v8  ;;  %v2907_v8 = vunpack.c.l.bf16 %v15340_v57 }
 0x2cd   : > { %v1972_v25 = vmul.f32 %v15328_v53, %v1944_v12  ;;  %v1973_v32 = vmul.f32 %v15331_v54, %v1945_v18  ;;  %v1974_v3 = vmul.f32 %v15334_v55, %v1946_v63 }
 0x2ce   : > { %v14516_v11 = vpop.eup %14515 }
 0x2cf   : > { %v14518_v16 = vpop.eup %14517  ;;  %v2000_v17 = vadd.f32 %v15343_v60, %v1972_v25  ;;  %v2001_v19 = vadd.f32 %v15346_v61, %v1973_v32  ;;  %v2002_v34 = vadd.f32 %v15349_v62, %v1974_v3  ;;  %v1947_v35 = vmul.f32 %v14516_v11, %v15215_v13 }
 0x2d0   : > { %v1948_v37 = vmul.f32 %v14516_v11, %v15218_v14  ;;  %v1949_v38 = vmul.f32 %v14516_v11, %v15221_v15  ;;  %v1950_v39 = vmul.f32 %v14518_v16, %v15230_v4  ;;  %v1951_v21 = vmul.f32 %v14518_v16, %v15233_v5 }
 0x2d1   : > { %v2141_v36 = vcombine.low %v2000_v17, %v2001_v19  ;;  %v2142_v40 = vcombine.high %v2000_v17, %v2001_v19  ;;  %v2143_v41 = vcombine.high %v2002_v34, %v2002_v34  ;;  %v2164_v33 = vrot.slane %v2002_v34, %v15352_v9 }
 0x2d2   : > { %v1952_v43 = vmul.f32 %v14518_v16, %v15236_v7  ;;  %v1975_v44 = vmul.f32 %v15328_v53, %v1947_v35  ;;  %v1976_v48 = vmul.f32 %v15331_v54, %v1948_v37  ;;  %v1977_v13 = vmul.f32 %v15334_v55, %v1949_v38 }
 0x2d3   : > { %v2150_v14 = vrot.slane %v2141_v36, %v15352_v9  ;;  %v2157_v15 = vrot.slane %v2142_v40, %v15352_v9  ;;  %v2171_v4 = vrot.slane %v2143_v41, %v15352_v9  ;;  %v1978_v5 = vmul.f32 %v15328_v53, %v1950_v39 }
 0x2d4   : > { %v1979_v49 = vmul.f32 %v15331_v54, %v1951_v21  ;;  %v1980_v50 = vmul.f32 %v15334_v55, %v1952_v43  ;;  %v2003_v7 = vadd.f32 %v15343_v60, %v1975_v44  ;;  %v2004_v51 = vadd.f32 %v15346_v61, %v1976_v48  ;;  %v14520_v21 = vpop.eup %14519 }
 0x2d5   : > { %v2172_v58 = vcombine.low %v2150_v14, %v2164_v33  ;;  %v2173_v12 = vcombine.high %v2150_v14, %v2164_v33  ;;  %v2174_v18 = vcombine.low %v2157_v15, %v2171_v4  ;;  %v2175_v63 = vcombine.high %v2157_v15, %v2171_v4 }
 0x2d6   : > { %v2005_v25 = vadd.f32 %v15349_v62, %v1977_v13  ;;  %v2006_v32 = vadd.f32 %v15343_v60, %v1978_v5  ;;  %v2007_v3 = vadd.f32 %v15346_v61, %v1979_v49  ;;  %v2008_v11 = vadd.f32 %v15349_v62, %v1980_v50 }
 0x2d7   : > { %v2182_v16 = vrot.slane %v2172_v58, %v15352_v9  ;;  %v2189_v17 = vrot.slane %v2174_v18, %v15352_v9  ;;  %v2196_v19 = vrot.slane %v2173_v12, %v15352_v9  ;;  %v2203_v34 = vrot.slane %v2175_v63, %v15352_v9 }
 0x2d8   : > { %v2208_v35 = vcombine.low %v2003_v7, %v2004_v51  ;;  %v2222_v37 = vrot.slane %v2005_v25, %v15352_v9  ;;  %v2231_v38 = vcombine.low %v2006_v32, %v2007_v3  ;;  %v2232_v39 = vcombine.high %v2006_v32, %v2007_v3 }
 0x2d9   : > { %v2321_v36 = vcombine.low %v2182_v16, %v2196_v19  ;;  %v13652_v40 = vcombine.high %v2182_v16, %v2196_v19  ;;  %v2323_v41 = vcombine.low %v2189_v17, %v2203_v34  ;;  %v13653_v33 = vcombine.high %v2189_v17, %v2203_v34 }
 0x2da   : > { %v2215_v43 = vrot.slane %v2208_v35, %v15352_v9  ;;  %v2233_v44 = vcombine.high %v2008_v11, %v2008_v11  ;;  %v2240_v48 = vrot.slane %v2231_v38, %v15352_v9  ;;  %v2247_v13 = vrot.slane %v2232_v39, %v15352_v9  ;;  %v15421_v35 = vld [vmem:[%s14801_s20 + $0x198] sm:$0xff] }
 0x2db   : > { %v2331_v14 = vrot.slane %v2321_v36, %v15352_v9  ;;  %v2338_v15 = vrot.slane %v13652_v40, %v15352_v9  ;;  %v2345_v4 = vrot.slane %v2323_v41, %v15352_v9  ;;  %v2352_v5 = vrot.slane %v13653_v33, %v15352_v9 }
 0x2dc   : > { %v2223_v49 = vcombine.low %v2215_v43, %v2222_v37  ;;  %v2254_v50 = vrot.slane %v2008_v11, %v15352_v9  ;;  %v2261_v7 = vrot.slane %v2233_v44, %v15352_v9  ;;  %v1953_v51 = vmul.f32 %v14520_v21, %v15244_v26 }
 0x2dd   : > { %v2354_v58 = vcombine.high %v2331_v14, %v2338_v15  ;;  %v2356_v12 = vcombine.high %v2345_v4, %v2352_v5  ;;  %v2353_v18 = vcombine.low %v2331_v14, %v2338_v15  ;;  %v2355_v63 = vcombine.low %v2345_v4, %v2352_v5  ;;  %v13694_v14 = vld [vmem:[%s14801_s20 + $0x250] sm:$0xff] }
 0x2de   : > { %v2230_v25 = vrot.slane %v2223_v49, %v15352_v9  ;;  %v2262_v32 = vcombine.low %v2240_v48, %v2254_v50  ;;  %v2263_v3 = vcombine.high %v2240_v48, %v2254_v50  ;;  %v2264_v16 = vcombine.low %v2247_v13, %v2261_v7 }
 0x2df   : > { %v2370_v17 = vrot.slane %v2354_v58, %v15352_v9  ;;  %v2384_v19 = vrot.slane %v2356_v12, %v15352_v9  ;;  %v2363_v11 = vrot.slane %v2353_v18, %v15352_v9  ;;  %v2377_v34 = vrot.slane %v2355_v63, %v15352_v9  ;;  %v13670_v12 = vld [vmem:[%s14801_s20 + $0x190] sm:$0xff]  ;;  %v13669_v18 = vld [vmem:[%s14801_s20 + $0x188] sm:$0xff] }
 0x2e0   : > { %v2265_v26 = vcombine.high %v2247_v13, %v2261_v7  ;;  %v2272_v37 = vrot.slane %v2262_v32, %v15352_v9  ;;  %v2279_v38 = vrot.slane %v2264_v16, %v15352_v9  ;;  %v2286_v39 = vrot.slane %v2263_v3, %v15352_v9  ;;  %v13692_v32 = vld [vmem:[%s14801_s20 + $0x240] sm:$0xff] }
 0x2e1   : > { %v15426_v36 = vcombine.low %v2370_v17, %v2384_v19  ;;  %v15428_v40 = vcombine.high %v2363_v11, %v2377_v34  ;;  %v15430_v41 = vcombine.low %v2363_v11, %v2377_v34  ;;  %v1954_v33 = vmul.f32 %v14520_v21, %v15247_v6  ;;  %v13668_v3 = vld [vmem:[%s14801_s20 + $0x180] sm:$0xff]  ;;  %v13691_v34 = vld [vmem:[%s14801_s20 + $0x238] sm:$0xff] }
 0x2e2   : > { %v15434_v43 = vrot.slane %v2265_v26, %v15352_v9  ;;  %v2294_v44 = vcombine.high %v2272_v37, %v2272_v37  ;;  %v2295_v48 = vcombine.high %v2279_v38, %v2279_v38  ;;  %v2296_v13 = vcombine.high %v2286_v39, %v2286_v39 }
 0x2e3   : > { %2562 = vmatprep.mubr.f32.mxu0 %v15426_v36  ;;  %13656 = vmatmul.mubr.msk.f32.vlgmr.msra.gmra.mxu1 %vm1853_vm6, %v15428_v40  ;;  %v2858_v15 = vunpack.c.h.bf16 %v15421_v35  ;;  %v2388_v4 = vcombine.low %v2230_v25, %v2272_v37  ;;  %v1955_v5 = vmul.f32 %v14520_v21, %v15250_v10  ;;  %v1981_v6 = vmul.f32 %v15328_v53, %v1953_v51  ;;  %v13693_v51 = vld [vmem:[%s14801_s20 + $0x248] sm:$0xff] }
 0x2e4   : > { %2918 = vmatpush1.msra.mxu1 %v2863_v52  ;;  %2563 = vmatmul.mubr.f32.vlgmr.msra.gmra.mxu0 %v15430_v41  ;;  %v2857_v49 = vunpack.c.l.bf16 %v15421_v35  ;;  %v2389_v50 = vcombine.low %v2286_v39, %v2294_v44  ;;  %v2390_v7 = vcombine.low %v2296_v13, %v2279_v38  ;;  %v2391_v58 = vcombine.low %v15434_v43, %v2295_v48  ;;  %v13667_v35 = vld [vmem:[%s14801_s20 + $0x178] sm:$0xff]  ;;  %v15498_v48 = vld [vmem:[%s14801_s20 + $0x2e8] sm:$0xff]  ;;  %v13666_v13 = vld [vmem:[%s14801_s20 + $0x170] sm:$0xff] }
 0x2e5   : > { %2919 = vmatprep.subr.mxu1 %v2862_v22  ;;  %13699 = vmatpush1.msk.msra.mxu0 %vm2491_vm9, %v2909_v0  ;;  %v2398_v10 = vrot.slane %v2388_v4, %v15352_v9  ;;  %v2904_v59 = vunpack.c.h.bf16 %v13694_v14  ;;  %v1982_v52 = vmul.f32 %v15331_v54, %v1954_v33  ;;  %v1983_v53 = vmul.f32 %v15334_v55, %v1955_v5 }
 0x2e6   : > { %2920 = vmatpush1.msra.mxu1 %v2861_v46  ;;  %3020 = vmatprep.subr.mxu0 %v2908_v23  ;;  %v2405_v21 = vrot.slane %v2389_v50, %v15352_v9  ;;  %v2412_v22 = vrot.slane %v2390_v7, %v15352_v9  ;;  %v2419_v31 = vrot.slane %v2391_v58, %v15352_v9  ;;  %v2903_v0 = vunpack.c.l.bf16 %v13694_v14  ;;  %v13665_v50 = vld [vmem:[%s14801_s20 + $0x168] sm:$0xff] }
 0x2e7   : > { %2921 = vmatprep.subr.mxu1 %v2860_v28  ;;  %3021 = vmatpush1.msra.mxu0 %v2907_v8  ;;  %v2856_v54 = vunpack.c.h.bf16 %v13670_v12  ;;  %v2009_v55 = vadd.f32 %v15343_v60, %v1981_v6  ;;  %v2010_v56 = vadd.f32 %v15346_v61, %v1982_v52  ;;  %v2011_v46 = vadd.f32 %v15349_v62, %v1983_v53  ;;  %v13664_v53 = vld [vmem:[%s14801_s20 + $0x160] sm:$0xff] }
 0x2e8   : > { %2922 = vmatpush1.msra.mxu1 %v2859_v27  ;;  %3022 = vmatprep.subr.mxu0 %v2906_v30  ;;  %v2421_v23 = vcombine.high %v2398_v10, %v2405_v21  ;;  %v2423_v63 = vcombine.high %v2412_v22, %v2419_v31  ;;  %v2420_v28 = vcombine.low %v2398_v10, %v2405_v21  ;;  %v2855_v57 = vunpack.c.l.bf16 %v13670_v12 }
 0x2e9   : > { %2651 = vmatprep.mubr.f32.mxu1 %v18790_v24  ;;  %2923 = vmatprep.subr.mxu1 %v2858_v15  ;;  %v2422_v8 = vcombine.low %v2412_v22, %v2419_v31  ;;  %v2298_v60 = vcombine.low %v2009_v55, %v2010_v56  ;;  %v2902_v25 = vunpack.c.h.bf16 %v13693_v51  ;;  %v2854_v61 = vunpack.c.h.bf16 %v13669_v18  ;;  %v13663_v31 = vld [vmem:[%s14801_s20 + $0x158] sm:$0xff]  ;;  %v13717_v55 = vld [vmem:[%s14801_s20 + $0x2e0] sm:$0xff] }
 0x2ea   : > { %3023 = vmatpush1.msra.mxu0 %v2905_v29  ;;  %v2437_v62 = vrot.slane %v2421_v23, %v15352_v9  ;;  %v2451_v1 = vrot.slane %v2423_v63, %v15352_v9  ;;  %v2430_v27 = vrot.slane %v2420_v28, %v15352_v9  ;;  %2924 = vmatpush1.msra.mxu1 %v2857_v49  ;;  %v2901_v30 = vunpack.c.l.bf16 %v13693_v51  ;;  %v13716_v28 = vld [vmem:[%s14801_s20 + $0x2d8] sm:$0xff] }
 0x2eb   : > { %v2444_v16 = vrot.slane %v2422_v8, %v15352_v9  ;;  %3024 = vmatprep.subr.mxu0 %v2904_v59  ;;  %2925 = vmatprep.subr.mxu1 %v2856_v54  ;;  %v2305_v17 = vrot.slane %v2298_v60, %v15352_v9  ;;  %v2312_v20 = vrot.slane %v2011_v46, %v15352_v9  ;;  %v2853_v19 = vunpack.c.l.bf16 %v13669_v18  ;;  %v13662_v46 = vld [vmem:[%s14801_s20 + $0x150] sm:$0xff] }
 0x2ec   : > { %v15488_v29 = vcombine.low %v2437_v62, %v2451_v1  ;;  %3025 = vmatpush1.msra.mxu0 %v2903_v0  ;;  %2926 = vmatpush1.msra.mxu1 %v2855_v57  ;;  %v2900_v11 = vunpack.c.h.bf16 %v13692_v32  ;;  %v2852_v39 = vunpack.c.h.bf16 %v13668_v3  ;;  %v2899_v33 = vunpack.c.l.bf16 %v13692_v32  ;;  %v13661_v32 = vld [vmem:[%s14801_s20 + $0x148] sm:$0xff] }
 0x2ed   : > { %v15492_v26 = vcombine.high %v2430_v27, %v2444_v16  ;;  %v15494_v37 = vcombine.low %v2430_v27, %v2444_v16  ;;  %v2313_v38 = vcombine.low %v2305_v17, %v2312_v20  ;;  %3026 = vmatprep.subr.mxu0 %v2902_v25  ;;  %2927 = vmatprep.subr.mxu1 %v2854_v61  ;;  %v2851_v44 = vunpack.c.l.bf16 %v13668_v3  ;;  %v13715_v25 = vld [vmem:[%s14801_s20 + $0x2d0] sm:$0xff]  ;;  %v13714_v27 = vld [vmem:[%s14801_s20 + $0x2c8] sm:$0xff]  ;;  %v13713_v17 = vld [vmem:[%s14801_s20 + $0x2c0] sm:$0xff] }
 0x2ee   : > { %2568 = vmatprep.mubr.f32.mxu0 %v15488_v29  ;;  %3027 = vmatpush1.msra.mxu0 %v2901_v30  ;;  %v2297_v14 = vcombine.high %v15434_v43, %v15434_v43  ;;  %v2898_v4 = vunpack.c.h.bf16 %v13691_v34  ;;  %v2850_v5 = vunpack.c.h.bf16 %v13667_v35  ;;  %v2897_v6 = vunpack.c.l.bf16 %v13691_v34 }
 0x2ef   : > { %13657 = vmatmul.mubr.msk.f32.gmra.mxu1 %vm1853_vm6, %v15492_v26  ;;  %2569 = vmatmul.mubr.f32.gmra.mxu0 %v15494_v37  ;;  %v2320_v15 = vrot.slane %v2313_v38, %v15352_v9  ;;  %v2849_v49 = vunpack.c.l.bf16 %v13667_v35  ;;  %v3283_v58 = vunpack.c.h.bf16 %v15498_v48  ;;  %v2848_v12 = vunpack.c.h.bf16 %v13666_v13  ;;  %v13712_v35 = vld [vmem:[%s14801_s20 + $0x2b8] sm:$0xff] }
 0x2f0   : > { %2657 = vmatprep.mubr.f32.mxu1 %v18790_v24  ;;  %2928 = vmatpush1.msra.mxu1 %v2853_v19  ;;  %v2847_v43 = vunpack.c.l.bf16 %v13666_v13  ;;  %v2846_v59 = vunpack.c.h.bf16 %v13665_v50  ;;  %v2845_v52 = vunpack.c.l.bf16 %v13665_v50  ;;  %v2844_v18 = vunpack.c.h.bf16 %v13664_v53  ;;  %v13660_v19 = vld [vmem:[%s14801_s20 + $0x140] sm:$0xff]  ;;  %v13659_v38 = vld [vmem:[%s14801_s20 + $0x138] sm:$0xff]  ;;  %v13711_v13 = vld [vmem:[%s14801_s20 + $0x2b0] sm:$0xff] }
 0x2f1   : > { %v2455_v7 = vcombine.low %v2297_v14, %v2320_v15  ;;  %3028 = vmatprep.subr.mxu0 %v2900_v11  ;;  %2929 = vmatprep.subr.mxu1 %v2852_v39  ;;  %v2843_v54 = vunpack.c.l.bf16 %v13664_v53  ;;  %v2842_v56 = vunpack.c.h.bf16 %v13663_v31  ;;  %v2841_v23 = vunpack.c.l.bf16 %v13663_v31  ;;  %v13690_v14 = vld [vmem:[%s14801_s20 + $0x230] sm:$0xff]  ;;  %v13689_v50 = vld [vmem:[%s14801_s20 + $0x228] sm:$0xff]  ;;  %v13708_v31 = vld [vmem:[%s14801_s20 + $0x298] sm:$0xff] }
 0x2f2   : > { %3029 = vmatpush1.msra.mxu0 %v2899_v33  ;;  %2930 = vmatpush1.msra.mxu1 %v2851_v44  ;;  %v3282_v63 = vunpack.c.l.bf16 %v15498_v48  ;;  %v3281_v57 = vunpack.c.h.bf16 %v13717_v55  ;;  %v2840_v8 = vunpack.c.h.bf16 %v13662_v46  ;;  %v3280_v60 = vunpack.c.l.bf16 %v13717_v55 }
 0x2f3   : > { %v2462_v10 = vrot.slane %v2455_v7, %v15352_v9  ;;  %3030 = vmatprep.subr.mxu0 %v2898_v4  ;;  %2931 = vmatprep.subr.mxu1 %v2850_v5  ;;  %v2839_v61 = vunpack.c.l.bf16 %v13662_v46  ;;  %v3279_v62 = vunpack.c.h.bf16 %v13716_v28  ;;  %v3278_v1 = vunpack.c.l.bf16 %v13716_v28 }
 0x2f4   : > { %3031 = vmatpush1.msra.mxu0 %v2897_v6  ;;  %2932 = vmatpush1.msra.mxu1 %v2849_v49  ;;  %v3277_v30 = vunpack.c.h.bf16 %v13715_v25  ;;  %v2838_v3 = vunpack.c.h.bf16 %v13661_v32  ;;  %v3276_v16 = vunpack.c.l.bf16 %v13715_v25  ;;  %v2837_v20 = vunpack.c.l.bf16 %v13661_v32  ;;  %v13710_v49 = vld [vmem:[%s14801_s20 + $0x2a8] sm:$0xff] }
 0x2f5   : > { %v2463_v21 = vcombine.high %v2462_v10, %v2462_v10  ;;  %v15513_v22 = vrot.slane %v2462_v10, %v15352_v9  ;;  %3336 = vmatprep.subr.mxu0 %v3283_v58  ;;  %2933 = vmatprep.subr.mxu1 %v2848_v12  ;;  %v3275_v11 = vunpack.c.h.bf16 %v13714_v27  ;;  %v3274_v34 = vunpack.c.l.bf16 %v13714_v27  ;;  %v13709_v10 = vld [vmem:[%s14801_s20 + $0x2a0] sm:$0xff]  ;;  %v13706_v25 = vld [vmem:[%s14801_s20 + $0x288] sm:$0xff] }
 0x2f6   : > { %2934 = vmatpush1.msra.mxu1 %v2847_v43  ;;  %v3273_v39 = vunpack.c.h.bf16 %v13713_v17  ;;  %v2836_v33 = vunpack.c.h.bf16 %v13660_v19  ;;  %v3272_v44 = vunpack.c.l.bf16 %v13713_v17  ;;  %v2835_v48 = vunpack.c.l.bf16 %v13660_v19 }
 0x2f7   : > { %v15517_v0 = vrot.slane %v2463_v21, %v15352_v9  ;;  %v15521_v51 = vcombine.high %v15513_v22, %v15513_v22  ;;  %2935 = vmatprep.subr.mxu1 %v2846_v59  ;;  %v3271_v15 = vunpack.c.h.bf16 %v13712_v35  ;;  %v2834_v4 = vunpack.c.h.bf16 %v13659_v38  ;;  %v13688_v59 = vld [vmem:[%s14801_s20 + $0x220] sm:$0xff] }
 0x2f8   : > { %2936 = vmatpush1.msra.mxu1 %v2845_v52  ;;  %v3270_v5 = vunpack.c.l.bf16 %v13712_v35  ;;  %v2833_v6 = vunpack.c.l.bf16 %v13659_v38  ;;  %v3269_v7 = vunpack.c.h.bf16 %v13711_v13  ;;  %v2896_v58 = vunpack.c.h.bf16 %v13690_v14 }
 0x2f9   : > { %2574 = vmatprep.mubr.f32.mxu0 %v15517_v0  ;;  %13658 = vmatmul.mubr.msk.f32.gmra.mxu1 %vm1853_vm6, %v15521_v51  ;;  %v3268_v12 = vunpack.c.l.bf16 %v13711_v13  ;;  %v2895_v43 = vunpack.c.l.bf16 %v13690_v14  ;;  %v3267_v52 = vunpack.c.h.bf16 %v13710_v49  ;;  %v3266_v53 = vunpack.c.l.bf16 %v13710_v49 }
 0x2fa   : > { %2575 = vmatmul.mubr.f32.gmra.mxu0 %v15513_v22  ;;  %2981 = vmatprep.mubr.f32.mxu1 %v15426_v36  ;;  %v2893_v21 = vunpack.c.l.bf16 %v13689_v50  ;;  %v2892_v55 = vunpack.c.h.bf16 %v13688_v59  ;;  %v2891_v46 = vunpack.c.l.bf16 %v13688_v59  ;;  %v3263_v28 = vunpack.c.h.bf16 %v13708_v31 }
 0x2fb   : > { %3064 = vmatprep.mubr.f32.mxu0 %v18790_v24  ;;  %2937 = vmatprep.subr.mxu1 %v2844_v18  ;;  %v13687_v18 = vld [vmem:[%s14801_s20 + $0x218] sm:$0xff] }
 0x2fc   : > { %2938 = vmatpush1.msra.mxu1 %v2843_v54  ;;  %v3265_v54 = vunpack.c.h.bf16 %v13709_v10 }
 0x2fd   : > { %2939 = vmatprep.subr.mxu1 %v2842_v56  ;;  %v3264_v56 = vunpack.c.l.bf16 %v13709_v10 }
 0x2fe   : > { %13700 = vmatmul.mubr.msk.f32.vlgmr.msra.gmra.mxu0 %vm1853_vm6, %v15428_v40  ;;  %2940 = vmatpush1.msra.mxu1 %v2841_v23  ;;  %v13707_v23 = vld [vmem:[%s14801_s20 + $0x290] sm:$0xff] }
 0x2ff   : > { %3337 = vmatpush1.msra.mxu0 %v3282_v63  ;;  %3070 = vmatprep.mubr.f32.mxu0 %v18790_v24  ;;  %v13686_v63 = vld [vmem:[%s14801_s20 + $0x210] sm:$0xff]  ;;  %v3261_v32 = vunpack.c.h.bf16 %v13707_v23 }
 0x300   : > { %3338 = vmatprep.subr.mxu0 %v3281_v57  ;;  %2941 = vmatprep.subr.mxu1 %v2840_v8  ;;  %v2890_v57 = vunpack.c.h.bf16 %v13687_v18  ;;  %v3262_v8 = vunpack.c.l.bf16 %v13708_v31  ;;  %v2887_v27 = vunpack.c.l.bf16 %v13686_v63 }
 0x301   : > { %3339 = vmatpush1.msra.mxu0 %v3280_v60  ;;  %2942 = vmatpush1.msra.mxu1 %v2839_v61  ;;  %v2889_v60 = vunpack.c.l.bf16 %v13687_v18  ;;  %v13685_v61 = vld [vmem:[%s14801_s20 + $0x208] sm:$0xff] }
 0x302   : > { %3340 = vmatprep.subr.mxu0 %v3279_v62  ;;  %13701 = vmatmul.mubr.msk.f32.gmra.mxu0 %vm1853_vm6, %v15492_v26  ;;  %v2888_v62 = vunpack.c.h.bf16 %v13686_v63  ;;  %v2886_v17 = vunpack.c.h.bf16 %v13685_v61  ;;  %v2885_v19 = vunpack.c.l.bf16 %v13685_v61 }
 0x303   : > { %3341 = vmatpush1.msra.mxu0 %v3278_v1  ;;  %3076 = vmatprep.mubr.f32.mxu0 %v18790_v24  ;;  %v3260_v1 = vunpack.c.l.bf16 %v13707_v23 }
 0x304   : > { %3342 = vmatprep.subr.mxu0 %v3277_v30  ;;  %2943 = vmatprep.subr.mxu1 %v2838_v3  ;;  %v13705_v30 = vld [vmem:[%s14801_s20 + $0x280] sm:$0xff] }
 0x305   : > { %3343 = vmatpush1.msra.mxu0 %v3276_v16  ;;  %2944 = vmatpush1.msra.mxu1 %v2837_v20  ;;  %v13684_v3 = vld [vmem:[%s14801_s20 + $0x200] sm:$0xff]  ;;  %v3259_v16 = vunpack.c.h.bf16 %v13706_v25  ;;  %v3258_v20 = vunpack.c.l.bf16 %v13706_v25  ;;  %v3257_v35 = vunpack.c.h.bf16 %v13705_v30 }
 0x306   : > { %3344 = vmatprep.subr.mxu0 %v3275_v11  ;;  %13702 = vmatmul.mubr.msk.f32.gmra.mxu0 %vm1853_vm6, %v15521_v51  ;;  %v13704_v11 = vld [vmem:[%s14801_s20 + $0x278] sm:$0xff]  ;;  %v2884_v38 = vunpack.c.h.bf16 %v13684_v3 }
 0x307   : > { %3345 = vmatpush1.msra.mxu0 %v3274_v34  ;;  %3400 = vmatprep.mubr.f32.mxu0 %v15426_v36  ;;  %v2894_v36 = vunpack.c.h.bf16 %v13689_v50  ;;  %v13683_v34 = vld [vmem:[%s14801_s20 + $0x1f8] sm:$0xff]  ;;  %v3255_v13 = vunpack.c.h.bf16 %v13704_v11 }
 0x308   : > { %3346 = vmatprep.subr.mxu0 %v3273_v39  ;;  %2945 = vmatprep.subr.mxu1 %v2836_v33  ;;  %v3256_v39 = vunpack.c.l.bf16 %v13705_v30  ;;  %v2883_v33 = vunpack.c.l.bf16 %v13684_v3  ;;  %v2882_v14 = vunpack.c.h.bf16 %v13683_v34 }
 0x309   : > { %3347 = vmatpush1.msra.mxu0 %v3272_v44  ;;  %2946 = vmatpush1.msra.mxu1 %v2835_v48  ;;  %v13703_v44 = vld [vmem:[%s14801_s20 + $0x270] sm:$0xff] }
 0x30a   : > { %3348 = vmatprep.subr.mxu0 %v3271_v15  ;;  %2947 = vmatprep.subr.mxu1 %v2834_v4  ;;  %v13682_v48 = vld [vmem:[%s14801_s20 + $0x1f0] sm:$0xff]  ;;  %v3254_v15 = vunpack.c.l.bf16 %v13704_v11  ;;  %v2881_v4 = vunpack.c.l.bf16 %v13683_v34  ;;  %v3253_v49 = vunpack.c.h.bf16 %v13703_v44 }
 0x30b   : > { %3349 = vmatpush1.msra.mxu0 %v3270_v5  ;;  %2948 = vmatpush1.msra.mxu1 %v2833_v6  ;;  %v13734_v5 = vld [vmem:[%s14801_s20 + $0x368] sm:$0xff]  ;;  %v2880_v50 = vunpack.c.h.bf16 %v13682_v48 }
 0x30c   : > { %3350 = vmatprep.subr.mxu0 %v3269_v7  ;;  %2949 = vmatprep.subr.mxu1 %v2896_v58  ;;  %v13681_v6 = vld [vmem:[%s14801_s20 + $0x1e8] sm:$0xff]  ;;  %v3252_v7 = vunpack.c.l.bf16 %v13703_v44  ;;  %v2879_v58 = vunpack.c.l.bf16 %v13682_v48  ;;  %v3315_v10 = vunpack.c.h.bf16 %v13734_v5  ;;  %v13741_v48 = vld [vmem:[%s14801_s20 + $0x3a0] sm:$0x33] }
 0x30d   : > { %3351 = vmatpush1.msra.mxu0 %v3268_v12  ;;  %2950 = vmatpush2.msra.mxu1 %v2895_v43  ;;  %v13733_v12 = vld [vmem:[%s14801_s20 + $0x360] sm:$0xff]  ;;  %v2878_v59 = vunpack.c.h.bf16 %v13681_v6 }
 0x30e   : > { %3352 = vmatprep.subr.mxu0 %v3267_v52  ;;  %2951 = vmatprep.subr.mxu1 %v2894_v36  ;;  %v13680_v43 = vld [vmem:[%s14801_s20 + $0x1e0] sm:$0xff]  ;;  %v3314_v52 = vunpack.c.l.bf16 %v13734_v5  ;;  %v2877_v36 = vunpack.c.l.bf16 %v13681_v6  ;;  %v3313_v31 = vunpack.c.h.bf16 %v13733_v12  ;;  %v3329_v6 = vunpack.c.h.bf16 %v13741_v48 }
 0x30f   : > { %3353 = vmatpush1.msra.mxu0 %v3266_v53  ;;  %2952 = vmatpush2.msra.mxu1 %v2893_v21  ;;  %v13732_v53 = vld [vmem:[%s14801_s20 + $0x358] sm:$0xff]  ;;  %v2876_v18 = vunpack.c.h.bf16 %v13680_v43 }
 0x310   : > { %3354 = vmatprep.subr.mxu0 %v3265_v54  ;;  %2953 = vmatprep.subr.mxu1 %v2892_v55  ;;  %v13679_v21 = vld [vmem:[%s14801_s20 + $0x1d8] sm:$0xff]  ;;  %v3312_v54 = vunpack.c.l.bf16 %v13733_v12  ;;  %v2875_v55 = vunpack.c.l.bf16 %v13680_v43  ;;  %v3311_v23 = vunpack.c.h.bf16 %v13732_v53  ;;  %v3328_v12 = vunpack.c.l.bf16 %v13741_v48 }
 0x311   : > { %3355 = vmatpush1.msra.mxu0 %v3264_v56  ;;  %2954 = vmatpush2.msra.mxu1 %v2891_v46  ;;  %v13731_v56 = vld [vmem:[%s14801_s20 + $0x350] sm:$0xff]  ;;  %v2874_v63 = vunpack.c.h.bf16 %v13679_v21  ;;  %v13724_v43 = vld [vmem:[%s14801_s20 + $0x318] sm:$0xff] }
 0x312   : > { %3356 = vmatprep.subr.mxu0 %v3263_v28  ;;  %2955 = vmatprep.subr.mxu1 %v2890_v57  ;;  %v13678_v46 = vld [vmem:[%s14801_s20 + $0x1d0] sm:$0xff]  ;;  %v3310_v28 = vunpack.c.l.bf16 %v13732_v53  ;;  %v2873_v57 = vunpack.c.l.bf16 %v13679_v21  ;;  %v3309_v25 = vunpack.c.h.bf16 %v13731_v56 }
 0x313   : > { %3357 = vmatpush1.msra.mxu0 %v3262_v8  ;;  %2956 = vmatpush2.msra.mxu1 %v2889_v60  ;;  %v13730_v8 = vld [vmem:[%s14801_s20 + $0x348] sm:$0xff]  ;;  %v2872_v61 = vunpack.c.h.bf16 %v13678_v46  ;;  %v13723_v21 = vld [vmem:[%s14801_s20 + $0x310] sm:$0xff] }
 0x314   : > { %3358 = vmatprep.subr.mxu0 %v3261_v32  ;;  %2957 = vmatprep.subr.mxu1 %v2888_v62  ;;  %v13677_v60 = vld [vmem:[%s14801_s20 + $0x1c8] sm:$0xff]  ;;  %v3308_v32 = vunpack.c.l.bf16 %v13731_v56  ;;  %v2871_v62 = vunpack.c.l.bf16 %v13678_v46  ;;  %v3307_v30 = vunpack.c.h.bf16 %v13730_v8  ;;  %v3293_v46 = vunpack.c.h.bf16 %v13723_v21 }
 0x315   : > { %3359 = vmatpush1.msra.mxu0 %v3260_v1  ;;  %2958 = vmatpush2.msra.mxu1 %v2887_v27  ;;  %v13729_v1 = vld [vmem:[%s14801_s20 + $0x340] sm:$0xff]  ;;  %v2870_v3 = vunpack.c.h.bf16 %v13677_v60  ;;  %v13722_v56 = vld [vmem:[%s14801_s20 + $0x308] sm:$0xff] }
 0x316   : > { %3360 = vmatprep.subr.mxu0 %v3259_v16  ;;  %2959 = vmatprep.subr.mxu1 %v2886_v17  ;;  %v13676_v27 = vld [vmem:[%s14801_s20 + $0x1c0] sm:$0xff]  ;;  %v3306_v16 = vunpack.c.l.bf16 %v13730_v8  ;;  %v2869_v17 = vunpack.c.l.bf16 %v13677_v60  ;;  %v3305_v11 = vunpack.c.h.bf16 %v13729_v1  ;;  %v3291_v8 = vunpack.c.h.bf16 %v13722_v56 }
 0x317   : > { %3361 = vmatpush1.msra.mxu0 %v3258_v20  ;;  %2960 = vmatpush2.msra.mxu1 %v2885_v19  ;;  %v13728_v20 = vld [vmem:[%s14801_s20 + $0x338] sm:$0xff]  ;;  %v2868_v34 = vunpack.c.h.bf16 %v13676_v27  ;;  %v13721_v60 = vld [vmem:[%s14801_s20 + $0x300] sm:$0xff] }
 0x318   : > { %3362 = vmatprep.subr.mxu0 %v3257_v35  ;;  %2961 = vmatprep.subr.mxu1 %v2884_v38  ;;  %v13675_v19 = vld [vmem:[%s14801_s20 + $0x1b8] sm:$0xff]  ;;  %v3304_v35 = vunpack.c.l.bf16 %v13729_v1  ;;  %v2867_v38 = vunpack.c.l.bf16 %v13676_v27 }
 0x319   : > { %3363 = vmatpush1.msra.mxu0 %v3256_v39  ;;  %2962 = vmatpush2.msra.mxu1 %v2883_v33  ;;  %v13727_v39 = vld [vmem:[%s14801_s20 + $0x330] sm:$0xff]  ;;  %v3303_v33 = vunpack.c.h.bf16 %v13728_v20  ;;  %v2866_v44 = vunpack.c.h.bf16 %v13675_v19  ;;  %v13720_v1 = vld [vmem:[%s14801_s20 + $0x2f8] sm:$0xff] }
 0x31a   : > { %3364 = vmatprep.subr.mxu0 %v3255_v13  ;;  %2963 = vmatprep.subr.mxu1 %v2882_v14  ;;  %v3302_v13 = vunpack.c.l.bf16 %v13728_v20  ;;  %v2865_v14 = vunpack.c.l.bf16 %v13675_v19  ;;  %v3300_v5 = vunpack.c.l.bf16 %v13727_v39  ;;  %v13719_v20 = vld [vmem:[%s14801_s20 + $0x2f0] sm:$0xff] }
 0x31b   : > { %3365 = vmatpush1.msra.mxu0 %v3254_v15  ;;  %2964 = vmatpush2.msra.mxu1 %v2881_v4  ;;  %v13726_v15 = vld [vmem:[%s14801_s20 + $0x328] sm:$0xff]  ;;  %v3301_v4 = vunpack.c.h.bf16 %v13727_v39  ;;  %v3285_v39 = vunpack.c.h.bf16 %v13719_v20 }
 0x31c   : > { %3366 = vmatprep.subr.mxu0 %v3253_v49  ;;  %2965 = vmatprep.subr.mxu1 %v2880_v50  ;;  %v13725_v49 = vld [vmem:[%s14801_s20 + $0x320] sm:$0xff]  ;;  %v13740_v50 = vld [vmem:[%s14801_s20 + $0x398] sm:$0xff] }
 0x31d   : > { %3367 = vmatpush1.msra.mxu0 %v3252_v7  ;;  %2966 = vmatpush2.msra.mxu1 %v2879_v58  ;;  %v3299_v7 = vunpack.c.h.bf16 %v13726_v15  ;;  %v3298_v58 = vunpack.c.l.bf16 %v13726_v15  ;;  %v3326_v53 = vunpack.c.l.bf16 %v13740_v50 }
 0x31e   : > { %3368 = vmatprep.subr.mxu0 %v3315_v10  ;;  %2967 = vmatprep.subr.mxu1 %v2878_v59  ;;  %v3297_v10 = vunpack.c.h.bf16 %v13725_v49  ;;  %v3327_v59 = vunpack.c.h.bf16 %v13740_v50 }
 0x31f   : > { %3369 = vmatpush2.msra.mxu0 %v3314_v52  ;;  %2968 = vmatpush2.msra.mxu1 %v2877_v36  ;;  %v13739_v52 = vld [vmem:[%s14801_s20 + $0x390] sm:$0xff]  ;;  %v3296_v36 = vunpack.c.l.bf16 %v13725_v49 }
 0x320   : > { %3370 = vmatprep.subr.mxu0 %v3313_v31  ;;  %2969 = vmatprep.subr.mxu1 %v2876_v18  ;;  %v3295_v31 = vunpack.c.h.bf16 %v13724_v43  ;;  %v3294_v18 = vunpack.c.l.bf16 %v13724_v43 }
 0x321   : > { %3371 = vmatpush2.msra.mxu0 %v3312_v54  ;;  %2970 = vmatpush2.msra.mxu1 %v2875_v55  ;;  %v3325_v54 = vunpack.c.h.bf16 %v13739_v52  ;;  %v13738_v55 = vld [vmem:[%s14801_s20 + $0x388] sm:$0xff] }
 0x322   : > { %3372 = vmatprep.subr.mxu0 %v3311_v23  ;;  %2971 = vmatprep.subr.mxu1 %v2874_v63  ;;  %v3324_v23 = vunpack.c.l.bf16 %v13739_v52  ;;  %v3292_v63 = vunpack.c.l.bf16 %v13723_v21 }
 0x323   : > { %3373 = vmatpush2.msra.mxu0 %v3310_v28  ;;  %2972 = vmatpush2.msra.mxu1 %v2873_v57  ;;  %v13737_v28 = vld [vmem:[%s14801_s20 + $0x380] sm:$0xff]  ;;  %v3323_v57 = vunpack.c.h.bf16 %v13738_v55 }
 0x324   : > { %3374 = vmatprep.subr.mxu0 %v3309_v25  ;;  %2973 = vmatprep.subr.mxu1 %v2872_v61  ;;  %v3322_v25 = vunpack.c.l.bf16 %v13738_v55  ;;  %v3290_v61 = vunpack.c.l.bf16 %v13722_v56  ;;  %v3320_v27 = vunpack.c.l.bf16 %v13737_v28 }
 0x325   : > { %3375 = vmatpush2.msra.mxu0 %v3308_v32  ;;  %2974 = vmatpush2.msra.mxu1 %v2871_v62  ;;  %v13736_v32 = vld [vmem:[%s14801_s20 + $0x378] sm:$0xff]  ;;  %v3321_v62 = vunpack.c.h.bf16 %v13737_v28 }
 0x326   : > { %3376 = vmatprep.subr.mxu0 %v3307_v30  ;;  %2975 = vmatprep.subr.mxu1 %v2870_v3  ;;  %v3289_v30 = vunpack.c.h.bf16 %v13721_v60  ;;  %v13735_v3 = vld [vmem:[%s14801_s20 + $0x370] sm:$0xff]  ;;  %v3318_v19 = vunpack.c.l.bf16 %v13736_v32  ;;  %s14707_s20 = smov 64  }
 0x327   : > { %3377 = vmatpush2.msra.mxu0 %v3306_v16  ;;  %2976 = vmatpush2.msra.mxu1 %v2869_v17  ;;  %v3288_v16 = vunpack.c.l.bf16 %v13721_v60  ;;  %v3319_v17 = vunpack.c.h.bf16 %v13736_v32 }
 0x328   : > { %3378 = vmatprep.subr.mxu0 %v3305_v11  ;;  %2977 = vmatprep.subr.mxu1 %v2868_v34  ;;  %v3287_v11 = vunpack.c.h.bf16 %v13720_v1  ;;  %v3286_v34 = vunpack.c.l.bf16 %v13720_v1 }
 0x329   : > { %3379 = vmatpush2.msra.mxu0 %v3304_v35  ;;  %2978 = vmatpush2.msra.mxu1 %v2867_v38  ;;  %v3317_v35 = vunpack.c.h.bf16 %v13735_v3  ;;  %v3316_v38 = vunpack.c.l.bf16 %v13735_v3 }
 0x32a   : > { %3380 = vmatprep.subr.mxu0 %v3303_v33  ;;  %2979 = vmatprep.subr.mxu1 %v2866_v44  ;;  %v3284_v33 = vunpack.c.l.bf16 %v13719_v20 }
 0x32b   : > { %3381 = vmatpush2.msra.mxu0 %v3302_v13  ;;  %2980 = vmatpush2.msra.mxu1 %v2865_v14 }
 0x32c   : > { %3382 = vmatprep.subr.mxu0 %v3301_v4  ;;  %2982 = vmatmul.mubr.f32.vlgmr.msra.gmra.mxu1 %v15430_v41 }
 0x32d   : > { %3383 = vmatpush2.msra.mxu0 %v3300_v5  ;;  %13742 = vmatprep.subr.msk.mxu1 %vm2491_vm9, %v3329_v6 }
 0x32e   : > { %3384 = vmatprep.subr.mxu0 %v3299_v7  ;;  %2987 = vmatprep.mubr.f32.mxu1 %v15488_v29 }
 0x32f   : > { %3385 = vmatpush2.msra.mxu0 %v3298_v58  ;;  %13743 = vmatpush1.msk.msra.mxu1 %vm2491_vm9, %v3328_v12 }
 0x330   : > { %3386 = vmatprep.subr.mxu0 %v3297_v10  ;;  %3439 = vmatprep.subr.mxu1 %v3327_v59 }
 0x331   : > { %3387 = vmatpush2.msra.mxu0 %v3296_v36  ;;  %3440 = vmatpush1.msra.mxu1 %v3326_v53 }
 0x332   : > { %3388 = vmatprep.subr.mxu0 %v3295_v31  ;;  %2988 = vmatmul.mubr.f32.gmra.mxu1 %v15494_v37 }
 0x333   : > { %3389 = vmatpush2.msra.mxu0 %v3294_v18  ;;  %3441 = vmatprep.subr.mxu1 %v3325_v54 }
 0x334   : > { %2993 = vmatprep.mubr.f32.mxu1 %v15517_v0  ;;  %3390 = vmatprep.subr.mxu0 %v3293_v46 }
 0x335   : > { %3442 = vmatpush1.msra.mxu1 %v3324_v23  ;;  %3391 = vmatpush2.msra.mxu0 %v3292_v63 }
 0x336   : > { %3443 = vmatprep.subr.mxu1 %v3323_v57  ;;  %3392 = vmatprep.subr.mxu0 %v3291_v8 }
 0x337   : > { %3444 = vmatpush1.msra.mxu1 %v3322_v25  ;;  %3393 = vmatpush2.msra.mxu0 %v3290_v61 }
 0x338   : > { %2994 = vmatmul.mubr.f32.gmra.mxu1 %v15513_v22  ;;  %3445 = vmatprep.subr.mxu1 %v3321_v62 }
 0x339   : > { %3394 = vmatprep.subr.mxu0 %v3289_v30  ;;  %3446 = vmatpush1.msra.mxu1 %v3320_v27 }
 0x33a   : > { %3395 = vmatpush2.msra.mxu0 %v3288_v16  ;;  %3447 = vmatprep.subr.mxu1 %v3319_v17 }
 0x33b   : > { %3396 = vmatprep.subr.mxu0 %v3287_v11  ;;  %3448 = vmatpush1.msra.mxu1 %v3318_v19 }
 0x33c   : > { %3397 = vmatpush2.msra.mxu0 %v3286_v34  ;;  %3449 = vmatprep.subr.mxu1 %v3317_v35 }
 0x33d   : > { %3398 = vmatprep.subr.mxu0 %v3285_v39  ;;  %3450 = vmatpush1.msra.mxu1 %v3316_v38 }
 0x33e   : > { %3483 = vmatprep.mubr.f32.mxu1 %v18790_v24  ;;  %3399 = vmatpush2.msra.mxu0 %v3284_v33 }
 0x33f   : > { %13744 = vmatmul.mubr.msk.f32.vlgmr.msra.gmra.mxu1 %vm1853_vm6, %v15428_v40  ;;  %3401 = vmatmul.mubr.f32.vlgmr.msra.gmra.mxu0 %v15430_v41 }
 0x340   : > { %3406 = vmatprep.mubr.f32.mxu0 %v15488_v29  ;;  %3489 = vmatprep.mubr.f32.mxu1 %v18790_v24 }
 0x343   : > { %13745 = vmatmul.mubr.msk.f32.gmra.mxu1 %vm1853_vm6, %v15492_v26  ;;  %3407 = vmatmul.mubr.f32.gmra.mxu0 %v15494_v37 }
 0x344   : > { %3412 = vmatprep.mubr.f32.mxu0 %v15517_v0  ;;  %3495 = vmatprep.mubr.f32.mxu1 %v18790_v24 }
 0x347   : > { %13746 = vmatmul.mubr.msk.f32.gmra.mxu1 %vm1853_vm6, %v15521_v51  ;;  %3413 = vmatmul.mubr.f32.gmra.mxu0 %v15513_v22 }
 0x3a3   : > { %v2647_v40 = vpop.f32.mrf.mxu1 }
 0x3a4   : > { %v2564_v41 = vpop.f32.mrf.mxu0 }
 0x3a5   : > { %v2649_v44 = vpop.f32.mrf.mxu1  ;;  %v2648_v48 = vadd.f32 %v2647_v40, %v2564_v41 }
 0x3a6   : > { %v2566_v29 = vpop.f32.mrf.mxu0 }
 0x3a7   : > { %v2650_v13 = vadd.f32 %v2649_v44, %v2566_v29 }
 0x3a9   : > { %v2670_v14 = vcombine.low %v2648_v48, %v2650_v13  ;;  %v2671_v15 = vcombine.high %v2648_v48, %v2650_v13 }
 0x3ab   : > { %v2678_v26 = vrot.slane %v2670_v14, %v15352_v9  ;;  %v2685_v37 = vrot.slane %v2671_v15, %v15352_v9 }
 0x3ad   : > { %v2686_v0 = vcombine.high %v2678_v26, %v2678_v26  ;;  %v2687_v4 = vcombine.high %v2685_v37, %v2685_v37  ;;  %v2694_v5 = vrot.slane %v2678_v26, %v15352_v9  ;;  %v2701_v51 = vrot.slane %v2685_v37, %v15352_v9 }
 0x3af   : > { %v2708_v22 = vrot.slane %v2686_v0, %v15352_v9  ;;  %v2715_v6 = vrot.slane %v2687_v4, %v15352_v9  ;;  %v2716_v49 = vcombine.high %v2694_v5, %v2694_v5  ;;  %v2717_v50 = vcombine.high %v2701_v51, %v2701_v51  ;;  %v2653_v7 = vpop.f32.mrf.mxu1  ;;  %v2570_v58 = vpop.f32.mrf.mxu0 }
 0x3b0   : > { %v4800_v12 = vrot.slane %v2694_v5, 1  ;;  %v4804_v43 = vrot.slane %v2701_v51, 1  ;;  %v2654_v10 = vadd.f32 %v2653_v7, %v2570_v58 }
 0x3b1   : > { %v2718_v59 = vcombine.high %v2708_v22, %v2708_v22  ;;  %v2719_v52 = vcombine.high %v2715_v6, %v2715_v6  ;;  %v3631_v36 = vcombine.low %v2694_v5, %v2708_v22  ;;  %v13747_v53 = vcombine.high %v2694_v5, %v2708_v22  ;;  %v2655_v21 = vpop.f32.mrf.mxu1  ;;  %v2572_v31 = vpop.f32.mrf.mxu0 }
 0x3b2   : > { %v3633_v18 = vcombine.low %v2701_v51, %v2715_v6  ;;  %v13748_v54 = vcombine.high %v2701_v51, %v2715_v6  ;;  %v4801_v55 = vrot.slane %v2708_v22, 1  ;;  %v4802_v56 = vrot.slane %v2716_v49, 1 }
 0x3b3   : > { %v4803_v46 = vrot.slane %v2718_v59, 1  ;;  %v4805_v23 = vrot.slane %v2715_v6, 1  ;;  %v4806_v63 = vrot.slane %v2717_v50, 1  ;;  %v4807_v28 = vrot.slane %v2719_v52, 1 }
 0x3b4   : > { %v2656_v57 = vadd.f32 %v2655_v21, %v2572_v31  ;;  %v3641_v8 = vrot.slane %v3631_v36, %v15352_v9  ;;  %v3648_v60 = vrot.slane %v13747_v53, %v15352_v9  ;;  %v3655_v25 = vrot.slane %v3633_v18, %v15352_v9 }
 0x3b5   : > { %v3662_v61 = vrot.slane %v13748_v54, %v15352_v9  ;;  %v4818_v32 = vcombine.low %v4800_v12, %v4801_v55  ;;  %v4819_v62 = vcombine.low %v4802_v56, %v4803_v46  ;;  %v4820_v1 = vcombine.low %v4804_v43, %v4805_v23 }
 0x3b6   : > { %v2720_v27 = vcombine.low %v2654_v10, %v2656_v57  ;;  %v2721_v30 = vcombine.high %v2654_v10, %v2656_v57  ;;  %v3663_v3 = vcombine.low %v3641_v8, %v3648_v60  ;;  %v4821_v16 = vcombine.low %v4806_v63, %v4807_v28 }
 0x3b7   : > { %v3664_v17 = vcombine.low %v3655_v25, %v3662_v61  ;;  %v4828_v20 = vrot.slane %v4818_v32, %v15352_v9  ;;  %v4835_v19 = vrot.slane %v4819_v62, %v15352_v9  ;;  %v4842_v40 = vrot.slane %v4820_v1, %v15352_v9 }
 0x3b8   : > { %v2728_v11 = vrot.slane %v2720_v27, %v15352_v9  ;;  %v2735_v34 = vrot.slane %v2721_v30, %v15352_v9  ;;  %v3671_v35 = vrot.slane %v3663_v3, %v15352_v9  ;;  %v4849_v38 = vrot.slane %v4821_v16, %v15352_v9 }
 0x3b9   : > { %v2659_v39 = vpop.f32.mrf.mxu1  ;;  %v3678_v33 = vrot.slane %v3664_v17, %v15352_v9  ;;  %v4850_v41 = vcombine.low %v4828_v20, %v4835_v19 }
 0x3ba   : > { %v2736_v44 = vcombine.high %v2728_v11, %v2728_v11  ;;  %v2737_v29 = vcombine.high %v2735_v34, %v2735_v34  ;;  %v15637_v48 = vrot.slane %v2728_v11, %v15352_v9  ;;  %v2751_v13 = vrot.slane %v2735_v34, %v15352_v9  ;;  %v2576_v14 = vpop.f32.mrf.mxu0 }
 0x3bb   : > { %v2661_v15 = vpop.f32.mrf.mxu1  ;;  %v15640_v26 = vcombine.low %v3671_v35, %v3678_v33  ;;  %v4851_v37 = vcombine.low %v4842_v40, %v4849_v38  ;;  %v2660_v12 = vadd.f32 %v2659_v39, %v2576_v14  ;;  %v4858_v21 = vrot.slane %v4850_v41, %v15352_v9 }
 0x3bc   : > { %v2758_v0 = vrot.slane %v2736_v44, %v15352_v9  ;;  %v2765_v4 = vrot.slane %v2737_v29, %v15352_v9  ;;  %v2766_v5 = vcombine.high %v15637_v48, %v15637_v48  ;;  %v2767_v51 = vcombine.high %v2751_v13, %v2751_v13  ;;  %v2578_v22 = vpop.f32.mrf.mxu0 }
 0x3bd   : > { %v2662_v6 = vadd.f32 %v2661_v15, %v2578_v22  ;;  %14382 = vmatprep.mubr.msk.f32.mxu1 %vm3757_vm10, %v15640_v26  ;;  %v5030_v10 = vrot.slane %v2751_v13, 1  ;;  %v4865_v55 = vrot.slane %v4851_v37, %v15352_v9 }
 0x3be   : > { %v2768_v49 = vcombine.high %v2758_v0, %v2758_v0  ;;  %v5027_v50 = vrot.slane %v2758_v0, 1  ;;  %v5028_v7 = vrot.slane %v2766_v5, 1  ;;  %v5031_v58 = vrot.slane %v2765_v4, 1  ;;  %v3066_v30 = vpop.f32.mrf.mxu0 }
 0x3bf   : > { %v5032_v59 = vrot.slane %v2767_v51, 1  ;;  %v2769_v36 = vcombine.high %v2765_v4, %v2765_v4  ;;  %v2770_v53 = vcombine.low %v2660_v12, %v2662_v6  ;;  %v15654_v28 = vcombine.low %v4858_v21, %v4865_v55 }
 0x3c0   : > { %v5029_v43 = vrot.slane %v2768_v49, 1  ;;  %v5045_v52 = vcombine.low %v5027_v50, %v5028_v7  ;;  %v3842_v3 = vcombine.low %v2768_v49, %v2751_v13  ;;  %v3841_v16 = vcombine.low %v2758_v0, %v2766_v5  ;;  %v3068_v20 = vpop.f32.mrf.mxu0 }
 0x3c1   : > { %v5047_v18 = vcombine.low %v5031_v58, %v5032_v59  ;;  %v2777_v54 = vrot.slane %v2770_v53, %v15352_v9  ;;  %v5033_v63 = vrot.slane %v2769_v36, 1  ;;  %v3843_v19 = vcombine.low %v2765_v4, %v2767_v51 }
 0x3c2   : > { %v5046_v31 = vcombine.low %v5029_v43, %v5030_v10  ;;  %v5055_v56 = vrot.slane %v5045_v52, %v15352_v9  ;;  %v3858_v11 = vrot.slane %v3842_v3, %v15352_v9  ;;  %v3851_v33 = vrot.slane %v3841_v16, %v15352_v9  ;;  %v3072_v40 = vpop.f32.mrf.mxu0 }
 0x3c3   : > { %v2785_v23 = vrot.slane %v2777_v54, %v15352_v9  ;;  %v5069_v61 = vrot.slane %v5047_v18, %v15352_v9  ;;  %v2778_v35 = vcombine.high %v2777_v54, %v2777_v54  ;;  %v3865_v29 = vrot.slane %v3843_v19, %v15352_v9 }
 0x3c4   : > { %v5062_v46 = vrot.slane %v5046_v31, %v15352_v9  ;;  %v3873_v14 = vcombine.low %v3851_v33, %v3858_v11  ;;  %v3074_v5 = vpop.f32.mrf.mxu0  ;;  %v3686_v6 = vrot.slane %v15637_v48, %v15352_v9 }
 0x3c5   : > { %v5034_v8 = vrot.slane %v2785_v23, 1  ;;  %v3844_v17 = vcombine.low %v2769_v36, %v2785_v23  ;;  %v15667_v13 = vrot.slane %v2778_v35, %v15352_v9 }
 0x3c6   : > { %v5077_v57 = vcombine.low %v5055_v56, %v5062_v46  ;;  %v3881_v50 = vrot.slane %v3873_v14, %v15352_v9  ;;  %v3078_v53 = vpop.f32.mrf.mxu0  ;;  %v15686_v18 = vrot.slane %v3686_v6, %v15352_v9 }
 0x3c7   : > { %v5048_v60 = vcombine.low %v5033_v63, %v5034_v8  ;;  %v3872_v38 = vrot.slane %v3844_v17, %v15352_v9  ;;  %v3896_v7 = vrot.slane %v15667_v13, %v15352_v9 }
 0x3c8   : > { %v5085_v62 = vrot.slane %v5077_v57, %v15352_v9 }
 0x3c9   : > { %v5076_v25 = vrot.slane %v5048_v60, %v15352_v9  ;;  %v3874_v4 = vcombine.low %v3865_v29, %v3872_v38  ;;  %v15689_v57 = vrot.slane %v3896_v7, %v15352_v9 }
 0x3cb   : > { %v5078_v32 = vcombine.low %v5069_v61, %v5076_v25  ;;  %v3888_v36 = vrot.slane %v3874_v4, %v15352_v9 }
 0x3cd   : > { %v5092_v1 = vrot.slane %v5078_v32, %v15352_v9  ;;  %v15694_v32 = vcombine.low %v3881_v50, %v3888_v36 }
 0x3cf   : > { %v15660_v27 = vcombine.low %v5085_v62, %v5092_v1  ;;  %v3080_v62 = vpop.f32.mrf.mxu0 }
 0x3ec   : > { %v2983_v34 = vpop.f32.mrf.mxu1 }
 0x3ed   : > { %v3067_v41 = vadd.f32 %v3066_v30, %v2983_v34 }
 0x3ee   : > { %v2985_v39 = vpop.f32.mrf.mxu1 }
 0x3ef   : > { %v3069_v44 = vadd.f32 %v3068_v20, %v2985_v39 }
 0x3f1   : > { %v3089_v15 = vcombine.low %v3067_v41, %v3069_v44  ;;  %v3090_v37 = vcombine.high %v3067_v41, %v3069_v44 }
 0x3f2   : > { %v2989_v0 = vpop.f32.mrf.mxu1 }
 0x3f3   : > { %v3097_v51 = vrot.slane %v3089_v15, %v15352_v9  ;;  %v3104_v22 = vrot.slane %v3090_v37, %v15352_v9  ;;  %v3073_v59 = vadd.f32 %v3072_v40, %v2989_v0 }
 0x3f4   : > { %v2991_v49 = vpop.f32.mrf.mxu1 }
 0x3f5   : > { %v3105_v58 = vcombine.high %v3097_v51, %v3097_v51  ;;  %v3106_v12 = vcombine.high %v3104_v22, %v3104_v22  ;;  %v3113_v43 = vrot.slane %v3097_v51, %v15352_v9  ;;  %v15678_v10 = vrot.slane %v3104_v22, %v15352_v9 }
 0x3f6   : > { %v3075_v52 = vadd.f32 %v3074_v5, %v2991_v49 }
 0x3f7   : > { %v3127_v21 = vrot.slane %v3105_v58, %v15352_v9  ;;  %v15683_v31 = vrot.slane %v3106_v12, %v15352_v9  ;;  %v3135_v46 = vcombine.high %v3113_v43, %v3113_v43  ;;  %v3136_v8 = vcombine.high %v15678_v10, %v15678_v10 }
 0x3f8   : > { %v3139_v54 = vcombine.low %v3073_v59, %v3075_v52  ;;  %v3140_v55 = vcombine.high %v3073_v59, %v3075_v52  ;;  %v2995_v56 = vpop.f32.mrf.mxu1  ;;  %v4809_v60 = vrot.slane %v3113_v43, 1 }
 0x3f9   : > { %v3694_v23 = vcombine.low %v3113_v43, %v3127_v21  ;;  %v13749_v63 = vcombine.high %v3113_v43, %v3127_v21  ;;  %v3137_v1 = vcombine.high %v3127_v21, %v3127_v21  ;;  %v3138_v30 = vcombine.high %v15683_v31, %v15683_v31 }
 0x3fa   : > { %v2997_v61 = vpop.f32.mrf.mxu1  ;;  %v3696_v3 = vcombine.low %v15678_v10, %v15683_v31  ;;  %v4810_v16 = vrot.slane %v3127_v21, 1  ;;  %v13750_v17 = vcombine.high %v15678_v10, %v15683_v31  ;;  %v3147_v20 = vrot.slane %v3139_v54, %v15352_v9 }
 0x3fb   : > { %v3154_v19 = vrot.slane %v3140_v55, %v15352_v9  ;;  %v3081_v11 = vadd.f32 %v3080_v62, %v2997_v61  ;;  %v15704_v34 = vrot.slane %v3135_v46, 1  ;;  %v3079_v35 = vadd.f32 %v3078_v53, %v2995_v56 }
 0x3fc   : > { %v15707_v38 = vrot.slane %v3694_v23, %v15352_v9  ;;  %v15710_v39 = vrot.slane %v13749_v63, %v15352_v9  ;;  %v3155_v33 = vcombine.high %v3147_v20, %v3147_v20  ;;  %v15713_v41 = vrot.slane %v3147_v20, %v15352_v9 }
 0x3fd   : > { %v3156_v40 = vcombine.high %v3154_v19, %v3154_v19  ;;  %v3170_v44 = vrot.slane %v3154_v19, %v15352_v9  ;;  %v15716_v29 = vrot.slane %v3137_v1, 1  ;;  %v3189_v15 = vcombine.low %v3079_v35, %v3081_v11 }
 0x3fe   : > { %v15719_v4 = vcombine.low %v4809_v60, %v4810_v16  ;;  %v15722_v5 = vrot.slane %v3155_v33, %v15352_v9  ;;  %v15729_v22 = vcombine.high %v15713_v41, %v15713_v41  ;;  %v15733_v49 = vrot.slane %v3136_v8, 1 }
 0x3ff   : > { %v3485_v37 = vpop.f32.mrf.mxu1  ;;  %v3402_v0 = vpop.f32.mrf.mxu0  ;;  %v15725_v51 = vrot.slane %v3156_v40, %v15352_v9  ;;  %v15731_v6 = vcombine.high %v3170_v44, %v3170_v44  ;;  %v3196_v50 = vrot.slane %v3189_v15, %v15352_v9  ;;  %v3718_v12 = vrot.slane %v3696_v3, %v15352_v9 }
 0x400   : > { %v3725_v43 = vrot.slane %v13750_v17, %v15352_v9  ;;  %v3187_v59 = vcombine.high %v15722_v5, %v15722_v5  ;;  %v5036_v52 = vrot.slane %v15722_v5, 1  ;;  %v5039_v36 = vrot.slane %v3170_v44, 1 }
 0x401   : > { %v3487_v7 = vpop.f32.mrf.mxu1  ;;  %v3404_v58 = vpop.f32.mrf.mxu0  ;;  %v3726_v53 = vcombine.low %v15707_v38, %v15710_v39  ;;  %v5037_v21 = vrot.slane %v15729_v22, 1  ;;  %v5040_v54 = vrot.slane %v15725_v51, 1  ;;  %v5041_v55 = vrot.slane %v15731_v6, 1 }
 0x402   : > { %v3188_v56 = vcombine.high %v15725_v51, %v15725_v51  ;;  %v5038_v63 = vrot.slane %v3187_v59, 1  ;;  %v3197_v8 = vcombine.high %v3196_v50, %v3196_v50  ;;  %v3204_v60 = vrot.slane %v3196_v50, %v15352_v9 }
 0x403   : > { %v3491_v46 = vpop.f32.mrf.mxu1  ;;  %v3408_v23 = vpop.f32.mrf.mxu0  ;;  %v3486_v61 = vadd.f32 %v3485_v37, %v3402_v0  ;;  %v15749_v62 = vcombine.low %v5036_v52, %v5037_v21  ;;  %v15751_v1 = vcombine.low %v5040_v54, %v5041_v55  ;;  %v3488_v16 = vadd.f32 %v3487_v7, %v3404_v58 }
 0x404   : > { %v5042_v3 = vrot.slane %v3188_v56, 1  ;;  %v3904_v19 = vcombine.low %v15722_v5, %v15729_v22  ;;  %v3905_v11 = vcombine.low %v3187_v59, %v3170_v44  ;;  %v15755_v35 = vcombine.low %v5038_v63, %v5039_v36 }
 0x405   : > { %v3493_v17 = vpop.f32.mrf.mxu1  ;;  %v3410_v20 = vpop.f32.mrf.mxu0  ;;  %v3727_v38 = vcombine.low %v3718_v12, %v3725_v43  ;;  %v3907_v39 = vcombine.low %v3188_v56, %v3204_v60  ;;  %v5043_v33 = vrot.slane %v3204_v60, 1  ;;  %v3508_v40 = vcombine.low %v3486_v61, %v3488_v16 }
 0x406   : > { %v3509_v15 = vcombine.high %v3486_v61, %v3488_v16  ;;  %v3906_v50 = vcombine.low %v15725_v51, %v15731_v6  ;;  %v3492_v52 = vadd.f32 %v3491_v46, %v3408_v23  ;;  %v3749_v7 = vrot.slane %v15713_v41, %v15352_v9 }
 0x407   : > { %v3497_v37 = vpop.f32.mrf.mxu1  ;;  %v3414_v0 = vpop.f32.mrf.mxu0  ;;  %v3494_v58 = vadd.f32 %v3493_v17, %v3410_v20  ;;  %v15762_v5 = vrot.slane %v3197_v8, %v15352_v9  ;;  %v15764_v44 = vcombine.low %v5042_v3, %v5043_v33  ;;  %v3516_v22 = vrot.slane %v3508_v40, %v15352_v9 }
 0x408   : > { %v3523_v12 = vrot.slane %v3509_v15, %v15352_v9  ;;  %v3921_v43 = vrot.slane %v3905_v11, %v15352_v9  ;;  %v15770_v59 = vrot.slane %v3749_v7, %v15352_v9  ;;  %v3935_v54 = vrot.slane %v3907_v39, %v15352_v9 }
 0x409   : > { %v3558_v51 = vcombine.low %v3492_v52, %v3494_v58  ;;  %v3559_v6 = vcombine.high %v3492_v52, %v3494_v58  ;;  %v3499_v36 = vpop.f32.mrf.mxu1  ;;  %v3416_v21 = vpop.f32.mrf.mxu0  ;;  %v3524_v55 = vcombine.high %v3516_v22, %v3516_v22  ;;  %v3498_v56 = vadd.f32 %v3497_v37, %v3414_v0 }
 0x40a   : > { %v3734_v46 = vrot.slane %v3726_v53, %v15352_v9  ;;  %v3525_v23 = vcombine.high %v3523_v12, %v3523_v12  ;;  %14378 = vmatprep.subr.msk.mxu1 %vm3757_vm10, %v15770_v59  ;;  %v3741_v60 = vrot.slane %v3727_v38, %v15352_v9  ;;  %v15780_v61 = vrot.slane %v3516_v22, %v15352_v9 }
 0x40b   : > { %v3566_v63 = vrot.slane %v3558_v51, %v15352_v9  ;;  %v3573_v8 = vrot.slane %v3559_v6, %v15352_v9  ;;  %v15783_v3 = vrot.slane %v3523_v12, %v15352_v9  ;;  %14379 = vmatpush3.xpose.msk.msra.mxu1 %vm3757_vm10, %v15770_v59  ;;  %v3500_v53 = vadd.f32 %v3499_v36, %v3416_v21 }
 0x40c   : > { %v3959_v16 = vrot.slane %v15762_v5, %v15352_v9  ;;  %v15796_v39 = vrot.slane %v3524_v55, %v15352_v9  ;;  %v15798_v33 = vcombine.low %v3734_v46, %v3741_v60  ;;  %v15804_v37 = vrot.slane %v3525_v23, %v15352_v9 }
 0x40d   : > { %v3574_v17 = vcombine.high %v3566_v63, %v3566_v63  ;;  %v3575_v20 = vcombine.high %v3573_v8, %v3573_v8  ;;  %v15790_v11 = vrot.slane %v3566_v63, %v15352_v9  ;;  %v15793_v38 = vrot.slane %v3573_v8, %v15352_v9 }
 0x40e   : > { %v3608_v40 = vcombine.low %v3498_v56, %v3500_v53  ;;  %v15801_v15 = vrot.slane %v3959_v16, %v15352_v9  ;;  %14380 = vmatprep.subr.msk.mxu1 %vm3757_vm10, %v15798_v33  ;;  %v3914_v51 = vrot.slane %v3904_v19, %v15352_v9  ;;  %v3928_v55 = vrot.slane %v3906_v50, %v15352_v9 }
 0x40f   : > { %v15807_v0 = vrot.slane %v3574_v17, %v15352_v9  ;;  %v15810_v52 = vrot.slane %v3575_v20, %v15352_v9  ;;  %v15814_v7 = vcombine.high %v15790_v11, %v15790_v11  ;;  %v15818_v58 = vcombine.high %v15793_v38, %v15793_v38  ;;  %14381 = vmatpush3.xpose.msk.msra.mxu1 %vm3757_vm10, %v15798_v33 }
 0x410   : > { %v5461_v22 = vrot.slane %v15793_v38, 1  ;;  %v3615_v12 = vrot.slane %v3608_v40, %v15352_v9  ;;  %14385 = vmatprep.subr.msk.mxu1 %vm3757_vm10, %v15801_v15  ;;  %v3936_v8 = vcombine.low %v3914_v51, %v3921_v43  ;;  %v3937_v60 = vcombine.low %v3928_v55, %v3935_v54 }
 0x411   : > { %v3606_v6 = vcombine.high %v15807_v0, %v15807_v0  ;;  %v5458_v36 = vrot.slane %v15807_v0, 1  ;;  %v5459_v21 = vrot.slane %v15814_v7, 1  ;;  %v5462_v56 = vrot.slane %v15810_v52, 1 }
 0x412   : > { %v3607_v46 = vcombine.high %v15810_v52, %v15810_v52  ;;  %v3616_v23 = vcombine.high %v3615_v12, %v3615_v12  ;;  %v3623_v19 = vrot.slane %v3615_v12, %v15352_v9  ;;  %v4155_v53 = vrot.slane %v15790_v11, %v15352_v9  ;;  %14383 = vmatmul.mubr.msk.f32.vlgmr.msra.gmra.mxu1 %vm3757_vm10, %v15686_v18 }
 0x413   : > { %v4248_v63 = vcombine.low %v3606_v6, %v15793_v38  ;;  %v5463_v40 = vrot.slane %v15818_v58, 1  ;;  %14386 = vmatpush3.xpose.msk.msra.mxu1 %vm3757_vm10, %v15801_v15  ;;  %14389 = vmatprep.mubr.msk.f32.mxu1 %vm3757_vm10, %v15694_v32  ;;  %v3944_v43 = vrot.slane %v3936_v8, %v15352_v9  ;;  %v3951_v54 = vrot.slane %v3937_v60, %v15352_v9 }
 0x414   : > { %v3630_v50 = vrot.slane %v3616_v23, %v15352_v9  ;;  %v4250_v16 = vcombine.low %v3607_v46, %v3623_v19  ;;  %v5464_v17 = vrot.slane %v3607_v46, 1  ;;  %v5465_v20 = vrot.slane %v3623_v19, 1 }
 0x415   : > { %v5460_v38 = vrot.slane %v3606_v6, 1  ;;  %v15852_v51 = vrot.slane %v4155_v53, %v15352_v9  ;;  %v4100_v55 = vcombine.low %v15780_v61, %v15796_v39  ;;  %v13759_v46 = vcombine.high %v15780_v61, %v15796_v39 }
 0x416   : > { %v5466_v12 = vrot.slane %v3630_v50, 1  ;;  %v5470_v23 = vcombine.low %v5464_v17, %v5465_v20  ;;  %v15858_v19 = vcombine.low %v3944_v43, %v3951_v54  ;;  %v4102_v24 = vcombine.low %v15783_v3, %v15804_v37 }
 0x417   : > { %v13760_v8 = vcombine.high %v15783_v3, %v15804_v37  ;;  %v4110_v6 = vrot.slane %v4100_v55, %v15352_v9  ;;  %v4117_v60 = vrot.slane %v13759_v46, %v15352_v9  ;;  %v5467_v25 = vcombine.low %v5458_v36, %v5459_v21 }
 0x418   : > { %v5522_v53 = vrot.slane %v5466_v12, %v15352_v9  ;;  %14387 = vmatprep.subr.msk.mxu1 %vm3757_vm10, %v15858_v19  ;;  %v4124_v17 = vrot.slane %v4102_v24, %v15352_v9  ;;  %v4302_v43 = vrot.slane %v3630_v50, %v15352_v9  ;;  %v5468_v54 = vcombine.low %v5460_v38, %v5461_v22 }
 0x419   : > { %v4131_v20 = vrot.slane %v13760_v8, %v15352_v9  ;;  %14388 = vmatpush3.xpose.msk.msra.mxu1 %vm3757_vm10, %v15858_v19  ;;  %v4132_v14 = vcombine.low %v4110_v6, %v4117_v60  ;;  %v5469_v46 = vcombine.low %v5462_v56, %v5463_v40  ;;  %v5477_v12 = vrot.slane %v5467_v25, %v15352_v9 }
 0x41a   : > { %v5529_v55 = vrot.slane %v5522_v53, %v15352_v9  ;;  %14392 = vmatprep.subr.msk.mxu1 %vm1858_vm7, %v15852_v51  ;;  %v5484_v24 = vrot.slane %v5468_v54, %v15352_v9  ;;  %v5498_v21 = vrot.slane %v5470_v23, %v15352_v9  ;;  %v4247_v22 = vcombine.low %v15807_v0, %v15814_v7 }
 0x41b   : > { %v4133_v36 = vcombine.low %v4124_v17, %v4131_v20  ;;  %v4140_v50 = vrot.slane %v4132_v14, %v15352_v9  ;;  %v5491_v38 = vrot.slane %v5469_v46, %v15352_v9  ;;  %v4249_v25 = vcombine.low %v15810_v52, %v15818_v58 }
 0x41c   : > { %14455 = vmatprep.subr.msk.mxu0 %vm1858_vm7, %v5529_v55  ;;  %v4264_v56 = vrot.slane %v4248_v63, %v15352_v9  ;;  %v4816_v40 = vrot.slane %v3138_v30, 1  ;;  %14390 = vmatmul.mubr.msk.f32.vlgmr.msra.gmra.mxu1 %vm3757_vm10, %v15689_v57  ;;  %v5499_v14 = vcombine.low %v5477_v12, %v5484_v24  ;;  %v4257_v7 = vrot.slane %v4247_v22, %v15352_v9 }
 0x41d   : > { %v4147_v0 = vrot.slane %v4133_v36, %v15352_v9  ;;  %14456 = vmatpush3.msk.msra.mxu0 %vm1858_vm7, %v5529_v55  ;;  %14393 = vmatpush3.msk.msra.mxu1 %vm1858_vm7, %v15852_v51  ;;  %v15899_v52 = vrot.slane %v4302_v43, %v15352_v9  ;;  %v5500_v58 = vcombine.low %v5491_v38, %v5498_v21  ;;  %v18841_v20 = vrot.slane %v15683_v31, 1 }
 0x41e   : > { %v4271_v63 = vrot.slane %v4249_v25, %v15352_v9  ;;  %v4278_v30 = vrot.slane %v4250_v16, %v15352_v9  ;;  %v5507_v8 = vrot.slane %v5499_v14, %v15352_v9  ;;  %v4279_v6 = vcombine.low %v4257_v7, %v4264_v56 }
 0x41f   : > { %v15903_v23 = vcombine.low %v4140_v50, %v4147_v0  ;;  %v4882_v60 = vcombine.low %v15704_v34, %v15716_v29  ;;  %v5514_v53 = vrot.slane %v5500_v58, %v15352_v9  ;;  %v18842_v43 = vrot.slane %v15678_v10, 1 }
 0x420   : > { %v4280_v17 = vcombine.low %v4271_v63, %v4278_v30  ;;  %v4287_v16 = vrot.slane %v4279_v6, %v15352_v9  ;;  %v4884_v55 = vcombine.low %v15733_v49, %v4816_v40  ;;  %v4891_v46 = vrot.slane %v15719_v4, %v15352_v9 }
 0x421   : > { %v4883_v54 = vcombine.low %v18842_v43, %v18841_v20  ;;  %14394 = vmatprep.subr.mxu1 %v15903_v23  ;;  %v4898_v12 = vrot.slane %v4882_v60, %v15352_v9  ;;  %v5139_v34 = vrot.slane %v15764_v44, %v15352_v9  ;;  %v5515_v31 = vcombine.low %v5507_v8, %v5514_v53 }
 0x422   : > { %14395 = vmatpush3.msra.mxu1 %v15903_v23  ;;  %v4294_v10 = vrot.slane %v4280_v17, %v15352_v9  ;;  %v4912_v49 = vrot.slane %v4884_v55, %v15352_v9  ;;  %v5118_v4 = vrot.slane %v15749_v62, %v15352_v9  ;;  %v5125_v24 = vrot.slane %v15755_v35, %v15352_v9 }
 0x423   : > { %v4905_v29 = vrot.slane %v4883_v54, %v15352_v9  ;;  %14399 = vmatprep.subr.msk.mxu1 %vm1858_vm7, %v15899_v52  ;;  %v4913_v36 = vcombine.low %v4891_v46, %v4898_v12  ;;  %14457 = vmatprep.subr.mxu0 %v5515_v31  ;;  %v5132_v21 = vrot.slane %v15751_v1, %v15352_v9  ;;  %v5302_v40 = vrot.slane %v15780_v61, 1 }
 0x424   : > { %v15931_v44 = vcombine.low %v4287_v16, %v4294_v10  ;;  %14458 = vmatpush3.msra.mxu0 %v5515_v31  ;;  %v5140_v38 = vcombine.low %v5118_v4, %v5125_v24  ;;  %v3554_v25 = vcombine.high %v15780_v61, %v15780_v61  ;;  %v3555_v62 = vcombine.high %v15783_v3, %v15783_v3 }
 0x425   : > { %v4914_v22 = vcombine.low %v4905_v29, %v4912_v49  ;;  %v4921_v50 = vrot.slane %v4913_v36, %v15352_v9  ;;  %v5141_v56 = vcombine.low %v5132_v21, %v5139_v34  ;;  %v3556_v35 = vcombine.high %v15796_v39, %v15796_v39 }
 0x426   : > { %v18843_v0 = vmov 0.0   ;;  %v5148_v14 = vrot.slane %v5140_v38, %v15352_v9  ;;  %v3557_v7 = vcombine.high %v15804_v37, %v15804_v37  ;;  %v5303_v58 = vrot.slane %v15796_v39, 1 }
 0x427   : > { %6386 = vmatprep.subr.mxu0 %v18843_v0  ;;  %v4928_v1 = vrot.slane %v4914_v22, %v15352_v9  ;;  %v5155_v63 = vrot.slane %v5141_v56, %v15352_v9  ;;  %v5304_v30 = vrot.slane %v3554_v25, 1  ;;  %v5305_v8 = vrot.slane %v3556_v35, 1 }
 0x428   : > { %v5306_v6 = vrot.slane %v15783_v3, 1  ;;  %v5307_v61 = vrot.slane %v15804_v37, 1  ;;  %v5308_v53 = vrot.slane %v3555_v62, 1  ;;  %v5309_v17 = vrot.slane %v3557_v7, 1 }
 0x429   : > { %v15951_v60 = vcombine.low %v4921_v50, %v4928_v1  ;;  %v15954_v20 = vcombine.low %v5148_v14, %v5155_v63  ;;  %v5311_v43 = vcombine.low %v5302_v40, %v5303_v58  ;;  %v5312_v54 = vcombine.low %v5304_v30, %v5305_v8 }
 0x42a   : > { %v5313_v16 = vcombine.low %v5306_v6, %v5307_v61  ;;  %v5314_v55 = vcombine.low %v5308_v53, %v5309_v17 }
 0x42b   : > { %v5321_v39 = vrot.slane %v5311_v43, %v15352_v9  ;;  %v5328_v46 = vrot.slane %v5312_v54, %v15352_v9 }
 0x42c   : > { %v5335_v12 = vrot.slane %v5313_v16, %v15352_v9  ;;  %v5342_v3 = vrot.slane %v5314_v55, %v15352_v9 }
 0x42d   : > { %v5343_v34 = vcombine.low %v5321_v39, %v5328_v46 }
 0x42e   : > { %v5344_v31 = vcombine.low %v5335_v12, %v5342_v3 }
 0x42f   : > { %v5351_v37 = vrot.slane %v5343_v34, %v15352_v9 }
 0x430   : > { %v5358_v10 = vrot.slane %v5344_v31, %v15352_v9 }
 0x432   : > { %v15962_v29 = vcombine.low %v5351_v37, %v5358_v10 }
 0x4d2   : > { %v14384_v49 = vpop.f32.mrf.mxu1 }
 0x4d3   : > { %v4051_v36 = vmul.f32 0.125, %v14384_v49 }
 0x4d4   : > { %v3832_v4 = vpop.f32.mrf.mxu1 }
 0x4d5   : > { %v4050_v24 = vmul.f32 0.125, %v3832_v4  ;;  %v4059_v21 = vsel %vm4058_vm11, %v4051_v36, -inf }
 0x4d6   : > { %4060 = vmax.xlane.f32.xlu1 %v4059_v21 }
 0x4d7   : > { %v4055_v22 = vsel %vm4054_vm12, %v4050_v24, -inf }
 0x4d8   : > { %4056 = vmax.xlane.f32.xlu0 %v4055_v22 }
 0x4dc   : > { %v14391_v50 = vpop.f32.mrf.mxu1 }
 0x4dd   : > { %v4053_v38 = vmul.f32 0.125, %v14391_v50 }
 0x4de   : > { %v4041_v25 = vpop.f32.mrf.mxu1 }
 0x4df   : > { %v4052_v56 = vmul.f32 0.125, %v4041_v25  ;;  %v4065_v62 = vsel %vm4058_vm11, %v4053_v38, -inf }
 0x4e0   : > { %4066 = vmax.xlane.f32.xlu1 %v4065_v62 }
 0x4e1   : > { %v4062_v35 = vsel %vm4054_vm12, %v4052_v56, -inf }
 0x4e2   : > { %4063 = vmax.xlane.f32.xlu0 %v4062_v35 }
 0x55f   : > { %v4061_v40 = vpop.xlane.xlu1 %4060 }
 0x560   : > { %v4069_v1 = vsub.f32 %v4051_v36, %v4061_v40 }
 0x561   : > { %v4057_v14 = vpop.xlane.xlu0 %4056 }
 0x562   : > { %v4074_v7 = vmul.f32 1.442695, %v4069_v1  ;;  %v4068_v58 = vsub.f32 %v4050_v24, %v4057_v14 }
 0x564   : > { %14521 = vpow2.f32 %v4074_v7  ;;  %v4072_v63 = vmul.f32 1.442695, %v4068_v58 }
 0x566   : > { %14523 = vpow2.f32 %v4072_v63 }
 0x569   : > { %v4067_v30 = vpop.xlane.xlu1 %4066 }
 0x56a   : > { %v4071_v8 = vsub.f32 %v4053_v38, %v4067_v30 }
 0x56b   : > { %v4064_v6 = vpop.xlane.xlu0 %4063 }
 0x56c   : > { %v4078_v61 = vmul.f32 1.442695, %v4071_v8  ;;  %v4070_v53 = vsub.f32 %v4052_v56, %v4064_v6 }
 0x56e   : > { %14525 = vpow2.f32 %v4078_v61  ;;  %v4076_v17 = vmul.f32 1.442695, %v4070_v53 }
 0x570   : > { %14527 = vpow2.f32 %v4076_v17 }
 0x571   : > { %v14522_v43 = vpop.eup %14521 }
 0x572   : > { %v4083_v54 = vsel %vm4058_vm11, %v14522_v43, 0.0 }
 0x573   : > { %v14524_v16 = vpop.eup %14523  ;;  %4084 = vadd.xlane.f32.xlu1 %v4083_v54 }
 0x574   : > { %v4080_v55 = vsel %vm4054_vm12, %v14524_v16, 0.0 }
 0x575   : > { %4081 = vadd.xlane.f32.xlu0 %v4080_v55 }
 0x57b   : > { %v14526_v39 = vpop.eup %14525 }
 0x57c   : > { %v4089_v46 = vsel %vm4058_vm11, %v14526_v39, 0.0 }
 0x57d   : > { %v14528_v12 = vpop.eup %14527  ;;  %4090 = vadd.xlane.f32.xlu1 %v4089_v46 }
 0x57e   : > { %v4086_v3 = vsel %vm4054_vm12, %v14528_v12, 0.0 }
 0x57f   : > { %4087 = vadd.xlane.f32.xlu0 %v4086_v3 }
 0x58e   : > { %4398 = vrot.lane.b32.xlu1 %v15798_v33, %s14707_s20 }
 0x592   : > { %4394 = vrot.lane.b32.xlu1 %v15640_v26, %s14707_s20 }
 0x595   : > { %4400 = vrot.lane.b32.xlu0 %v15770_v59, %s14707_s20 }
 0x596   : > { %4491 = vrot.lane.b32.xlu1 %v15801_v15, %s14707_s20 }
 0x599   : > { %4396 = vrot.lane.b32.xlu0 %v15686_v18, %s14707_s20 }
 0x59a   : > { %4489 = vrot.lane.b32.xlu1 %v15858_v19, %s14707_s20 }
 0x59d   : > { %4485 = vrot.lane.b32.xlu0 %v15694_v32, %s14707_s20 }
 0x59e   : > { %4487 = vrot.lane.b32.xlu1 %v15689_v57, %s14707_s20 }
 0x5fc   : > { %v4085_v33 = vpop.xlane.xlu1 %4084 }
 0x5fd   : > { %14529 = vrcp.f32 %v4085_v33 }
 0x5fe   : > { %v4082_v26 = vpop.xlane.xlu0 %4081 }
 0x5ff   : > { %14531 = vrcp.f32 %v4082_v26 }
 0x606   : > { %v4091_v59 = vpop.xlane.xlu1 %4090 }
 0x607   : > { %14533 = vrcp.f32 %v4091_v59 }
 0x608   : > { %v4088_v34 = vpop.xlane.xlu0 %4087 }
 0x609   : > { %14535 = vrcp.f32 %v4088_v34 }
 0x60a   : > { %v14530_v15 = vpop.eup %14529  ;;  %v4399_v19 = vpop.permute.xlu1 %4398 }
 0x60b   : > { %v4095_v37 = vmul.f32 %v14530_v15, %v14522_v43 }
 0x60c   : > { %v14532_v31 = vpop.eup %14531  ;;  %v4401_v57 = vpop.permute.xlu0 %4400 }
 0x60d   : > { %v4093_v18 = vmul.f32 %v14532_v31, %v14524_v16 }
 0x60e   : > { %v4395_v49 = vpop.permute.xlu1 %4394 }
 0x60f   : > { %14396 = vmatprep.mubr.msk.f32.mxu1 %vm4054_vm12, %v4093_v18 }
 0x610   : > { %14397 = vmatmul.mubr.msk.f32.vlgmr.msra.gmra.mxu1 %vm4054_vm12, %v4095_v37  ;;  %v4397_v24 = vpop.permute.xlu0 %4396 }
 0x611   : > { %14400 = vmatpush3.msk.msra.mxu1 %vm1858_vm7, %v15899_v52 }
 0x612   : > { %14401 = vmatprep.subr.mxu1 %v15931_v44  ;;  %v4492_v21 = vpop.permute.xlu1 %4491 }
 0x613   : > { %14402 = vmatpush3.msra.mxu1 %v15931_v44 }
 0x614   : > { %v14534_v32 = vpop.eup %14533  ;;  %14406 = vmatprep.subr.msk.mxu1 %vm3757_vm10, %v4401_v57  ;;  %v4486_v22 = vpop.permute.xlu0 %4485 }
 0x615   : > { %v4099_v4 = vmul.f32 %v14534_v32, %v14526_v39 }
 0x616   : > { %v14536_v10 = vpop.eup %14535  ;;  %v4490_v50 = vpop.permute.xlu1 %4489 }
 0x617   : > { %v4097_v36 = vmul.f32 %v14536_v10, %v14528_v12 }
 0x619   : > { %14403 = vmatprep.mubr.msk.f32.mxu1 %vm4054_vm12, %v4097_v36 }
 0x61a   : > { %14404 = vmatmul.mubr.msk.f32.vlgmr.msra.gmra.mxu1 %vm4054_vm12, %v4099_v4  ;;  %v4488_v38 = vpop.permute.xlu1 %4487 }
 0x61b   : > { %14407 = vmatpush3.xpose.msk.msra.mxu1 %vm3757_vm10, %v4401_v57  ;;  %14410 = vmatprep.mubr.msk.f32.mxu1 %vm3757_vm10, %v4395_v49 }
 0x61c   : > { %14408 = vmatprep.subr.msk.mxu1 %vm3757_vm10, %v4399_v19 }
 0x61f   : > { %14409 = vmatpush3.xpose.msk.msra.mxu1 %vm3757_vm10, %v4399_v19 }
 0x620   : > { %14413 = vmatprep.subr.msk.mxu1 %vm3757_vm10, %v4492_v21 }
 0x622   : > { %14411 = vmatmul.mubr.msk.f32.vlgmr.msra.gmra.mxu1 %vm3757_vm10, %v4397_v24 }
 0x623   : > { %14414 = vmatpush3.xpose.msk.msra.mxu1 %vm3757_vm10, %v4492_v21  ;;  %14417 = vmatprep.mubr.msk.f32.mxu1 %vm3757_vm10, %v4486_v22 }
 0x624   : > { %14415 = vmatprep.subr.msk.mxu1 %vm3757_vm10, %v4490_v50 }
 0x627   : > { %14416 = vmatpush3.xpose.msk.msra.mxu1 %vm3757_vm10, %v4490_v50  ;;  %v4817_v50 = vrot.slane %v15713_v41, 1 }
 0x62a   : > { %14418 = vmatmul.mubr.msk.f32.vlgmr.msra.gmra.mxu1 %vm3757_vm10, %v4488_v38 }
 0x6d0   : > { %v16008_v25 = vpop.f32.mrf.mxu1 }
 0x6d2   : > { %v16010_v56 = vpop.f32.mrf.mxu1 }
 0x6da   : > { %v16012_v62 = vpop.f32.mrf.mxu1 }
 0x6dc   : > { %v16014_v35 = vpop.f32.mrf.mxu1 }
 0x6e2   : > { %v14412_v40 = vpop.f32.mrf.mxu1 }
 0x6e3   : > { %v4577_v1 = vmul.f32 0.125, %v14412_v40  ;;  %v4936_v40 = vrot.slane %v4817_v50, %v15352_v9 }
 0x6e4   : > { %v4476_v14 = vpop.f32.mrf.mxu1 }
 0x6e5   : > { %v4576_v7 = vmul.f32 0.125, %v4476_v14  ;;  %v4583_v58 = vsel %vm4058_vm11, %v4577_v1, -inf  ;;  %v4943_v41 = vrot.slane %v4936_v40, %v15352_v9 }
 0x6e6   : > { %4584 = vmax.xlane.f32.xlu1 %v4583_v58  ;;  %v5044_v58 = vrot.slane %v15762_v5, 1 }
 0x6e7   : > { %v4580_v63 = vsel %vm4054_vm12, %v4576_v7, -inf }
 0x6e8   : > { %4581 = vmax.xlane.f32.xlu0 %v4580_v63 }
 0x6ea   : > { %v14419_v30 = vpop.f32.mrf.mxu1 }
 0x6eb   : > { %v4579_v61 = vmul.f32 0.125, %v14419_v30  ;;  %v4808_v30 = vrot.slane %v15637_v48, 1 }
 0x6ec   : > { %v4567_v8 = vpop.f32.mrf.mxu1 }
 0x6ed   : > { %v4578_v6 = vmul.f32 0.125, %v4567_v8  ;;  %v4589_v17 = vsel %vm4058_vm11, %v4579_v61, -inf  ;;  %v4873_v5 = vrot.slane %v4808_v30, %v15352_v9 }
 0x6ef   : > { %v4586_v53 = vsel %vm4054_vm12, %v4578_v6, -inf }
 0x6f0   : > { %4587 = vmax.xlane.f32.xlu0 %v4586_v53  ;;  %v5035_v53 = vrot.slane %v15667_v13, 1 }
 0x6f4   : > { %4590 = vmax.xlane.f32.xlu0 %v4589_v17  ;;  %v4880_v17 = vrot.slane %v4873_v5, %v15352_v9 }
 0x76f   : > { %v4585_v43 = vpop.xlane.xlu1 %4584 }
 0x770   : > { %v4593_v54 = vsub.f32 %v4577_v1, %v4585_v43 }
 0x771   : > { %v4582_v16 = vpop.xlane.xlu0 %4581 }
 0x772   : > { %v4598_v55 = vmul.f32 1.442695, %v4593_v54  ;;  %v4592_v39 = vsub.f32 %v4576_v7, %v4582_v16 }
 0x774   : > { %14537 = vpow2.f32 %v4598_v55  ;;  %v4596_v46 = vmul.f32 1.442695, %v4592_v39 }
 0x776   : > { %14539 = vpow2.f32 %v4596_v46 }
 0x779   : > { %v4588_v12 = vpop.xlane.xlu0 %4587 }
 0x77a   : > { %v4594_v3 = vsub.f32 %v4578_v6, %v4588_v12  ;;  %v5163_v6 = vrot.slane %v5044_v58, %v15352_v9 }
 0x77c   : > { %v4600_v33 = vmul.f32 1.442695, %v4594_v3  ;;  %v5170_v48 = vrot.slane %v5163_v6, %v15352_v9 }
 0x77d   : > { %v4591_v26 = vpop.xlane.xlu0 %4590 }
 0x77e   : > { %14541 = vpow2.f32 %v4600_v33  ;;  %v4595_v59 = vsub.f32 %v4579_v61, %v4591_v26  ;;  %v5310_v61 = vrot.slane %v15790_v11, 1  ;;  %v5100_v11 = vrot.slane %v5035_v53, %v15352_v9 }
 0x780   : > { %v4602_v34 = vmul.f32 1.442695, %v4595_v59 }
 0x781   : > { %v14538_v15 = vpop.eup %14537 }
 0x782   : > { %14543 = vpow2.f32 %v4602_v34  ;;  %v4607_v31 = vsel %vm4058_vm11, %v14538_v15, 0.0 }
 0x783   : > { %v14540_v18 = vpop.eup %14539  ;;  %4608 = vadd.xlane.f32.xlu1 %v4607_v31 }
 0x784   : > { %v4604_v37 = vsel %vm4054_vm12, %v14540_v18, 0.0 }
 0x785   : > { %4605 = vadd.xlane.f32.xlu0 %v4604_v37 }
 0x78b   : > { %v14542_v19 = vpop.eup %14541 }
 0x78c   : > { %v4610_v57 = vsel %vm4054_vm12, %v14542_v19, 0.0 }
 0x78d   : > { %4611 = vadd.xlane.f32.xlu0 %v4610_v57 }
 0x78f   : > { %v14544_v32 = vpop.eup %14543 }
 0x790   : > { %v4613_v10 = vsel %vm4058_vm11, %v14544_v32, 0.0 }
 0x791   : > { %4614 = vadd.xlane.f32.xlu1 %v4613_v10 }
 0x7a2   : > { %4624 = vrot.lane.b32.xlu1 %v15903_v23, %s14707_s20 }
 0x7a3   : > { %4626 = vrot.lane.b32.xlu0 %v15852_v51, %s14707_s20 }
 0x7a6   : > { %4714 = vrot.lane.b32.xlu1 %v15899_v52, %s14707_s20 }
 0x7aa   : > { %4712 = vrot.lane.b32.xlu1 %v15931_v44, %s14707_s20 }
 0x80c   : > { %v4609_v49 = vpop.xlane.xlu1 %4608 }
 0x80d   : > { %14545 = vrcp.f32 %v4609_v49 }
 0x80e   : > { %v4606_v36 = vpop.xlane.xlu0 %4605 }
 0x80f   : > { %14547 = vrcp.f32 %v4606_v36 }
 0x816   : > { %v4612_v4 = vpop.xlane.xlu0 %4611 }
 0x817   : > { %14549 = vrcp.f32 %v4612_v4 }
 0x81a   : > { %v4615_v24 = vpop.xlane.xlu1 %4614  ;;  %v4627_v21 = vpop.permute.xlu0 %4626 }
 0x81b   : > { %v14546_v22 = vpop.eup %14545  ;;  %14551 = vrcp.f32 %v4615_v24  ;;  %14420 = vmatprep.subr.msk.mxu1 %vm1858_vm7, %v4627_v21 }
 0x81c   : > { %v14548_v23 = vpop.eup %14547  ;;  %14421 = vmatpush3.msk.msra.mxu1 %vm1858_vm7, %v4627_v21  ;;  %v4619_v44 = vmul.f32 %v14546_v22, %v14538_v15 }
 0x81d   : > { %v4617_v51 = vmul.f32 %v14548_v23, %v14540_v18 }
 0x81e   : > { %v4625_v52 = vpop.permute.xlu1 %4624 }
 0x81f   : > { %14422 = vmatprep.subr.mxu1 %v4625_v52  ;;  %14424 = vmatprep.mubr.msk.f32.mxu1 %vm4054_vm12, %v4617_v51 }
 0x820   : > { %14423 = vmatpush3.msra.mxu1 %v4625_v52 }
 0x821   : > { %14425 = vmatmul.mubr.msk.f32.vlgmr.msra.gmra.mxu1 %vm4054_vm12, %v4619_v44 }
 0x822   : > { %v4715_v38 = vpop.permute.xlu1 %4714 }
 0x823   : > { %14427 = vmatprep.subr.msk.mxu1 %vm1858_vm7, %v4715_v38 }
 0x824   : > { %v14550_v1 = vpop.eup %14549  ;;  %14428 = vmatpush3.msk.msra.mxu1 %vm1858_vm7, %v4715_v38 }
 0x825   : > { %v4621_v14 = vmul.f32 %v14550_v1, %v14542_v19  ;;  %v5664_v1 = vld [vmem:[%s14806_s24 + $0xb4] sm:$0xff] }
 0x826   : > { %v4713_v7 = vpop.permute.xlu1 %4712 }
 0x827   : > { %14429 = vmatprep.subr.mxu1 %v4713_v7  ;;  %14431 = vmatprep.mubr.msk.f32.mxu1 %vm4054_vm12, %v4621_v14  ;;  %v5728_v14 = vunpack.c.h.bf16 %v5664_v1 }
 0x828   : > { %v14552_v63 = vpop.eup %14551  ;;  %14430 = vmatpush3.msra.mxu1 %v4713_v7 }
 0x829   : > { %14434 = vmatprep.subr.msk.mxu1 %vm3757_vm10, %v4943_v41  ;;  %v4623_v8 = vmul.f32 %v14552_v63, %v14544_v32 }
 0x82b   : > { %14432 = vmatmul.mubr.msk.f32.vlgmr.msra.gmra.mxu1 %vm4054_vm12, %v4623_v8  ;;  %v5662_v8 = vld [vmem:[%s14806_s24 + $0xa8] sm:$0xff] }
 0x82c   : > { %14435 = vmatpush3.xpose.msk.msra.mxu1 %vm3757_vm10, %v4943_v41  ;;  %14438 = vmatprep.mubr.msk.f32.mxu1 %vm3757_vm10, %v15654_v28  ;;  %v5366_v28 = vrot.slane %v5310_v61, %v15352_v9  ;;  %v5727_v61 = vunpack.c.l.bf16 %v5664_v1 }
 0x82d   : > { %14436 = vmatprep.subr.msk.mxu1 %vm3757_vm10, %v15951_v60 }
 0x82e   : > { %v5373_v13 = vrot.slane %v5366_v28, %v15352_v9  ;;  %v5724_v28 = vunpack.c.l.bf16 %v5662_v8 }
 0x830   : > { %14437 = vmatpush3.xpose.msk.msra.mxu1 %vm3757_vm10, %v15951_v60  ;;  %v5107_v60 = vrot.slane %v5100_v11, %v15352_v9  ;;  %v5658_v11 = vld [vmem:[%s14806_s24 + $0x90] sm:$0xff] }
 0x831   : > { %14441 = vmatprep.subr.msk.mxu1 %vm3757_vm10, %v5170_v48 }
 0x833   : > { %14439 = vmatmul.mubr.msk.f32.vlgmr.msra.gmra.mxu1 %vm3757_vm10, %v4880_v17  ;;  %v5725_v17 = vunpack.c.h.bf16 %v5662_v8  ;;  %v5649_v8 = vld [vmem:[%s14806_s24 + $0x50] ss:$12 sps:$4 sm:$0xff]  }
 0x834   : > { %14442 = vmatpush3.xpose.msk.msra.mxu1 %vm3757_vm10, %v5170_v48  ;;  %14445 = vmatprep.mubr.msk.f32.mxu1 %vm3757_vm10, %v15660_v27  ;;  %v5660_v48 = vld [vmem:[%s14806_s24 + $0x9c] sm:$0xff] }
 0x835   : > { %14443 = vmatprep.subr.msk.mxu1 %vm3757_vm10, %v15954_v20 }
 0x838   : > { %14444 = vmatpush3.xpose.msk.msra.mxu1 %vm3757_vm10, %v15954_v20 }
 0x839   : > { %14448 = vmatprep.subr.msk.mxu1 %vm1858_vm7, %v5373_v13 }
 0x83b   : > { %14446 = vmatmul.mubr.msk.f32.vlgmr.msra.gmra.mxu1 %vm3757_vm10, %v5107_v60  ;;  %v5721_v60 = vunpack.c.l.bf16 %v5660_v48 }
 0x83c   : > { %14449 = vmatpush3.msk.msra.mxu1 %vm1858_vm7, %v5373_v13  ;;  %v5722_v13 = vunpack.c.h.bf16 %v5660_v48  ;;  %v5645_v48 = vld [vmem:[%s14806_s24 + $0x38] ss:$12 sps:$4 sm:$0xff]  }
 0x83d   : > { %14450 = vmatprep.subr.mxu1 %v15962_v29 }
 0x83e   : > { %14451 = vmatpush3.msra.mxu1 %v15962_v29 }
 0x83f   : > { %6303 = vmatprep.subr.mxu1 %v5728_v14  ;;  %v5640_v14 = vld [vmem:[%s14806_s24 + $0x24] sm:$0xff] }
 0x8e1   : > { %v14426_v27 = vpop.f32.mrf.mxu1 }
 0x8e3   : > { %v4703_v43 = vpop.f32.mrf.mxu1 }
 0x8eb   : > { %v14433_v54 = vpop.f32.mrf.mxu1 }
 0x8ed   : > { %v4791_v16 = vpop.f32.mrf.mxu1 }
 0x8f3   : > { %v14440_v55 = vpop.f32.mrf.mxu1 }
 0x8f4   : > { %v5255_v39 = vmul.f32 0.125, %v14440_v55 }
 0x8f5   : > { %v5018_v46 = vpop.f32.mrf.mxu1 }
 0x8f6   : > { %v5254_v20 = vmul.f32 0.125, %v5018_v46  ;;  %v5261_v12 = vsel %vm4058_vm11, %v5255_v39, -inf }
 0x8f7   : > { %5262 = vmax.xlane.f32.xlu1 %v5261_v12 }
 0x8f8   : > { %v5258_v3 = vsel %vm4054_vm12, %v5254_v20, -inf }
 0x8f9   : > { %5259 = vmax.xlane.f32.xlu0 %v5258_v3  ;;  %v5652_v3 = vld [vmem:[%s14806_s24 + $0x6c] sm:$0xff] }
 0x8fb   : > { %v14447_v33 = vpop.f32.mrf.mxu1 }
 0x8fc   : > { %v5257_v34 = vmul.f32 0.125, %v14447_v33 }
 0x8fd   : > { %v5245_v26 = vpop.f32.mrf.mxu1 }
 0x8fe   : > { %v5256_v59 = vmul.f32 0.125, %v5245_v26  ;;  %v5267_v15 = vsel %vm4058_vm11, %v5257_v34, -inf }
 0x900   : > { %v5264_v29 = vsel %vm4054_vm12, %v5256_v59, -inf }
 0x901   : > { %5265 = vmax.xlane.f32.xlu0 %v5264_v29 }
 0x905   : > { %5268 = vmax.xlane.f32.xlu0 %v5267_v15  ;;  %v5710_v15 = vunpack.c.h.bf16 %v5652_v3 }
 0x980   : > { %v5263_v31 = vpop.xlane.xlu1 %5262 }
 0x981   : > { %v5271_v18 = vsub.f32 %v5255_v39, %v5263_v31 }
 0x982   : > { %v5260_v37 = vpop.xlane.xlu0 %5259 }
 0x983   : > { %v5276_v19 = vmul.f32 1.442695, %v5271_v18  ;;  %v5270_v57 = vsub.f32 %v5254_v20, %v5260_v37  ;;  %v5665_v20 = vld [vmem:[%s14806_s24 + $0xb0] ss:$12 sps:$4 sm:$0xff]   ;;  %v5661_v18 = vld [vmem:[%s14806_s24 + $0x98] ss:$12 sps:$4 sm:$0xff]   ;;  %v5709_v37 = vunpack.c.l.bf16 %v5652_v3 }
 0x984   : > { %v5729_v29 = vunpack.c.h.bf16 %v5665_v20  ;;  %v5680_v3 = vld [vmem:[%s14806_s24 + $0x114] sm:$0xff] }
 0x985   : > { %14553 = vpow2.f32 %v5276_v19  ;;  %v5274_v32 = vmul.f32 1.442695, %v5270_v57  ;;  %v5648_v19 = vld [vmem:[%s14806_s24 + $0x54] sm:$0xff]  ;;  %v5726_v57 = vunpack.c.l.bf16 %v5665_v20 }
 0x987   : > { %14555 = vpow2.f32 %v5274_v32 }
 0x98a   : > { %v5266_v10 = vpop.xlane.xlu0 %5265 }
 0x98b   : > { %v5272_v49 = vsub.f32 %v5256_v59, %v5266_v10  ;;  %v5650_v59 = vld [vmem:[%s14806_s24 + $0x60] sm:$0xff] }
 0x98c   : > { %v5707_v32 = vunpack.c.h.bf16 %v5650_v59  ;;  %v5706_v10 = vunpack.c.l.bf16 %v5650_v59 }
 0x98d   : > { %v5278_v36 = vmul.f32 1.442695, %v5272_v49  ;;  %v5646_v49 = vld [vmem:[%s14806_s24 + $0x48] sm:$0xff] }
 0x98e   : > { %v5269_v4 = vpop.xlane.xlu0 %5268 }
 0x98f   : > { %14557 = vpow2.f32 %v5278_v36  ;;  %v5273_v24 = vsub.f32 %v5257_v34, %v5269_v4  ;;  %v5723_v36 = vunpack.c.h.bf16 %v5661_v18  ;;  %v5704_v4 = vunpack.c.h.bf16 %v5648_v19 }
 0x991   : > { %v5280_v21 = vmul.f32 1.442695, %v5273_v24  ;;  %v5657_v24 = vld [vmem:[%s14806_s24 + $0x80] ss:$12 sps:$4 sm:$0xff]  }
 0x992   : > { %v14554_v22 = vpop.eup %14553 }
 0x993   : > { %14559 = vpow2.f32 %v5280_v21  ;;  %v5285_v23 = vsel %vm4058_vm11, %v14554_v22, 0.0  ;;  %v5703_v21 = vunpack.c.l.bf16 %v5648_v19  ;;  %v5677_v19 = vld [vmem:[%s14806_s24 + $0xf8] ss:$12 sps:$4 sm:$0xff]  }
 0x994   : > { %v14556_v51 = vpop.eup %14555  ;;  %5286 = vadd.xlane.f32.xlu1 %v5285_v23  ;;  %v5720_v23 = vunpack.c.l.bf16 %v5661_v18  ;;  %v5751_v18 = vunpack.c.l.bf16 %v5680_v3 }
 0x995   : > { %v5282_v52 = vsel %vm4054_vm12, %v14556_v51, 0.0 }
 0x996   : > { %5283 = vadd.xlane.f32.xlu0 %v5282_v52  ;;  %v5700_v52 = vunpack.c.l.bf16 %v5646_v49 }
 0x99c   : > { %v14558_v50 = vpop.eup %14557 }
 0x99d   : > { %v5288_v44 = vsel %vm4054_vm12, %v14558_v50, 0.0 }
 0x99e   : > { %5289 = vadd.xlane.f32.xlu0 %v5288_v44  ;;  %v5717_v44 = vunpack.c.h.bf16 %v5657_v24 }
 0x9a0   : > { %v14560_v38 = vpop.eup %14559 }
 0x9a1   : > { %v5291_v40 = vsel %vm4058_vm11, %v14560_v38, 0.0 }
 0x9a2   : > { %5292 = vadd.xlane.f32.xlu1 %v5291_v40  ;;  %v5653_v40 = vld [vmem:[%s14806_s24 + $0x68] ss:$12 sps:$4 sm:$0xff]  }
 0x9b3   : > { %5622 = vrot.lane.b32.xlu1 %v4791_v16, %s14707_s20  ;;  %v5654_v16 = vld [vmem:[%s14806_s24 + $0x78] sm:$0xff] }
 0x9b4   : > { %5618 = vrot.lane.b32.xlu0 %v4703_v43, %s14707_s20  ;;  %v5719_v43 = vunpack.c.h.bf16 %v5658_v11  ;;  %v5713_v33 = vunpack.c.h.bf16 %v5654_v16  ;;  %v5712_v26 = vunpack.c.l.bf16 %v5654_v16  ;;  %v5636_v16 = vld [vmem:[%s14806_s24 + $0xc] sm:$0xff] }
 0x9b5   : > { %v5686_v20 = vunpack.c.h.bf16 %v5636_v16 }
 0x9b7   : > { %5620 = vrot.lane.b32.xlu1 %v14426_v27, %s14707_s20  ;;  %v5656_v27 = vld [vmem:[%s14806_s24 + $0x84] sm:$0xff] }
 0x9b8   : > { %v5716_v39 = vunpack.c.h.bf16 %v5656_v27  ;;  %v5715_v12 = vunpack.c.l.bf16 %v5656_v27 }
 0x9bb   : > { %5624 = vrot.lane.b32.xlu1 %v14433_v54, %s14707_s20  ;;  %v5718_v54 = vunpack.c.l.bf16 %v5658_v11  ;;  %v5696_v11 = vunpack.c.l.bf16 %v5645_v48 }
 0xa1d   : > { %v5287_v7 = vpop.xlane.xlu1 %5286 }
 0xa1e   : > { %14561 = vrcp.f32 %v5287_v7  ;;  %v5714_v7 = vunpack.c.l.bf16 %v5657_v24 }
 0xa1f   : > { %v5284_v58 = vpop.xlane.xlu0 %5283 }
 0xa20   : > { %14563 = vrcp.f32 %v5284_v58 }
 0xa27   : > { %v5290_v41 = vpop.xlane.xlu0 %5289 }
 0xa28   : > { %14565 = vrcp.f32 %v5290_v41 }
 0xa2b   : > { %v5293_v63 = vpop.xlane.xlu1 %5292  ;;  %v14562_v30 = vpop.eup %14561 }
 0xa2c   : > { %14567 = vrcp.f32 %v5293_v63  ;;  %v5297_v53 = vmul.f32 %v14562_v30, %v14554_v22  ;;  %v5644_v22 = vld [vmem:[%s14806_s24 + $0x3c] sm:$0xff]  ;;  %v5711_v63 = vunpack.c.h.bf16 %v5653_v40  ;;  %v5692_v30 = vunpack.c.h.bf16 %v5640_v14 }
 0xa2d   : > { %v14564_v6 = vpop.eup %14563  ;;  %v5697_v1 = vunpack.c.l.bf16 %v5644_v22 }
 0xa2e   : > { %v5295_v5 = vmul.f32 %v14564_v6, %v14556_v51  ;;  %v5701_v51 = vunpack.c.h.bf16 %v5646_v49  ;;  %v5691_v6 = vunpack.c.l.bf16 %v5640_v14  ;;  %v5674_v49 = vld [vmem:[%s14806_s24 + $0xf0] sm:$0xff] }
 0xa2f   : > { %v5669_v14 = vld [vmem:[%s14806_s24 + $0xc8] ss:$12 sps:$4 sm:$0xff]  }
 0xa30   : > { %14452 = vmatprep.mubr.msk.f32.mxu1 %vm4054_vm12, %v5295_v5  ;;  %v5708_v5 = vunpack.c.l.bf16 %v5653_v40 }
 0xa31   : > { %14453 = vmatmul.mubr.msk.f32.vlgmr.msra.gmra.mxu1 %vm4054_vm12, %v5297_v53  ;;  %v5702_v53 = vunpack.c.l.bf16 %v5649_v8 }
 0xa32   : > { %6304 = vmatpush1.msra.mxu1 %v5727_v61  ;;  %v5705_v61 = vunpack.c.h.bf16 %v5649_v8 }
 0xa33   : > { %6305 = vmatprep.subr.mxu1 %v5725_v17  ;;  %v5699_v17 = vunpack.c.h.bf16 %v5645_v48  ;;  %v5732_v48 = vunpack.c.l.bf16 %v5669_v14 }
 0xa34   : > { %6306 = vmatpush1.msra.mxu1 %v5724_v28  ;;  %v5641_v28 = vld [vmem:[%s14806_s24 + $0x20] ss:$12 sps:$4 sm:$0xff]  }
 0xa35   : > { %v14566_v55 = vpop.eup %14565  ;;  %6307 = vmatprep.subr.mxu1 %v5722_v13  ;;  %v5693_v13 = vunpack.c.h.bf16 %v5641_v28  ;;  %v5690_v27 = vunpack.c.l.bf16 %v5641_v28 }
 0xa36   : > { %v5299_v46 = vmul.f32 %v14566_v55, %v14558_v50  ;;  %6308 = vmatpush1.msra.mxu1 %v5721_v60  ;;  %v5642_v50 = vld [vmem:[%s14806_s24 + $0x30] sm:$0xff]  ;;  %v5638_v60 = vld [vmem:[%s14806_s24 + $0x18] sm:$0xff] }
 0xa37   : > { %6309 = vmatprep.subr.mxu1 %v5719_v43  ;;  %v5695_v58 = vunpack.c.h.bf16 %v5642_v50  ;;  %v5694_v41 = vunpack.c.l.bf16 %v5642_v50  ;;  %v5688_v43 = vunpack.c.l.bf16 %v5638_v60  ;;  %v5637_v55 = vld [vmem:[%s14806_s24 + $0x8] ss:$12 sps:$4 sm:$0xff]   ;;  %v5670_v50 = vld [vmem:[%s14806_s24 + $0xd8] sm:$0xff] }
 0xa38   : > { %14459 = vmatprep.mubr.msk.f32.mxu0 %vm4054_vm12, %v5299_v46  ;;  %6310 = vmatpush1.msra.mxu1 %v5718_v54  ;;  %v5689_v54 = vunpack.c.h.bf16 %v5638_v60  ;;  %v5685_v46 = vunpack.c.l.bf16 %v5636_v16 }
 0xa39   : > { %v14568_v34 = vpop.eup %14567  ;;  %6311 = vmatprep.subr.mxu1 %v5716_v39  ;;  %v5634_v39 = vld [vmem:[%s14806_s24] sm:$0xff] }
 0xa3a   : > { %v5301_v31 = vmul.f32 %v14568_v34, %v14560_v38  ;;  %6312 = vmatpush1.msra.mxu1 %v5715_v12  ;;  %v5698_v38 = vunpack.c.h.bf16 %v5644_v22  ;;  %v5687_v12 = vunpack.c.h.bf16 %v5637_v55  ;;  %v5683_v59 = vunpack.c.h.bf16 %v5634_v39 }
 0xa3b   : > { %6313 = vmatprep.subr.mxu1 %v5713_v33  ;;  %v5681_v33 = vld [vmem:[%s14806_s24 + $0x110] ss:$12 sps:$4 sm:$0xff]   ;;  %v5684_v34 = vunpack.c.l.bf16 %v5637_v55  ;;  %v5742_v22 = vunpack.c.l.bf16 %v5674_v49 }
 0xa3c   : > { %14460 = vmatmul.mubr.msk.f32.vlgmr.msra.gmra.mxu0 %vm4054_vm12, %v5301_v31  ;;  %6314 = vmatpush1.msra.mxu1 %v5712_v26  ;;  %v5682_v26 = vunpack.c.l.bf16 %v5634_v39  ;;  %v5753_v31 = vunpack.c.h.bf16 %v5681_v33 }
 0xa3d   : > { %6387 = vmatpush1.msra.mxu0 %v5729_v29  ;;  %6315 = vmatprep.subr.mxu1 %v5710_v15  ;;  %v5678_v29 = vld [vmem:[%s14806_s24 + $0x108] sm:$0xff]  ;;  %v5752_v15 = vunpack.c.h.bf16 %v5680_v3 }
 0xa3e   : > { %6388 = vmatprep.subr.mxu0 %v18843_v0  ;;  %6316 = vmatpush1.msra.mxu1 %v5709_v37  ;;  %v5676_v37 = vld [vmem:[%s14806_s24 + $0xfc] sm:$0xff] }
 0xa3f   : > { %6389 = vmatpush1.msra.mxu0 %v5726_v57  ;;  %6317 = vmatprep.subr.mxu1 %v5707_v32  ;;  %v5749_v57 = vunpack.c.h.bf16 %v5678_v29  ;;  %v5750_v32 = vunpack.c.l.bf16 %v5681_v33  ;;  %v5745_v24 = vunpack.c.l.bf16 %v5676_v37 }
 0xa40   : > { %6390 = vmatprep.subr.mxu0 %v18843_v0  ;;  %6318 = vmatpush1.msra.mxu1 %v5706_v10  ;;  %v5748_v10 = vunpack.c.l.bf16 %v5678_v29 }
 0xa41   : > { %6391 = vmatpush1.msra.mxu0 %v5723_v36  ;;  %6319 = vmatprep.subr.mxu1 %v5704_v4  ;;  %v5746_v36 = vunpack.c.h.bf16 %v5676_v37  ;;  %v5747_v4 = vunpack.c.h.bf16 %v5677_v19 }
 0xa42   : > { %6392 = vmatprep.subr.mxu0 %v18843_v0  ;;  %6320 = vmatpush1.msra.mxu1 %v5703_v21  ;;  %v5743_v21 = vunpack.c.h.bf16 %v5674_v49 }
 0xa43   : > { %6393 = vmatpush1.msra.mxu0 %v5720_v23  ;;  %6321 = vmatprep.subr.mxu1 %v5701_v51  ;;  %v5744_v23 = vunpack.c.l.bf16 %v5677_v19  ;;  %v5672_v51 = vld [vmem:[%s14806_s24 + $0xe4] sm:$0xff] }
 0xa44   : > { %6394 = vmatprep.subr.mxu0 %v18843_v0  ;;  %6322 = vmatpush1.msra.mxu1 %v5700_v52  ;;  %v5673_v52 = vld [vmem:[%s14806_s24 + $0xe0] ss:$12 sps:$4 sm:$0xff]  }
 0xa45   : > { %6395 = vmatpush1.msra.mxu0 %v5717_v44  ;;  %6323 = vmatprep.subr.mxu1 %v5698_v38  ;;  %v5739_v44 = vunpack.c.l.bf16 %v5672_v51  ;;  %v5740_v38 = vunpack.c.h.bf16 %v5672_v51  ;;  %v5741_v40 = vunpack.c.h.bf16 %v5673_v52 }
 0xa46   : > { %6396 = vmatprep.subr.mxu0 %v18843_v0  ;;  %6324 = vmatpush1.msra.mxu1 %v5697_v1  ;;  %v5668_v1 = vld [vmem:[%s14806_s24 + $0xcc] sm:$0xff] }
 0xa47   : > { %6397 = vmatpush1.msra.mxu0 %v5714_v7  ;;  %6325 = vmatprep.subr.mxu1 %v5695_v58  ;;  %v5736_v7 = vunpack.c.l.bf16 %v5670_v50  ;;  %v5737_v58 = vunpack.c.h.bf16 %v5670_v50  ;;  %v5733_v8 = vunpack.c.l.bf16 %v5668_v1 }
 0xa48   : > { %6398 = vmatprep.subr.mxu0 %v18843_v0  ;;  %6326 = vmatpush1.msra.mxu1 %v5694_v41  ;;  %v5738_v41 = vunpack.c.l.bf16 %v5673_v52 }
 0xa49   : > { %6399 = vmatpush1.msra.mxu0 %v5711_v63  ;;  %6327 = vmatprep.subr.mxu1 %v5692_v30  ;;  %v5666_v63 = vld [vmem:[%s14806_s24 + $0xc0] sm:$0xff]  ;;  %v5734_v30 = vunpack.c.h.bf16 %v5668_v1 }
 0xa4a   : > { %6400 = vmatprep.subr.mxu0 %v18843_v0  ;;  %6328 = vmatpush1.msra.mxu1 %v5691_v6  ;;  %v5735_v6 = vunpack.c.h.bf16 %v5669_v14 }
 0xa4b   : > { %6401 = vmatpush1.msra.mxu0 %v5708_v5  ;;  %6329 = vmatprep.subr.mxu1 %v5689_v54  ;;  %v5731_v5 = vunpack.c.h.bf16 %v5666_v63 }
 0xa4c   : > { %6402 = vmatprep.subr.mxu0 %v18843_v0  ;;  %6330 = vmatpush1.msra.mxu1 %v5688_v43 }
 0xa4d   : > { %6403 = vmatpush1.msra.mxu0 %v5705_v61  ;;  %6331 = vmatprep.subr.mxu1 %v5686_v20  ;;  %v5730_v61 = vunpack.c.l.bf16 %v5666_v63 }
 0xa4e   : > { %6404 = vmatprep.subr.mxu0 %v18843_v0  ;;  %6332 = vmatpush1.msra.mxu1 %v5685_v46 }
 0xa4f   : > { %6405 = vmatpush1.msra.mxu0 %v5702_v53  ;;  %6333 = vmatprep.subr.mxu1 %v5683_v59  ;;  %v5623_v53 = vpop.permute.xlu1 %5622 }
 0xa50   : > { %6406 = vmatprep.subr.mxu0 %v18843_v0  ;;  %6334 = vmatpush1.msra.mxu1 %v5682_v26 }
 0xa51   : > { %6407 = vmatpush1.msra.mxu0 %v5699_v17  ;;  %6351 = vmatprep.subr.mxu1 %v5752_v15  ;;  %v5619_v17 = vpop.permute.xlu0 %5618 }
 0xa52   : > { %6408 = vmatprep.subr.mxu0 %v18843_v0  ;;  %6352 = vmatpush2.msra.mxu1 %v5751_v18 }
 0xa53   : > { %6409 = vmatpush1.msra.mxu0 %v5696_v11  ;;  %6353 = vmatprep.subr.mxu1 %v5749_v57  ;;  %v5621_v11 = vpop.permute.xlu1 %5620 }
 0xa54   : > { %6410 = vmatprep.subr.mxu0 %v18843_v0  ;;  %6354 = vmatpush2.msra.mxu1 %v5748_v10  ;;  %v5631_v20 = vsel %vm3757_vm10, %v16008_v25, %v5621_v11  ;;  %v5632_v25 = vsel %vm3757_vm10, %v16014_v35, %v5623_v53 }
 0xa55   : > { %6411 = vmatpush1.msra.mxu0 %v5693_v13  ;;  %6355 = vmatprep.subr.mxu1 %v5746_v36  ;;  %v5630_v13 = vsel %vm3757_vm10, %v16010_v56, %v5619_v17 }
 0xa56   : > { %6412 = vmatprep.subr.mxu0 %v18843_v0  ;;  %6356 = vmatpush2.msra.mxu1 %v5745_v24 }
 0xa57   : > { %6413 = vmatpush1.msra.mxu0 %v5690_v27  ;;  %6357 = vmatprep.subr.mxu1 %v5743_v21  ;;  %v5625_v55 = vpop.permute.xlu1 %5624 }
 0xa58   : > { %6414 = vmatprep.subr.mxu0 %v18843_v0  ;;  %6358 = vmatpush2.msra.mxu1 %v5742_v22  ;;  %v5633_v59 = vsel %vm3757_vm10, %v16012_v62, %v5625_v55 }
 0xa59   : > { %6415 = vmatpush1.msra.mxu0 %v5687_v12  ;;  %6359 = vmatprep.subr.mxu1 %v5740_v38 }
 0xa5a   : > { %6416 = vmatprep.subr.mxu0 %v18843_v0  ;;  %6360 = vmatpush2.msra.mxu1 %v5739_v44 }
 0xa5b   : > { %6417 = vmatpush1.msra.mxu0 %v5684_v34  ;;  %6361 = vmatprep.subr.mxu1 %v5737_v58 }
 0xa5c   : > { %6434 = vmatprep.subr.mxu0 %v18843_v0  ;;  %6362 = vmatpush2.msra.mxu1 %v5736_v7 }
 0xa5d   : > { %6435 = vmatpush2.msra.mxu0 %v5753_v31  ;;  %6363 = vmatprep.subr.mxu1 %v5734_v30 }
 0xa5e   : > { %6436 = vmatprep.subr.mxu0 %v18843_v0  ;;  %6364 = vmatpush2.msra.mxu1 %v5733_v8 }
 0xa5f   : > { %6437 = vmatpush2.msra.mxu0 %v5750_v32  ;;  %6365 = vmatprep.subr.mxu1 %v5731_v5 }
 0xa60   : > { %6438 = vmatprep.subr.mxu0 %v18843_v0  ;;  %6366 = vmatpush2.msra.mxu1 %v5730_v61 }
 0xa61   : > { %6439 = vmatpush2.msra.mxu0 %v5747_v4 }
 0xa62   : > { %6440 = vmatprep.subr.mxu0 %v18843_v0 }
 0xa63   : > { %6441 = vmatpush2.msra.mxu0 %v5744_v23 }
 0xa64   : > { %6442 = vmatprep.subr.mxu0 %v18843_v0 }
 0xa65   : > { %6443 = vmatpush2.msra.mxu0 %v5741_v40 }
 0xa66   : > { %6444 = vmatprep.subr.mxu0 %v18843_v0 }
 0xa67   : > { %6445 = vmatpush2.msra.mxu0 %v5738_v41 }
 0xa68   : > { %6446 = vmatprep.subr.mxu0 %v18843_v0 }
 0xa69   : > { %6447 = vmatpush2.msra.mxu0 %v5735_v6 }
 0xa6a   : > { %6448 = vmatprep.subr.mxu0 %v18843_v0 }
 0xa6b   : > { %6449 = vmatpush2.msra.mxu0 %v5732_v48 }
 0xaf1   : > { %v14454_v28 = vpop.f32.mrf.mxu1 }
 0xaf2   : > { %v5825_v26 = vcombine.low %v5631_v20, %v14454_v28 }
 0xaf3   : > { %v5449_v60 = vpop.f32.mrf.mxu1 }
 0xaf4   : > { %v5775_v27 = vcombine.low %v5630_v13, %v5449_v60  ;;  %v5776_v43 = vcombine.high %v5630_v13, %v5449_v60  ;;  %v5832_v62 = vrot.slane %v5825_v26, %v15352_v9 }
 0xaf6   : > { %v5783_v54 = vrot.slane %v5775_v27, %v15352_v9  ;;  %v5790_v16 = vrot.slane %v5776_v43, %v15352_v9  ;;  %v5839_v41 = vrot.slane %v5832_v62, %v15352_v9 }
 0xaf8   : > { %v5791_v39 = vcombine.high %v5783_v54, %v5783_v54  ;;  %v5792_v46 = vcombine.high %v5790_v16, %v5790_v16  ;;  %v5799_v12 = vrot.slane %v5783_v54, %v15352_v9  ;;  %v5806_v3 = vrot.slane %v5790_v16, %v15352_v9 }
 0xafa   : > { %v5813_v33 = vrot.slane %v5791_v39, %v15352_v9  ;;  %v5820_v56 = vrot.slane %v5792_v46, %v15352_v9 }
 0xafc   : > { %v5972_v34 = vcombine.low %v5799_v12, %v5813_v33  ;;  %v13795_v29 = vcombine.high %v5799_v12, %v5813_v33  ;;  %v5974_v15 = vcombine.low %v5806_v3, %v5820_v56  ;;  %v13796_v31 = vcombine.high %v5806_v3, %v5820_v56  ;;  %v14461_v18 = vpop.f32.mrf.mxu0 }
 0xafd   : > { %v5890_v37 = vcombine.low %v5633_v59, %v14461_v18 }
 0xafe   : > { %v5982_v19 = vrot.slane %v5972_v34, %v15352_v9  ;;  %v5989_v57 = vrot.slane %v13795_v29, %v15352_v9  ;;  %v5996_v32 = vrot.slane %v5974_v15, %v15352_v9  ;;  %v6003_v10 = vrot.slane %v13796_v31, %v15352_v9  ;;  %v5605_v49 = vpop.f32.mrf.mxu0 }
 0xaff   : > { %v5840_v36 = vcombine.low %v5632_v25, %v5605_v49  ;;  %v5841_v4 = vcombine.high %v5632_v25, %v5605_v49  ;;  %v5897_v35 = vrot.slane %v5890_v37, %v15352_v9  ;;  %v13648_v25 = vld [vmem:[%s14826_s23 + $0x2] ss:$8 sm:$0x7] }
 0xb00   : > { %v6005_v24 = vcombine.high %v5982_v19, %v5989_v57  ;;  %v6007_v21 = vcombine.high %v5996_v32, %v6003_v10  ;;  %v6004_v22 = vcombine.low %v5982_v19, %v5989_v57  ;;  %v6006_v23 = vcombine.low %v5996_v32, %v6003_v10 }
 0xb01   : > { %v5848_v51 = vrot.slane %v5840_v36, %v15352_v9  ;;  %v5855_v52 = vrot.slane %v5841_v4, %v15352_v9  ;;  %v5904_v48 = vrot.slane %v5897_v35, %v15352_v9  ;;  %v5758_v37 = vrot.slane %v13648_v25, %v15316_v2 }
 0xb02   : > { %v6021_v50 = vrot.slane %v6005_v24, %v15352_v9  ;;  %v6035_v44 = vrot.slane %v6007_v21, %v15352_v9  ;;  %v6014_v38 = vrot.slane %v6004_v22, %v15352_v9  ;;  %v6028_v40 = vrot.slane %v6006_v23, %v15352_v9 }
 0xb03   : > { %v5856_v1 = vcombine.high %v5848_v51, %v5848_v51  ;;  %v5857_v14 = vcombine.high %v5855_v52, %v5855_v52  ;;  %v5864_v7 = vrot.slane %v5848_v51, %v15352_v9  ;;  %v5871_v58 = vrot.slane %v5855_v52, %v15352_v9 }
 0xb04   : > { %v6037_v63 = vcombine.low %v6021_v50, %v6035_v44  ;;  %v6036_v30 = vcombine.low %v6014_v38, %v6028_v40  ;;  %v5762_v19 = vrot.slane %v13648_v25, %v15319_v45  ;;  %v5766_v57 = vrot.slane %v13648_v25, %v15322_v47 }
 0xb05   : > { %v5878_v8 = vrot.slane %v5856_v1, %v15352_v9  ;;  %v5885_v6 = vrot.slane %v5857_v14, %v15352_v9  ;;  %v5886_v5 = vcombine.high %v5864_v7, %v5864_v7  ;;  %v5887_v61 = vcombine.high %v5871_v58, %v5871_v58 }
 0xb06   : > { %v6038_v53 = vcombine.low %v5839_v41, %v5864_v7  ;;  %13799 = vmatprep.mubr.msk.f32.mxu1 %vm3757_vm10, %v6037_v63  ;;  %13802 = vmatprep.mubr.msk.f32.mxu0 %vm3757_vm10, %v6037_v63  ;;  %v5905_v32 = vcombine.low %v5758_v37, %v5762_v19  ;;  %v5906_v10 = vcombine.high %v5758_v37, %v5762_v19 }
 0xb07   : > { %v5888_v17 = vcombine.high %v5878_v8, %v5878_v8  ;;  %v5889_v28 = vcombine.high %v5885_v6, %v5885_v6  ;;  %v6039_v11 = vcombine.low %v5878_v8, %v5886_v5  ;;  %v6041_v13 = vcombine.low %v5885_v6, %v5887_v61  ;;  %6368 = vmatmul.mubr.f32.vlgmr.msra.gmra.mxu1 %v6036_v30 }
 0xb08   : > { %6451 = vmatmul.mubr.f32.vlgmr.msra.gmra.mxu0 %v6036_v30  ;;  %v6048_v27 = vrot.slane %v6038_v53, %v15352_v9  ;;  %v5907_v49 = vcombine.high %v5766_v57, %v5766_v57  ;;  %v5914_v62 = vrot.slane %v5905_v32, %v15352_v9  ;;  %v5921_v36 = vrot.slane %v5906_v10, %v15352_v9 }
 0xb09   : > { %v6040_v60 = vcombine.low %v5888_v17, %v5871_v58  ;;  %v6055_v43 = vrot.slane %v6039_v11, %v15352_v9  ;;  %v6104_v54 = vcombine.low %v5889_v28, %v5904_v48  ;;  %v6069_v16 = vrot.slane %v6041_v13, %v15352_v9 }
 0xb0a   : > { %v5928_v4 = vrot.slane %v5766_v57, %v15352_v9  ;;  %v5935_v24 = vrot.slane %v5907_v49, %v15352_v9 }
 0xb0b   : > { %v6062_v55 = vrot.slane %v6040_v60, %v15352_v9  ;;  %v6071_v39 = vcombine.high %v6048_v27, %v6055_v43  ;;  %v6070_v46 = vcombine.low %v6048_v27, %v6055_v43  ;;  %v6111_v20 = vrot.slane %v6104_v54, %v15352_v9 }
 0xb0c   : > { %v5936_v21 = vcombine.low %v5914_v62, %v5928_v4  ;;  %v5937_v22 = vcombine.high %v5914_v62, %v5928_v4  ;;  %v5938_v23 = vcombine.low %v5921_v36, %v5935_v24  ;;  %v5939_v35 = vcombine.high %v5921_v36, %v5935_v24 }
 0xb0d   : > { %v6073_v12 = vcombine.high %v6062_v55, %v6069_v16  ;;  %v6072_v3 = vcombine.low %v6062_v55, %v6069_v16  ;;  %v6087_v33 = vrot.slane %v6071_v39, %v15352_v9  ;;  %v6080_v26 = vrot.slane %v6070_v46, %v15352_v9 }
 0xb0e   : > { %v6112_v34 = vcombine.high %v6111_v20, %v6111_v20  ;;  %v6119_v18 = vrot.slane %v6111_v20, %v15352_v9  ;;  %v5946_v51 = vrot.slane %v5936_v21, %v15352_v9  ;;  %v5953_v52 = vrot.slane %v5938_v23, %v15352_v9 }
 0xb0f   : > { %v6101_v56 = vrot.slane %v6073_v12, %v15352_v9  ;;  %v6094_v59 = vrot.slane %v6072_v3, %v15352_v9  ;;  %v5960_v50 = vrot.slane %v5937_v22, %v15352_v9  ;;  %v5967_v44 = vrot.slane %v5939_v35, %v15352_v9 }
 0xb10   : > { %v6126_v31 = vrot.slane %v6112_v34, %v15352_v9  ;;  %v5968_v6 = vcombine.high %v5946_v51, %v5946_v51  ;;  %v5969_v5 = vcombine.high %v5953_v52, %v5953_v52  ;;  %v6197_v11 = vcombine.low %v5946_v51, %v5946_v51 }
 0xb11   : > { %v6103_v29 = vcombine.low %v6087_v33, %v6101_v56  ;;  %v6102_v15 = vcombine.low %v6080_v26, %v6094_v59  ;;  %v6130_v38 = vcombine.low %v5946_v51, %v5960_v50  ;;  %v13797_v40 = vcombine.high %v5946_v51, %v5960_v50 }
 0xb12   : > { %v6132_v1 = vcombine.low %v5953_v52, %v5967_v44  ;;  %v13798_v14 = vcombine.high %v5953_v52, %v5967_v44  ;;  %v5970_v61 = vcombine.high %v5960_v50, %v5960_v50  ;;  %v6198_v13 = vcombine.low %v5960_v50, %v5968_v6 }
 0xb13   : > { %13800 = vmatprep.mubr.msk.f32.mxu1 %vm3757_vm10, %v6103_v29  ;;  %13803 = vmatprep.mubr.msk.f32.mxu0 %vm3757_vm10, %v6103_v29  ;;  %v6140_v7 = vrot.slane %v6130_v38, %v15352_v9  ;;  %v6147_v58 = vrot.slane %v13797_v40, %v15352_v9  ;;  %v6200_v27 = vcombine.low %v5967_v44, %v5969_v5 }
 0xb14   : > { %6374 = vmatmul.mubr.f32.gmra.mxu1 %v6102_v15  ;;  %6456 = vmatmul.mubr.f32.gmra.mxu0 %v6102_v15  ;;  %v6154_v41 = vrot.slane %v6132_v1, %v15352_v9  ;;  %v6161_v63 = vrot.slane %v13798_v14, %v15352_v9  ;;  %v6199_v60 = vcombine.low %v5970_v61, %v5953_v52 }
 0xb15   : > { %13801 = vmatprep.mubr.msk.f32.mxu1 %vm3757_vm10, %v6126_v31  ;;  %13804 = vmatprep.mubr.msk.f32.mxu0 %vm3757_vm10, %v6126_v31  ;;  %v6162_v30 = vcombine.low %v6140_v7, %v6147_v58  ;;  %v6163_v48 = vcombine.high %v6140_v7, %v6147_v58  ;;  %v6207_v55 = vrot.slane %v6197_v11, %v15352_v9 }
 0xb16   : > { %v6164_v8 = vcombine.low %v6154_v41, %v6161_v63  ;;  %v6165_v53 = vcombine.high %v6154_v41, %v6161_v63  ;;  %v6214_v39 = vrot.slane %v6198_v13, %v15352_v9  ;;  %v6221_v46 = vrot.slane %v6199_v60, %v15352_v9 }
 0xb17   : > { %v6172_v17 = vrot.slane %v6162_v30, %v15352_v9  ;;  %v6179_v43 = vrot.slane %v6163_v48, %v15352_v9  ;;  %v6228_v20 = vrot.slane %v6200_v27, %v15352_v9  ;;  %v5971_v12 = vcombine.high %v5967_v44, %v5967_v44 }
 0xb18   : > { %6380 = vmatmul.mubr.f32.gmra.mxu1 %v6119_v18  ;;  %6461 = vmatmul.mubr.f32.gmra.mxu0 %v6119_v18  ;;  %v6186_v28 = vrot.slane %v6164_v8, %v15352_v9  ;;  %v6193_v54 = vrot.slane %v6165_v53, %v15352_v9  ;;  %v6229_v29 = vcombine.low %v6207_v55, %v6214_v39 }
 0xb19   : > { %8861 = vmatprep.mubr.f32.mxu0 %v18843_v0  ;;  %v6231_v15 = vcombine.low %v6221_v46, %v6228_v20  ;;  %v6264_v31 = vcombine.low %v5971_v12, %v5946_v51  ;;  %v6230_v57 = vcombine.high %v6207_v55, %v6214_v39  ;;  %v6232_v32 = vcombine.high %v6221_v46, %v6228_v20 }
 0xb1a   : > { %v6195_v16 = vcombine.high %v6172_v17, %v6186_v28  ;;  %v6194_v3 = vcombine.low %v6172_v17, %v6186_v28  ;;  %v6196_v33 = vcombine.low %v6179_v43, %v6193_v54  ;;  %v6239_v62 = vrot.slane %v6229_v29, %v15352_v9 }
 0xb1b   : > { %v6253_v36 = vrot.slane %v6231_v15, %v15352_v9  ;;  %v6271_v4 = vrot.slane %v6264_v31, %v15352_v9  ;;  %v6246_v35 = vrot.slane %v6230_v57, %v15352_v9  ;;  %v6260_v51 = vrot.slane %v6232_v32, %v15352_v9 }
 0xb1d   : > { %v6262_v40 = vcombine.high %v6239_v62, %v6253_v36  ;;  %v6279_v1 = vrot.slane %v6271_v4, %v15352_v9  ;;  %v6261_v63 = vcombine.low %v6239_v62, %v6253_v36  ;;  %v6263_v30 = vcombine.low %v6246_v35, %v6260_v51 }
 0xb1e   : > { %v6272_v8 = vcombine.high %v6271_v4, %v6271_v4 }
 0xb1f   : > { %v6287_v11 = vcombine.high %v6279_v1, %v6279_v1 }
 0xb20   : > { %v6286_v20 = vrot.slane %v6272_v8, %v15352_v9  ;;  %v14651_v8 = vld [vmem:[#allocation2 + $0x8] sm:$0xff] }
 0xbc7   : > { %v6369_v56 = vpop.f32.mrf.mxu1 }
 0xbc8   : > { %v6452_v26 = vpop.f32.mrf.mxu0  ;;  %v6370_v18 = vadd.f32 %v6369_v56, %v6194_v3 }
 0xbc9   : > { %v6453_v59 = vadd.f32 %v6452_v26, %v6195_v16  ;;  %v6371_v34 = vpop.f32.mrf.mxu1 }
 0xbca   : > { %v6372_v25 = vadd.f32 %v6371_v34, %v6196_v33  ;;  %v6454_v37 = vpop.f32.mrf.mxu0 }
 0xbcb   : > { %v6477_v19 = vcombine.high %v6453_v59, %v6453_v59  ;;  %v6498_v24 = vrot.slane %v6453_v59, %v15352_v9 }
 0xbcc   : > { %v6475_v10 = vcombine.low %v6370_v18, %v6372_v25  ;;  %v6476_v49 = vcombine.high %v6370_v18, %v6372_v25 }
 0xbcd   : > { %v6505_v21 = vrot.slane %v6477_v19, %v15352_v9 }
 0xbce   : > { %v6484_v22 = vrot.slane %v6475_v10, %v15352_v9  ;;  %v6491_v23 = vrot.slane %v6476_v49, %v15352_v9 }
 0xbd0   : > { %v6506_v52 = vcombine.low %v6484_v22, %v6498_v24  ;;  %v6507_v50 = vcombine.high %v6484_v22, %v6498_v24  ;;  %v6508_v44 = vcombine.low %v6491_v23, %v6505_v21  ;;  %v6509_v38 = vcombine.high %v6491_v23, %v6505_v21 }
 0xbd2   : > { %v6516_v14 = vrot.slane %v6506_v52, %v15352_v9  ;;  %v6523_v7 = vrot.slane %v6508_v44, %v15352_v9  ;;  %v6530_v58 = vrot.slane %v6507_v50, %v15352_v9  ;;  %v6537_v41 = vrot.slane %v6509_v38, %v15352_v9  ;;  %v14649_v44 = vld [vmem:[#allocation2] sm:$0xff] }
 0xbd4   : > { %v6640_v6 = vcombine.low %v6516_v14, %v6530_v58  ;;  %v13805_v5 = vcombine.high %v6516_v14, %v6530_v58  ;;  %v6642_v61 = vcombine.low %v6523_v7, %v6537_v41  ;;  %v13806_v48 = vcombine.high %v6523_v7, %v6537_v41  ;;  %v6375_v53 = vpop.f32.mrf.mxu1  ;;  %v6457_v17 = vpop.f32.mrf.mxu0 }
 0xbd5   : > { %v6458_v28 = vadd.f32 %v6457_v17, %v6262_v40  ;;  %v6376_v55 = vadd.f32 %v6375_v53, %v6261_v63  ;;  %v14650_v40 = vld [vmem:[#allocation2 + $0x10] sm:$0xff] }
 0xbd6   : > { %v6650_v13 = vrot.slane %v6640_v6, %v15352_v9  ;;  %v6657_v60 = vrot.slane %v13805_v5, %v15352_v9  ;;  %v6664_v27 = vrot.slane %v6642_v61, %v15352_v9  ;;  %v6671_v43 = vrot.slane %v13806_v48, %v15352_v9  ;;  %v6377_v54 = vpop.f32.mrf.mxu1  ;;  %v6459_v16 = vpop.f32.mrf.mxu0 }
 0xbd7   : > { %v6544_v39 = vcombine.high %v6458_v28, %v6458_v28  ;;  %v6378_v46 = vadd.f32 %v6377_v54, %v6263_v30  ;;  %v6565_v34 = vrot.slane %v6458_v28, %v15352_v9 }
 0xbd8   : > { %v6381_v12 = vpop.f32.mrf.mxu1  ;;  %v6462_v3 = vpop.f32.mrf.mxu0  ;;  %v6672_v33 = vcombine.low %v6650_v13, %v6657_v60  ;;  %v6673_v56 = vcombine.high %v6650_v13, %v6657_v60  ;;  %v6674_v26 = vcombine.low %v6664_v27, %v6671_v43  ;;  %v6675_v59 = vcombine.high %v6664_v27, %v6671_v43 }
 0xbd9   : > { %v6542_v29 = vcombine.low %v6376_v55, %v6378_v46  ;;  %v6543_v15 = vcombine.high %v6376_v55, %v6378_v46  ;;  %v6572_v31 = vrot.slane %v6544_v39, %v15352_v9  ;;  %v6382_v36 = vadd.f32 %v6381_v12, %v6279_v1 }
 0xbda   : > { %v6383_v18 = vpop.f32.mrf.mxu1  ;;  %v6464_v25 = vpop.f32.mrf.mxu0  ;;  %v6682_v37 = vrot.slane %v6672_v33, %v15352_v9  ;;  %v6689_v19 = vrot.slane %v6673_v56, %v15352_v9  ;;  %v6696_v57 = vrot.slane %v6674_v26, %v15352_v9  ;;  %v6703_v62 = vrot.slane %v6675_v59, %v15352_v9 }
 0xbdb   : > { %v6551_v32 = vrot.slane %v6542_v29, %v15352_v9  ;;  %v6558_v10 = vrot.slane %v6543_v15, %v15352_v9  ;;  %v6384_v49 = vadd.f32 %v6383_v18, %v6286_v20  ;;  %v6463_v4 = vadd.f32 %v6462_v3, %v6287_v11  ;;  %v14653_v25 = vld [vmem:[#allocation2 + $0x20] sm:$0x1] }
 0xbdc   : > { %v6704_v24 = vcombine.low %v6682_v37, %v6696_v57  ;;  %v6705_v21 = vcombine.high %v6682_v37, %v6696_v57  ;;  %v6706_v50 = vcombine.low %v6689_v19, %v6703_v62 }
 0xbdd   : > { %v6573_v22 = vcombine.low %v6551_v32, %v6565_v34  ;;  %v6574_v23 = vcombine.high %v6551_v32, %v6565_v34  ;;  %v6575_v35 = vcombine.low %v6558_v10, %v6572_v31  ;;  %v6576_v51 = vcombine.high %v6558_v10, %v6572_v31  ;;  %v14652_v34 = vld [vmem:[#allocation2 + $0x18] sm:$0x1]  ;;  %v14654_v32 = vld [vmem:[#allocation2 + $0x28] sm:$0x1] }
 0xbde   : > { %v6609_v52 = vcombine.low %v6382_v36, %v6384_v49  ;;  %v16253_v38 = vadd.f32 %v14649_v44, %v6704_v24  ;;  %v16255_v14 = vadd.f32 %v14650_v40, %v6705_v21  ;;  %v6623_v63 = vrot.slane %v6463_v4, %v15352_v9  ;;  %v14655_v21 = vld [vmem:[#allocation2 + $0x48] sm:$0x1]  ;;  %v14657_v40 = vld [vmem:[#allocation2 + $0x58] sm:$0x1] }
 0xbdf   : > { %v6583_v7 = vrot.slane %v6573_v22, %v15352_v9  ;;  %v6590_v58 = vrot.slane %v6575_v35, %v15352_v9  ;;  %v6597_v1 = vrot.slane %v6574_v23, %v15352_v9  ;;  %v6604_v41 = vrot.slane %v6576_v51, %v15352_v9 }
 0xbe0   : > { %18844 = vst [vmem:[#allocation10_spill] sm:$0xff] %v16253_v38  ;;  %18845 = vst [vmem:[#allocation11_spill] sm:$0xff] %v16255_v14  ;;  %v6616_v30 = vrot.slane %v6609_v52, %v15352_v9  ;;  %v16263_v6 = vadd.f32 %v14651_v8, %v6706_v50  ;;  %v6845_v53 = vsel %vm1853_vm6, %v16255_v14, 0.0  ;;  %v14656_v50 = vld [vmem:[#allocation2 + $0x50] sm:$0x1] }
 0xbe1   : > { %v6605_v5 = vcombine.high %v6583_v7, %v6583_v7  ;;  %v6606_v61 = vcombine.high %v6590_v58, %v6590_v58  ;;  %v6607_v48 = vcombine.high %v6597_v1, %v6597_v1  ;;  %v6713_v17 = vrot.slane %v6583_v7, %v15352_v9 }
 0xbe2   : > { %18846 = vst [vmem:[#allocation12_spill] sm:$0xff] %v16263_v6  ;;  %v6624_v28 = vcombine.low %v6616_v30, %v6623_v63  ;;  %v6625_v11 = vcombine.high %v6616_v30, %v6623_v63  ;;  %v6844_v13 = vadd.f32 %v16263_v6, %v16253_v38  ;;  %v6608_v60 = vcombine.high %v6604_v41, %v6604_v41 }
 0xbe3   : > { %v6730_v27 = vcombine.low %v6597_v1, %v6605_v5  ;;  %v6731_v43 = vcombine.low %v6607_v48, %v6590_v58  ;;  %v6714_v54 = vcombine.high %v6713_v17, %v6713_v17  ;;  %v6732_v46 = vcombine.low %v6604_v41, %v6606_v61 }
 0xbe4   : > { %v6632_v16 = vrot.slane %v6624_v28, %v15352_v9  ;;  %v6639_v55 = vrot.slane %v6625_v11, %v15352_v9  ;;  %v6846_v39 = vadd.f32 %v6845_v53, %v6844_v13  ;;  %v6721_v3 = vrot.slane %v6713_v17, %v15352_v9  ;;  %v14658_v13 = vld [vmem:[#allocation2 + $0x30] sm:$0xff] }
 0xbe5   : > { %v6740_v20 = vrot.slane %v6730_v27, %v15352_v9  ;;  %v6747_v12 = vrot.slane %v6731_v43, %v15352_v9  ;;  %v6728_v26 = vrot.slane %v6714_v54, %v15352_v9  ;;  %v6754_v57 = vrot.slane %v6732_v46, %v15352_v9  ;;  %v14659_v27 = vld [vmem:[#allocation2 + $0x38] sm:$0xff]  ;;  %v14660_v54 = vld [vmem:[#allocation2 + $0x40] sm:$0xff] }
 0xbe6   : > { %v6733_v33 = vcombine.low %v6608_v60, %v6632_v16  ;;  %v6803_v56 = vrot.slane %v6639_v55, %v15352_v9  ;;  %6847 = vadd.xlane.f32.xlu0 %v6846_v39  ;;  %v6729_v59 = vcombine.high %v6721_v3, %v6721_v3  ;;  %v16277_v29 = vadd.f32 %v14652_v34, %v6721_v3  ;;  %v7065_v3 = vld [vmem:[%s14811_s28 + $0x208] sm:$0xff]  ;;  %v7060_v34 = vld [vmem:[%s14811_s28 + $0x1e0] sm:$0xff] }
 0xbe7   : > { %v6762_v15 = vcombine.low %v6740_v20, %v6747_v12  ;;  %v16280_v37 = vadd.f32 %v14653_v25, %v6728_v26  ;;  %v6763_v62 = vcombine.high %v6740_v20, %v6747_v12  ;;  %v7075_v20 = vld [vmem:[%s14811_s28 + $0x258] sm:$0xff]  ;;  %v7070_v12 = vld [vmem:[%s14811_s28 + $0x230] sm:$0xff]  ;;  %v7316_v25 = vunpack.c.h.bf16 %v7060_v34 }
 0xbe8   : > { %18847 = vst [vmem:[#allocation13_spill] sm:$0xff] %v16277_v29  ;;  %v6761_v31 = vrot.slane %v6733_v33, %v15352_v9  ;;  %v6804_v18 = vcombine.high %v6803_v56, %v6803_v56  ;;  %v6811_v19 = vrot.slane %v6803_v56, %v15352_v9  ;;  %v16284_v10 = vadd.f32 %v14654_v32, %v6729_v59 }
 0xbe9   : > { %18848 = vst [vmem:[#allocation14_spill] sm:$0xff] %v16280_v37  ;;  %v6849_v49 = vsel %vm1858_vm7, %v16277_v29, 0.0  ;;  %v6850_v36 = vsel %vm1858_vm7, %v16280_v37, 0.0  ;;  %v6772_v58 = vrot.slane %v6762_v15, %v15352_v9  ;;  %v6779_v41 = vrot.slane %v6763_v62, %v15352_v9  ;;  %v7045_v62 = vld [vmem:[%s14811_s28 + $0x168] sm:$0xff] }
 0xbea   : > { %18849 = vst [vmem:[#allocation15_spill] sm:$0xff] %v16284_v10  ;;  %v6818_v4 = vrot.slane %v6804_v18, %v15352_v9  ;;  %v6819_v24 = vcombine.high %v6811_v19, %v6811_v19  ;;  %v16291_v22 = vadd.f32 %v14655_v21, %v6811_v19  ;;  %v6851_v23 = vadd.f32 %v6850_v36, %v6849_v49  ;;  %v7055_v18 = vld [vmem:[%s14811_s28 + $0x1b8] sm:$0xff] }
 0xbeb   : > { %v6764_v35 = vcombine.low %v6754_v57, %v6761_v31  ;;  %v6765_v51 = vcombine.high %v6754_v57, %v6761_v31  ;;  %v6852_v52 = vsel %vm1862_vm8, %v16284_v10, 0.0  ;;  %v7345_v33 = vunpack.c.l.bf16 %v7075_v20  ;;  %v7050_v57 = vld [vmem:[%s14811_s28 + $0x190] sm:$0xff] }
 0xbec   : > { %18850 = vst [vmem:[#allocation16_spill] sm:$0xff] %v16291_v22  ;;  %v16295_v44 = vadd.f32 %v14656_v50, %v6818_v4  ;;  %v16297_v7 = vadd.f32 %v14657_v40, %v6819_v24  ;;  %v6853_v1 = vadd.f32 %v6852_v52, %v6851_v23  ;;  %v6861_v8 = vsel %vm1858_vm7, %v16291_v22, 0.0  ;;  %v7040_v24 = vld [vmem:[%s14811_s28 + $0x140] sm:$0xff]  ;;  %v7030_v50 = vld [vmem:[%s14811_s28 + $0xf0] sm:$0xff] }
 0xbed   : > { %v6786_v63 = vrot.slane %v6764_v35, %v15352_v9  ;;  %v6793_v30 = vrot.slane %v6765_v51, %v15352_v9  ;;  %v7346_v56 = vunpack.c.h.bf16 %v7075_v20  ;;  %v7336_v26 = vunpack.c.h.bf16 %v7070_v12  ;;  %v7035_v35 = vld [vmem:[%s14811_s28 + $0x118] sm:$0xff] }
 0xbee   : > { %18851 = vst [vmem:[#allocation17_spill] sm:$0xff] %v16295_v44  ;;  %18852 = vst [vmem:[#allocation18_spill] sm:$0xff] %v16297_v7  ;;  %v6862_v5 = vsel %vm1858_vm7, %v16295_v44, 0.0  ;;  %6854 = vadd.xlane.f32.xlu0 %v6853_v1  ;;  %v6864_v28 = vsel %vm1862_vm8, %v16297_v7, 0.0  ;;  %v7335_v59 = vunpack.c.l.bf16 %v7070_v12  ;;  %v7326_v15 = vunpack.c.h.bf16 %v7065_v3  ;;  %v7025_v1 = vld [vmem:[%s14811_s28 + $0xc8] sm:$0xff] }
 0xbef   : > { %v6863_v61 = vadd.f32 %v6862_v5, %v6861_v8  ;;  %v6794_v48 = vcombine.low %v6772_v58, %v6786_v63  ;;  %v6795_v53 = vcombine.high %v6772_v58, %v6786_v63  ;;  %v6796_v17 = vcombine.low %v6779_v41, %v6793_v30  ;;  %8714 = vmatprep.subr.mxu1 %v7346_v56 }
 0xbf0   : > { %8715 = vmatpush1.msra.mxu1 %v7345_v33  ;;  %v7325_v31 = vunpack.c.l.bf16 %v7065_v3  ;;  %v7315_v19 = vunpack.c.l.bf16 %v7060_v34  ;;  %v7306_v32 = vunpack.c.h.bf16 %v7055_v18  ;;  %v7305_v49 = vunpack.c.l.bf16 %v7055_v18 }
 0xbf1   : > { %v6865_v11 = vadd.f32 %v6864_v28, %v6863_v61  ;;  %v16309_v60 = vadd.f32 %v14658_v13, %v6794_v48  ;;  %v16311_v43 = vadd.f32 %v14659_v27, %v6796_v17  ;;  %v16313_v16 = vadd.f32 %v14660_v54, %v6795_v53  ;;  %8716 = vmatprep.subr.mxu1 %v7336_v26 }
 0xbf2   : > { %8717 = vmatpush1.msra.mxu1 %v7335_v59  ;;  %v7296_v36 = vunpack.c.h.bf16 %v7050_v57  ;;  %v7295_v4 = vunpack.c.l.bf16 %v7050_v57  ;;  %v7286_v21 = vunpack.c.h.bf16 %v7045_v62  ;;  %v7285_v23 = vunpack.c.l.bf16 %v7045_v62 }
 0xbf3   : > { %18853 = vst [vmem:[#allocation19_spill] sm:$0xff] %v16309_v60  ;;  %18854 = vst [vmem:[#allocation20_spill] sm:$0xff] %v16311_v43  ;;  %6866 = vadd.xlane.f32.xlu0 %v6865_v11  ;;  %v6856_v55 = vadd.f32 %v16311_v43, %v16309_v60  ;;  %v6857_v39 = vsel %vm1853_vm6, %v16313_v16, 0.0  ;;  %8718 = vmatprep.subr.mxu1 %v7326_v15  ;;  %v7276_v51 = vunpack.c.h.bf16 %v7040_v24  ;;  %v7275_v52 = vunpack.c.l.bf16 %v7040_v24 }
 0xbf4   : > { %18855 = vst [vmem:[#allocation21_spill] sm:$0xff] %v16313_v16  ;;  %8719 = vmatpush1.msra.mxu1 %v7325_v31  ;;  %v7266_v40 = vunpack.c.h.bf16 %v7035_v35  ;;  %v7265_v58 = vunpack.c.l.bf16 %v7035_v35  ;;  %v7256_v41 = vunpack.c.h.bf16 %v7030_v50  ;;  %v7255_v63 = vunpack.c.l.bf16 %v7030_v50 }
 0xbf5   : > { %v6858_v46 = vadd.f32 %v6857_v39, %v6856_v55  ;;  %8720 = vmatprep.subr.mxu1 %v7316_v25  ;;  %v7246_v30 = vunpack.c.h.bf16 %v7025_v1  ;;  %v7245_v8 = vunpack.c.l.bf16 %v7025_v1 }
 0xbf6   : > { %8721 = vmatpush1.msra.mxu1 %v7315_v19 }
 0xbf7   : > { %6859 = vadd.xlane.f32.xlu1 %v6858_v46  ;;  %8722 = vmatprep.subr.mxu1 %v7306_v32 }
 0xbf8   : > { %8723 = vmatpush1.msra.mxu1 %v7305_v49 }
 0xbf9   : > { %8724 = vmatprep.subr.mxu1 %v7296_v36 }
 0xbfa   : > { %8725 = vmatpush1.msra.mxu1 %v7295_v4 }
 0xbfb   : > { %8726 = vmatprep.subr.mxu1 %v7286_v21 }
 0xbfc   : > { %8727 = vmatpush1.msra.mxu1 %v7285_v23 }
 0xbfd   : > { %8728 = vmatprep.subr.mxu1 %v7276_v51 }
 0xbfe   : > { %8729 = vmatpush1.msra.mxu1 %v7275_v52 }
 0xbff   : > { %8730 = vmatprep.subr.mxu1 %v7266_v40 }
 0xc00   : > { %8731 = vmatpush1.msra.mxu1 %v7265_v58 }
 0xc01   : > { %8732 = vmatprep.subr.mxu1 %v7256_v41 }
 0xc02   : > { %8733 = vmatpush1.msra.mxu1 %v7255_v63 }
 0xc03   : > { %8734 = vmatprep.subr.mxu1 %v7246_v30 }
 0xc04   : > { %8735 = vmatpush1.msra.mxu1 %v7245_v8 }
 0xc6f   : > { %v6848_v5 = vpop.xlane.xlu0 %6847 }
 0xc70   : > { %v6868_v61 = vmul.f32 0.0032467532, %v6848_v5 }
 0xc72   : > { %v16331_v48 = vsub.f32 %v16253_v38, %v6868_v61  ;;  %v16334_v53 = vsub.f32 %v16263_v6, %v6868_v61  ;;  %v16337_v17 = vsub.f32 %v16255_v14, %v6868_v61 }
 0xc74   : > { %v6884_v28 = vmul.f32 %v16331_v48, %v16331_v48  ;;  %v6885_v11 = vmul.f32 %v16334_v53, %v16334_v53  ;;  %v6886_v13 = vmul.f32 %v16337_v17, %v16337_v17 }
 0xc76   : > { %v6896_v27 = vadd.f32 %v6885_v11, %v6884_v28  ;;  %v6897_v54 = vsel %vm1853_vm6, %v6886_v13, 0.0  ;;  %v7020_v28 = vld [vmem:[%s14811_s28 + $0xa0] sm:$0xff] }
 0xc77   : > { %v6855_v55 = vpop.xlane.xlu0 %6854  ;;  %v7235_v11 = vunpack.c.l.bf16 %v7020_v28  ;;  %v7236_v13 = vunpack.c.h.bf16 %v7020_v28 }
 0xc78   : > { %v6898_v39 = vadd.f32 %v6897_v54, %v6896_v27  ;;  %v6869_v46 = vmul.f32 0.0032467532, %v6855_v55  ;;  %v7015_v27 = vld [vmem:[%s14811_s28 + $0x78] sm:$0xff]  ;;  %v7010_v54 = vld [vmem:[%s14811_s28 + $0x50] sm:$0xff] }
 0xc79   : > { %v7225_v55 = vunpack.c.l.bf16 %v7015_v27  ;;  %8736 = vmatprep.subr.mxu1 %v7236_v13  ;;  %v7185_v13 = vld [vmem:[%s14811_s28 + $0x5c8] sm:$0xff] }
 0xc7a   : > { %6899 = vadd.xlane.f32.xlu0 %v6898_v39  ;;  %v16347_v20 = vsub.f32 %v16277_v29, %v6869_v46  ;;  %v16350_v12 = vsub.f32 %v16280_v37, %v6869_v46  ;;  %v16353_v3 = vsub.f32 %v16284_v10, %v6869_v46  ;;  %v7226_v39 = vunpack.c.h.bf16 %v7015_v27  ;;  %v7005_v46 = vld [vmem:[%s14811_s28 + $0x28] sm:$0xff]  ;;  %8737 = vmatpush1.msra.mxu1 %v7235_v11  ;;  %v7120_v11 = vld [vmem:[%s14811_s28 + $0x3c0] sm:$0xff] }
 0xc7b   : > { %v7586_v10 = vld [vmem:[%s14816_s12 + $0x8] sm:$0x3] }
 0xc7c   : > { %v6867_v33 = vpop.xlane.xlu0 %6866  ;;  %v6887_v26 = vmul.f32 %v16347_v20, %v16347_v20  ;;  %v6888_v59 = vmul.f32 %v16350_v12, %v16350_v12  ;;  %v6889_v34 = vmul.f32 %v16353_v3, %v16353_v3  ;;  %8738 = vmatprep.subr.mxu1 %v7226_v39  ;;  %v7180_v39 = vld [vmem:[%s14811_s28 + $0x5a0] sm:$0xff] }
 0xc7d   : > { %v6871_v56 = vmul.f32 0.0032467532, %v6867_v33  ;;  %v7216_v33 = vunpack.c.h.bf16 %v7010_v54  ;;  %8739 = vmatpush1.msra.mxu1 %v7225_v55 }
 0xc7e   : > { %v6901_v18 = vsel %vm1858_vm7, %v6887_v26, 0.0  ;;  %v6902_v19 = vsel %vm1858_vm7, %v6888_v59, 0.0  ;;  %v6904_v49 = vsel %vm1862_vm8, %v6889_v34, 0.0  ;;  %v7000_v26 = vld [vmem:[%s14811_s28] sm:$0xff]  ;;  %v7206_v59 = vunpack.c.h.bf16 %v7005_v46 }
 0xc7f   : > { %v16362_v15 = vsub.f32 %v16291_v22, %v6871_v56  ;;  %v16365_v31 = vsub.f32 %v16295_v44, %v6871_v56  ;;  %v6903_v32 = vadd.f32 %v6902_v19, %v6901_v18  ;;  %v16384_v35 = vsub.f32 %v16297_v7, %v6871_v56  ;;  %8740 = vmatprep.subr.mxu1 %v7216_v33  ;;  %v7155_v19 = vld [vmem:[%s14811_s28 + $0x4d8] sm:$0xff] }
 0xc80   : > { %v6860_v25 = vpop.xlane.xlu1 %6859  ;;  %v7215_v56 = vunpack.c.l.bf16 %v7010_v54  ;;  %v7205_v34 = vunpack.c.l.bf16 %v7005_v46  ;;  %v7196_v18 = vunpack.c.h.bf16 %v7000_v26  ;;  %v7115_v33 = vld [vmem:[%s14811_s28 + $0x398] sm:$0xff] }
 0xc81   : > { %v6870_v57 = vmul.f32 0.0032467532, %v6860_v25  ;;  %v6893_v62 = vmul.f32 %v16362_v15, %v16362_v15  ;;  %v6894_v36 = vmul.f32 %v16365_v31, %v16365_v31  ;;  %v6905_v23 = vadd.f32 %v6904_v49, %v6903_v32  ;;  %v7150_v49 = vld [vmem:[%s14811_s28 + $0x4b0] sm:$0xff] }
 0xc82   : > { %v6895_v63 = vmul.f32 %v16384_v35, %v16384_v35  ;;  %8741 = vmatpush1.msra.mxu1 %v7215_v56  ;;  %v7195_v25 = vunpack.c.l.bf16 %v7000_v26  ;;  %v7505_v32 = vunpack.c.l.bf16 %v7155_v19  ;;  %v7565_v56 = vunpack.c.l.bf16 %v7185_v13 }
 0xc83   : > { %v16375_v4 = vsub.f32 %v16309_v60, %v6870_v57  ;;  %v16378_v24 = vsub.f32 %v16311_v43, %v6870_v57  ;;  %v16381_v21 = vsub.f32 %v16313_v16, %v6870_v57  ;;  %6906 = vadd.xlane.f32.xlu0 %v6905_v23  ;;  %v6913_v40 = vsel %vm1858_vm7, %v6893_v62, 0.0  ;;  %8742 = vmatprep.subr.mxu1 %v7206_v59  ;;  %v7145_v62 = vld [vmem:[%s14811_s28 + $0x488] sm:$0xff]  ;;  %v7175_v59 = vld [vmem:[%s14811_s28 + $0x578] sm:$0xff] }
 0xc84   : > { %v6914_v58 = vsel %vm1858_vm7, %v6894_v36, 0.0  ;;  %v6916_v5 = vsel %vm1862_vm8, %v6895_v63, 0.0  ;;  %8743 = vmatpush1.msra.mxu1 %v7205_v34  ;;  %v7506_v57 = vunpack.c.h.bf16 %v7155_v19  ;;  %v7495_v36 = vunpack.c.l.bf16 %v7150_v49  ;;  %v7125_v63 = vld [vmem:[%s14811_s28 + $0x3e8] sm:$0xff]  ;;  %v7110_v19 = vld [vmem:[%s14811_s28 + $0x370] sm:$0xff] }
 0xc85   : > { %v6890_v51 = vmul.f32 %v16375_v4, %v16375_v4  ;;  %v6891_v52 = vmul.f32 %v16378_v24, %v16378_v24  ;;  %v6892_v50 = vmul.f32 %v16381_v21, %v16381_v21  ;;  %v6915_v8 = vadd.f32 %v6914_v58, %v6913_v40  ;;  %8744 = vmatprep.subr.mxu1 %v7196_v18 }
 0xc86   : > { %8745 = vmatpush1.msra.mxu1 %v7195_v25  ;;  %v7496_v23 = vunpack.c.h.bf16 %v7150_v49  ;;  %v7446_v27 = vunpack.c.h.bf16 %v7125_v63  ;;  %v7445_v46 = vunpack.c.l.bf16 %v7125_v63  ;;  %v7566_v26 = vunpack.c.h.bf16 %v7185_v13  ;;  %v7160_v63 = vld [vmem:[%s14811_s28 + $0x500] sm:$0xff] }
 0xc87   : > { %v6908_v1 = vadd.f32 %v6891_v52, %v6890_v51  ;;  %v6909_v41 = vsel %vm1853_vm6, %v6892_v50, 0.0  ;;  %v6917_v61 = vadd.f32 %v6916_v5, %v6915_v8  ;;  %8746 = vmatprep.subr.mxu1 %v7506_v57  ;;  %v7486_v51 = vunpack.c.h.bf16 %v7145_v62  ;;  %v7140_v50 = vld [vmem:[%s14811_s28 + $0x460] sm:$0xff] }
 0xc88   : > { %8747 = vmatpush2.msra.mxu1 %v7505_v32  ;;  %v7485_v52 = vunpack.c.l.bf16 %v7145_v62  ;;  %v7476_v40 = vunpack.c.h.bf16 %v7140_v50  ;;  %v7475_v58 = vunpack.c.l.bf16 %v7140_v50  ;;  %v7436_v34 = vunpack.c.h.bf16 %v7120_v11  ;;  %v7170_v32 = vld [vmem:[%s14811_s28 + $0x550] sm:$0xff] }
 0xc89   : > { %v6910_v30 = vadd.f32 %v6909_v41, %v6908_v1  ;;  %8748 = vmatprep.subr.mxu1 %v7496_v23  ;;  %v7135_v1 = vld [vmem:[%s14811_s28 + $0x438] sm:$0xff]  ;;  %v7130_v41 = vld [vmem:[%s14811_s28 + $0x410] sm:$0xff]  ;;  %v7556_v18 = vunpack.c.h.bf16 %v7180_v39  ;;  %v7435_v25 = vunpack.c.l.bf16 %v7120_v11  ;;  %v7555_v57 = vunpack.c.l.bf16 %v7180_v39  ;;  %v7105_v23 = vld [vmem:[%s14811_s28 + $0x348] sm:$0xff] }
 0xc8a   : > { %8749 = vmatpush2.msra.mxu1 %v7495_v36  ;;  %v7466_v8 = vunpack.c.h.bf16 %v7135_v1  ;;  %v7456_v5 = vunpack.c.h.bf16 %v7130_v41  ;;  %v7455_v28 = vunpack.c.l.bf16 %v7130_v41  ;;  %v7426_v49 = vunpack.c.h.bf16 %v7115_v33  ;;  %v16426_v11 = vld [vmem:[%s14811_s28 + $0x260] sm:$0xff] }
 0xc8b   : > { %6911 = vadd.xlane.f32.xlu1 %v6910_v30  ;;  %8750 = vmatprep.subr.mxu1 %v7486_v51  ;;  %v7465_v30 = vunpack.c.l.bf16 %v7135_v1  ;;  %v7546_v62 = vunpack.c.h.bf16 %v7175_v59  ;;  %v7425_v36 = vunpack.c.l.bf16 %v7115_v33  ;;  %v7545_v51 = vunpack.c.l.bf16 %v7175_v59  ;;  %v7100_v1 = vld [vmem:[%s14811_s28 + $0x320] sm:$0xff] }
 0xc8c   : > { %8751 = vmatpush2.msra.mxu1 %v7485_v52  ;;  %v7165_v52 = vld [vmem:[%s14811_s28 + $0x528] sm:$0xff]  ;;  %v7416_v50 = vunpack.c.h.bf16 %v7110_v19  ;;  %v7535_v41 = vunpack.c.l.bf16 %v7170_v32  ;;  %v7396_v13 = vunpack.c.h.bf16 %v7100_v1  ;;  %v7515_v39 = vunpack.c.l.bf16 %v7160_v63 }
 0xc8d   : > { %8752 = vmatprep.subr.mxu1 %v7476_v40  ;;  %v7536_v40 = vunpack.c.h.bf16 %v7170_v32  ;;  %v7348_v33 = vunpack.c.h.bf16 %v16426_v11  ;;  %v16433_v32 = vld [vmem:[%s14811_s28 + $0x5f8] sm:$0x33] }
 0xc8e   : > { %8753 = vmatpush2.msra.mxu1 %v7475_v58  ;;  %v7415_v58 = vunpack.c.l.bf16 %v7110_v19 }
 0xc8f   : > { %6918 = vadd.xlane.f32.xlu1 %v6917_v61  ;;  %v7190_v61 = vld [vmem:[%s14811_s28 + $0x5f0] sm:$0x33]  ;;  %8754 = vmatprep.subr.mxu1 %v7466_v8  ;;  %v7526_v8 = vunpack.c.h.bf16 %v7165_v52 }
 0xc90   : > { %v7575_v54 = vunpack.c.l.bf16 %v7190_v61  ;;  %v7576_v55 = vunpack.c.h.bf16 %v7190_v61  ;;  %8755 = vmatpush2.msra.mxu1 %v7465_v30  ;;  %v7406_v30 = vunpack.c.h.bf16 %v7105_v23  ;;  %v7095_v61 = vld [vmem:[%s14811_s28 + $0x2f8] sm:$0xff] }
 0xc91   : > { %8756 = vmatprep.subr.mxu1 %v7456_v5  ;;  %v7405_v5 = vunpack.c.l.bf16 %v7105_v23 }
 0xc92   : > { %13829 = vmatprep.subr.msk.mxu0 %vm2491_vm9, %v7576_v55  ;;  %8757 = vmatpush2.msra.mxu1 %v7455_v28  ;;  %v7525_v28 = vunpack.c.l.bf16 %v7165_v52  ;;  %v7090_v55 = vld [vmem:[%s14811_s28 + $0x2d0] sm:$0xff] }
 0xc93   : > { %13830 = vmatpush1.msk.msra.mxu0 %vm2491_vm9, %v7575_v54  ;;  %8758 = vmatprep.subr.mxu1 %v7446_v27  ;;  %v7516_v27 = vunpack.c.h.bf16 %v7160_v63  ;;  %v7395_v54 = vunpack.c.l.bf16 %v7100_v1  ;;  %v7376_v59 = vunpack.c.h.bf16 %v7090_v55  ;;  %v13650_v1 = vld [vmem:[%s14826_s23 + $0x4] ss:$8 sm:$0x7] }
 0xc94   : > { %8817 = vmatprep.subr.mxu0 %v7566_v26  ;;  %8759 = vmatpush2.msra.mxu1 %v7445_v46  ;;  %v7386_v46 = vunpack.c.h.bf16 %v7095_v61  ;;  %v7085_v26 = vld [vmem:[%s14811_s28 + $0x2a8] sm:$0xff] }
 0xc95   : > { %8818 = vmatpush1.msra.mxu0 %v7565_v56  ;;  %8760 = vmatprep.subr.mxu1 %v7436_v34  ;;  %v7385_v56 = vunpack.c.l.bf16 %v7095_v61  ;;  %v7375_v34 = vunpack.c.l.bf16 %v7090_v55  ;;  %v7365_v19 = vunpack.c.l.bf16 %v7085_v26 }
 0xc96   : > { %8819 = vmatprep.subr.mxu0 %v7556_v18  ;;  %8761 = vmatpush2.msra.mxu1 %v7435_v25  ;;  %v7080_v18 = vld [vmem:[%s14811_s28 + $0x280] sm:$0xff]  ;;  %v7366_v25 = vunpack.c.h.bf16 %v7085_v26 }
 0xc97   : > { %8820 = vmatpush1.msra.mxu0 %v7555_v57  ;;  %8762 = vmatprep.subr.mxu1 %v7426_v49  ;;  %v7356_v57 = vunpack.c.h.bf16 %v7080_v18  ;;  %v7355_v49 = vunpack.c.l.bf16 %v7080_v18 }
 0xc98   : > { %8821 = vmatprep.subr.mxu0 %v7546_v62  ;;  %8763 = vmatpush2.msra.mxu1 %v7425_v36  ;;  %v7578_v62 = vunpack.c.h.bf16 %v16433_v32 }
 0xc99   : > { %8822 = vmatpush1.msra.mxu0 %v7545_v51  ;;  %8764 = vmatprep.subr.mxu1 %v7416_v50 }
 0xc9a   : > { %8823 = vmatprep.subr.mxu0 %v7536_v40  ;;  %8765 = vmatpush2.msra.mxu1 %v7415_v58  ;;  %v13649_v58 = vld [vmem:[%s14826_s23 + $0x3] ss:$8 sm:$0x7] }
 0xc9b   : > { %8824 = vmatpush1.msra.mxu0 %v7535_v41  ;;  %8766 = vmatprep.subr.mxu1 %v7406_v30  ;;  %v16440_v63 = vrot.slane %v13649_v58, %v15316_v2  ;;  %v16443_v30 = vrot.slane %v13649_v58, %v15319_v45 }
 0xc9c   : > { %8825 = vmatprep.subr.mxu0 %v7526_v8  ;;  %8767 = vmatpush2.msra.mxu1 %v7405_v5  ;;  %v16446_v8 = vrot.slane %v13649_v58, %v15322_v47  ;;  %v16483_v58 = vld [vmem:[%s14811_s28 + $0x198] sm:$0xff] }
 0xc9d   : > { %8826 = vmatpush1.msra.mxu0 %v7525_v28  ;;  %8768 = vmatprep.subr.mxu1 %v7396_v13  ;;  %v16449_v28 = vrot.slane %v13650_v1, %v15316_v2  ;;  %v16452_v13 = vrot.slane %v13650_v1, %v15319_v45 }
 0xc9e   : > { %8827 = vmatprep.subr.mxu0 %v7516_v27  ;;  %8769 = vmatpush2.msra.mxu1 %v7395_v54 }
 0xc9f   : > { %8828 = vmatpush1.msra.mxu0 %v7515_v39  ;;  %8770 = vmatprep.subr.mxu1 %v7386_v46  ;;  %v16458_v39 = vrot.slane %v13650_v1, %v15322_v47 }
 0xca0   : > { %8880 = vmatprep.subr.mxu0 %v7348_v33  ;;  %8771 = vmatpush2.msra.mxu1 %v7385_v56 }
 0xca1   : > { %8772 = vmatprep.subr.mxu1 %v7376_v59 }
 0xca2   : > { %8773 = vmatpush2.msra.mxu1 %v7375_v34  ;;  %v16464_v34 = vld [vmem:[%s14811_s28 + $0x238] sm:$0xff] }
 0xca3   : > { %8774 = vmatprep.subr.mxu1 %v7366_v25 }
 0xca4   : > { %8775 = vmatpush2.msra.mxu1 %v7365_v19  ;;  %v16473_v19 = vld [vmem:[%s14811_s28 + $0x1e8] sm:$0xff] }
 0xca5   : > { %8776 = vmatprep.subr.mxu1 %v7356_v57 }
 0xca6   : > { %8777 = vmatpush2.msra.mxu1 %v7355_v49  ;;  %v7347_v49 = vunpack.c.l.bf16 %v16426_v11 }
 0xca7   : > { %13834 = vmatprep.subr.msk.mxu1 %vm2491_vm9, %v7578_v62  ;;  %v7337_v62 = vunpack.c.l.bf16 %v16464_v34 }
 0xd03   : > { %v6900_v36 = vpop.xlane.xlu0 %6899 }
 0xd04   : > { %v6920_v23 = vmul.f32 0.0032467532, %v6900_v36  ;;  %v7338_v36 = vunpack.c.h.bf16 %v16464_v34 }
 0xd06   : > { %v6924_v51 = vadd.f32 1e-05, %v6920_v23 }
 0xd08   : > { %14569 = vrsqrt.f32 %v6924_v51 }
 0xd0c   : > { %v6907_v52 = vpop.xlane.xlu0 %6906 }
 0xd0d   : > { %v6921_v50 = vmul.f32 0.0032467532, %v6907_v52 }
 0xd0f   : > { %v6925_v40 = vadd.f32 1e-05, %v6921_v50 }
 0xd11   : > { %14571 = vrsqrt.f32 %v6925_v40  ;;  %v16480_v40 = vld [vmem:[%s14811_s28 + $0x1c0] sm:$0xff] }
 0xd14   : > { %v6912_v41 = vpop.xlane.xlu1 %6911 }
 0xd15   : > { %v14570_v5 = vpop.eup %14569  ;;  %v6922_v61 = vmul.f32 0.0032467532, %v6912_v41 }
 0xd16   : > { %v6932_v27 = vmul.f32 %v14570_v5, %v16331_v48  ;;  %v6933_v54 = vmul.f32 %v14570_v5, %v16334_v53  ;;  %v6934_v55 = vmul.f32 %v14570_v5, %v16337_v17  ;;  %v16467_v53 = vld [vmem:[%s14811_s28 + $0x210] sm:$0xff] }
 0xd17   : > { %v6926_v46 = vadd.f32 1e-05, %v6922_v61  ;;  %v16508_v5 = vld [vmem:[%s14811_s28 + $0x5d0] sm:$0xff] }
 0xd18   : > { %v6919_v33 = vpop.xlane.xlu1 %6918  ;;  %v6960_v56 = vmul.f32 %v16440_v63, %v6932_v27  ;;  %v6961_v26 = vmul.f32 %v16443_v30, %v6933_v54  ;;  %v6962_v59 = vmul.f32 %v16446_v8, %v6934_v55 }
 0xd19   : > { %14573 = vrsqrt.f32 %v6926_v46  ;;  %v6923_v48 = vmul.f32 0.0032467532, %v6919_v33  ;;  %v16493_v46 = vld [vmem:[%s14811_s28 + $0x170] sm:$0xff] }
 0xd1a   : > { %v6988_v17 = vadd.f32 %v16449_v28, %v6960_v56  ;;  %v6989_v18 = vadd.f32 %v16452_v13, %v6961_v26  ;;  %v6990_v25 = vadd.f32 %v16458_v39, %v6962_v59 }
 0xd1b   : > { %v6927_v57 = vadd.f32 1e-05, %v6923_v48 }
 0xd1c   : > { %v7641_v23 = vcombine.low %v6988_v17, %v6989_v18  ;;  %v7642_v51 = vcombine.high %v6988_v17, %v6989_v18  ;;  %v7643_v52 = vcombine.high %v6990_v25, %v6990_v25  ;;  %v7664_v54 = vrot.slane %v6990_v25, %v15352_v9 }
 0xd1d   : > { %14575 = vrsqrt.f32 %v6927_v57 }
 0xd1e   : > { %v7650_v61 = vrot.slane %v7641_v23, %v15352_v9  ;;  %v7657_v27 = vrot.slane %v7642_v51, %v15352_v9  ;;  %v7671_v55 = vrot.slane %v7643_v52, %v15352_v9  ;;  %v14572_v48 = vpop.eup %14571 }
 0xd1f   : > { %v6935_v25 = vmul.f32 %v14572_v48, %v16347_v20  ;;  %v6936_v51 = vmul.f32 %v14572_v48, %v16350_v12  ;;  %v6937_v33 = vmul.f32 %v14572_v48, %v16353_v3 }
 0xd20   : > { %v7672_v17 = vcombine.low %v7650_v61, %v7664_v54  ;;  %v7673_v18 = vcombine.high %v7650_v61, %v7664_v54  ;;  %v7674_v57 = vcombine.low %v7657_v27, %v7671_v55  ;;  %v7675_v23 = vcombine.high %v7657_v27, %v7671_v55 }
 0xd21   : > { %v7577_v61 = vunpack.c.l.bf16 %v16433_v32  ;;  %v6963_v20 = vmul.f32 %v16440_v63, %v6935_v25  ;;  %v6964_v12 = vmul.f32 %v16443_v30, %v6936_v51  ;;  %v6965_v27 = vmul.f32 %v16446_v8, %v6937_v33 }
 0xd22   : > { %v7682_v56 = vrot.slane %v7672_v17, %v15352_v9  ;;  %v7689_v41 = vrot.slane %v7674_v57, %v15352_v9  ;;  %v7696_v26 = vrot.slane %v7673_v18, %v15352_v9  ;;  %v7703_v59 = vrot.slane %v7675_v23, %v15352_v9 }
 0xd23   : > { %v7568_v17 = vunpack.c.h.bf16 %v16508_v5  ;;  %v6991_v18 = vadd.f32 %v16449_v28, %v6963_v20  ;;  %v6992_v57 = vadd.f32 %v16452_v13, %v6964_v12  ;;  %v6993_v23 = vadd.f32 %v16458_v39, %v6965_v27 }
 0xd24   : > { %v8007_v54 = vcombine.low %v7682_v56, %v7696_v26  ;;  %v13807_v3 = vcombine.high %v7682_v56, %v7696_v26  ;;  %v8009_v55 = vcombine.low %v7689_v41, %v7703_v59  ;;  %v13808_v48 = vcombine.high %v7689_v41, %v7703_v59 }
 0xd25   : > { %v7708_v59 = vcombine.low %v6991_v18, %v6992_v57 }
 0xd26   : > { %v14574_v52 = vpop.eup %14573  ;;  %v8017_v32 = vrot.slane %v8007_v54, %v15352_v9  ;;  %v8024_v25 = vrot.slane %v13807_v3, %v15352_v9  ;;  %v8031_v51 = vrot.slane %v8009_v55, %v15352_v9  ;;  %v8038_v33 = vrot.slane %v13808_v48, %v15352_v9 }
 0xd27   : > { %v6938_v56 = vmul.f32 %v14574_v52, %v16375_v4  ;;  %v6939_v41 = vmul.f32 %v14574_v52, %v16378_v24  ;;  %v6940_v26 = vmul.f32 %v14574_v52, %v16381_v21  ;;  %v7715_v55 = vrot.slane %v7708_v59, %v15352_v9 }
 0xd28   : > { %v8039_v20 = vcombine.low %v8017_v32, %v8024_v25  ;;  %v8040_v12 = vcombine.high %v8017_v32, %v8024_v25  ;;  %v8041_v50 = vcombine.low %v8031_v51, %v8038_v33  ;;  %v8042_v27 = vcombine.high %v8031_v51, %v8038_v33 }
 0xd29   : > { %v6966_v1 = vmul.f32 %v16440_v63, %v6938_v56  ;;  %v6967_v54 = vmul.f32 %v16443_v30, %v6939_v41  ;;  %v6968_v3 = vmul.f32 %v16446_v8, %v6940_v26  ;;  %v7722_v25 = vrot.slane %v6993_v23, %v15352_v9  ;;  %v7181_v41 = vld [vmem:[%s14811_s28 + $0x5a8] sm:$0xff] }
 0xd2a   : > { %v14576_v48 = vpop.eup %14575  ;;  %v8056_v4 = vrot.slane %v8040_v12, %v15352_v9  ;;  %v8070_v24 = vrot.slane %v8042_v27, %v15352_v9  ;;  %v8049_v21 = vrot.slane %v8039_v20, %v15352_v9  ;;  %v8063_v52 = vrot.slane %v8041_v50, %v15352_v9 }
 0xd2b   : > { %v6994_v18 = vadd.f32 %v16449_v28, %v6966_v1  ;;  %v6995_v57 = vadd.f32 %v16452_v13, %v6967_v54  ;;  %v6996_v32 = vadd.f32 %v16458_v39, %v6968_v3  ;;  %v6941_v26 = vmul.f32 %v14576_v48, %v16362_v15 }
 0xd2c   : > { %v16537_v51 = vcombine.low %v8056_v4, %v8070_v24  ;;  %v16539_v33 = vcombine.high %v8049_v21, %v8063_v52  ;;  %v16541_v56 = vcombine.low %v8049_v21, %v8063_v52  ;;  %v7723_v59 = vcombine.low %v7715_v55, %v7722_v25  ;;  %v7176_v4 = vld [vmem:[%s14811_s28 + $0x580] sm:$0xff] }
 0xd2d   : > { %v7731_v50 = vcombine.low %v6994_v18, %v6995_v57  ;;  %v7732_v20 = vcombine.high %v6994_v18, %v6995_v57  ;;  %v7733_v1 = vcombine.high %v6996_v32, %v6996_v32  ;;  %v7567_v23 = vunpack.c.l.bf16 %v16508_v5  ;;  %v7171_v18 = vld [vmem:[%s14811_s28 + $0x558] sm:$0xff] }
 0xd2e   : > { %8778 = vmatprep.mubr.f32.mxu1 %v16537_v51  ;;  %13831 = vmatmul.mubr.msk.f32.vlgmr.msra.gmra.mxu0 %vm1853_vm6, %v16539_v33  ;;  %v7754_v12 = vrot.slane %v6996_v32, %v15352_v9  ;;  %v6942_v27 = vmul.f32 %v14576_v48, %v16365_v31  ;;  %v6943_v54 = vmul.f32 %v14576_v48, %v16384_v35  ;;  %v7558_v15 = vunpack.c.h.bf16 %v7181_v41  ;;  %v16569_v48 = vld [vmem:[%s14811_s28 + $0x148] sm:$0xff] }
 0xd2f   : > { %8881 = vmatpush1.msra.mxu0 %v7347_v49  ;;  %8779 = vmatmul.mubr.f32.vlgmr.msra.gmra.mxu1 %v16541_v56  ;;  %v7730_v3 = vrot.slane %v7723_v59, %v15352_v9  ;;  %v7740_v55 = vrot.slane %v7731_v50, %v15352_v9  ;;  %v7747_v5 = vrot.slane %v7732_v20, %v15352_v9  ;;  %v7288_v31 = vunpack.c.h.bf16 %v16493_v46 }
 0xd30   : > { %8882 = vmatprep.subr.mxu0 %v7338_v36  ;;  %13835 = vmatpush1.msk.msra.mxu1 %vm2491_vm9, %v7577_v61  ;;  %v7761_v35 = vrot.slane %v7733_v1, %v15352_v9  ;;  %v6969_v11 = vmul.f32 %v16440_v63, %v6941_v26  ;;  %v6970_v49 = vmul.f32 %v16443_v30, %v6942_v27  ;;  %v7557_v24 = vunpack.c.l.bf16 %v7181_v41  ;;  %v7166_v41 = vld [vmem:[%s14811_s28 + $0x530] sm:$0xff]  ;;  %v7161_v27 = vld [vmem:[%s14811_s28 + $0x508] sm:$0xff] }
 0xd31   : > { %8883 = vmatpush1.msra.mxu0 %v7337_v62  ;;  %8983 = vmatprep.subr.mxu1 %v7568_v17  ;;  %v7762_v21 = vcombine.low %v7740_v55, %v7754_v12  ;;  %v7763_v36 = vcombine.high %v7740_v55, %v7754_v12  ;;  %v6971_v52 = vmul.f32 %v16446_v8, %v6943_v54  ;;  %v18856_v61 = vunpack.c.h.bf16 %v16467_v53 }
 0xd32   : > { %8984 = vmatpush1.msra.mxu1 %v7567_v23  ;;  %v7764_v63 = vcombine.low %v7747_v5, %v7761_v35  ;;  %v7765_v57 = vcombine.high %v7747_v5, %v7761_v35  ;;  %v7548_v30 = vunpack.c.h.bf16 %v7176_v4  ;;  %v6997_v34 = vadd.f32 %v16449_v28, %v6969_v11  ;;  %8867 = vmatprep.mubr.f32.mxu0 %v18843_v0  ;;  %v7036_v35 = vld [vmem:[%s14811_s28 + $0x120] sm:$0xff] }
 0xd33   : > { %8884 = vmatprep.subr.mxu0 %v18856_v61  ;;  %v18857_v62 = vunpack.c.l.bf16 %v16467_v53  ;;  %8985 = vmatprep.subr.mxu1 %v7558_v15  ;;  %v7772_v17 = vrot.slane %v7762_v21, %v15352_v9  ;;  %v7786_v32 = vrot.slane %v7763_v36, %v15352_v9  ;;  %v7547_v8 = vunpack.c.l.bf16 %v7176_v4 }
 0xd34   : > { %v6998_v25 = vadd.f32 %v16452_v13, %v6970_v49  ;;  %v18858_v26 = vunpack.c.h.bf16 %v16473_v19  ;;  %v7277_v59 = vunpack.c.l.bf16 %v16569_v48  ;;  %v7779_v28 = vrot.slane %v7764_v63, %v15352_v9  ;;  %8986 = vmatpush1.msra.mxu1 %v7557_v24  ;;  %v16599_v24 = vld [vmem:[%s14811_s28 + $0x268] sm:$0xff] }
 0xd35   : > { %8885 = vmatpush1.msra.mxu0 %v18857_v62  ;;  %v6999_v53 = vadd.f32 %v16458_v39, %v6971_v52  ;;  %v7538_v50 = vunpack.c.h.bf16 %v7171_v18  ;;  %v18859_v20 = vunpack.c.l.bf16 %v16473_v19  ;;  %v7794_v1 = vcombine.high %v7772_v17, %v7772_v17  ;;  %8987 = vmatprep.subr.mxu1 %v7548_v30 }
 0xd36   : > { %8886 = vmatprep.subr.mxu0 %v18858_v26  ;;  %v7796_v13 = vcombine.high %v7786_v32, %v7786_v32  ;;  %v8074_v23 = vcombine.low %v7730_v3, %v7772_v17  ;;  %v7537_v12 = vunpack.c.l.bf16 %v7171_v18  ;;  %v18860_v54 = vunpack.c.h.bf16 %v16480_v40  ;;  %8988 = vmatpush1.msra.mxu1 %v7547_v8 }
 0xd37   : > { %8887 = vmatpush1.msra.mxu0 %v18859_v20  ;;  %v7793_v15 = vrot.slane %v7765_v57, %v15352_v9  ;;  %v7795_v55 = vcombine.high %v7779_v28, %v7779_v28  ;;  %v7798_v39 = vcombine.low %v6997_v34, %v6998_v25  ;;  %v7528_v5 = vunpack.c.h.bf16 %v7166_v41  ;;  %8989 = vmatprep.subr.mxu1 %v7538_v50  ;;  %v7026_v20 = vld [vmem:[%s14811_s28 + $0xd0] sm:$0xff] }
 0xd38   : > { %8888 = vmatprep.subr.mxu0 %v18860_v54  ;;  %v18861_v19 = vunpack.c.l.bf16 %v16480_v40  ;;  %v7278_v4 = vunpack.c.h.bf16 %v16569_v48  ;;  %v8075_v3 = vcombine.low %v7786_v32, %v7794_v1  ;;  %v8076_v11 = vcombine.low %v7796_v13, %v7779_v28  ;;  %v7031_v48 = vld [vmem:[%s14811_s28 + $0xf8] sm:$0xff]  ;;  %8990 = vmatpush1.msra.mxu1 %v7537_v12 }
 0xd39   : > { %v7527_v49 = vunpack.c.l.bf16 %v7166_v41  ;;  %v18862_v21 = vunpack.c.h.bf16 %v16483_v58  ;;  %v8077_v36 = vcombine.low %v7793_v15, %v7795_v55  ;;  %v7805_v52 = vrot.slane %v7798_v39, %v15352_v9  ;;  %8991 = vmatprep.subr.mxu1 %v7528_v5 }
 0xd3a   : > { %8889 = vmatpush1.msra.mxu0 %v18861_v19  ;;  %v7812_v18 = vrot.slane %v6999_v53, %v15352_v9  ;;  %v7518_v40 = vunpack.c.h.bf16 %v7161_v27  ;;  %v18863_v61 = vunpack.c.l.bf16 %v16483_v58  ;;  %v8084_v63 = vrot.slane %v8074_v23, %v15352_v9 }
 0xd3b   : > { %8890 = vmatprep.subr.mxu0 %v18862_v21  ;;  %v8091_v57 = vrot.slane %v8075_v3, %v15352_v9  ;;  %v8098_v30 = vrot.slane %v8076_v11, %v15352_v9  ;;  %v7517_v34 = vunpack.c.l.bf16 %v7161_v27  ;;  %v7268_v62 = vunpack.c.h.bf16 %v7036_v35  ;;  %8992 = vmatpush1.msra.mxu1 %v7527_v49 }
 0xd3c   : > { %8891 = vmatpush1.msra.mxu0 %v18863_v61  ;;  %v8105_v17 = vrot.slane %v8077_v36, %v15352_v9  ;;  %v7813_v32 = vcombine.low %v7805_v52, %v7812_v18  ;;  %v7350_v58 = vunpack.c.h.bf16 %v16599_v24  ;;  %v18864_v8 = vunpack.c.l.bf16 %v16493_v46  ;;  %8993 = vmatprep.subr.mxu1 %v7518_v40  ;;  %v7011_v36 = vld [vmem:[%s14811_s28 + $0x58] sm:$0xff]  ;;  %v7006_v61 = vld [vmem:[%s14811_s28 + $0x30] sm:$0xff] }
 0xd3d   : > { %8892 = vmatprep.subr.mxu0 %v7288_v31  ;;  %v7267_v25 = vunpack.c.l.bf16 %v7036_v35  ;;  %v8107_v41 = vcombine.high %v8084_v63, %v8091_v57  ;;  %v8106_v26 = vcombine.low %v8084_v63, %v8091_v57  ;;  %v7797_v28 = vcombine.high %v7793_v15, %v7793_v15  ;;  %8994 = vmatpush1.msra.mxu1 %v7517_v34  ;;  %v7021_v15 = vld [vmem:[%s14811_s28 + $0xa8] sm:$0xff]  ;;  %v7016_v35 = vld [vmem:[%s14811_s28 + $0x80] sm:$0xff] }
 0xd3e   : > { %8893 = vmatpush1.msra.mxu0 %v18864_v8  ;;  %v7258_v53 = vunpack.c.h.bf16 %v7031_v48  ;;  %v8109_v31 = vcombine.high %v8098_v30, %v8105_v17  ;;  %v8108_v50 = vcombine.low %v8098_v30, %v8105_v17  ;;  %v7820_v1 = vrot.slane %v7813_v32, %v15352_v9  ;;  %9046 = vmatprep.subr.mxu1 %v7350_v58  ;;  %v7001_v30 = vld [vmem:[%s14811_s28 + $0x8] sm:$0xff]  ;;  %v7156_v32 = vld [vmem:[%s14811_s28 + $0x4e0] sm:$0xff] }
 0xd3f   : > { %8894 = vmatprep.subr.mxu0 %v7278_v4  ;;  %v7257_v13 = vunpack.c.l.bf16 %v7031_v48  ;;  %v8123_v23 = vrot.slane %v8107_v41, %v15352_v9  ;;  %v8116_v46 = vrot.slane %v8106_v26, %v15352_v9  ;;  %v7247_v55 = vunpack.c.l.bf16 %v7026_v20 }
 0xd40   : > { %8895 = vmatpush1.msra.mxu0 %v7277_v59  ;;  %v8137_v12 = vrot.slane %v8109_v31, %v15352_v9  ;;  %v8130_v27 = vrot.slane %v8108_v50, %v15352_v9  ;;  %v8141_v54 = vcombine.low %v7797_v28, %v7820_v1  ;;  %v7248_v39 = vunpack.c.h.bf16 %v7026_v20  ;;  %v7151_v31 = vld [vmem:[%s14811_s28 + $0x4b8] sm:$0xff]  ;;  %v7062_v20 = vld [vmem:[%s14811_s28 + $0x1f0] sm:$0xff] }
 0xd41   : > { %8896 = vmatprep.subr.mxu0 %v7268_v62  ;;  %v7238_v3 = vunpack.c.h.bf16 %v7021_v15  ;;  %v7237_v21 = vunpack.c.l.bf16 %v7021_v15  ;;  %v7228_v52 = vunpack.c.h.bf16 %v7016_v35  ;;  %v7227_v40 = vunpack.c.l.bf16 %v7016_v35  ;;  %v7072_v62 = vld [vmem:[%s14811_s28 + $0x240] sm:$0xff]  ;;  %v7146_v1 = vld [vmem:[%s14811_s28 + $0x490] sm:$0xff] }
 0xd42   : > { %8897 = vmatpush1.msra.mxu0 %v7267_v25  ;;  %v16624_v59 = vcombine.low %v8123_v23, %v8137_v12  ;;  %v16626_v5 = vcombine.high %v8116_v46, %v8130_v27  ;;  %v16628_v19 = vcombine.low %v8116_v46, %v8130_v27  ;;  %v8148_v4 = vrot.slane %v8141_v54, %v15352_v9  ;;  %v7067_v25 = vld [vmem:[%s14811_s28 + $0x218] sm:$0xff]  ;;  %v7057_v46 = vld [vmem:[%s14811_s28 + $0x1c8] sm:$0xff] }
 0xd43   : > { %8898 = vmatprep.subr.mxu0 %v7258_v53  ;;  %v7218_v63 = vunpack.c.h.bf16 %v7011_v36  ;;  %v7217_v57 = vunpack.c.l.bf16 %v7011_v36  ;;  %v7208_v34 = vunpack.c.h.bf16 %v7006_v61  ;;  %v7207_v17 = vunpack.c.l.bf16 %v7006_v61  ;;  %v7047_v36 = vld [vmem:[%s14811_s28 + $0x178] sm:$0xff] }
 0xd44   : > { %8899 = vmatpush1.msra.mxu0 %v7257_v13  ;;  %8784 = vmatprep.mubr.f32.mxu1 %v16624_v59  ;;  %v8149_v11 = vcombine.high %v8148_v4, %v8148_v4  ;;  %v16636_v49 = vrot.slane %v8148_v4, %v15352_v9  ;;  %v7349_v58 = vunpack.c.l.bf16 %v16599_v24  ;;  %v7198_v8 = vunpack.c.h.bf16 %v7001_v30  ;;  %v7052_v4 = vld [vmem:[%s14811_s28 + $0x1a0] sm:$0xff] }
 0xd45   : > { %13832 = vmatmul.mubr.msk.f32.gmra.mxu0 %vm1853_vm6, %v16626_v5  ;;  %8900 = vmatprep.subr.mxu0 %v7248_v39  ;;  %v7197_v41 = vunpack.c.l.bf16 %v7001_v30  ;;  %v7340_v26 = vunpack.c.h.bf16 %v7072_v62  ;;  %v7339_v28 = vunpack.c.l.bf16 %v7072_v62  ;;  %v7508_v53 = vunpack.c.h.bf16 %v7156_v32 }
 0xd46   : > { %8785 = vmatmul.mubr.f32.gmra.mxu1 %v16628_v19  ;;  %8901 = vmatpush1.msra.mxu0 %v7247_v55  ;;  %v16641_v18 = vrot.slane %v8149_v11, %v15352_v9  ;;  %v16647_v48 = vcombine.high %v16636_v49, %v16636_v49  ;;  %v7330_v50 = vunpack.c.h.bf16 %v7067_v25  ;;  %v7507_v24 = vunpack.c.l.bf16 %v7156_v32  ;;  %v7141_v55 = vld [vmem:[%s14811_s28 + $0x468] sm:$0xff]  ;;  %v7126_v32 = vld [vmem:[%s14811_s28 + $0x3f0] sm:$0xff] }
 0xd47   : > { %8873 = vmatprep.mubr.f32.mxu0 %v18843_v0  ;;  %8902 = vmatprep.subr.mxu0 %v7238_v3  ;;  %v7329_v13 = vunpack.c.l.bf16 %v7067_v25  ;;  %v7498_v23 = vunpack.c.h.bf16 %v7151_v31  ;;  %v7497_v12 = vunpack.c.l.bf16 %v7151_v31  ;;  %v7320_v27 = vunpack.c.h.bf16 %v7062_v20 }
 0xd48   : > { %8790 = vmatprep.mubr.f32.mxu1 %v16641_v18  ;;  %8903 = vmatpush1.msra.mxu0 %v7237_v21  ;;  %v7319_v54 = vunpack.c.l.bf16 %v7062_v20  ;;  %v7488_v15 = vunpack.c.h.bf16 %v7146_v1  ;;  %v7310_v39 = vunpack.c.h.bf16 %v7057_v46  ;;  %v7487_v35 = vunpack.c.l.bf16 %v7146_v1  ;;  %v7136_v21 = vld [vmem:[%s14811_s28 + $0x440] sm:$0xff] }
 0xd49   : > { %13833 = vmatmul.mubr.msk.f32.gmra.mxu0 %vm1853_vm6, %v16647_v48  ;;  %8904 = vmatprep.subr.mxu0 %v7228_v52  ;;  %v7309_v3 = vunpack.c.l.bf16 %v7057_v46  ;;  %v7478_v11 = vunpack.c.h.bf16 %v7141_v55  ;;  %v7300_v52 = vunpack.c.h.bf16 %v7052_v4  ;;  %v7299_v61 = vunpack.c.l.bf16 %v7052_v4  ;;  %v7116_v1 = vld [vmem:[%s14811_s28 + $0x3a0] sm:$0xff] }
 0xd4a   : > { %8791 = vmatmul.mubr.f32.gmra.mxu1 %v16636_v49  ;;  %8905 = vmatpush1.msra.mxu0 %v7227_v40  ;;  %v7477_v40 = vunpack.c.l.bf16 %v7141_v55  ;;  %v7468_v30 = vunpack.c.h.bf16 %v7136_v21  ;;  %v7467_v62 = vunpack.c.l.bf16 %v7136_v21  ;;  %v7448_v31 = vunpack.c.h.bf16 %v7126_v32 }
 0xd4b   : > { %8944 = vmatprep.mubr.f32.mxu0 %v16537_v51  ;;  %8906 = vmatprep.subr.mxu0 %v7218_v63  ;;  %v7131_v63 = vld [vmem:[%s14811_s28 + $0x418] sm:$0xff]  ;;  %v7447_v20 = vunpack.c.l.bf16 %v7126_v32  ;;  %v7428_v55 = vunpack.c.h.bf16 %v7116_v1  ;;  %v7427_v4 = vunpack.c.l.bf16 %v7116_v1  ;;  %v7157_v1 = vld [vmem:[%s14811_s28 + $0x4e8] sm:$0xff] }
 0xd4c   : > { %8907 = vmatpush1.msra.mxu0 %v7217_v57  ;;  %9027 = vmatprep.mubr.f32.mxu1 %v18843_v0  ;;  %v7042_v57 = vld [vmem:[%s14811_s28 + $0x150] sm:$0xff]  ;;  %v7007_v32 = vld [vmem:[%s14811_s28 + $0x38] sm:$0xff] }
 0xd4d   : > { %8908 = vmatprep.subr.mxu0 %v7208_v34  ;;  %v7290_v34 = vunpack.c.h.bf16 %v7047_v36  ;;  %v7280_v25 = vunpack.c.h.bf16 %v7042_v57 }
 0xd4e   : > { %8909 = vmatpush1.msra.mxu0 %v7207_v17  ;;  %13836 = vmatmul.mubr.msk.f32.vlgmr.msra.gmra.mxu1 %vm1853_vm6, %v16539_v33  ;;  %v7289_v17 = vunpack.c.l.bf16 %v7047_v36 }
 0xd4f   : > { %9047 = vmatpush1.msra.mxu1 %v7349_v58  ;;  %8910 = vmatprep.subr.mxu0 %v7198_v8  ;;  %v7037_v58 = vld [vmem:[%s14811_s28 + $0x128] sm:$0xff]  ;;  %v7458_v8 = vunpack.c.h.bf16 %v7131_v63 }
 0xd50   : > { %9048 = vmatprep.subr.mxu1 %v7340_v26  ;;  %8911 = vmatpush1.msra.mxu0 %v7197_v41  ;;  %v7457_v41 = vunpack.c.l.bf16 %v7131_v63  ;;  %v7279_v26 = vunpack.c.l.bf16 %v7042_v57  ;;  %v7012_v63 = vld [vmem:[%s14811_s28 + $0x60] sm:$0xff] }
 0xd51   : > { %9049 = vmatpush1.msra.mxu1 %v7339_v28  ;;  %8912 = vmatprep.subr.mxu0 %v7508_v53  ;;  %v7121_v28 = vld [vmem:[%s14811_s28 + $0x3c8] sm:$0xff]  ;;  %v7032_v53 = vld [vmem:[%s14811_s28 + $0x100] sm:$0xff] }
 0xd52   : > { %9033 = vmatprep.mubr.f32.mxu1 %v18843_v0  ;;  %9050 = vmatprep.subr.mxu1 %v7330_v50  ;;  %v7270_v50 = vunpack.c.h.bf16 %v7037_v58  ;;  %v7260_v46 = vunpack.c.h.bf16 %v7032_v53 }
 0xd53   : > { %8913 = vmatpush2.msra.mxu0 %v7507_v24  ;;  %13837 = vmatmul.mubr.msk.f32.gmra.mxu1 %vm1853_vm6, %v16626_v5  ;;  %v7269_v24 = vunpack.c.l.bf16 %v7037_v58 }
 0xd54   : > { %9051 = vmatpush1.msra.mxu1 %v7329_v13  ;;  %8914 = vmatprep.subr.mxu0 %v7498_v23  ;;  %v7027_v13 = vld [vmem:[%s14811_s28 + $0xd8] sm:$0xff]  ;;  %v7438_v23 = vunpack.c.h.bf16 %v7121_v28 }
 0xd55   : > { %9052 = vmatprep.subr.mxu1 %v7320_v27  ;;  %8915 = vmatpush2.msra.mxu0 %v7497_v12  ;;  %v7437_v12 = vunpack.c.l.bf16 %v7121_v28  ;;  %v7259_v27 = vunpack.c.l.bf16 %v7032_v53  ;;  %v7002_v28 = vld [vmem:[%s14811_s28 + $0x10] sm:$0xff] }
 0xd56   : > { %9053 = vmatpush1.msra.mxu1 %v7319_v54  ;;  %8916 = vmatprep.subr.mxu0 %v7488_v15  ;;  %v7111_v54 = vld [vmem:[%s14811_s28 + $0x378] sm:$0xff]  ;;  %v7022_v15 = vld [vmem:[%s14811_s28 + $0xb0] sm:$0xff] }
 0xd57   : > { %9039 = vmatprep.mubr.f32.mxu1 %v18843_v0  ;;  %9054 = vmatprep.subr.mxu1 %v7310_v39  ;;  %v7250_v39 = vunpack.c.h.bf16 %v7027_v13  ;;  %v7418_v21 = vunpack.c.h.bf16 %v7111_v54  ;;  %v7240_v36 = vunpack.c.h.bf16 %v7022_v15 }
 0xd58   : > { %8917 = vmatpush2.msra.mxu0 %v7487_v35  ;;  %13838 = vmatmul.mubr.msk.f32.gmra.mxu1 %vm1853_vm6, %v16647_v48  ;;  %v7249_v35 = vunpack.c.l.bf16 %v7027_v13 }
 0xd59   : > { %9055 = vmatpush1.msra.mxu1 %v7309_v3  ;;  %8918 = vmatprep.subr.mxu0 %v7478_v11  ;;  %v7106_v3 = vld [vmem:[%s14811_s28 + $0x350] sm:$0xff]  ;;  %v7017_v11 = vld [vmem:[%s14811_s28 + $0x88] sm:$0xff] }
 0xd5a   : > { %9056 = vmatprep.subr.mxu1 %v7300_v52  ;;  %9110 = vmatprep.mubr.f32.mxu1 %v16537_v51  ;;  %v7417_v52 = vunpack.c.l.bf16 %v7111_v54  ;;  %v7408_v57 = vunpack.c.h.bf16 %v7106_v3  ;;  %v7152_v54 = vld [vmem:[%s14811_s28 + $0x4c0] sm:$0xff] }
 0xd5b   : > { %8919 = vmatpush2.msra.mxu0 %v7477_v40  ;;  %9057 = vmatpush1.msra.mxu1 %v7299_v61  ;;  %v7239_v40 = vunpack.c.l.bf16 %v7022_v15  ;;  %v7101_v61 = vld [vmem:[%s14811_s28 + $0x328] sm:$0xff] }
 0xd5c   : > { %8920 = vmatprep.subr.mxu0 %v7468_v30  ;;  %9058 = vmatprep.subr.mxu1 %v7290_v34  ;;  %v7230_v30 = vunpack.c.h.bf16 %v7017_v11  ;;  %v7407_v34 = vunpack.c.l.bf16 %v7106_v3  ;;  %v7398_v58 = vunpack.c.h.bf16 %v7101_v61 }
 0xd5d   : > { %8921 = vmatpush2.msra.mxu0 %v7467_v62  ;;  %9059 = vmatpush1.msra.mxu1 %v7289_v17  ;;  %v7229_v62 = vunpack.c.l.bf16 %v7017_v11  ;;  %v7096_v17 = vld [vmem:[%s14811_s28 + $0x300] sm:$0xff]  ;;  %v7500_v11 = vunpack.c.h.bf16 %v7152_v54 }
 0xd5e   : > { %8922 = vmatprep.subr.mxu0 %v7458_v8  ;;  %9060 = vmatprep.subr.mxu1 %v7280_v25  ;;  %v7220_v8 = vunpack.c.h.bf16 %v7012_v63  ;;  %v7397_v25 = vunpack.c.l.bf16 %v7101_v61  ;;  %v7388_v53 = vunpack.c.h.bf16 %v7096_v17  ;;  %v7142_v61 = vld [vmem:[%s14811_s28 + $0x470] sm:$0xff] }
 0xd5f   : > { %8923 = vmatpush2.msra.mxu0 %v7457_v41  ;;  %9061 = vmatpush1.msra.mxu1 %v7279_v26  ;;  %v7219_v41 = vunpack.c.l.bf16 %v7012_v63  ;;  %v7091_v26 = vld [vmem:[%s14811_s28 + $0x2d8] sm:$0xff] }
 0xd60   : > { %8924 = vmatprep.subr.mxu0 %v7448_v31  ;;  %9062 = vmatprep.subr.mxu1 %v7270_v50  ;;  %v7210_v31 = vunpack.c.h.bf16 %v7007_v32  ;;  %v7387_v50 = vunpack.c.l.bf16 %v7096_v17  ;;  %v7378_v13 = vunpack.c.h.bf16 %v7091_v26  ;;  %v7187_v63 = vld [vmem:[%s14811_s28 + $0x5d8] sm:$0xff]  ;;  %v7480_v17 = vunpack.c.h.bf16 %v7142_v61 }
 0xd61   : > { %8925 = vmatpush2.msra.mxu0 %v7447_v20  ;;  %9063 = vmatpush1.msra.mxu1 %v7269_v24  ;;  %v7209_v20 = vunpack.c.l.bf16 %v7007_v32  ;;  %v7086_v24 = vld [vmem:[%s14811_s28 + $0x2b0] sm:$0xff]  ;;  %v7570_v32 = vunpack.c.h.bf16 %v7187_v63 }
 0xd62   : > { %8926 = vmatprep.subr.mxu0 %v7438_v23  ;;  %9064 = vmatprep.subr.mxu1 %v7260_v46  ;;  %v7200_v23 = vunpack.c.h.bf16 %v7002_v28  ;;  %v7377_v46 = vunpack.c.l.bf16 %v7091_v26  ;;  %v7368_v15 = vunpack.c.h.bf16 %v7086_v24  ;;  %v7132_v26 = vld [vmem:[%s14811_s28 + $0x420] sm:$0xff] }
 0xd63   : > { %8927 = vmatpush2.msra.mxu0 %v7437_v12  ;;  %9065 = vmatpush1.msra.mxu1 %v7259_v27  ;;  %v7199_v12 = vunpack.c.l.bf16 %v7002_v28  ;;  %v7081_v27 = vld [vmem:[%s14811_s28 + $0x288] sm:$0xff] }
 0xd64   : > { %8928 = vmatprep.subr.mxu0 %v7428_v55  ;;  %9066 = vmatprep.subr.mxu1 %v7250_v39  ;;  %v7510_v55 = vunpack.c.h.bf16 %v7157_v1  ;;  %v7367_v39 = vunpack.c.l.bf16 %v7086_v24  ;;  %v7358_v3 = vunpack.c.h.bf16 %v7081_v27  ;;  %v7177_v28 = vld [vmem:[%s14811_s28 + $0x588] sm:$0xff]  ;;  %v7460_v24 = vunpack.c.h.bf16 %v7132_v26 }
 0xd65   : > { %8929 = vmatpush2.msra.mxu0 %v7427_v4  ;;  %9067 = vmatpush1.msra.mxu1 %v7249_v35  ;;  %v7509_v4 = vunpack.c.l.bf16 %v7157_v1  ;;  %v7147_v35 = vld [vmem:[%s14811_s28 + $0x498] sm:$0xff]  ;;  %v7550_v1 = vunpack.c.h.bf16 %v7177_v28 }
 0xd66   : > { %8930 = vmatprep.subr.mxu0 %v7418_v21  ;;  %9068 = vmatprep.subr.mxu1 %v7240_v36  ;;  %v7192_v21 = vld [vmem:[%s14811_s28 + $0x600] sm:$0x33]  ;;  %v7357_v36 = vunpack.c.l.bf16 %v7081_v27 }
 0xd67   : > { %8931 = vmatpush2.msra.mxu0 %v7417_v52  ;;  %9069 = vmatpush1.msra.mxu1 %v7239_v40  ;;  %v7499_v52 = vunpack.c.l.bf16 %v7152_v54  ;;  %v7490_v40 = vunpack.c.h.bf16 %v7147_v35  ;;  %v7167_v54 = vld [vmem:[%s14811_s28 + $0x538] sm:$0xff] }
 0xd68   : > { %8932 = vmatprep.subr.mxu0 %v7408_v57  ;;  %9070 = vmatprep.subr.mxu1 %v7230_v30  ;;  %v7580_v57 = vunpack.c.h.bf16 %v7192_v21  ;;  %v7489_v30 = vunpack.c.l.bf16 %v7147_v35 }
 0xd69   : > { %8933 = vmatpush2.msra.mxu0 %v7407_v34  ;;  %9071 = vmatpush1.msra.mxu1 %v7229_v62  ;;  %v7579_v34 = vunpack.c.l.bf16 %v7192_v21  ;;  %v7137_v62 = vld [vmem:[%s14811_s28 + $0x448] sm:$0xff]  ;;  %v7530_v21 = vunpack.c.h.bf16 %v7167_v54 }
 0xd6a   : > { %8934 = vmatprep.subr.mxu0 %v7398_v58  ;;  %9072 = vmatprep.subr.mxu1 %v7220_v8  ;;  %v7182_v58 = vld [vmem:[%s14811_s28 + $0x5b0] sm:$0xff]  ;;  %v7479_v8 = vunpack.c.l.bf16 %v7142_v61 }
 0xd6b   : > { %8935 = vmatpush2.msra.mxu0 %v7397_v25  ;;  %9073 = vmatpush1.msra.mxu1 %v7219_v41  ;;  %v7569_v25 = vunpack.c.l.bf16 %v7187_v63  ;;  %v7470_v41 = vunpack.c.h.bf16 %v7137_v62 }
 0xd6c   : > { %8936 = vmatprep.subr.mxu0 %v7388_v53  ;;  %9074 = vmatprep.subr.mxu1 %v7210_v31  ;;  %v7560_v53 = vunpack.c.h.bf16 %v7182_v58  ;;  %v7469_v31 = vunpack.c.l.bf16 %v7137_v62 }
 0xd6d   : > { %8937 = vmatpush2.msra.mxu0 %v7387_v50  ;;  %9075 = vmatpush1.msra.mxu1 %v7209_v20  ;;  %v7559_v50 = vunpack.c.l.bf16 %v7182_v58  ;;  %v7127_v20 = vld [vmem:[%s14811_s28 + $0x3f8] sm:$0xff] }
 0xd6e   : > { %8938 = vmatprep.subr.mxu0 %v7378_v13  ;;  %9076 = vmatprep.subr.mxu1 %v7200_v23  ;;  %v7172_v13 = vld [vmem:[%s14811_s28 + $0x560] sm:$0xff]  ;;  %v7459_v23 = vunpack.c.l.bf16 %v7132_v26  ;;  %v7450_v27 = vunpack.c.h.bf16 %v7127_v20 }
 0xd6f   : > { %8939 = vmatpush2.msra.mxu0 %v7377_v46  ;;  %9077 = vmatpush1.msra.mxu1 %v7199_v12  ;;  %v7549_v46 = vunpack.c.l.bf16 %v7177_v28  ;;  %v7122_v12 = vld [vmem:[%s14811_s28 + $0x3d0] sm:$0xff] }
 0xd70   : > { %8940 = vmatprep.subr.mxu0 %v7368_v15  ;;  %9078 = vmatprep.subr.mxu1 %v7510_v55  ;;  %v7449_v15 = vunpack.c.l.bf16 %v7127_v20  ;;  %v7540_v55 = vunpack.c.h.bf16 %v7172_v13  ;;  %v7440_v35 = vunpack.c.h.bf16 %v7122_v12 }
 0xd71   : > { %8941 = vmatpush2.msra.mxu0 %v7367_v39  ;;  %9079 = vmatpush2.msra.mxu1 %v7509_v4  ;;  %v7117_v39 = vld [vmem:[%s14811_s28 + $0x3a8] sm:$0xff]  ;;  %v7539_v4 = vunpack.c.l.bf16 %v7172_v13 }
 0xd72   : > { %8942 = vmatprep.subr.mxu0 %v7358_v3  ;;  %9080 = vmatprep.subr.mxu1 %v7500_v11  ;;  %v7162_v3 = vld [vmem:[%s14811_s28 + $0x510] sm:$0xff]  ;;  %v7439_v11 = vunpack.c.l.bf16 %v7122_v12  ;;  %v7429_v61 = vunpack.c.l.bf16 %v7117_v39  ;;  %v7092_v12 = vld [vmem:[%s14811_s28 + $0x2e0] sm:$0xff] }
 0xd73   : > { %8943 = vmatpush2.msra.mxu0 %v7357_v36  ;;  %9081 = vmatpush2.msra.mxu1 %v7499_v52  ;;  %v7529_v36 = vunpack.c.l.bf16 %v7167_v54  ;;  %v7430_v52 = vunpack.c.h.bf16 %v7117_v39  ;;  %v7520_v63 = vunpack.c.h.bf16 %v7162_v3  ;;  %v7380_v39 = vunpack.c.h.bf16 %v7092_v12 }
 0xd74   : > { %8945 = vmatmul.mubr.f32.vlgmr.msra.gmra.mxu0 %v16541_v56  ;;  %9082 = vmatprep.subr.mxu1 %v7490_v40  ;;  %v7112_v40 = vld [vmem:[%s14811_s28 + $0x380] sm:$0xff] }
 0xd75   : > { %13839 = vmatprep.subr.msk.mxu0 %vm2491_vm9, %v7580_v57  ;;  %8950 = vmatprep.mubr.f32.mxu0 %v16624_v59  ;;  %v7078_v57 = vld [vmem:[%s14811_s28 + $0x270] sm:$0xff]  ;;  %v7420_v62 = vunpack.c.h.bf16 %v7112_v40 }
 0xd76   : > { %9083 = vmatpush2.msra.mxu1 %v7489_v30  ;;  %13840 = vmatpush1.msk.msra.mxu0 %vm2491_vm9, %v7579_v34  ;;  %v7519_v30 = vunpack.c.l.bf16 %v7162_v3  ;;  %v7107_v34 = vld [vmem:[%s14811_s28 + $0x358] sm:$0xff]  ;;  %v7352_v58 = vunpack.c.h.bf16 %v7078_v57  ;;  %v7379_v3 = vunpack.c.l.bf16 %v7092_v12  ;;  %v7178_v12 = vld [vmem:[%s14811_s28 + $0x590] sm:$0xff] }
 0xd77   : > { %9084 = vmatprep.subr.mxu1 %v7480_v17  ;;  %9149 = vmatprep.subr.mxu0 %v7570_v32  ;;  %v7073_v17 = vld [vmem:[%s14811_s28 + $0x248] sm:$0xff]  ;;  %v7419_v32 = vunpack.c.l.bf16 %v7112_v40  ;;  %v7409_v26 = vunpack.c.l.bf16 %v7107_v34 }
 0xd78   : > { %9085 = vmatpush2.msra.mxu1 %v7479_v8  ;;  %9150 = vmatpush1.msra.mxu0 %v7569_v25  ;;  %v7351_v8 = vunpack.c.l.bf16 %v7078_v57  ;;  %v7410_v25 = vunpack.c.h.bf16 %v7107_v34  ;;  %v7342_v28 = vunpack.c.h.bf16 %v7073_v17 }
 0xd79   : > { %8951 = vmatmul.mubr.f32.gmra.mxu0 %v16628_v19  ;;  %9086 = vmatprep.subr.mxu1 %v7470_v41  ;;  %v7102_v41 = vld [vmem:[%s14811_s28 + $0x330] sm:$0xff] }
 0xd7a   : > { %9151 = vmatprep.subr.mxu0 %v7560_v53  ;;  %8956 = vmatprep.mubr.f32.mxu0 %v16641_v18  ;;  %v7068_v53 = vld [vmem:[%s14811_s28 + $0x220] sm:$0xff]  ;;  %v7400_v20 = vunpack.c.h.bf16 %v7102_v41 }
 0xd7b   : > { %9087 = vmatpush2.msra.mxu1 %v7469_v31  ;;  %9152 = vmatpush1.msra.mxu0 %v7559_v50  ;;  %v7341_v31 = vunpack.c.l.bf16 %v7073_v17  ;;  %v7097_v50 = vld [vmem:[%s14811_s28 + $0x308] sm:$0xff]  ;;  %v7332_v13 = vunpack.c.h.bf16 %v7068_v53 }
 0xd7c   : > { %9088 = vmatprep.subr.mxu1 %v7460_v24  ;;  %9153 = vmatprep.subr.mxu0 %v7550_v1  ;;  %v7063_v24 = vld [vmem:[%s14811_s28 + $0x1f8] sm:$0xff]  ;;  %v7399_v1 = vunpack.c.l.bf16 %v7102_v41  ;;  %v7193_v17 = vld [vmem:[%s14811_s28 + $0x608] sm:$0x33]  ;;  %v7188_v41 = vld [vmem:[%s14811_s28 + $0x5e0] sm:$0xff] }
 0xd7d   : > { %9089 = vmatpush2.msra.mxu1 %v7459_v23  ;;  %9154 = vmatpush1.msra.mxu0 %v7549_v46  ;;  %v7331_v23 = vunpack.c.l.bf16 %v7068_v53  ;;  %v7390_v46 = vunpack.c.h.bf16 %v7097_v50  ;;  %v7322_v54 = vunpack.c.h.bf16 %v7063_v24  ;;  %v7581_v53 = vunpack.c.l.bf16 %v7193_v17 }
 0xd7e   : > { %8957 = vmatmul.mubr.f32.gmra.mxu0 %v16636_v49  ;;  %9090 = vmatprep.subr.mxu1 %v7450_v27  ;;  %v7389_v27 = vunpack.c.l.bf16 %v7097_v50 }
 0xd7f   : > { %9155 = vmatprep.subr.mxu0 %v7540_v55  ;;  %9091 = vmatpush2.msra.mxu1 %v7449_v15  ;;  %v7058_v15 = vld [vmem:[%s14811_s28 + $0x1d0] sm:$0xff]  ;;  %v7321_v55 = vunpack.c.l.bf16 %v7063_v24  ;;  %v7183_v24 = vld [vmem:[%s14811_s28 + $0x5b8] sm:$0xff] }
 0xd80   : > { %9156 = vmatpush1.msra.mxu0 %v7539_v4  ;;  %9092 = vmatprep.subr.mxu1 %v7440_v35  ;;  %v7087_v4 = vld [vmem:[%s14811_s28 + $0x2b8] sm:$0xff]  ;;  %v7053_v35 = vld [vmem:[%s14811_s28 + $0x1a8] sm:$0xff] }
 0xd81   : > { %9157 = vmatprep.subr.mxu0 %v7530_v21  ;;  %9093 = vmatpush2.msra.mxu1 %v7439_v11  ;;  %v7312_v11 = vunpack.c.h.bf16 %v7058_v15  ;;  %v7311_v21 = vunpack.c.l.bf16 %v7058_v15  ;;  %v7370_v40 = vunpack.c.h.bf16 %v7087_v4  ;;  %v7301_v57 = vunpack.c.l.bf16 %v7053_v35 }
 0xd82   : > { %9158 = vmatpush1.msra.mxu0 %v7529_v36  ;;  %9094 = vmatprep.subr.mxu1 %v7430_v52  ;;  %v7082_v36 = vld [vmem:[%s14811_s28 + $0x290] sm:$0xff]  ;;  %v7048_v52 = vld [vmem:[%s14811_s28 + $0x180] sm:$0xff]  ;;  %v7561_v15 = vunpack.c.l.bf16 %v7183_v24 }
 0xd83   : > { %9159 = vmatprep.subr.mxu0 %v7520_v63  ;;  %9095 = vmatpush2.msra.mxu1 %v7429_v61  ;;  %v7302_v61 = vunpack.c.h.bf16 %v7053_v35  ;;  %v7369_v63 = vunpack.c.l.bf16 %v7087_v4  ;;  %v7360_v34 = vunpack.c.h.bf16 %v7082_v36  ;;  %v7552_v4 = vunpack.c.h.bf16 %v7178_v12  ;;  %v7173_v35 = vld [vmem:[%s14811_s28 + $0x568] sm:$0xff] }
 0xd84   : > { %9160 = vmatpush1.msra.mxu0 %v7519_v30  ;;  %9193 = vmatprep.mubr.f32.mxu0 %v18843_v0  ;;  %v7043_v30 = vld [vmem:[%s14811_s28 + $0x158] sm:$0xff] }
 0xd85   : > { %9096 = vmatprep.subr.mxu1 %v7420_v62  ;;  %13841 = vmatmul.mubr.msk.f32.vlgmr.msra.gmra.mxu0 %vm1853_vm6, %v16539_v33  ;;  %v7292_v62 = vunpack.c.h.bf16 %v7048_v52 }
 0xd86   : > { %9212 = vmatprep.subr.mxu0 %v7352_v58  ;;  %9097 = vmatpush2.msra.mxu1 %v7419_v32  ;;  %v7359_v32 = vunpack.c.l.bf16 %v7082_v36  ;;  %v7291_v58 = vunpack.c.l.bf16 %v7048_v52  ;;  %v7168_v52 = vld [vmem:[%s14811_s28 + $0x540] sm:$0xff] }
 0xd87   : > { %9213 = vmatpush1.msra.mxu0 %v7351_v8  ;;  %9098 = vmatprep.subr.mxu1 %v7410_v25  ;;  %v7282_v8 = vunpack.c.h.bf16 %v7043_v30  ;;  %v7038_v25 = vld [vmem:[%s14811_s28 + $0x130] sm:$0xff] }
 0xd88   : > { %9214 = vmatprep.subr.mxu0 %v7342_v28  ;;  %9099 = vmatpush2.msra.mxu1 %v7409_v26  ;;  %v7582_v26 = vunpack.c.h.bf16 %v7193_v17  ;;  %v7281_v28 = vunpack.c.l.bf16 %v7043_v30  ;;  %v7272_v50 = vunpack.c.h.bf16 %v7038_v25  ;;  %v7532_v17 = vunpack.c.h.bf16 %v7168_v52 }
 0xd89   : > { %9199 = vmatprep.mubr.f32.mxu0 %v18843_v0  ;;  %9215 = vmatpush1.msra.mxu0 %v7341_v31  ;;  %v7033_v31 = vld [vmem:[%s14811_s28 + $0x108] sm:$0xff] }
 0xd8a   : > { %9100 = vmatprep.subr.mxu1 %v7400_v20  ;;  %13842 = vmatmul.mubr.msk.f32.gmra.mxu0 %vm1853_vm6, %v16626_v5  ;;  %v7572_v20 = vunpack.c.h.bf16 %v7188_v41 }
 0xd8b   : > { %9216 = vmatprep.subr.mxu0 %v7332_v13  ;;  %9101 = vmatpush2.msra.mxu1 %v7399_v1  ;;  %v7271_v1 = vunpack.c.l.bf16 %v7038_v25  ;;  %v7571_v13 = vunpack.c.l.bf16 %v7188_v41 }
 0xd8c   : > { %9217 = vmatpush1.msra.mxu0 %v7331_v23  ;;  %9102 = vmatprep.subr.mxu1 %v7390_v46  ;;  %v7262_v23 = vunpack.c.h.bf16 %v7033_v31  ;;  %v7028_v46 = vld [vmem:[%s14811_s28 + $0xe0] sm:$0xff] }
 0xd8d   : > { %9218 = vmatprep.subr.mxu0 %v7322_v54  ;;  %9103 = vmatpush2.msra.mxu1 %v7389_v27  ;;  %v7562_v27 = vunpack.c.h.bf16 %v7183_v24  ;;  %v7261_v54 = vunpack.c.l.bf16 %v7033_v31 }
 0xd8e   : > { %9205 = vmatprep.mubr.f32.mxu0 %v18843_v0  ;;  %9219 = vmatpush1.msra.mxu0 %v7321_v55  ;;  %v7023_v55 = vld [vmem:[%s14811_s28 + $0xb8] sm:$0xff] }
 0xd8f   : > { %9104 = vmatprep.subr.mxu1 %v7380_v39  ;;  %13843 = vmatmul.mubr.msk.f32.gmra.mxu0 %vm1853_vm6, %v16647_v48  ;;  %v7252_v39 = vunpack.c.h.bf16 %v7028_v46  ;;  %v7242_v36 = vunpack.c.h.bf16 %v7023_v55 }
 0xd90   : > { %9220 = vmatprep.subr.mxu0 %v7312_v11  ;;  %9105 = vmatpush2.msra.mxu1 %v7379_v3  ;;  %v7251_v3 = vunpack.c.l.bf16 %v7028_v46  ;;  %v7551_v11 = vunpack.c.l.bf16 %v7178_v12 }
 0xd91   : > { %9221 = vmatpush1.msra.mxu0 %v7311_v21  ;;  %9276 = vmatprep.mubr.f32.mxu0 %v16537_v51  ;;  %v7018_v21 = vld [vmem:[%s14811_s28 + $0x90] sm:$0xff] }
 0xd92   : > { %9106 = vmatprep.subr.mxu1 %v7370_v40  ;;  %9222 = vmatprep.subr.mxu0 %v7302_v61  ;;  %v7241_v40 = vunpack.c.l.bf16 %v7023_v55  ;;  %v7542_v61 = vunpack.c.h.bf16 %v7173_v35  ;;  %v7232_v30 = vunpack.c.h.bf16 %v7018_v21 }
 0xd93   : > { %9107 = vmatpush2.msra.mxu1 %v7369_v63  ;;  %9223 = vmatpush1.msra.mxu0 %v7301_v57  ;;  %v7013_v63 = vld [vmem:[%s14811_s28 + $0x68] sm:$0xff]  ;;  %v7541_v57 = vunpack.c.l.bf16 %v7173_v35 }
 0xd94   : > { %9108 = vmatprep.subr.mxu1 %v7360_v34  ;;  %9224 = vmatprep.subr.mxu0 %v7292_v62  ;;  %v7163_v34 = vld [vmem:[%s14811_s28 + $0x518] sm:$0xff]  ;;  %v7231_v62 = vunpack.c.l.bf16 %v7018_v21  ;;  %v7221_v25 = vunpack.c.l.bf16 %v7013_v63  ;;  %v7148_v21 = vld [vmem:[%s14811_s28 + $0x4a0] sm:$0xff] }
 0xd95   : > { %9109 = vmatpush2.msra.mxu1 %v7359_v32  ;;  %9225 = vmatpush1.msra.mxu0 %v7291_v58  ;;  %v7531_v32 = vunpack.c.l.bf16 %v7168_v52  ;;  %v7222_v58 = vunpack.c.h.bf16 %v7013_v63  ;;  %v7522_v41 = vunpack.c.h.bf16 %v7163_v34  ;;  %v7492_v63 = vunpack.c.h.bf16 %v7148_v21 }
 0xd96   : > { %9111 = vmatmul.mubr.f32.vlgmr.msra.gmra.mxu1 %v16541_v56  ;;  %9226 = vmatprep.subr.mxu0 %v7282_v8  ;;  %v7008_v8 = vld [vmem:[%s14811_s28 + $0x40] sm:$0xff] }
 0xd97   : > { %13844 = vmatprep.subr.msk.mxu1 %vm2491_vm9, %v7582_v26  ;;  %9116 = vmatprep.mubr.f32.mxu1 %v16624_v59  ;;  %v7079_v26 = vld [vmem:[%s14811_s28 + $0x278] sm:$0xff]  ;;  %v7212_v31 = vunpack.c.h.bf16 %v7008_v8 }
 0xd98   : > { %9227 = vmatpush1.msra.mxu0 %v7281_v28  ;;  %13845 = vmatpush1.msk.msra.mxu1 %vm2491_vm9, %v7581_v53  ;;  %v7521_v28 = vunpack.c.l.bf16 %v7163_v34  ;;  %v7003_v53 = vld [vmem:[%s14811_s28 + $0x18] sm:$0xff]  ;;  %v7354_v24 = vunpack.c.h.bf16 %v7079_v26  ;;  %v7491_v34 = vunpack.c.l.bf16 %v7148_v21 }
 0xd99   : > { %9228 = vmatprep.subr.mxu0 %v7272_v50  ;;  %9315 = vmatprep.subr.mxu1 %v7572_v20  ;;  %v7074_v50 = vld [vmem:[%s14811_s28 + $0x250] sm:$0xff]  ;;  %v7211_v20 = vunpack.c.l.bf16 %v7008_v8  ;;  %v7201_v46 = vunpack.c.l.bf16 %v7003_v53 }
 0xd9a   : > { %9229 = vmatpush1.msra.mxu0 %v7271_v1  ;;  %9316 = vmatpush1.msra.mxu1 %v7571_v13  ;;  %v7353_v1 = vunpack.c.l.bf16 %v7079_v26  ;;  %v7202_v13 = vunpack.c.h.bf16 %v7003_v53  ;;  %v7344_v12 = vunpack.c.h.bf16 %v7074_v50  ;;  %v7044_v53 = vld [vmem:[%s14811_s28 + $0x160] sm:$0xff] }
 0xd9b   : > { %9117 = vmatmul.mubr.f32.gmra.mxu1 %v16628_v19  ;;  %9230 = vmatprep.subr.mxu0 %v7262_v23  ;;  %v7158_v23 = vld [vmem:[%s14811_s28 + $0x4f0] sm:$0xff] }
 0xd9c   : > { %9317 = vmatprep.subr.mxu1 %v7562_v27  ;;  %9122 = vmatprep.mubr.f32.mxu1 %v16641_v18  ;;  %v7069_v27 = vld [vmem:[%s14811_s28 + $0x228] sm:$0xff]  ;;  %v7512_v55 = vunpack.c.h.bf16 %v7158_v23 }
 0xd9d   : > { %9231 = vmatpush1.msra.mxu0 %v7261_v54  ;;  %9318 = vmatpush1.msra.mxu1 %v7561_v15  ;;  %v7343_v54 = vunpack.c.l.bf16 %v7074_v50  ;;  %v7153_v15 = vld [vmem:[%s14811_s28 + $0x4c8] sm:$0xff]  ;;  %v7334_v35 = vunpack.c.h.bf16 %v7069_v27 }
 0xd9e   : > { %9232 = vmatprep.subr.mxu0 %v7252_v39  ;;  %9319 = vmatprep.subr.mxu1 %v7552_v4  ;;  %v7064_v39 = vld [vmem:[%s14811_s28 + $0x200] sm:$0xff]  ;;  %v7511_v4 = vunpack.c.l.bf16 %v7158_v23 }
 0xd9f   : > { %9233 = vmatpush1.msra.mxu0 %v7251_v3  ;;  %9320 = vmatpush1.msra.mxu1 %v7551_v11  ;;  %v7333_v3 = vunpack.c.l.bf16 %v7069_v27  ;;  %v7502_v11 = vunpack.c.h.bf16 %v7153_v15  ;;  %v7324_v52 = vunpack.c.h.bf16 %v7064_v39  ;;  %v7283_v27 = vunpack.c.l.bf16 %v7044_v53 }
 0xda0   : > { %9123 = vmatmul.mubr.f32.gmra.mxu1 %v16636_v49  ;;  %9234 = vmatprep.subr.mxu0 %v7242_v36  ;;  %v7501_v36 = vunpack.c.l.bf16 %v7153_v15  ;;  %v7034_v15 = vld [vmem:[%s14811_s28 + $0x110] sm:$0xff] }
 0xda1   : > { %9321 = vmatprep.subr.mxu1 %v7542_v61  ;;  %9235 = vmatpush1.msra.mxu0 %v7241_v40  ;;  %v7059_v40 = vld [vmem:[%s14811_s28 + $0x1d8] sm:$0xff]  ;;  %v7323_v61 = vunpack.c.l.bf16 %v7064_v39  ;;  %v7264_v21 = vunpack.c.h.bf16 %v7034_v15 }
 0xda2   : > { %9322 = vmatpush1.msra.mxu1 %v7541_v57  ;;  %9236 = vmatprep.subr.mxu0 %v7232_v30  ;;  %v7143_v57 = vld [vmem:[%s14811_s28 + $0x478] sm:$0xff]  ;;  %v7054_v30 = vld [vmem:[%s14811_s28 + $0x1b0] sm:$0xff] }
 0xda3   : > { %9323 = vmatprep.subr.mxu1 %v7532_v17  ;;  %9237 = vmatpush1.msra.mxu0 %v7231_v62  ;;  %v7314_v62 = vunpack.c.h.bf16 %v7059_v40  ;;  %v7313_v17 = vunpack.c.l.bf16 %v7059_v40  ;;  %v7482_v8 = vunpack.c.h.bf16 %v7143_v57  ;;  %v7303_v26 = vunpack.c.l.bf16 %v7054_v30  ;;  %v7113_v40 = vld [vmem:[%s14811_s28 + $0x388] sm:$0xff] }
 0xda4   : > { %9324 = vmatpush1.msra.mxu1 %v7531_v32  ;;  %9238 = vmatprep.subr.mxu0 %v7222_v58  ;;  %v7138_v32 = vld [vmem:[%s14811_s28 + $0x450] sm:$0xff]  ;;  %v7049_v58 = vld [vmem:[%s14811_s28 + $0x188] sm:$0xff] }
 0xda5   : > { %9325 = vmatprep.subr.mxu1 %v7522_v41  ;;  %9239 = vmatpush1.msra.mxu0 %v7221_v25  ;;  %v7304_v25 = vunpack.c.h.bf16 %v7054_v30  ;;  %v7481_v41 = vunpack.c.l.bf16 %v7143_v57  ;;  %v7294_v50 = vunpack.c.h.bf16 %v7049_v58 }
 0xda6   : > { %9326 = vmatpush1.msra.mxu1 %v7521_v28  ;;  %9359 = vmatprep.mubr.f32.mxu1 %v18843_v0  ;;  %v7133_v28 = vld [vmem:[%s14811_s28 + $0x428] sm:$0xff] }
 0xda7   : > { %9240 = vmatprep.subr.mxu0 %v7212_v31  ;;  %13846 = vmatmul.mubr.msk.f32.vlgmr.msra.gmra.mxu1 %vm1853_vm6, %v16539_v33  ;;  %v7472_v31 = vunpack.c.h.bf16 %v7138_v32  ;;  %v7462_v23 = vunpack.c.h.bf16 %v7133_v28 }
 0xda8   : > { %9378 = vmatprep.subr.mxu1 %v7354_v24  ;;  %9241 = vmatpush1.msra.mxu0 %v7211_v20  ;;  %v7471_v20 = vunpack.c.l.bf16 %v7138_v32  ;;  %v7293_v24 = vunpack.c.l.bf16 %v7049_v58  ;;  %v7422_v32 = vunpack.c.h.bf16 %v7113_v40 }
 0xda9   : > { %9379 = vmatpush1.msra.mxu1 %v7353_v1  ;;  %9242 = vmatprep.subr.mxu0 %v7202_v13  ;;  %v7128_v1 = vld [vmem:[%s14811_s28 + $0x400] sm:$0xff]  ;;  %v7039_v13 = vld [vmem:[%s14811_s28 + $0x138] sm:$0xff] }
 0xdaa   : > { %9380 = vmatprep.subr.mxu1 %v7344_v12  ;;  %9243 = vmatpush1.msra.mxu0 %v7201_v46  ;;  %v7284_v46 = vunpack.c.h.bf16 %v7044_v53  ;;  %v7461_v12 = vunpack.c.l.bf16 %v7133_v28  ;;  %v7451_v39 = vunpack.c.l.bf16 %v7128_v1 }
 0xdab   : > { %9365 = vmatprep.mubr.f32.mxu1 %v18843_v0  ;;  %9381 = vmatpush1.msra.mxu1 %v7343_v54  ;;  %v7123_v54 = vld [vmem:[%s14811_s28 + $0x3d8] sm:$0xff] }
 0xdac   : > { %9244 = vmatprep.subr.mxu0 %v7512_v55  ;;  %13847 = vmatmul.mubr.msk.f32.gmra.mxu1 %vm1853_vm6, %v16626_v5  ;;  %v7452_v55 = vunpack.c.h.bf16 %v7128_v1 }
 0xdad   : > { %9382 = vmatprep.subr.mxu1 %v7334_v35  ;;  %9245 = vmatpush2.msra.mxu0 %v7511_v4  ;;  %v7273_v4 = vunpack.c.l.bf16 %v7039_v13  ;;  %v7118_v35 = vld [vmem:[%s14811_s28 + $0x3b0] sm:$0xff] }
 0xdae   : > { %9383 = vmatpush1.msra.mxu1 %v7333_v3  ;;  %9246 = vmatprep.subr.mxu0 %v7502_v11  ;;  %v7029_v3 = vld [vmem:[%s14811_s28 + $0xe8] sm:$0xff]  ;;  %v7442_v11 = vunpack.c.h.bf16 %v7123_v54  ;;  %v7431_v30 = vunpack.c.l.bf16 %v7118_v35 }
 0xdaf   : > { %9384 = vmatprep.subr.mxu1 %v7324_v52  ;;  %9247 = vmatpush2.msra.mxu0 %v7501_v36  ;;  %v7441_v36 = vunpack.c.l.bf16 %v7123_v54  ;;  %v7263_v52 = vunpack.c.l.bf16 %v7034_v15  ;;  %v7254_v57 = vunpack.c.h.bf16 %v7029_v3 }
 0xdb0   : > { %9371 = vmatprep.mubr.f32.mxu1 %v18843_v0  ;;  %9385 = vmatpush1.msra.mxu1 %v7323_v61  ;;  %v7024_v61 = vld [vmem:[%s14811_s28 + $0xc0] sm:$0xff] }
 0xdb1   : > { %9248 = vmatprep.subr.mxu0 %v7492_v63  ;;  %13848 = vmatmul.mubr.msk.f32.gmra.mxu1 %vm1853_vm6, %v16647_v48  ;;  %v7432_v63 = vunpack.c.h.bf16 %v7118_v35  ;;  %v7244_v58 = vunpack.c.h.bf16 %v7024_v61 }
 0xdb2   : > { %9386 = vmatprep.subr.mxu1 %v7314_v62  ;;  %9249 = vmatpush2.msra.mxu0 %v7491_v34  ;;  %v7253_v34 = vunpack.c.l.bf16 %v7029_v3  ;;  %v7108_v62 = vld [vmem:[%s14811_s28 + $0x360] sm:$0xff] }
 0xdb3   : > { %9387 = vmatpush1.msra.mxu1 %v7313_v17  ;;  %9442 = vmatprep.mubr.f32.mxu1 %v16537_v51  ;;  %v7274_v51 = vunpack.c.h.bf16 %v7039_v13  ;;  %v7019_v17 = vld [vmem:[%s14811_s28 + $0x98] sm:$0xff]  ;;  %v7412_v28 = vunpack.c.h.bf16 %v7108_v62 }
 0xdb4   : > { %9250 = vmatprep.subr.mxu0 %v7482_v8  ;;  %9388 = vmatprep.subr.mxu1 %v7304_v25  ;;  %v7421_v8 = vunpack.c.l.bf16 %v7113_v40  ;;  %v7243_v25 = vunpack.c.l.bf16 %v7024_v61  ;;  %v7234_v53 = vunpack.c.h.bf16 %v7019_v17 }
 0xdb5   : > { %9251 = vmatpush2.msra.mxu0 %v7481_v41  ;;  %9389 = vmatpush1.msra.mxu1 %v7303_v26  ;;  %v7103_v41 = vld [vmem:[%s14811_s28 + $0x338] sm:$0xff]  ;;  %v7014_v26 = vld [vmem:[%s14811_s28 + $0x70] sm:$0xff] }
 0xdb6   : > { %9252 = vmatprep.subr.mxu0 %v7472_v31  ;;  %9390 = vmatprep.subr.mxu1 %v7294_v50  ;;  %v7411_v31 = vunpack.c.l.bf16 %v7108_v62  ;;  %v7233_v50 = vunpack.c.l.bf16 %v7019_v17  ;;  %v7402_v1 = vunpack.c.h.bf16 %v7103_v41  ;;  %v7224_v13 = vunpack.c.h.bf16 %v7014_v26  ;;  %v7194_v17 = vld [vmem:[%s14811_s28 + $0x610] sm:$0x33] }
 0xdb7   : > { %9253 = vmatpush2.msra.mxu0 %v7471_v20  ;;  %9391 = vmatpush1.msra.mxu1 %v7293_v24  ;;  %v7098_v20 = vld [vmem:[%s14811_s28 + $0x310] sm:$0xff]  ;;  %v7009_v24 = vld [vmem:[%s14811_s28 + $0x48] sm:$0xff] }
 0xdb8   : > { %9254 = vmatprep.subr.mxu0 %v7462_v23  ;;  %9392 = vmatprep.subr.mxu1 %v7284_v46  ;;  %v7401_v23 = vunpack.c.l.bf16 %v7103_v41  ;;  %v7223_v46 = vunpack.c.l.bf16 %v7014_v26  ;;  %v7392_v54 = vunpack.c.h.bf16 %v7098_v20  ;;  %v7214_v15 = vunpack.c.h.bf16 %v7009_v24  ;;  %v7189_v41 = vld [vmem:[%s14811_s28 + $0x5e8] sm:$0xff] }
 0xdb9   : > { %9255 = vmatpush2.msra.mxu0 %v7461_v12  ;;  %9393 = vmatpush1.msra.mxu1 %v7283_v27  ;;  %v7093_v12 = vld [vmem:[%s14811_s28 + $0x2e8] sm:$0xff]  ;;  %v7004_v27 = vld [vmem:[%s14811_s28 + $0x20] sm:$0xff]  ;;  %v7584_v26 = vunpack.c.h.bf16 %v7194_v17 }
 0xdba   : > { %9256 = vmatprep.subr.mxu0 %v7452_v55  ;;  %9394 = vmatprep.subr.mxu1 %v7274_v51  ;;  %v7391_v55 = vunpack.c.l.bf16 %v7098_v20  ;;  %v7213_v51 = vunpack.c.l.bf16 %v7009_v24  ;;  %v7382_v35 = vunpack.c.h.bf16 %v7093_v12  ;;  %v7204_v3 = vunpack.c.h.bf16 %v7004_v27  ;;  %v7184_v24 = vld [vmem:[%s14811_s28 + $0x5c0] sm:$0xff] }
 0xdbb   : > { %9257 = vmatpush2.msra.mxu0 %v7451_v39  ;;  %9395 = vmatpush1.msra.mxu1 %v7273_v4  ;;  %v7088_v39 = vld [vmem:[%s14811_s28 + $0x2c0] sm:$0xff]  ;;  %v7159_v4 = vld [vmem:[%s14811_s28 + $0x4f8] sm:$0xff]  ;;  %v7574_v20 = vunpack.c.h.bf16 %v7189_v41 }
 0xdbc   : > { %9258 = vmatprep.subr.mxu0 %v7442_v11  ;;  %9396 = vmatprep.subr.mxu1 %v7264_v21  ;;  %v7381_v11 = vunpack.c.l.bf16 %v7093_v12  ;;  %v7203_v21 = vunpack.c.l.bf16 %v7004_v27  ;;  %v7372_v40 = vunpack.c.h.bf16 %v7088_v39  ;;  %v7514_v61 = vunpack.c.h.bf16 %v7159_v4  ;;  %v7179_v12 = vld [vmem:[%s14811_s28 + $0x598] sm:$0xff] }
 0xdbd   : > { %9259 = vmatpush2.msra.mxu0 %v7441_v36  ;;  %9397 = vmatpush1.msra.mxu1 %v7263_v52  ;;  %v7083_v36 = vld [vmem:[%s14811_s28 + $0x298] sm:$0xff]  ;;  %v7154_v52 = vld [vmem:[%s14811_s28 + $0x4d0] sm:$0xff]  ;;  %v7564_v27 = vunpack.c.h.bf16 %v7184_v24 }
 0xdbe   : > { %9260 = vmatprep.subr.mxu0 %v7432_v63  ;;  %9398 = vmatprep.subr.mxu1 %v7254_v57  ;;  %v7371_v63 = vunpack.c.l.bf16 %v7088_v39  ;;  %v7513_v57 = vunpack.c.l.bf16 %v7159_v4  ;;  %v7504_v62 = vunpack.c.h.bf16 %v7154_v52  ;;  %v7554_v39 = vunpack.c.h.bf16 %v7179_v12  ;;  %v7174_v4 = vld [vmem:[%s14811_s28 + $0x570] sm:$0xff] }
 0xdbf   : > { %9261 = vmatpush2.msra.mxu0 %v7431_v30  ;;  %9399 = vmatpush1.msra.mxu1 %v7253_v34  ;;  %v7149_v30 = vld [vmem:[%s14811_s28 + $0x4a8] sm:$0xff]  ;;  %v7362_v34 = vunpack.c.h.bf16 %v7083_v36 }
 0xdc0   : > { %9262 = vmatprep.subr.mxu0 %v7422_v32  ;;  %9400 = vmatprep.subr.mxu1 %v7244_v58  ;;  %v7361_v32 = vunpack.c.l.bf16 %v7083_v36  ;;  %v7503_v58 = vunpack.c.l.bf16 %v7154_v52  ;;  %v7169_v36 = vld [vmem:[%s14811_s28 + $0x548] sm:$0xff] }
 0xdc1   : > { %9263 = vmatpush2.msra.mxu0 %v7421_v8  ;;  %9401 = vmatpush1.msra.mxu1 %v7243_v25  ;;  %v7494_v8 = vunpack.c.h.bf16 %v7149_v30  ;;  %v7144_v25 = vld [vmem:[%s14811_s28 + $0x480] sm:$0xff] }
 0xdc2   : > { %9264 = vmatprep.subr.mxu0 %v7412_v28  ;;  %9402 = vmatprep.subr.mxu1 %v7234_v53  ;;  %v7493_v28 = vunpack.c.l.bf16 %v7149_v30  ;;  %v7583_v53 = vunpack.c.l.bf16 %v7194_v17  ;;  %v7164_v30 = vld [vmem:[%s14811_s28 + $0x520] sm:$0xff]  ;;  %v7533_v17 = vunpack.c.l.bf16 %v7169_v36 }
 0xdc3   : > { %9265 = vmatpush2.msra.mxu0 %v7411_v31  ;;  %9403 = vmatpush1.msra.mxu1 %v7233_v50  ;;  %v7139_v31 = vld [vmem:[%s14811_s28 + $0x458] sm:$0xff]  ;;  %v7484_v50 = vunpack.c.h.bf16 %v7144_v25 }
 0xdc4   : > { %9266 = vmatprep.subr.mxu0 %v7402_v1  ;;  %9404 = vmatprep.subr.mxu1 %v7224_v13  ;;  %v7483_v1 = vunpack.c.l.bf16 %v7144_v25  ;;  %v7573_v13 = vunpack.c.l.bf16 %v7189_v41  ;;  %v7524_v25 = vunpack.c.h.bf16 %v7164_v30  ;;  %v7523_v41 = vunpack.c.l.bf16 %v7164_v30 }
 0xdc5   : > { %9267 = vmatpush2.msra.mxu0 %v7401_v23  ;;  %9405 = vmatpush1.msra.mxu1 %v7223_v46  ;;  %v7474_v23 = vunpack.c.h.bf16 %v7139_v31  ;;  %v7134_v46 = vld [vmem:[%s14811_s28 + $0x430] sm:$0xff] }
 0xdc6   : > { %9268 = vmatprep.subr.mxu0 %v7392_v54  ;;  %9406 = vmatprep.subr.mxu1 %v7214_v15  ;;  %v7473_v54 = vunpack.c.l.bf16 %v7139_v31  ;;  %v7563_v15 = vunpack.c.l.bf16 %v7184_v24  ;;  %v7104_v31 = vld [vmem:[%s14811_s28 + $0x340] sm:$0xff]  ;;  %v7099_v24 = vld [vmem:[%s14811_s28 + $0x318] sm:$0xff] }
 0xdc7   : > { %9269 = vmatpush2.msra.mxu0 %v7391_v55  ;;  %9407 = vmatpush1.msra.mxu1 %v7213_v51  ;;  %v7129_v55 = vld [vmem:[%s14811_s28 + $0x408] sm:$0xff]  ;;  %v7464_v51 = vunpack.c.h.bf16 %v7134_v46 }
 0xdc8   : > { %9270 = vmatprep.subr.mxu0 %v7382_v35  ;;  %9408 = vmatprep.subr.mxu1 %v7204_v3  ;;  %v7463_v35 = vunpack.c.l.bf16 %v7134_v46  ;;  %v7553_v3 = vunpack.c.l.bf16 %v7179_v12  ;;  %v7453_v52 = vunpack.c.l.bf16 %v7129_v55  ;;  %v7394_v46 = vunpack.c.h.bf16 %v7099_v24 }
 0xdc9   : > { %9271 = vmatpush2.msra.mxu0 %v7381_v11  ;;  %9409 = vmatpush1.msra.mxu1 %v7203_v21  ;;  %v7124_v11 = vld [vmem:[%s14811_s28 + $0x3e0] sm:$0xff]  ;;  %v7454_v21 = vunpack.c.h.bf16 %v7129_v55  ;;  %v7393_v12 = vunpack.c.l.bf16 %v7099_v24 }
 0xdca   : > { %9272 = vmatprep.subr.mxu0 %v7372_v40  ;;  %9410 = vmatprep.subr.mxu1 %v7514_v61  ;;  %v7544_v40 = vunpack.c.h.bf16 %v7174_v4  ;;  %v7119_v61 = vld [vmem:[%s14811_s28 + $0x3b8] sm:$0xff] }
 0xdcb   : > { %9273 = vmatpush2.msra.mxu0 %v7371_v63  ;;  %9411 = vmatpush2.msra.mxu1 %v7513_v57  ;;  %v7543_v63 = vunpack.c.l.bf16 %v7174_v4  ;;  %v7444_v57 = vunpack.c.h.bf16 %v7124_v11  ;;  %v10345_v4 = vld [vmem:[%s14821_s5 + $0x234] sm:$0xff] }
 0xdcc   : > { %9274 = vmatprep.subr.mxu0 %v7362_v34  ;;  %9412 = vmatprep.subr.mxu1 %v7504_v62  ;;  %v7443_v34 = vunpack.c.l.bf16 %v7124_v11  ;;  %v7534_v62 = vunpack.c.h.bf16 %v7169_v36  ;;  %v10277_v36 = vld [vmem:[%s14821_s5 + $0x9c] sm:$0xff] }
 0xdcd   : > { %9275 = vmatpush2.msra.mxu0 %v7361_v32  ;;  %9413 = vmatpush2.msra.mxu1 %v7503_v58  ;;  %v7434_v32 = vunpack.c.h.bf16 %v7119_v61  ;;  %v7114_v58 = vld [vmem:[%s14811_s28 + $0x390] sm:$0xff]  ;;  %v10598_v30 = vunpack.c.l.bf16 %v10277_v36 }
 0xdce   : > { %9277 = vmatmul.mubr.f32.vlgmr.msra.gmra.mxu0 %v16541_v56  ;;  %9414 = vmatprep.subr.mxu1 %v7494_v8  ;;  %v7433_v8 = vunpack.c.l.bf16 %v7119_v61 }
 0xdcf   : > { %13849 = vmatprep.subr.msk.mxu0 %vm2491_vm9, %v7584_v26  ;;  %9282 = vmatprep.mubr.f32.mxu0 %v16624_v59  ;;  %v7109_v26 = vld [vmem:[%s14811_s28 + $0x368] sm:$0xff] }
 0xdd0   : > { %9415 = vmatpush2.msra.mxu1 %v7493_v28  ;;  %13850 = vmatpush1.msk.msra.mxu0 %vm2491_vm9, %v7583_v53  ;;  %v7424_v28 = vunpack.c.h.bf16 %v7114_v58  ;;  %v7423_v53 = vunpack.c.l.bf16 %v7114_v58  ;;  %v10337_v58 = vld [vmem:[%s14821_s5 + $0x204] sm:$0xff] }
 0xdd1   : > { %9416 = vmatprep.subr.mxu1 %v7484_v50  ;;  %9481 = vmatprep.subr.mxu0 %v7574_v20  ;;  %v7414_v50 = vunpack.c.h.bf16 %v7109_v26  ;;  %v7413_v20 = vunpack.c.l.bf16 %v7109_v26  ;;  %v10688_v24 = vunpack.c.l.bf16 %v10337_v58 }
 0xdd2   : > { %9417 = vmatpush2.msra.mxu1 %v7483_v1  ;;  %9482 = vmatpush1.msra.mxu0 %v7573_v13  ;;  %v7404_v1 = vunpack.c.h.bf16 %v7104_v31  ;;  %v7403_v13 = vunpack.c.l.bf16 %v7104_v31 }
 0xdd3   : > { %9283 = vmatmul.mubr.f32.gmra.mxu0 %v16628_v19  ;;  %9418 = vmatprep.subr.mxu1 %v7474_v23  ;;  %v7094_v23 = vld [vmem:[%s14811_s28 + $0x2f0] sm:$0xff] }
 0xdd4   : > { %9483 = vmatprep.subr.mxu0 %v7564_v27  ;;  %9288 = vmatprep.mubr.f32.mxu0 %v16641_v18  ;;  %v7089_v27 = vld [vmem:[%s14811_s28 + $0x2c8] sm:$0xff] }
 0xdd5   : > { %9419 = vmatpush2.msra.mxu1 %v7473_v54  ;;  %9484 = vmatpush1.msra.mxu0 %v7563_v15  ;;  %v7384_v54 = vunpack.c.h.bf16 %v7094_v23  ;;  %v7084_v15 = vld [vmem:[%s14811_s28 + $0x2a0] sm:$0xff]  ;;  %v7374_v55 = vunpack.c.h.bf16 %v7089_v27 }
 0xdd6   : > { %9420 = vmatprep.subr.mxu1 %v7464_v51  ;;  %9485 = vmatprep.subr.mxu0 %v7554_v39  ;;  %v7373_v51 = vunpack.c.l.bf16 %v7089_v27  ;;  %v7364_v39 = vunpack.c.h.bf16 %v7084_v15 }
 0xdd7   : > { %9421 = vmatpush2.msra.mxu1 %v7463_v35  ;;  %9486 = vmatpush1.msra.mxu0 %v7553_v3  ;;  %v10279_v35 = vld [vmem:[%s14821_s5 + $0xa8] sm:$0xff] }
 0xdd8   : > { %9289 = vmatmul.mubr.f32.gmra.mxu0 %v16636_v49  ;;  %9422 = vmatprep.subr.mxu1 %v7454_v21  ;;  %v10343_v21 = vld [vmem:[%s14821_s5 + $0x228] sm:$0xff]  ;;  %v10602_v61 = vunpack.c.h.bf16 %v10279_v35 }
 0xdd9   : > { %9487 = vmatprep.subr.mxu0 %v7544_v40  ;;  %9423 = vmatpush2.msra.mxu1 %v7453_v52  ;;  %v10341_v52 = vld [vmem:[%s14821_s5 + $0x21c] sm:$0xff]  ;;  %v10701_v40 = vunpack.c.h.bf16 %v10345_v4 }
 0xdda   : > { %9488 = vmatpush1.msra.mxu0 %v7543_v63  ;;  %9424 = vmatprep.subr.mxu1 %v7444_v57  ;;  %v10698_v63 = vunpack.c.h.bf16 %v10343_v21  ;;  %v10339_v57 = vld [vmem:[%s14821_s5 + $0x210] sm:$0xff] }
 0xddb   : > { %9489 = vmatprep.subr.mxu0 %v7534_v62  ;;  %9425 = vmatpush2.msra.mxu1 %v7443_v34  ;;  %v10599_v34 = vunpack.c.h.bf16 %v10277_v36  ;;  %v10695_v62 = vunpack.c.h.bf16 %v10341_v52  ;;  %v10691_v26 = vunpack.c.l.bf16 %v10339_v57 }
 0xddc   : > { %9490 = vmatpush1.msra.mxu0 %v7533_v17  ;;  %9426 = vmatprep.subr.mxu1 %v7434_v32  ;;  %v10273_v17 = vld [vmem:[%s14821_s5 + $0x84] sm:$0xff] }
 0xddd   : > { %9491 = vmatprep.subr.mxu0 %v7524_v25  ;;  %9427 = vmatpush2.msra.mxu1 %v7433_v8  ;;  %v10692_v25 = vunpack.c.h.bf16 %v10339_v57  ;;  %v10592_v31 = vunpack.c.l.bf16 %v10273_v17  ;;  %v10325_v57 = vld [vmem:[%s14821_s5 + $0x1bc] sm:$0xff] }
 0xdde   : > { %9492 = vmatpush1.msra.mxu0 %v7523_v41  ;;  %9525 = vmatprep.mubr.f32.mxu0 %v18843_v0  ;;  %v10271_v41 = vld [vmem:[%s14821_s5 + $0x78] sm:$0xff] }
 0xddf   : > { %9428 = vmatprep.subr.mxu1 %v7424_v28  ;;  %13851 = vmatmul.mubr.msk.f32.vlgmr.msra.gmra.mxu0 %vm1853_vm6, %v16539_v33  ;;  %v7383_v33 = vunpack.c.l.bf16 %v7094_v23  ;;  %v10593_v28 = vunpack.c.h.bf16 %v10273_v17  ;;  %v10589_v23 = vunpack.c.l.bf16 %v10271_v41  ;;  %v10670_v17 = vunpack.c.l.bf16 %v10325_v57 }
 0xde0   : > { %9429 = vmatpush2.msra.mxu1 %v7423_v53  ;;  %9531 = vmatprep.mubr.f32.mxu0 %v18843_v0  ;;  %v10335_v53 = vld [vmem:[%s14821_s5 + $0x1f8] sm:$0xff] }
 0xde1   : > { %9430 = vmatprep.subr.mxu1 %v7414_v50  ;;  %v10689_v50 = vunpack.c.h.bf16 %v10337_v58  ;;  %v10685_v27 = vunpack.c.l.bf16 %v10335_v53 }
 0xde2   : > { %9431 = vmatpush2.msra.mxu1 %v7413_v20  ;;  %v10269_v20 = vld [vmem:[%s14821_s5 + $0x6c] sm:$0xff] }
 0xde3   : > { %9432 = vmatprep.subr.mxu1 %v7404_v1  ;;  %13852 = vmatmul.mubr.msk.f32.gmra.mxu0 %vm1853_vm6, %v16626_v5  ;;  %v7363_v5 = vunpack.c.l.bf16 %v7084_v15  ;;  %v10590_v1 = vunpack.c.h.bf16 %v10271_v41  ;;  %v10586_v15 = vunpack.c.l.bf16 %v10269_v20 }
 0xde4   : > { %9433 = vmatpush2.msra.mxu1 %v7403_v13  ;;  %9537 = vmatprep.mubr.f32.mxu0 %v18843_v0  ;;  %v10333_v13 = vld [vmem:[%s14821_s5 + $0x1ec] sm:$0xff] }
 0xde5   : > { %9434 = vmatprep.subr.mxu1 %v7394_v46  ;;  %v10686_v46 = vunpack.c.h.bf16 %v10335_v53 }
 0xde6   : > { %9435 = vmatpush2.msra.mxu1 %v7393_v12  ;;  %v10267_v12 = vld [vmem:[%s14821_s5 + $0x60] sm:$0xff] }
 0xde7   : > { %9436 = vmatprep.subr.mxu1 %v7384_v54  ;;  %13853 = vmatmul.mubr.msk.f32.gmra.mxu0 %vm1853_vm6, %v16647_v48  ;;  %v10281_v48 = vld [vmem:[%s14821_s5 + $0xb4] sm:$0xff]  ;;  %v10587_v54 = vunpack.c.h.bf16 %v10269_v20 }
 0xde8   : > { %9437 = vmatpush2.msra.mxu1 %v7383_v33  ;;  %v10604_v3 = vunpack.c.l.bf16 %v10281_v48  ;;  %v10605_v11 = vunpack.c.h.bf16 %v10281_v48  ;;  %v10331_v33 = vld [vmem:[%s14821_s5 + $0x1e0] sm:$0xff]  ;;  %v10329_v48 = vld [vmem:[%s14821_s5 + $0x1d4] sm:$0xff] }
 0xde9   : > { %9438 = vmatprep.subr.mxu1 %v7374_v55  ;;  %v10683_v55 = vunpack.c.h.bf16 %v10333_v13  ;;  %v10677_v36 = vunpack.c.h.bf16 %v10329_v48 }
 0xdea   : > { %9439 = vmatpush2.msra.mxu1 %v7373_v51  ;;  %11815 = vmatprep.subr.mxu0 %v10605_v11  ;;  %v10265_v51 = vld [vmem:[%s14821_s5 + $0x54] sm:$0xff] }
 0xdeb   : > { %9440 = vmatprep.subr.mxu1 %v7364_v39  ;;  %11816 = vmatpush1.msra.mxu0 %v10604_v3  ;;  %v10682_v39 = vunpack.c.l.bf16 %v10333_v13  ;;  %v10679_v3 = vunpack.c.l.bf16 %v10331_v33  ;;  %v10581_v11 = vunpack.c.h.bf16 %v10265_v51 }
 0xdec   : > { %9441 = vmatpush2.msra.mxu1 %v7363_v5  ;;  %11817 = vmatprep.subr.mxu0 %v10602_v61  ;;  %v10584_v5 = vunpack.c.h.bf16 %v10267_v12 }
 0xded   : > { %9443 = vmatmul.mubr.f32.vlgmr.msra.gmra.mxu1 %v16541_v56  ;;  %v10700_v56 = vunpack.c.l.bf16 %v10345_v4  ;;  %11898 = vmatprep.subr.mxu1 %v10701_v40  ;;  %v10583_v4 = vunpack.c.l.bf16 %v10267_v12  ;;  %v10327_v40 = vld [vmem:[%s14821_s5 + $0x1c8] sm:$0xff] }
 0xdee   : > { %9448 = vmatprep.mubr.f32.mxu1 %v16624_v59  ;;  %v10601_v59 = vunpack.c.l.bf16 %v10279_v35  ;;  %v10680_v35 = vunpack.c.h.bf16 %v10331_v33  ;;  %v10674_v61 = vunpack.c.h.bf16 %v10327_v40 }
 0xdef   : > { %11899 = vmatpush1.msra.mxu1 %v10700_v56  ;;  %v10263_v56 = vld [vmem:[%s14821_s5 + $0x48] sm:$0xff] }
 0xdf0   : > { %11900 = vmatprep.subr.mxu1 %v10698_v63  ;;  %11818 = vmatpush1.msra.mxu0 %v10601_v59  ;;  %v10578_v59 = vunpack.c.h.bf16 %v10263_v56  ;;  %v10261_v63 = vld [vmem:[%s14821_s5 + $0x3c] sm:$0xff] }
 0xdf1   : > { %9449 = vmatmul.mubr.f32.gmra.mxu1 %v16628_v19  ;;  %v10275_v19 = vld [vmem:[%s14821_s5 + $0x90] sm:$0xff]  ;;  %11819 = vmatprep.subr.mxu0 %v10599_v34  ;;  %v10671_v34 = vunpack.c.h.bf16 %v10325_v57 }
 0xdf2   : > { %9454 = vmatprep.mubr.f32.mxu1 %v16641_v18  ;;  %v10697_v18 = vunpack.c.l.bf16 %v10343_v21  ;;  %v10596_v32 = vunpack.c.h.bf16 %v10275_v19  ;;  %v10595_v8 = vunpack.c.l.bf16 %v10275_v19  ;;  %11820 = vmatpush1.msra.mxu0 %v10598_v30  ;;  %v10580_v21 = vunpack.c.l.bf16 %v10265_v51 }
 0xdf3   : > { %v10577_v19 = vunpack.c.l.bf16 %v10263_v56  ;;  %v10575_v30 = vunpack.c.h.bf16 %v10261_v63 }
 0xdf4   : > { %11901 = vmatpush1.msra.mxu1 %v10697_v18  ;;  %11821 = vmatprep.subr.mxu0 %v10596_v32  ;;  %v10673_v18 = vunpack.c.l.bf16 %v10327_v40  ;;  %v10323_v32 = vld [vmem:[%s14821_s5 + $0x1b0] sm:$0xff] }
 0xdf5   : > { %9455 = vmatmul.mubr.f32.gmra.mxu1 %v16636_v49  ;;  %v10694_v49 = vunpack.c.l.bf16 %v10341_v52  ;;  %11902 = vmatprep.subr.mxu1 %v10695_v62  ;;  %v10676_v52 = vunpack.c.l.bf16 %v10329_v48  ;;  %v10574_v62 = vunpack.c.l.bf16 %v10261_v63  ;;  %v10667_v41 = vunpack.c.l.bf16 %v10323_v32 }
 0xdf6   : > { %11822 = vmatpush1.msra.mxu0 %v10595_v8  ;;  %v10668_v8 = vunpack.c.h.bf16 %v10323_v32 }
 0xdf7   : > { %11903 = vmatpush1.msra.mxu1 %v10694_v49  ;;  %11823 = vmatprep.subr.mxu0 %v10593_v28  ;;  %v10259_v49 = vld [vmem:[%s14821_s5 + $0x30] sm:$0xff]  ;;  %v10321_v28 = vld [vmem:[%s14821_s5 + $0x1a4] sm:$0xff] }
 0xdf8   : > { %11904 = vmatprep.subr.mxu1 %v10692_v25  ;;  %11824 = vmatpush1.msra.mxu0 %v10592_v31  ;;  %v10572_v58 = vunpack.c.h.bf16 %v10259_v49  ;;  %v10571_v25 = vunpack.c.l.bf16 %v10259_v49  ;;  %v10665_v31 = vunpack.c.h.bf16 %v10321_v28  ;;  %v10664_v20 = vunpack.c.l.bf16 %v10321_v28 }
 0xdf9   : > { %11905 = vmatpush1.msra.mxu1 %v10691_v26  ;;  %11825 = vmatprep.subr.mxu0 %v10590_v1  ;;  %v10257_v26 = vld [vmem:[%s14821_s5 + $0x24] sm:$0xff]  ;;  %v10319_v1 = vld [vmem:[%s14821_s5 + $0x198] sm:$0xff] }
 0xdfa   : > { %11906 = vmatprep.subr.mxu1 %v10689_v50  ;;  %11826 = vmatpush1.msra.mxu0 %v10589_v23  ;;  %v10569_v53 = vunpack.c.h.bf16 %v10257_v26  ;;  %v10568_v50 = vunpack.c.l.bf16 %v10257_v26  ;;  %v10662_v23 = vunpack.c.h.bf16 %v10319_v1  ;;  %v10661_v12 = vunpack.c.l.bf16 %v10319_v1 }
 0xdfb   : > { %11907 = vmatpush1.msra.mxu1 %v10688_v24  ;;  %11827 = vmatprep.subr.mxu0 %v10587_v54  ;;  %v10255_v24 = vld [vmem:[%s14821_s5 + $0x18] sm:$0xff]  ;;  %v10317_v54 = vld [vmem:[%s14821_s5 + $0x18c] sm:$0xff] }
 0xdfc   : > { %11908 = vmatprep.subr.mxu1 %v10686_v46  ;;  %11828 = vmatpush1.msra.mxu0 %v10586_v15  ;;  %v10566_v13 = vunpack.c.h.bf16 %v10255_v24  ;;  %v10565_v46 = vunpack.c.l.bf16 %v10255_v24  ;;  %v10659_v15 = vunpack.c.h.bf16 %v10317_v54  ;;  %v10658_v51 = vunpack.c.l.bf16 %v10317_v54 }
 0xdfd   : > { %11909 = vmatpush1.msra.mxu1 %v10685_v27  ;;  %11829 = vmatprep.subr.mxu0 %v10584_v5  ;;  %v10253_v27 = vld [vmem:[%s14821_s5 + $0xc] sm:$0xff]  ;;  %v10315_v5 = vld [vmem:[%s14821_s5 + $0x180] sm:$0xff] }
 0xdfe   : > { %11910 = vmatprep.subr.mxu1 %v10683_v55  ;;  %11830 = vmatpush1.msra.mxu0 %v10583_v4  ;;  %v10563_v33 = vunpack.c.h.bf16 %v10253_v27  ;;  %v10562_v55 = vunpack.c.l.bf16 %v10253_v27  ;;  %v10656_v4 = vunpack.c.h.bf16 %v10315_v5 }
 0xdff   : > { %11911 = vmatpush1.msra.mxu1 %v10682_v39  ;;  %11831 = vmatprep.subr.mxu0 %v10581_v11  ;;  %v10251_v39 = vld [vmem:[%s14821_s5] sm:$0xff]  ;;  %v10313_v11 = vld [vmem:[%s14821_s5 + $0x174] sm:$0xff] }
 0xe00   : > { %11912 = vmatprep.subr.mxu1 %v10680_v35  ;;  %11832 = vmatpush1.msra.mxu0 %v10580_v21  ;;  %v10560_v48 = vunpack.c.h.bf16 %v10251_v39  ;;  %v10559_v35 = vunpack.c.l.bf16 %v10251_v39  ;;  %v10377_v21 = vld [vmem:[%s14821_s5 + $0x2f4] sm:$0xff]  ;;  %v10652_v56 = vunpack.c.l.bf16 %v10313_v11 }
 0xe01   : > { %11913 = vmatpush1.msra.mxu1 %v10679_v3  ;;  %11833 = vmatprep.subr.mxu0 %v10578_v59  ;;  %v10655_v3 = vunpack.c.l.bf16 %v10315_v5  ;;  %v10748_v40 = vunpack.c.l.bf16 %v10377_v21  ;;  %v10311_v59 = vld [vmem:[%s14821_s5 + $0x168] sm:$0xff] }
 0xe02   : > { %11914 = vmatprep.subr.mxu1 %v10677_v36  ;;  %11834 = vmatpush1.msra.mxu0 %v10577_v19  ;;  %v10653_v36 = vunpack.c.h.bf16 %v10313_v11  ;;  %v10650_v19 = vunpack.c.h.bf16 %v10311_v59  ;;  %v10649_v63 = vunpack.c.l.bf16 %v10311_v59 }
 0xe03   : > { %11915 = vmatpush1.msra.mxu1 %v10676_v52  ;;  %11835 = vmatprep.subr.mxu0 %v10575_v30  ;;  %v10749_v52 = vunpack.c.h.bf16 %v10377_v21  ;;  %v10309_v30 = vld [vmem:[%s14821_s5 + $0x15c] sm:$0xff] }
 0xe04   : > { %11916 = vmatprep.subr.mxu1 %v10674_v61  ;;  %11836 = vmatpush1.msra.mxu0 %v10574_v62  ;;  %v10375_v61 = vld [vmem:[%s14821_s5 + $0x2e8] sm:$0xff]  ;;  %v10647_v62 = vunpack.c.h.bf16 %v10309_v30  ;;  %v10646_v49 = vunpack.c.l.bf16 %v10309_v30 }
 0xe05   : > { %11917 = vmatpush1.msra.mxu1 %v10673_v18  ;;  %11837 = vmatprep.subr.mxu0 %v10572_v58  ;;  %v10746_v18 = vunpack.c.h.bf16 %v10375_v61  ;;  %v10745_v57 = vunpack.c.l.bf16 %v10375_v61  ;;  %v10307_v58 = vld [vmem:[%s14821_s5 + $0x150] sm:$0xff] }
 0xe06   : > { %11918 = vmatprep.subr.mxu1 %v10671_v34  ;;  %11838 = vmatpush1.msra.mxu0 %v10571_v25  ;;  %v10373_v34 = vld [vmem:[%s14821_s5 + $0x2dc] sm:$0xff]  ;;  %v10644_v25 = vunpack.c.h.bf16 %v10307_v58  ;;  %v10643_v26 = vunpack.c.l.bf16 %v10307_v58  ;;  %v10291_v58 = vld [vmem:[%s14821_s5 + $0xf0] sm:$0xff] }
 0xe07   : > { %11919 = vmatpush1.msra.mxu1 %v10670_v17  ;;  %11839 = vmatprep.subr.mxu0 %v10569_v53  ;;  %v10743_v17 = vunpack.c.h.bf16 %v10373_v34  ;;  %v10742_v32 = vunpack.c.l.bf16 %v10373_v34  ;;  %v10305_v53 = vld [vmem:[%s14821_s5 + $0x144] sm:$0xff] }
 0xe08   : > { %11920 = vmatprep.subr.mxu1 %v10668_v8  ;;  %11840 = vmatpush1.msra.mxu0 %v10568_v50  ;;  %v10371_v8 = vld [vmem:[%s14821_s5 + $0x2d0] sm:$0xff]  ;;  %v10641_v50 = vunpack.c.h.bf16 %v10305_v53  ;;  %v10640_v24 = vunpack.c.l.bf16 %v10305_v53  ;;  %v10353_v53 = vld [vmem:[%s14821_s5 + $0x264] sm:$0xff] }
 0xe09   : > { %11921 = vmatpush1.msra.mxu1 %v10667_v41  ;;  %11841 = vmatprep.subr.mxu0 %v10566_v13  ;;  %v10740_v41 = vunpack.c.h.bf16 %v10371_v8  ;;  %v10739_v28 = vunpack.c.l.bf16 %v10371_v8  ;;  %v10303_v13 = vld [vmem:[%s14821_s5 + $0x138] sm:$0xff] }
 0xe0a   : > { %11922 = vmatprep.subr.mxu1 %v10665_v31  ;;  %11842 = vmatpush1.msra.mxu0 %v10565_v46  ;;  %v10369_v31 = vld [vmem:[%s14821_s5 + $0x2c4] sm:$0xff]  ;;  %v10638_v46 = vunpack.c.h.bf16 %v10303_v13  ;;  %v10637_v27 = vunpack.c.l.bf16 %v10303_v13 }
 0xe0b   : > { %11923 = vmatpush1.msra.mxu1 %v10664_v20  ;;  %11843 = vmatprep.subr.mxu0 %v10563_v33  ;;  %v10737_v20 = vunpack.c.h.bf16 %v10369_v31  ;;  %v10736_v1 = vunpack.c.l.bf16 %v10369_v31  ;;  %v10301_v33 = vld [vmem:[%s14821_s5 + $0x12c] sm:$0xff]  ;;  %v10287_v31 = vld [vmem:[%s14821_s5 + $0xd8] sm:$0xff] }
 0xe0c   : > { %11924 = vmatprep.subr.mxu1 %v10662_v23  ;;  %11844 = vmatpush1.msra.mxu0 %v10562_v55  ;;  %v10367_v23 = vld [vmem:[%s14821_s5 + $0x2b8] sm:$0xff]  ;;  %v10635_v55 = vunpack.c.h.bf16 %v10301_v33  ;;  %v10634_v39 = vunpack.c.l.bf16 %v10301_v33  ;;  %v10614_v33 = vunpack.c.h.bf16 %v10287_v31 }
 0xe0d   : > { %11925 = vmatpush1.msra.mxu1 %v10661_v12  ;;  %11845 = vmatprep.subr.mxu0 %v10560_v48  ;;  %v10734_v12 = vunpack.c.h.bf16 %v10367_v23  ;;  %v10733_v54 = vunpack.c.l.bf16 %v10367_v23  ;;  %v10299_v48 = vld [vmem:[%s14821_s5 + $0x120] sm:$0xff] }
 0xe0e   : > { %11926 = vmatprep.subr.mxu1 %v10659_v15  ;;  %11846 = vmatpush1.msra.mxu0 %v10559_v35  ;;  %v10365_v15 = vld [vmem:[%s14821_s5 + $0x2ac] sm:$0xff]  ;;  %v10631_v35 = vunpack.c.l.bf16 %v10299_v48 }
 0xe0f   : > { %11927 = vmatpush1.msra.mxu1 %v10658_v51  ;;  %11847 = vmatprep.subr.mxu0 %v10653_v36  ;;  %v10731_v51 = vunpack.c.h.bf16 %v10365_v15  ;;  %v10730_v5 = vunpack.c.l.bf16 %v10365_v15  ;;  %v10297_v36 = vld [vmem:[%s14821_s5 + $0x114] sm:$0xff]  ;;  %v10349_v15 = vld [vmem:[%s14821_s5 + $0x24c] sm:$0xff] }
 0xe10   : > { %11928 = vmatprep.subr.mxu1 %v10656_v4  ;;  %11848 = vmatpush2.msra.mxu0 %v10652_v56  ;;  %v10363_v4 = vld [vmem:[%s14821_s5 + $0x2a0] sm:$0xff]  ;;  %v10361_v56 = vld [vmem:[%s14821_s5 + $0x294] sm:$0xff] }
 0xe11   : > { %11929 = vmatpush1.msra.mxu1 %v10655_v3  ;;  %11849 = vmatprep.subr.mxu0 %v10650_v19  ;;  %v10632_v3 = vunpack.c.h.bf16 %v10299_v48  ;;  %v10727_v11 = vunpack.c.l.bf16 %v10363_v4  ;;  %v10728_v21 = vunpack.c.h.bf16 %v10363_v4  ;;  %v10724_v59 = vunpack.c.l.bf16 %v10361_v56  ;;  %v10295_v19 = vld [vmem:[%s14821_s5 + $0x108] sm:$0xff] }
 0xe12   : > { %11930 = vmatprep.subr.mxu1 %v10749_v52  ;;  %11850 = vmatpush2.msra.mxu0 %v10649_v63  ;;  %v10629_v52 = vunpack.c.h.bf16 %v10297_v36  ;;  %v10725_v61 = vunpack.c.h.bf16 %v10361_v56  ;;  %v10293_v63 = vld [vmem:[%s14821_s5 + $0xfc] sm:$0xff]  ;;  %v10626_v30 = vunpack.c.h.bf16 %v10295_v19 }
 0xe13   : > { %11931 = vmatpush2.msra.mxu1 %v10748_v40  ;;  %11851 = vmatprep.subr.mxu0 %v10647_v62  ;;  %v10628_v40 = vunpack.c.l.bf16 %v10297_v36 }
 0xe14   : > { %11932 = vmatprep.subr.mxu1 %v10746_v18  ;;  %11852 = vmatpush2.msra.mxu0 %v10646_v49  ;;  %v10359_v18 = vld [vmem:[%s14821_s5 + $0x288] sm:$0xff]  ;;  %v10622_v49 = vunpack.c.l.bf16 %v10293_v63 }
 0xe15   : > { %11933 = vmatpush2.msra.mxu1 %v10745_v57  ;;  %11853 = vmatprep.subr.mxu0 %v10644_v25  ;;  %v10625_v57 = vunpack.c.l.bf16 %v10295_v19  ;;  %v10721_v34 = vunpack.c.l.bf16 %v10359_v18  ;;  %v10722_v62 = vunpack.c.h.bf16 %v10359_v18  ;;  %v10355_v25 = vld [vmem:[%s14821_s5 + $0x270] sm:$0xff] }
 0xe16   : > { %11934 = vmatprep.subr.mxu1 %v10743_v17  ;;  %11854 = vmatpush2.msra.mxu0 %v10643_v26  ;;  %v10357_v17 = vld [vmem:[%s14821_s5 + $0x27c] sm:$0xff]  ;;  %v10289_v26 = vld [vmem:[%s14821_s5 + $0xe4] sm:$0xff]  ;;  %v10716_v13 = vunpack.c.h.bf16 %v10355_v25 }
 0xe17   : > { %11935 = vmatpush2.msra.mxu1 %v10742_v32  ;;  %11855 = vmatprep.subr.mxu0 %v10641_v50  ;;  %v10623_v32 = vunpack.c.h.bf16 %v10293_v63  ;;  %v10718_v8 = vunpack.c.l.bf16 %v10357_v17  ;;  %v16912_v50 = vpop.f32.mrf.mxu0  ;;  %v10616_v23 = vunpack.c.l.bf16 %v10289_v26 }
 0xe18   : > { %11936 = vmatprep.subr.mxu1 %v10740_v41  ;;  %11856 = vmatpush2.msra.mxu0 %v10640_v24  ;;  %v10719_v41 = vunpack.c.h.bf16 %v10357_v17  ;;  %v10715_v24 = vunpack.c.l.bf16 %v10355_v25  ;;  %v16938_v17 = vld [vmem:[%s14821_s5 + $0x534] sm:$0xff] }
 0xe19   : > { %11937 = vmatpush2.msra.mxu1 %v10739_v28  ;;  %11857 = vmatprep.subr.mxu0 %v10638_v46  ;;  %v10619_v28 = vunpack.c.l.bf16 %v10291_v58  ;;  %v10617_v46 = vunpack.c.h.bf16 %v10289_v26  ;;  %v16920_v48 = vpop.f32.mrf.mxu0  ;;  %18866 = vst [vmem:[#allocation23_spill] sm:$0xff] %v16938_v17  ;;  %v10893_v25 = vunpack.c.h.bf16 %v16938_v17 }
 0xe1a   : > { %11938 = vmatprep.subr.mxu1 %v10737_v20  ;;  %11858 = vmatpush2.msra.mxu0 %v10637_v27  ;;  %v10620_v20 = vunpack.c.h.bf16 %v10291_v58  ;;  %v10712_v27 = vunpack.c.l.bf16 %v10353_v53  ;;  %v7619_v58 = vsub.s32 7, %v15313_v42 }
 0xe1b   : > { %11939 = vmatpush2.msra.mxu1 %v10736_v1  ;;  %11859 = vmatprep.subr.mxu0 %v10635_v55  ;;  %v10351_v1 = vld [vmem:[%s14821_s5 + $0x258] sm:$0xff]  ;;  %v16917_v55 = vpop.f32.mrf.mxu1  ;;  %v16923_v36 = vpop.f32.mrf.mxu0 }
 0xe1c   : > { %11940 = vmatprep.subr.mxu1 %v10734_v12  ;;  %11860 = vmatpush2.msra.mxu0 %v10634_v39  ;;  %v10285_v12 = vld [vmem:[%s14821_s5 + $0xcc] sm:$0xff]  ;;  %v10710_v39 = vunpack.c.h.bf16 %v10351_v1  ;;  %v10709_v4 = vunpack.c.l.bf16 %v10351_v1 }
 0xe1d   : > { %11941 = vmatpush2.msra.mxu1 %v10733_v54  ;;  %11861 = vmatprep.subr.mxu0 %v10632_v3  ;;  %v10713_v54 = vunpack.c.h.bf16 %v10353_v53  ;;  %v10347_v3 = vld [vmem:[%s14821_s5 + $0x240] sm:$0xff]  ;;  %v16929_v63 = vpop.f32.mrf.mxu0 }
 0xe1e   : > { %11942 = vmatprep.subr.mxu1 %v10731_v51  ;;  %11862 = vmatpush2.msra.mxu0 %v10631_v35  ;;  %v10613_v51 = vunpack.c.l.bf16 %v10287_v31  ;;  %v10611_v35 = vunpack.c.h.bf16 %v10285_v12  ;;  %v10703_v19 = vunpack.c.l.bf16 %v10347_v3 }
 0xe1f   : > { %11943 = vmatpush2.msra.mxu1 %v10730_v5  ;;  %11863 = vmatprep.subr.mxu0 %v10629_v52  ;;  %v10283_v5 = vld [vmem:[%s14821_s5 + $0xc0] sm:$0xff]  ;;  %v10706_v52 = vunpack.c.l.bf16 %v10349_v15  ;;  %v16947_v26 = vpop.f32.mrf.mxu0 }
 0xe20   : > { %11944 = vmatprep.subr.mxu1 %v10728_v21  ;;  %11864 = vmatpush2.msra.mxu0 %v10628_v40  ;;  %v10707_v21 = vunpack.c.h.bf16 %v10349_v15  ;;  %v10608_v56 = vunpack.c.h.bf16 %v10283_v5  ;;  %v16925_v40 = vpop.f32.mrf.mxu1 }
 0xe21   : > { %11945 = vmatpush2.msra.mxu1 %v10727_v11  ;;  %11865 = vmatprep.subr.mxu0 %v10626_v30  ;;  %v10610_v11 = vunpack.c.l.bf16 %v10285_v12  ;;  %v7607_v30 = vsub.s32 4, %v15313_v42 }
 0xe22   : > { %11946 = vmatprep.subr.mxu1 %v10725_v61  ;;  %11866 = vmatpush2.msra.mxu0 %v10625_v57  ;;  %v10704_v61 = vunpack.c.h.bf16 %v10347_v3  ;;  %v16927_v18 = vpop.f32.mrf.mxu1  ;;  %v7603_v57 = vsub.s32 3, %v15313_v42 }
 0xe23   : > { %11947 = vmatpush2.msra.mxu1 %v10724_v59  ;;  %11867 = vmatprep.subr.mxu0 %v10623_v32  ;;  %v10607_v59 = vunpack.c.l.bf16 %v10283_v5  ;;  %v7615_v32 = vsub.s32 6, %v15313_v42 }
 0xe24   : > { %11948 = vmatprep.subr.mxu1 %v10722_v62  ;;  %11868 = vmatpush2.msra.mxu0 %v10622_v49  ;;  %v16935_v62 = vld [vmem:[%s14821_s5 + $0x3b4] sm:$0xff]  ;;  %v7585_v49 = vld [vmem:[%s14816_s12] sm:$0xff] }
 0xe25   : > { %11949 = vmatpush2.msra.mxu1 %v10721_v34  ;;  %11869 = vmatprep.subr.mxu0 %v10620_v20  ;;  %v7611_v34 = vsub.s32 5, %v15313_v42  ;;  %18865 = vst [vmem:[#allocation22_spill] sm:$0xff] %v16935_v62  ;;  %v7596_v53 = vrot.slane %v7585_v49, %v15319_v45  ;;  %v7600_v31 = vrot.slane %v7585_v49, %v15322_v47 }
 0xe26   : > { %11950 = vmatprep.subr.mxu1 %v10719_v41  ;;  %11870 = vmatpush2.msra.mxu0 %v10619_v28  ;;  %v16945_v41 = vpop.f32.mrf.mxu1  ;;  %v7592_v28 = vrot.slane %v7585_v49, %v15316_v2  ;;  %v7604_v20 = vrot.slane %v7585_v49, %v7603_v57  ;;  %v7616_v1 = vrot.slane %v7585_v49, %v7615_v32 }
 0xe27   : > { %11951 = vmatpush2.msra.mxu1 %v10718_v8  ;;  %11871 = vmatprep.subr.mxu0 %v10617_v46  ;;  %v10797_v8 = vunpack.c.h.bf16 %v16935_v62  ;;  %v7612_v42 = vrot.slane %v7585_v49, %v7611_v34  ;;  %v16954_v46 = vpop.f32.mrf.mxu0 }
 0xe28   : > { %11952 = vmatprep.subr.mxu1 %v10716_v13  ;;  %11872 = vmatpush2.msra.mxu0 %v10616_v23  ;;  %v7620_v13 = vrot.slane %v7585_v49, %v7619_v58  ;;  %v16952_v23 = vpop.f32.mrf.mxu1  ;;  %v7821_v12 = vcombine.low %v7592_v28, %v7596_v53 }
 0xe29   : > { %11953 = vmatpush2.msra.mxu1 %v10715_v24  ;;  %11873 = vmatprep.subr.mxu0 %v10614_v33  ;;  %v7608_v24 = vrot.slane %v7585_v49, %v7607_v30 }
 0xe2a   : > { %11954 = vmatprep.subr.mxu1 %v10713_v54  ;;  %11874 = vmatpush2.msra.mxu0 %v10613_v51  ;;  %v7827_v15 = vcombine.low %v7616_v1, %v7620_v13  ;;  %v7828_v51 = vcombine.high %v7616_v1, %v7620_v13  ;;  %v16958_v5 = vpop.f32.mrf.mxu1  ;;  %v7835_v3 = vrot.slane %v7821_v12, %v15352_v9 }
 0xe2b   : > { %11955 = vmatpush2.msra.mxu1 %v10712_v27  ;;  %11875 = vmatprep.subr.mxu0 %v10611_v35  ;;  %v7823_v27 = vcombine.low %v7600_v31, %v7604_v20  ;;  %v7825_v54 = vcombine.low %v7608_v24, %v7612_v42  ;;  %v7826_v33 = vcombine.high %v7608_v24, %v7612_v42 }
 0xe2c   : > { %11956 = vmatprep.subr.mxu1 %v10710_v39  ;;  %11876 = vmatpush2.msra.mxu0 %v10610_v11  ;;  %v7824_v35 = vcombine.high %v7600_v31, %v7604_v20 }
 0xe2d   : > { %11957 = vmatpush2.msra.mxu1 %v10709_v4  ;;  %11877 = vmatprep.subr.mxu0 %v10608_v56  ;;  %v7822_v4 = vcombine.high %v7592_v28, %v7596_v53  ;;  %v7849_v11 = vrot.slane %v7823_v27, %v15352_v9  ;;  %v7877_v56 = vrot.slane %v7827_v15, %v15352_v9 }
 0xe2e   : > { %11958 = vmatprep.subr.mxu1 %v10707_v21  ;;  %11878 = vmatpush2.msra.mxu0 %v10607_v59  ;;  %v7863_v21 = vrot.slane %v7825_v54, %v15352_v9  ;;  %v7884_v59 = vrot.slane %v7828_v51, %v15352_v9  ;;  %v7856_v30 = vrot.slane %v7824_v35, %v15352_v9 }
 0xe2f   : > { %11959 = vmatpush2.msra.mxu1 %v10706_v52  ;;  %11981 = vmatprep.subr.mxu0 %v10797_v8  ;;  %v7870_v52 = vrot.slane %v7826_v33, %v15352_v9  ;;  %v7842_v57 = vrot.slane %v7822_v4, %v15352_v9  ;;  %v7885_v34 = vcombine.low %v7835_v3, %v7849_v11 }
 0xe30   : > { %11960 = vmatprep.subr.mxu1 %v10704_v61  ;;  %v7886_v49 = vcombine.high %v7835_v3, %v7849_v11  ;;  %v7889_v32 = vcombine.low %v7863_v21, %v7877_v56  ;;  %v7890_v58 = vcombine.high %v7863_v21, %v7877_v56 }
 0xe31   : > { %11961 = vmatpush2.msra.mxu1 %v10703_v19  ;;  %v16968_v19 = vpop.f32.mrf.mxu1  ;;  %v7891_v8 = vcombine.low %v7870_v52, %v7884_v59  ;;  %v7887_v53 = vcombine.low %v7842_v57, %v7856_v30  ;;  %v7888_v31 = vcombine.high %v7842_v57, %v7856_v30  ;;  %v16977_v20 = vrot.slane %v7885_v34, %v15352_v9 }
 0xe32   : > { %12064 = vmatprep.subr.mxu1 %v10893_v25  ;;  %v16980_v24 = vrot.slane %v7886_v49, %v15352_v9  ;;  %v16983_v42 = vrot.slane %v7889_v32, %v15352_v9  ;;  %v16989_v13 = vrot.slane %v7890_v58, %v15352_v9  ;;  %v7892_v15 = vcombine.high %v7870_v52, %v7884_v59 }
 0xe33   : > { %v16974_v28 = vpop.f32.mrf.mxu1  ;;  %v16986_v1 = vrot.slane %v7891_v8, %v15352_v9  ;;  %v16996_v54 = vrot.slane %v7887_v53, %v15352_v9  ;;  %v16999_v33 = vrot.slane %v7888_v31, %v15352_v9  ;;  %v13819_v49 = vcombine.low %v16977_v20, %v16977_v20 }
 0xe34   : > { %v16956_v39 = vpop.f32.mrf.mxu0  ;;  %v13809_v51 = vcombine.low %v16977_v20, %v16980_v24  ;;  %v13811_v4 = vcombine.high %v16977_v20, %v16980_v24  ;;  %v7950_v35 = vcombine.high %v16977_v20, %v16983_v42  ;;  %v7954_v11 = vcombine.high %v16980_v24, %v16989_v13 }
 0xe35   : > { %v16993_v27 = vpop.f32.mrf.mxu1  ;;  %v7952_v3 = vcombine.high %v16996_v54, %v16986_v1  ;;  %v13813_v52 = vcombine.low %v16996_v54, %v16999_v33  ;;  %v13815_v59 = vcombine.high %v16996_v54, %v16999_v33  ;;  %v17020_v57 = vrot.slane %v7892_v15, %v15352_v9 }
 0xe36   : > { %v16966_v61 = vpop.f32.mrf.mxu0  ;;  %v8185_v30 = vrot.slane %v13809_v51, %v15352_v9  ;;  %v8199_v34 = vrot.slane %v13811_v4, %v15352_v9  ;;  %v13821_v32 = vcombine.low %v16980_v24, %v7950_v35  ;;  %v13823_v58 = vcombine.low %v7954_v11, %v16996_v54 }
 0xe37   : > { %v17013_v56 = vpop.f32.mrf.mxu1  ;;  %v13825_v8 = vcombine.low %v16999_v33, %v7952_v3  ;;  %v8213_v15 = vrot.slane %v13813_v52, %v15352_v9  ;;  %v8227_v51 = vrot.slane %v13815_v59, %v15352_v9  ;;  %v7956_v4 = vcombine.high %v16999_v33, %v17020_v57 }
 0xe38   : > { %18868 = vst [vmem:[#allocation25_spill] sm:$0xff] %v17013_v56  ;;  %v8235_v43 = vcombine.low %v8185_v30, %v8199_v34  ;;  %v8236_v35 = vcombine.high %v8185_v30, %v8199_v34  ;;  %v8387_v11 = vrot.slane %v13819_v49, %v15352_v9  ;;  %v8401_v3 = vrot.slane %v13821_v32, %v15352_v9 }
 0xe39   : > { %v16972_v25 = vpop.f32.mrf.mxu0  ;;  %v17031_v31 = vpop.f32.mrf.mxu1  ;;  %v8415_v60 = vrot.slane %v13823_v58, %v15352_v9  ;;  %v8429_v7 = vrot.slane %v13825_v8, %v15352_v9  ;;  %v8239_v52 = vcombine.low %v8213_v15, %v8227_v51  ;;  %v13827_v59 = vcombine.low %v7956_v4, %v16977_v20 }
 0xe3a   : > { %18870 = vst [vmem:[#allocation27_spill] sm:$0xff] %v17031_v31  ;;  %v17050_v37 = vrot.slane %v8235_v43, %v15352_v9  ;;  %v8240_v30 = vcombine.high %v8213_v15, %v8227_v51  ;;  %v17055_v49 = vrot.slane %v8236_v35, %v15352_v9  ;;  %v8437_v32 = vcombine.low %v8387_v11, %v8401_v3 }
 0xe3b   : > { %v16991_v12 = vpop.f32.mrf.mxu0  ;;  %v17043_v44 = vpop.f32.mrf.mxu1  ;;  %v8441_v58 = vcombine.low %v8415_v60, %v8429_v7  ;;  %v7953_v8 = vcombine.low %v16980_v24, %v16989_v13  ;;  %v7951_v4 = vcombine.low %v16996_v54, %v16986_v1  ;;  %v7955_v14 = vcombine.low %v16999_v33, %v17020_v57 }
 0xe3c   : > { %18871 = vst [vmem:[#allocation28_spill] sm:$0xff] %v17043_v44  ;;  %v7624_v43 = vrot.slane %v7586_v10, %v15316_v2  ;;  %v7628_v15 = vrot.slane %v7586_v10, %v15319_v45  ;;  %v17066_v51 = vrot.slane %v8239_v52, %v15352_v9  ;;  %v8438_v35 = vcombine.high %v8387_v11, %v8401_v3 }
 0xe3d   : > { %v8442_v6 = vcombine.high %v8415_v60, %v8429_v7  ;;  %v8583_v38 = vrot.slane %v13827_v59, %v15352_v9  ;;  %v13810_v24 = vcombine.low %v16983_v42, %v16989_v13  ;;  %v13812_v54 = vcombine.high %v16983_v42, %v16989_v13 }
 0xe3e   : > { %v17011_v21 = vpop.f32.mrf.mxu0  ;;  %v13814_v33 = vcombine.low %v16986_v1, %v17020_v57  ;;  %v13816_v10 = vcombine.high %v16986_v1, %v17020_v57  ;;  %v17082_v7 = vrot.slane %v8240_v30, %v15352_v9  ;;  %v17085_v60 = vrot.slane %v8437_v32, %v15352_v9 }
 0xe3f   : > { %18867 = vst [vmem:[#allocation24_spill] sm:$0xff] %v17011_v21  ;;  %v13820_v11 = vcombine.low %v16983_v42, %v16983_v42  ;;  %v13822_v3 = vcombine.high %v7953_v8, %v16983_v42  ;;  %v17091_v59 = vrot.slane %v8441_v58, %v15352_v9  ;;  %v13824_v47 = vcombine.high %v16989_v13, %v7951_v4 }
 0xe40   : > { %v17029_v53 = vpop.f32.mrf.mxu0  ;;  %v13826_v45 = vcombine.high %v7955_v14, %v16986_v1  ;;  %v7957_v2 = vcombine.low %v7624_v43, %v7628_v15  ;;  %v17096_v0 = vrot.slane %v8438_v35, %v15352_v9  ;;  %v17099_v30 = vrot.slane %v8442_v6, %v15352_v9 }
 0xe41   : > { %18869 = vst [vmem:[#allocation26_spill] sm:$0xff] %v17029_v53  ;;  %v8591_v32 = vcombine.high %v8583_v38, %v8583_v38  ;;  %v7958_v62 = vcombine.high %v7624_v43, %v7628_v15  ;;  %v8192_v8 = vrot.slane %v13810_v24, %v15352_v9  ;;  %v8206_v58 = vrot.slane %v13812_v54, %v15352_v9 }
 0xe42   : > { %v8220_v31 = vrot.slane %v13814_v33, %v15352_v9  ;;  %v8234_v13 = vrot.slane %v13816_v10, %v15352_v9  ;;  %v8299_v1 = vcombine.low %v17050_v37, %v17066_v51  ;;  %v8394_v6 = vrot.slane %v13820_v11, %v15352_v9 }
 0xe43   : > { %v8408_v4 = vrot.slane %v13822_v3, %v15352_v9  ;;  %v8303_v43 = vcombine.low %v17055_v49, %v17082_v7  ;;  %v8422_v15 = vrot.slane %v13824_v47, %v15352_v9  ;;  %v8436_v35 = vrot.slane %v13826_v45, %v15352_v9 }
 0xe44   : > { %v7965_v24 = vrot.slane %v7957_v2, %v15352_v9  ;;  %v8501_v54 = vcombine.low %v17085_v60, %v17091_v59  ;;  %v17121_v33 = vrot.slane %v8583_v38, %v15352_v9  ;;  %v7949_v11 = vcombine.low %v16977_v20, %v16983_v42 }
 0xe45   : > { %v17037_v16 = vpop.f32.mrf.mxu0  ;;  %v7972_v3 = vrot.slane %v7958_v62, %v15352_v9  ;;  %v8505_v47 = vcombine.low %v17096_v0, %v17099_v30  ;;  %v17131_v45 = vrot.slane %v8591_v32, %v15352_v9  ;;  %v8237_v2 = vcombine.low %v8192_v8, %v8206_v58 }
 0xe46   : > { %v8241_v44 = vcombine.low %v8220_v31, %v8234_v13  ;;  %v8238_v21 = vcombine.high %v8192_v8, %v8206_v58  ;;  %v8242_v38 = vcombine.high %v8220_v31, %v8234_v13  ;;  %v8440_v53 = vcombine.high %v8394_v6, %v8408_v4 }
 0xe47   : > { %v17046_v22 = vpop.f32.mrf.mxu0  ;;  %v8443_v20 = vcombine.low %v8422_v15, %v8436_v35  ;;  %v8444_v42 = vcombine.high %v8422_v15, %v8436_v35  ;;  %v7973_v62 = vcombine.high %v7965_v24, %v7965_v24  ;;  %v7974_v8 = vcombine.high %v7972_v3, %v7972_v3 }
 0xe48   : > { %v8284_v58 = vrot.slane %v8241_v44, %v15352_v9  ;;  %v17167_v44 = vrot.slane %v7965_v24, %v15352_v9 }
 0xe49   : > { %v17161_v15 = vrot.slane %v8443_v20, %v15352_v9  ;;  %v17164_v35 = vrot.slane %v8444_v42, %v15352_v9  ;;  %v8783_v20 = vadd.f32 %v16925_v40, %v8303_v43  ;;  %v8789_v42 = vadd.f32 %v16945_v41, %v8505_v47 }
 0xe4a   : > { %v17069_v29 = vpop.f32.mrf.mxu0  ;;  %18877 = vst [vmem:[#allocation34_spill] sm:$0xff] %v17167_v44 }
 0xe4b   : > { %18872 = vst [vmem:[#allocation29_spill] sm:$0xff] %v17069_v29 }
 0xe4c   : > { %v17101_v17 = vpop.f32.mrf.mxu0 }
 0xe4d   : > { %18873 = vst [vmem:[#allocation30_spill] sm:$0xff] %v17101_v17  ;;  %v8439_v17 = vcombine.low %v8394_v6, %v8408_v4 }
 0xe4f   : > { %v17123_v10 = vpop.f32.mrf.mxu0  ;;  %v17155_v6 = vrot.slane %v8439_v17, %v15352_v9 }
 0xe50   : > { %18875 = vst [vmem:[#allocation32_spill] sm:$0xff] %v17123_v10  ;;  %v8300_v10 = vcombine.high %v17050_v37, %v17066_v51  ;;  %v8256_v51 = vrot.slane %v8237_v2, %v15352_v9  ;;  %v17174_v2 = vrot.slane %v7972_v3, %v15352_v9 }
 0xe51   : > { %v17141_v56 = vpop.f32.mrf.mxu0 }
 0xe52   : > { %v8301_v31 = vcombine.low %v8256_v51, %v8284_v58  ;;  %v8302_v32 = vcombine.high %v8256_v51, %v8284_v58  ;;  %v8866_v58 = vadd.f32 %v16920_v48, %v8783_v20 }
 0xe56   : > { %v17052_v34 = vpop.f32.mrf.mxu1 }
 0xe58   : > { %v17079_v52 = vpop.f32.mrf.mxu1 }
 0xe5b   : > { %v17107_v14 = vpop.f32.mrf.mxu1 }
 0xe5c   : > { %18874 = vst [vmem:[#allocation31_spill] sm:$0xff] %v17107_v14  ;;  %v8304_v14 = vcombine.high %v17055_v49, %v17082_v7  ;;  %v8270_v49 = vrot.slane %v8238_v21, %v15352_v9  ;;  %v8298_v7 = vrot.slane %v8242_v38, %v15352_v9  ;;  %v17170_v21 = vrot.slane %v7973_v62, %v15352_v9 }
 0xe5d   : > { %v17133_v29 = vpop.f32.mrf.mxu1  ;;  %v8781_v38 = vadd.f32 %v16917_v55, %v8299_v1  ;;  %v8793_v55 = vadd.f32 %v16952_v23, %v17121_v33 }
 0xe5e   : > { %18876 = vst [vmem:[#allocation33_spill] sm:$0xff] %v17133_v29  ;;  %v13828_v29 = vcombine.high %v17020_v57, %v7949_v11  ;;  %v17158_v57 = vrot.slane %v8440_v53, %v15352_v9  ;;  %v8306_v17 = vcombine.high %v8270_v49, %v8298_v7  ;;  %v17177_v53 = vrot.slane %v7974_v8, %v15352_v9 }
 0xe5f   : > { %v8305_v3 = vcombine.low %v8270_v49, %v8298_v7  ;;  %v8307_v41 = vcombine.low %v17167_v44, %v17170_v21  ;;  %v13817_v1 = vcombine.high %v17167_v44, %v17170_v21  ;;  %v8864_v51 = vadd.f32 %v16912_v50, %v8781_v38 }
 0xe60   : > { %v17150_v13 = vpop.f32.mrf.mxu1  ;;  %v8590_v11 = vrot.slane %v13828_v29, %v15352_v9  ;;  %18878 = vst [vmem:[#allocation35_spill] sm:$0xff] %v17177_v53  ;;  %v8787_v29 = vadd.f32 %v16927_v18, %v8501_v54  ;;  %v8309_v18 = vcombine.low %v17174_v2, %v17177_v53  ;;  %v13818_v54 = vcombine.high %v17174_v2, %v17177_v53 }
 0xe61   : > { %v8872_v49 = vadd.f32 %v16929_v63, %v8789_v42  ;;  %v8795_v7 = vadd.f32 %v16958_v5, %v17131_v45  ;;  %v8949_v8 = vadd.f32 %v16966_v61, %v8304_v14  ;;  %v8947_v53 = vadd.f32 %v16956_v39, %v8300_v10 }
 0xe62   : > { %v17184_v62 = vpop.f32.mrf.mxu1  ;;  %v8592_v43 = vcombine.high %v8590_v11, %v8590_v11  ;;  %v8870_v24 = vadd.f32 %v16923_v36, %v8787_v29  ;;  %v8317_v48 = vrot.slane %v8307_v41, %v15352_v9  ;;  %v8324_v63 = vrot.slane %v13817_v1, %v15352_v9 }
 0xe63   : > { %v9113_v38 = vadd.f32 %v17052_v34, %v8301_v31  ;;  %v8331_v36 = vrot.slane %v8309_v18, %v15352_v9  ;;  %v8338_v61 = vrot.slane %v13818_v54, %v15352_v9  ;;  %v9574_v14 = vcombine.low %v8864_v51, %v8866_v58 }
 0xe64   : > { %v9761_v23 = vcombine.high %v8870_v24, %v8872_v49  ;;  %v9032_v39 = vadd.f32 %v16974_v28, %v8949_v8  ;;  %v8876_v42 = vadd.f32 %v16947_v26, %v8793_v55  ;;  %v17220_v34 = vrot.slane %v8590_v11, %v15352_v9 }
 0xe65   : > { %v17223_v31 = vrot.slane %v8592_v43, %v15352_v9  ;;  %v8339_v29 = vcombine.low %v8317_v48, %v8324_v63  ;;  %v9196_v41 = vadd.f32 %v17037_v16, %v9113_v38  ;;  %v8341_v1 = vcombine.low %v8331_v36, %v8338_v61 }
 0xe66   : > { %v9588_v28 = vrot.slane %v9574_v14, %v15352_v9  ;;  %v17235_v8 = vrot.slane %v9761_v23, %v15352_v9  ;;  %v18879_v16 = vcombine.high %v17085_v60, %v17091_v59  ;;  %v18880_v43 = vcombine.high %v17096_v0, %v17099_v30 }
 0xe67   : > { %v9361_v40 = vpop.f32.mrf.mxu1  ;;  %v8508_v18 = vcombine.high %v17158_v57, %v17164_v35  ;;  %v17248_v54 = vrot.slane %v8339_v29, %v15352_v9  ;;  %v8340_v60 = vcombine.high %v8317_v48, %v8324_v63  ;;  %v8504_v0 = vcombine.high %v17155_v6, %v17161_v15  ;;  %v18881_v63 = vld [vmem:[#allocation25_spill] sm:$0xff] }
 0xe68   : > { %v8342_v59 = vcombine.high %v8331_v36, %v8338_v61  ;;  %v18882_v23 = vcombine.low %v17158_v57, %v17164_v35  ;;  %v18884_v57 = vcombine.low %v17155_v6, %v17161_v15  ;;  %v18885_v35 = vld [vmem:[#allocation31_spill] sm:$0xff] }
 0xe69   : > { %v9363_v50 = vpop.f32.mrf.mxu1  ;;  %v17272_v61 = vrot.slane %v8340_v60, %v15352_v9  ;;  %v18889_v60 = vcombine.high %v17121_v33, %v17121_v33 }
 0xe6c   : > { %v9367_v38 = vpop.f32.mrf.mxu1 }
 0xe8e   : > { %v9278_v4 = vpop.f32.mrf.mxu0 }
 0xe90   : > { %v9280_v37 = vpop.f32.mrf.mxu0 }
 0xe91   : > { %v9281_v47 = vadd.f32 %v9280_v37, %v8306_v17  ;;  %v9115_v37 = vadd.f32 %v17079_v52, %v8305_v3  ;;  %v9279_v17 = vadd.f32 %v9278_v4, %v8302_v32  ;;  %v9575_v52 = vcombine.high %v8864_v51, %v8866_v58 }
 0xe92   : > { %v9760_v32 = vcombine.low %v8870_v24, %v8872_v49  ;;  %v8878_v4 = vadd.f32 %v16954_v46, %v8795_v7  ;;  %v9030_v3 = vadd.f32 %v16968_v19, %v8947_v53  ;;  %v8953_v53 = vadd.f32 %v16972_v25, %v18879_v16 }
 0xe93   : > { %v9364_v5 = vadd.f32 %v9363_v50, %v9281_v47  ;;  %v9198_v10 = vadd.f32 %v17046_v22, %v9115_v37  ;;  %v9362_v20 = vadd.f32 %v9361_v40, %v9279_v17  ;;  %v9284_v24 = vpop.f32.mrf.mxu0  ;;  %v17229_v22 = vrot.slane %v9575_v52, %v15352_v9 }
 0xe94   : > { %v17232_v26 = vrot.slane %v9760_v32, %v15352_v9  ;;  %v9946_v11 = vcombine.low %v8876_v42, %v8878_v4  ;;  %v9576_v55 = vcombine.low %v9030_v3, %v9032_v39  ;;  %v9577_v40 = vcombine.high %v9030_v3, %v9032_v39  ;;  %v18883_v39 = vld [vmem:[#allocation33_spill] sm:$0xff] }
 0xe95   : > { %v9580_v46 = vcombine.low %v9362_v20, %v9364_v5  ;;  %v9578_v19 = vcombine.low %v9196_v41, %v9198_v10  ;;  %v8955_v47 = vadd.f32 %v16991_v12, %v18880_v43  ;;  %v9581_v51 = vcombine.high %v9362_v20, %v9364_v5  ;;  %v9286_v49 = vpop.f32.mrf.mxu0 }
 0xe96   : > { %v17252_v7 = vrot.slane %v8341_v1, %v15352_v9  ;;  %v17255_v25 = vrot.slane %v9946_v11, %v15352_v9  ;;  %v8622_v12 = vcombine.high %v17220_v34, %v17220_v34  ;;  %v9602_v30 = vrot.slane %v9576_v55, %v15352_v9  ;;  %v9369_v1 = vpop.f32.mrf.mxu1 }
 0xe97   : > { %v9630_v58 = vrot.slane %v9580_v46, %v15352_v9  ;;  %v9609_v37 = vrot.slane %v9577_v40, %v15352_v9  ;;  %v9579_v17 = vcombine.high %v9196_v41, %v9198_v10  ;;  %v9616_v50 = vrot.slane %v9578_v19, %v15352_v9 }
 0xe98   : > { %v9036_v48 = vadd.f32 %v16993_v27, %v8953_v53  ;;  %v9038_v5 = vadd.f32 %v18881_v63, %v8955_v47  ;;  %v9287_v14 = vadd.f32 %v9286_v49, %v8508_v18  ;;  %v8624_v52 = vcombine.high %v17223_v31, %v17223_v31  ;;  %v18887_v53 = vld [vmem:[#allocation26_spill] sm:$0xff] }
 0xe99   : > { %v9637_v32 = vrot.slane %v9581_v51, %v15352_v9  ;;  %v9642_v4 = vcombine.low %v9616_v50, %v9630_v58  ;;  %v9121_v27 = vadd.f32 %v18883_v39, %v18882_v23  ;;  %v9643_v10 = vcombine.high %v9616_v50, %v9630_v58  ;;  %v18888_v18 = vld [vmem:[#allocation30_spill] sm:$0xff] }
 0xe9a   : > { %v9285_v20 = vadd.f32 %v9284_v24, %v8504_v0  ;;  %v17279_v42 = vrot.slane %v8342_v59, %v15352_v9  ;;  %v9638_v29 = vcombine.low %v9588_v28, %v9602_v30  ;;  %v9639_v3 = vcombine.high %v9588_v28, %v9602_v30  ;;  %v18890_v0 = vld [vmem:[#allocation24_spill] sm:$0xff] }
 0xe9b   : > { %v9640_v41 = vcombine.low %v17229_v22, %v9609_v37  ;;  %v9623_v46 = vrot.slane %v9579_v17, %v15352_v9  ;;  %v9641_v11 = vcombine.high %v17229_v22, %v9609_v37  ;;  %v9762_v55 = vcombine.low %v9036_v48, %v9038_v5  ;;  %v18891_v17 = vld [vmem:[#allocation29_spill] sm:$0xff] }
 0xe9c   : > { %v9119_v40 = vadd.f32 %v18885_v35, %v18884_v57  ;;  %v9370_v19 = vadd.f32 %v9369_v1, %v9287_v14  ;;  %v9763_v24 = vcombine.high %v9036_v48, %v9038_v5  ;;  %v18886_v16 = vcombine.high %v17131_v45, %v17131_v45  ;;  %v9290_v48 = vpop.f32.mrf.mxu0  ;;  %v18892_v5 = vld [vmem:[#allocation28_spill] sm:$0xff] }
 0xe9d   : > { %v9644_v43 = vcombine.low %v9623_v46, %v9637_v32  ;;  %v9680_v47 = vrot.slane %v9642_v4, %v15352_v9  ;;  %v9204_v51 = vadd.f32 %v18888_v18, %v9121_v27  ;;  %v9645_v58 = vcombine.high %v9623_v46, %v9637_v32 }
 0xe9e   : > { %v8961_v28 = vadd.f32 %v18887_v53, %v18886_v16  ;;  %v9694_v22 = vrot.slane %v9643_v10, %v15352_v9  ;;  %v9368_v49 = vadd.f32 %v9367_v38, %v9285_v20  ;;  %v9652_v6 = vrot.slane %v9638_v29, %v15352_v9  ;;  %v18893_v10 = vld [vmem:[#allocation27_spill] sm:$0xff]  ;;  %v9292_v57 = vpop.f32.mrf.mxu0 }
 0xe9f   : > { %v9659_v15 = vrot.slane %v9640_v41, %v15352_v9  ;;  %v8959_v45 = vadd.f32 %v18890_v0, %v18889_v60  ;;  %v8003_v59 = vcombine.high %v17167_v44, %v17167_v44  ;;  %v9666_v30 = vrot.slane %v9639_v3, %v15352_v9 }
 0xea0   : > { %v17305_v37 = vrot.slane %v9762_v55, %v15352_v9  ;;  %v9202_v50 = vadd.f32 %v18891_v17, %v9119_v40  ;;  %v9766_v38 = vcombine.low %v9368_v49, %v9370_v19  ;;  %v9673_v63 = vrot.slane %v9641_v11, %v15352_v9 }
 0xea1   : > { %v17310_v14 = vadd.f32 %v18892_v5, %v8961_v28  ;;  %v9687_v33 = vrot.slane %v9644_v43, %v15352_v9  ;;  %v17313_v32 = vcombine.low %v9652_v6, %v9680_v47  ;;  %v17316_v4 = vrot.slane %v9763_v24, %v15352_v9  ;;  %v9373_v43 = vpop.f32.mrf.mxu1 }
 0xea2   : > { %v9764_v23 = vcombine.low %v9202_v50, %v9204_v51  ;;  %v9701_v39 = vrot.slane %v9645_v58, %v15352_v9  ;;  %v17319_v27 = vcombine.low %v9666_v30, %v9694_v22  ;;  %v9042_v20 = vadd.f32 %v18893_v10, %v8959_v45 }
 0xea3   : > { %v17322_v29 = vcombine.high %v9652_v6, %v9680_v47  ;;  %v8004_v3 = vcombine.high %v17174_v2, %v17174_v2  ;;  %v8005_v41 = vcombine.high %v17170_v21, %v17170_v21  ;;  %v9824_v46 = vcombine.low %v17232_v26, %v17305_v37 }
 0xea4   : > { %v17330_v1 = vcombine.high %v9666_v30, %v9694_v22  ;;  %v9767_v11 = vcombine.high %v9368_v49, %v9370_v19  ;;  %v9816_v55 = vrot.slane %v9766_v38, %v15352_v9  ;;  %v9825_v35 = vcombine.high %v17232_v26, %v17305_v37 }
 0xea5   : > { %v9947_v40 = vcombine.low %v9042_v20, %v17310_v14  ;;  %v17336_v24 = vcombine.low %v9659_v15, %v9687_v33  ;;  %v10107_v16 = vmul.f32 0.70710677, %v17313_v32  ;;  %v9765_v53 = vcombine.high %v9202_v50, %v9204_v51 }
 0xea6   : > { %v9802_v28 = vrot.slane %v9764_v23, %v15352_v9  ;;  %v17340_v47 = vcombine.low %v9673_v63, %v9701_v39  ;;  %v10109_v19 = vmul.f32 0.70710677, %v17319_v27  ;;  %v9127_v18 = vadd.f32 %v17184_v62, %v17223_v31  ;;  %v18894_v23 = vld [vmem:[#allocation32_spill] sm:$0xff] }
 0xea7   : > { %v17345_v58 = vcombine.high %v9659_v15, %v9687_v33  ;;  %v10111_v26 = vmul.f32 0.70710677, %v17322_v29  ;;  %v9293_v22 = vadd.f32 %v9292_v57, %v8624_v52  ;;  %v17351_v49 = vcombine.high %v9673_v63, %v9701_v39  ;;  %v9375_v52 = vpop.f32.mrf.mxu1 }
 0xea8   : > { %v10113_v51 = vmul.f32 0.70710677, %v17330_v1  ;;  %v9823_v6 = vrot.slane %v9767_v11, %v15352_v9  ;;  %v9828_v60 = vcombine.low %v9802_v28, %v9816_v55  ;;  %v10115_v0 = vmul.f32 0.70710677, %v17336_v24 }
 0xea9   : > { %14577 = verf.f32 %v10107_v16  ;;  %v9829_v45 = vcombine.high %v9802_v28, %v9816_v55  ;;  %v9291_v62 = vadd.f32 %v9290_v48, %v8622_v12  ;;  %v9809_v15 = vrot.slane %v9765_v53, %v15352_v9 }
 0xeaa   : > { %v9125_v31 = vadd.f32 %v17150_v13, %v17220_v34  ;;  %v10117_v30 = vmul.f32 0.70710677, %v17340_v47  ;;  %14579 = verf.f32 %v10109_v19  ;;  %v9210_v37 = vadd.f32 %v17141_v56, %v9127_v18 }
 0xeab   : > { %v10119_v17 = vmul.f32 0.70710677, %v17345_v58  ;;  %14581 = verf.f32 %v10111_v26  ;;  %v9376_v50 = vadd.f32 %v9375_v52, %v9293_v22  ;;  %v10121_v38 = vmul.f32 0.70710677, %v17351_v49 }
 0xeac   : > { %14583 = verf.f32 %v10113_v51  ;;  %v9830_v63 = vcombine.low %v9809_v15, %v9823_v6  ;;  %v9866_v12 = vrot.slane %v9828_v60, %v15352_v9  ;;  %v9831_v48 = vcombine.high %v9809_v15, %v9823_v6 }
 0xead   : > { %14585 = verf.f32 %v10115_v0  ;;  %v9880_v13 = vrot.slane %v9829_v45, %v15352_v9  ;;  %v9374_v34 = vadd.f32 %v9373_v43, %v9291_v62  ;;  %v9826_v5 = vcombine.low %v17235_v8, %v17316_v4 }
 0xeae   : > { %v9827_v56 = vcombine.high %v17235_v8, %v17316_v4  ;;  %v9838_v14 = vrot.slane %v9824_v46, %v15352_v9  ;;  %14587 = verf.f32 %v10117_v30  ;;  %v9852_v33 = vrot.slane %v9825_v35, %v15352_v9 }
 0xeaf   : > { %v9208_v39 = vadd.f32 %v18894_v23, %v9125_v31  ;;  %14589 = verf.f32 %v10119_v17  ;;  %v9949_v10 = vcombine.low %v9374_v34, %v9376_v50  ;;  %v9963_v20 = vrot.slane %v9947_v40, %v15352_v9  ;;  %v18896_v23 = vld [vmem:[#allocation22_spill] sm:$0xff] }
 0xeb0   : > { %14591 = verf.f32 %v10121_v38  ;;  %v9873_v11 = vrot.slane %v9830_v63, %v15352_v9  ;;  %v17377_v55 = vcombine.low %v9838_v14, %v9866_v12  ;;  %v9887_v16 = vrot.slane %v9831_v48, %v15352_v9 }
 0xeb1   : > { %v9948_v57 = vcombine.low %v9208_v39, %v9210_v37  ;;  %v17380_v8 = vcombine.low %v9852_v33, %v9880_v13  ;;  %v9845_v46 = vrot.slane %v9826_v5, %v15352_v9  ;;  %v17385_v35 = vcombine.high %v9838_v14, %v9866_v12  ;;  %v17434_v12 = vld [vmem:[%s14821_s5 + $0x3a8] sm:$0xff] }
 0xeb2   : > { %v8509_v40 = vcombine.low %v17167_v44, %v17167_v44  ;;  %v8510_v53 = vcombine.low %v17170_v21, %v8003_v59  ;;  %v9859_v28 = vrot.slane %v9827_v56, %v15352_v9  ;;  %v17394_v43 = vcombine.high %v9852_v33, %v9880_v13  ;;  %v18895_v59 = vld [vmem:[#allocation35_spill] sm:$0xff] }
 0xeb3   : > { %v9977_v19 = vrot.slane %v9949_v10, %v15352_v9  ;;  %v8511_v18 = vcombine.low %v8005_v41, %v17174_v2  ;;  %v9978_v26 = vcombine.low %v17255_v25, %v9963_v20  ;;  %v17402_v22 = vcombine.low %v9845_v46, %v9873_v11  ;;  %v17440_v56 = vld [vmem:[%s14821_s5 + $0x528] sm:$0xff] }
 0xeb4   : > { %v10123_v51 = vmul.f32 0.70710677, %v17377_v55  ;;  %v8512_v6 = vcombine.low %v18895_v59, %v8004_v3  ;;  %v9979_v60 = vcombine.high %v17255_v25, %v9963_v20  ;;  %v9970_v0 = vrot.slane %v9948_v57, %v15352_v9  ;;  %v18897_v10 = vld [vmem:[#allocation23_spill] sm:$0xff] }
 0xeb5   : > { %v17411_v45 = vcombine.low %v9859_v28, %v9887_v16  ;;  %v10125_v21 = vmul.f32 0.70710677, %v17380_v8  ;;  %v17414_v62 = vcombine.high %v9845_v46, %v9873_v11  ;;  %v10127_v15 = vmul.f32 0.70710677, %v17385_v35 }
 0xeb6   : > { %v14578_v41 = vpop.eup %14577  ;;  %v17418_v31 = vrot.slane %v8509_v40, %v15352_v9  ;;  %v17421_v2 = vrot.slane %v8510_v53, %v15352_v9  ;;  %v17423_v25 = vcombine.high %v9859_v28, %v9887_v16  ;;  %v10129_v52 = vmul.f32 0.70710677, %v17394_v43 }
 0xeb7   : > { %v14580_v3 = vpop.eup %14579  ;;  %v9980_v30 = vcombine.low %v9970_v0, %v9977_v19  ;;  %v17427_v37 = vrot.slane %v8511_v18, %v15352_v9  ;;  %v10131_v50 = vmul.f32 0.70710677, %v17402_v22  ;;  %14593 = verf.f32 %v10123_v51 }
 0xeb8   : > { %v14582_v17 = vpop.eup %14581  ;;  %v9981_v38 = vcombine.high %v9970_v0, %v9977_v19  ;;  %v17431_v63 = vrot.slane %v8512_v6, %v15352_v9  ;;  %v9988_v13 = vrot.slane %v9978_v26, %v15352_v9  ;;  %v9995_v34 = vrot.slane %v9979_v60, %v15352_v9 }
 0xeb9   : > { %v14584_v48 = vpop.eup %14583  ;;  %v10133_v5 = vmul.f32 0.70710677, %v17411_v45  ;;  %14595 = verf.f32 %v10125_v21  ;;  %v10135_v33 = vmul.f32 0.70710677, %v17414_v62  ;;  %v10137_v57 = vmul.f32 0.70710677, %v17423_v25 }
 0xeba   : > { %v14586_v14 = vpop.eup %14585  ;;  %14597 = verf.f32 %v10127_v15  ;;  %v10002_v16 = vrot.slane %v9980_v30, %v15352_v9  ;;  %v10071_v53 = vmul.f32 0.5, %v17313_v32  ;;  %v10009_v28 = vrot.slane %v9981_v38, %v15352_v9 }
 0xebb   : > { %v14588_v11 = vpop.eup %14587  ;;  %14599 = verf.f32 %v10129_v52  ;;  %v10075_v26 = vmul.f32 0.5, %v17322_v29  ;;  %v10179_v51 = vadd.f32 1.0, %v14578_v41  ;;  %v10181_v6 = vadd.f32 1.0, %v14580_v3 }
 0xebc   : > { %v14590_v40 = vpop.eup %14589  ;;  %14601 = verf.f32 %v10131_v50  ;;  %v10073_v60 = vmul.f32 0.5, %v17319_v27  ;;  %v10183_v0 = vadd.f32 1.0, %v14582_v17  ;;  %v10185_v21 = vadd.f32 1.0, %v14584_v48 }
 0xebd   : > { %v14592_v18 = vpop.eup %14591  ;;  %14603 = verf.f32 %v10133_v5  ;;  %v17453_v15 = vcombine.low %v9988_v13, %v10002_v16  ;;  %v10187_v32 = vadd.f32 1.0, %v14586_v14  ;;  %v10189_v52 = vadd.f32 1.0, %v14588_v11  ;;  %v17474_v14 = vld [vmem:[%s14821_s5 + $0x51c] sm:$0xff]  ;;  %v9444_v11 = vpop.f32.mrf.mxu1 }
 0xebe   : > { %14605 = verf.f32 %v10135_v33  ;;  %v10077_v30 = vmul.f32 0.5, %v17330_v1  ;;  %v17456_v50 = vcombine.low %v9995_v34, %v10009_v28  ;;  %v10191_v29 = vadd.f32 1.0, %v14590_v40  ;;  %v17471_v34 = vld [vmem:[%s14821_s5 + $0x39c] sm:$0xff] }
 0xebf   : > { %14607 = verf.f32 %v10137_v57  ;;  %v10193_v41 = vadd.f32 1.0, %v14592_v18  ;;  %v10079_v3 = vmul.f32 0.5, %v17336_v24  ;;  %v10081_v27 = vmul.f32 0.5, %v17340_v47  ;;  %v17483_v57 = vld [vmem:[%s14821_s5 + $0x390] sm:$0xff] }
 0xec0   : > { %v17460_v17 = vmul.f32 %v10179_v51, %v10071_v53  ;;  %v17462_v38 = vmul.f32 %v10181_v6, %v10073_v60  ;;  %v10083_v48 = vmul.f32 0.5, %v17345_v58  ;;  %v10085_v13 = vmul.f32 0.5, %v17351_v49  ;;  %v17492_v53 = vld [vmem:[%s14821_s5 + $0x510] sm:$0xff] }
 0xec1   : > { %v17466_v5 = vmul.f32 %v10183_v0, %v10075_v26  ;;  %v17468_v1 = vmul.f32 %v10185_v21, %v10077_v30  ;;  %v10139_v24 = vmul.f32 0.70710677, %v17453_v15  ;;  %v17477_v47 = vmul.f32 %v10187_v32, %v10079_v3  ;;  %v17506_v30 = vld [vmem:[%s14821_s5 + $0x384] sm:$0xff] }
 0xec2   : > { %v17479_v33 = vmul.f32 %v10189_v52, %v10081_v27  ;;  %v10141_v58 = vmul.f32 0.70710677, %v17456_v50  ;;  %v17486_v49 = vmul.f32 %v10191_v29, %v10083_v48  ;;  %v17488_v16 = vmul.f32 %v10193_v41, %v10085_v13 }
 0xec3   : > { %v11137_v18 = vcombine.low %v17460_v17, %v17462_v38  ;;  %v11139_v0 = vcombine.low %v17466_v5, %v17468_v1  ;;  %14609 = verf.f32 %v10139_v24  ;;  %v10087_v6 = vmul.f32 0.5, %v17377_v55 }
 0xec4   : > { %v14594_v28 = vpop.eup %14593  ;;  %v11141_v21 = vcombine.low %v17477_v47, %v17479_v33  ;;  %v11143_v41 = vcombine.low %v17486_v49, %v17488_v16  ;;  %14611 = verf.f32 %v10141_v58  ;;  %v10089_v27 = vmul.f32 0.5, %v17380_v8 }
 0xec5   : > { %v11151_v13 = vrot.slane %v11137_v18, %v15352_v9  ;;  %v11165_v26 = vrot.slane %v11139_v0, %v15352_v9  ;;  %v10091_v58 = vmul.f32 0.5, %v17385_v35  ;;  %v10093_v32 = vmul.f32 0.5, %v17394_v43 }
 0xec6   : > { %v14596_v60 = vpop.eup %14595  ;;  %v11179_v24 = vrot.slane %v11141_v21, %v15352_v9  ;;  %v11193_v51 = vrot.slane %v11143_v41, %v15352_v9  ;;  %v10095_v46 = vmul.f32 0.5, %v17402_v22  ;;  %v10097_v41 = vmul.f32 0.5, %v17411_v45  ;;  %v9446_v22 = vpop.f32.mrf.mxu1 }
 0xec7   : > { %v14598_v29 = vpop.eup %14597  ;;  %v11201_v18 = vcombine.low %v11151_v13, %v11165_v26  ;;  %v11202_v19 = vcombine.high %v11151_v13, %v11165_v26  ;;  %v10195_v8 = vadd.f32 1.0, %v14594_v28  ;;  %v10197_v26 = vadd.f32 1.0, %v14596_v60 }
 0xec8   : > { %v14600_v48 = vpop.eup %14599  ;;  %v11205_v55 = vcombine.low %v11179_v24, %v11193_v51  ;;  %v11206_v20 = vcombine.high %v11179_v24, %v11193_v51  ;;  %v10199_v13 = vadd.f32 1.0, %v14598_v29  ;;  %v10099_v43 = vmul.f32 0.5, %v17414_v62 }
 0xec9   : > { %v14602_v52 = vpop.eup %14601  ;;  %v11229_v40 = vrot.slane %v11202_v19, %v15352_v9  ;;  %v11215_v39 = vrot.slane %v11201_v18, %v15352_v9  ;;  %v10201_v36 = vadd.f32 1.0, %v14600_v48  ;;  %v17540_v62 = vmul.f32 %v10195_v8, %v10087_v6 }
 0xeca   : > { %v14604_v3 = vpop.eup %14603  ;;  %v11257_v35 = vrot.slane %v11206_v20, %v15352_v9  ;;  %v11243_v4 = vrot.slane %v11205_v55, %v15352_v9  ;;  %v10203_v51 = vadd.f32 1.0, %v14602_v52  ;;  %v18900_v20 = vcombine.low %v17248_v54, %v17252_v7  ;;  %v17543_v52 = vld [vmem:[%s14821_s5 + $0x504] sm:$0xff] }
 0xecb   : > { %v14606_v0 = vpop.eup %14605  ;;  %v10205_v24 = vadd.f32 1.0, %v14604_v3  ;;  %v10101_v29 = vmul.f32 0.5, %v17423_v25  ;;  %v9527_v3 = vpop.f32.mrf.mxu0  ;;  %v17551_v54 = vmul.f32 %v10197_v26, %v10089_v27  ;;  %v17553_v7 = vmul.f32 %v10199_v13, %v10091_v58 }
 0xecc   : > { %v14608_v21 = vpop.eup %14607  ;;  %v17529_v44 = vcombine.low %v11229_v40, %v11257_v35  ;;  %v17531_v45 = vcombine.high %v11229_v40, %v11257_v35  ;;  %v10207_v19 = vadd.f32 1.0, %v14606_v0  ;;  %v9445_v18 = vadd.f32 %v9444_v11, %v18900_v20  ;;  %v17568_v11 = vld [vmem:[%s14821_s5 + $0x4f8] sm:$0xff] }
 0xecd   : > { %v10209_v28 = vadd.f32 1.0, %v14608_v21  ;;  %v17536_v55 = vcombine.low %v11215_v39, %v11243_v4  ;;  %v17538_v60 = vcombine.high %v11215_v39, %v11243_v4  ;;  %v18903_v40 = vcombine.low %v17272_v61, %v17279_v42  ;;  %v17556_v4 = vld [vmem:[%s14821_s5 + $0x378] sm:$0xff]  ;;  %v9529_v13 = vpop.f32.mrf.mxu0 }
 0xece   : > { %18898 = vst [vmem:[#allocation25_spill] sm:$0xff] %v17529_v44  ;;  %18899 = vst [vmem:[#allocation33_spill] sm:$0xff] %v17531_v45  ;;  %11879 = vmatprep.mubr.f32.mxu0 %v17529_v44  ;;  %11962 = vmatprep.mubr.f32.mxu1 %v17531_v45  ;;  %v17560_v25 = vmul.f32 %v10201_v36, %v10093_v32  ;;  %v17562_v39 = vmul.f32 %v10203_v51, %v10095_v46  ;;  %v10785_v42 = vunpack.c.h.bf16 %v17506_v30  ;;  %v17836_v45 = vld [vmem:[%s14821_s5 + $0x5b8] sm:$0xff] }
 0xecf   : > { %18901 = vst [vmem:[#allocation31_spill] sm:$0xff] %v17536_v55  ;;  %18902 = vst [vmem:[#allocation26_spill] sm:$0xff] %v17538_v60  ;;  %v9447_v48 = vadd.f32 %v9446_v22, %v18903_v40  ;;  %11880 = vmatmul.mubr.f32.vlgmr.msra.gmra.mxu0 %v17536_v55  ;;  %11963 = vmatmul.mubr.f32.vlgmr.msra.gmra.mxu1 %v17538_v60  ;;  %v17564_v61 = vmul.f32 %v10205_v24, %v10097_v41  ;;  %v18904_v6 = vunpack.c.l.bf16 %v18896_v23 }
 0xed0   : > { %v18905_v27 = vunpack.c.l.bf16 %v18897_v10  ;;  %v17574_v58 = vmul.f32 %v10207_v19, %v10099_v43  ;;  %v17576_v0 = vmul.f32 %v10209_v28, %v10101_v29  ;;  %v10880_v36 = vunpack.c.l.bf16 %v17543_v52  ;;  %v14610_v32 = vpop.eup %14609 }
 0xed1   : > { %11982 = vmatpush1.msra.mxu0 %v18904_v6  ;;  %v10881_v46 = vunpack.c.h.bf16 %v17543_v52  ;;  %v18906_v21 = vunpack.c.h.bf16 %v17434_v12  ;;  %v18907_v41 = vunpack.c.h.bf16 %v17440_v56  ;;  %v11339_v23 = vcombine.low %v17540_v62, %v17551_v54  ;;  %v14612_v26 = vpop.eup %14611 }
 0xed2   : > { %12065 = vmatpush1.msra.mxu1 %v18905_v27  ;;  %v11341_v10 = vcombine.low %v17553_v7, %v17560_v25  ;;  %v10781_v8 = vunpack.c.l.bf16 %v17556_v4  ;;  %v10782_v35 = vunpack.c.h.bf16 %v17556_v4  ;;  %v17590_v43 = vadd.f32 %v9527_v3, %v9445_v18  ;;  %v17611_v3 = vld [vmem:[%s14821_s5 + $0x36c] sm:$0xff] }
 0xed3   : > { %11983 = vmatprep.subr.mxu0 %v18906_v21  ;;  %12066 = vmatprep.subr.mxu1 %v18907_v41  ;;  %v18908_v22 = vunpack.c.l.bf16 %v17434_v12  ;;  %v18909_v51 = vunpack.c.l.bf16 %v17440_v56  ;;  %v11343_v24 = vcombine.low %v17562_v39, %v17564_v61  ;;  %v11345_v19 = vcombine.low %v17574_v58, %v17576_v0 }
 0xed4   : > { %v10877_v28 = vunpack.c.l.bf16 %v17568_v11  ;;  %v17601_v20 = vadd.f32 %v9529_v13, %v9447_v48  ;;  %v11353_v52 = vrot.slane %v11339_v23, %v15352_v9  ;;  %v11367_v18 = vrot.slane %v11341_v10, %v15352_v9 }
 0xed5   : > { %11984 = vmatpush1.msra.mxu0 %v18908_v22  ;;  %12067 = vmatpush1.msra.mxu1 %v18909_v51  ;;  %v18910_v12 = vunpack.c.h.bf16 %v17471_v34  ;;  %v18911_v56 = vunpack.c.h.bf16 %v17474_v14  ;;  %v10878_v29 = vunpack.c.h.bf16 %v17568_v11  ;;  %v11381_v40 = vrot.slane %v11343_v24, %v15352_v9 }
 0xed6   : > { %v11395_v48 = vrot.slane %v11345_v19, %v15352_v9  ;;  %v18912_v6 = vunpack.c.l.bf16 %v17471_v34  ;;  %v18913_v27 = vunpack.c.l.bf16 %v17474_v14  ;;  %v10103_v21 = vmul.f32 0.5, %v17453_v15  ;;  %v17626_v19 = vld [vmem:[%s14821_s5 + $0x4ec] sm:$0xff] }
 0xed7   : > { %11985 = vmatprep.subr.mxu0 %v18910_v12  ;;  %12068 = vmatprep.subr.mxu1 %v18911_v56  ;;  %v10211_v41 = vadd.f32 1.0, %v14610_v32  ;;  %v11404_v23 = vcombine.high %v11353_v52, %v11367_v18  ;;  %v11403_v10 = vcombine.low %v11353_v52, %v11367_v18  ;;  %v10105_v13 = vmul.f32 0.5, %v17456_v50 }
 0xed8   : > { %11986 = vmatpush1.msra.mxu0 %v18912_v6  ;;  %12069 = vmatpush1.msra.mxu1 %v18913_v27  ;;  %v10213_v22 = vadd.f32 1.0, %v14612_v26  ;;  %v18914_v51 = vunpack.c.h.bf16 %v17483_v57  ;;  %v18915_v24 = vunpack.c.h.bf16 %v17492_v53  ;;  %v11408_v34 = vcombine.high %v11381_v40, %v11395_v48  ;;  %v10395_v27 = vld [vmem:[%s14821_s5 + $0x360] sm:$0xff] }
 0xed9   : > { %v11407_v12 = vcombine.low %v11381_v40, %v11395_v48  ;;  %v17628_v14 = vmul.f32 %v10211_v41, %v10103_v21  ;;  %v18916_v15 = vunpack.c.l.bf16 %v17483_v57  ;;  %v18917_v32 = vunpack.c.l.bf16 %v17492_v53 }
 0xeda   : > { %11987 = vmatprep.subr.mxu0 %v18914_v51  ;;  %12070 = vmatprep.subr.mxu1 %v18915_v24  ;;  %v10778_v50 = vunpack.c.l.bf16 %v17611_v3  ;;  %v11431_v26 = vrot.slane %v11404_v23, %v15352_v9  ;;  %v11417_v52 = vrot.slane %v11403_v10, %v15352_v9  ;;  %v17637_v18 = vmul.f32 %v10213_v22, %v10105_v13  ;;  %v10393_v24 = vld [vmem:[%s14821_s5 + $0x354] sm:$0xff] }
 0xedb   : > { %11988 = vmatpush1.msra.mxu0 %v18916_v15  ;;  %12071 = vmatpush1.msra.mxu1 %v18917_v32  ;;  %v10779_v56 = vunpack.c.h.bf16 %v17611_v3  ;;  %v11459_v40 = vrot.slane %v11408_v34, %v15352_v9  ;;  %v11445_v57 = vrot.slane %v11407_v12, %v15352_v9  ;;  %v18918_v53 = vunpack.c.l.bf16 %v17506_v30  ;;  %v10457_v32 = vld [vmem:[%s14821_s5 + $0x4d4] sm:$0xff] }
 0xedc   : > { %11989 = vmatprep.subr.mxu0 %v10785_v42  ;;  %12072 = vmatprep.subr.mxu1 %v10881_v46  ;;  %v11138_v48 = vcombine.high %v17460_v17, %v17462_v38  ;;  %v10875_v6 = vunpack.c.h.bf16 %v17626_v19  ;;  %v11541_v42 = vcombine.low %v17628_v14, %v17637_v18  ;;  %v11140_v46 = vcombine.high %v17466_v5, %v17468_v1 }
 0xedd   : > { %11990 = vmatpush1.msra.mxu0 %v18918_v53  ;;  %12073 = vmatpush1.msra.mxu1 %v10880_v36  ;;  %v11142_v3 = vcombine.high %v17477_v47, %v17479_v33  ;;  %v11144_v30 = vcombine.high %v17486_v49, %v17488_v16  ;;  %v17656_v36 = vcombine.low %v11431_v26, %v11459_v40  ;;  %v10874_v49 = vunpack.c.l.bf16 %v17626_v19  ;;  %v10389_v53 = vld [vmem:[%s14821_s5 + $0x33c] sm:$0xff] }
 0xede   : > { %11991 = vmatprep.subr.mxu0 %v10782_v35  ;;  %v17658_v21 = vcombine.high %v11431_v26, %v11459_v40  ;;  %v17660_v17 = vcombine.low %v11417_v52, %v11445_v57  ;;  %v17662_v38 = vcombine.high %v11417_v52, %v11445_v57  ;;  %12074 = vmatprep.subr.mxu1 %v10878_v29  ;;  %v10459_v35 = vld [vmem:[%s14821_s5 + $0x4e0] sm:$0xff]  ;;  %v10776_v16 = vunpack.c.h.bf16 %v10395_v27  ;;  %v10391_v52 = vld [vmem:[%s14821_s5 + $0x348] sm:$0xff] }
 0xedf   : > { %18919 = vst [vmem:[#allocation30_spill] sm:$0xff] %v17656_v36  ;;  %v11549_v41 = vrot.slane %v11541_v42, %v15352_v9  ;;  %v17667_v5 = vrot.slane %v11138_v48, %v15352_v9  ;;  %v17670_v1 = vrot.slane %v11140_v46, %v15352_v9  ;;  %v17673_v47 = vrot.slane %v11142_v3, %v15352_v9  ;;  %v10453_v3 = vld [vmem:[%s14821_s5 + $0x4bc] sm:$0xff] }
 0xee0   : > { %18920 = vst [vmem:[#allocation24_spill] sm:$0xff] %v17658_v21  ;;  %18921 = vst [vmem:[#allocation29_spill] sm:$0xff] %v17660_v17  ;;  %11992 = vmatpush1.msra.mxu0 %v10781_v8  ;;  %11885 = vmatprep.mubr.f32.mxu0 %v17656_v36  ;;  %v17680_v33 = vrot.slane %v11144_v30, %v15352_v9  ;;  %v9710_v29 = vcombine.low %v17590_v43, %v17601_v20  ;;  %v10872_v8 = vunpack.c.h.bf16 %v10459_v35  ;;  %v17908_v36 = vld [vmem:[%s14821_s5 + $0x3e4] sm:$0xff] }
 0xee1   : > { %18922 = vst [vmem:[#allocation28_spill] sm:$0xff] %v17662_v38  ;;  %11968 = vmatprep.mubr.f32.mxu1 %v17658_v21  ;;  %v8541_v23 = vcombine.low %v17418_v31, %v17421_v2  ;;  %11886 = vmatmul.mubr.f32.gmra.mxu0 %v17660_v17  ;;  %v11557_v4 = vcombine.high %v11549_v41, %v11549_v41  ;;  %v10871_v51 = vunpack.c.l.bf16 %v10459_v35  ;;  %v10775_v15 = vunpack.c.l.bf16 %v10395_v27  ;;  %v18929_v27 = vld [vmem:[#allocation34_spill] sm:$0xff]  ;;  %v17827_v21 = vld [vmem:[%s14821_s5 + $0x5c4] sm:$0xff] }
 0xee2   : > { %11969 = vmatmul.mubr.f32.gmra.mxu1 %v17662_v38  ;;  %v17690_v10 = vrot.slane %v11549_v41, %v15352_v9  ;;  %v11204_v13 = vcombine.high %v17667_v5, %v17670_v1  ;;  %v11208_v22 = vcombine.high %v17673_v47, %v17680_v33  ;;  %11993 = vmatprep.subr.mxu0 %v10779_v56  ;;  %v10455_v56 = vld [vmem:[%s14821_s5 + $0x4c8] sm:$0xff]  ;;  %v10868_v42 = vunpack.c.l.bf16 %v10457_v32 }
 0xee3   : > { %12075 = vmatpush1.msra.mxu1 %v10877_v28  ;;  %v8543_v19 = vcombine.low %v17427_v37, %v17431_v63  ;;  %v8542_v34 = vcombine.high %v17418_v31, %v17421_v2  ;;  %v17704_v12 = vrot.slane %v11557_v4, %v15352_v9  ;;  %11994 = vmatpush1.msra.mxu0 %v10778_v50  ;;  %v10772_v50 = vunpack.c.l.bf16 %v10393_v24  ;;  %v10451_v4 = vld [vmem:[%s14821_s5 + $0x4b0] sm:$0xff]  ;;  %v17824_v38 = vld [vmem:[%s14821_s5 + $0x444] sm:$0xff] }
 0xee4   : > { %18923 = vst [vmem:[#allocation27_spill] sm:$0xff] %v17690_v10  ;;  %12076 = vmatprep.subr.mxu1 %v10875_v6  ;;  %v8006_v11 = vcombine.high %v18895_v59, %v18895_v59  ;;  %v11236_v28 = vrot.slane %v11204_v13, %v15352_v9  ;;  %v11264_v26 = vrot.slane %v11208_v22, %v15352_v9  ;;  %v10773_v59 = vunpack.c.h.bf16 %v10393_v24  ;;  %v10385_v24 = vld [vmem:[%s14821_s5 + $0x324] sm:$0xff] }
 0xee5   : > { %18924 = vst [vmem:[#allocation32_spill] sm:$0xff] %v17704_v12  ;;  %12077 = vmatpush1.msra.mxu1 %v10874_v49  ;;  %11995 = vmatprep.subr.mxu0 %v10776_v16  ;;  %v9711_v31 = vcombine.high %v17590_v43, %v17601_v20  ;;  %v17717_v2 = vcombine.high %v17704_v12, %v17704_v12  ;;  %v10869_v20 = vunpack.c.h.bf16 %v10457_v32  ;;  %v10770_v46 = vunpack.c.h.bf16 %v10391_v52 }
 0xee6   : > { %11891 = vmatprep.mubr.f32.mxu0 %v17704_v12  ;;  %12078 = vmatprep.subr.mxu1 %v10872_v8  ;;  %v9718_v40 = vrot.slane %v9710_v29, %v15352_v9  ;;  %v17724_v57 = vcombine.high %v17690_v10, %v17690_v10  ;;  %v17726_v43 = vcombine.low %v11236_v28, %v11264_v26  ;;  %v10769_v41 = vunpack.c.l.bf16 %v10391_v52 }
 0xee7   : > { %18925 = vst [vmem:[#allocation35_spill] sm:$0xff] %v17717_v2  ;;  %11892 = vmatmul.mubr.f32.gmra.mxu0 %v17690_v10  ;;  %12079 = vmatpush1.msra.mxu1 %v10871_v51  ;;  %v8544_v48 = vcombine.high %v17427_v37, %v17431_v63  ;;  %v17732_v6 = vcombine.high %v11236_v28, %v11264_v26  ;;  %v10866_v37 = vunpack.c.h.bf16 %v10455_v56  ;;  %v10387_v63 = vld [vmem:[%s14821_s5 + $0x330] sm:$0xff]  ;;  %v10865_v29 = vunpack.c.l.bf16 %v10455_v56 }
 0xee8   : > { %18926 = vst [vmem:[#allocation22_spill] sm:$0xff] %v17724_v57  ;;  %18927 = vst [vmem:[#allocation23_spill] sm:$0xff] %v17726_v43  ;;  %11974 = vmatprep.mubr.f32.mxu1 %v17717_v2  ;;  %11996 = vmatpush1.msra.mxu0 %v10775_v15  ;;  %v17736_v30 = vrot.slane %v8541_v23, %v15352_v9  ;;  %v8625_v35 = vcombine.low %v8006_v11, %v18929_v27  ;;  %v10767_v23 = vunpack.c.h.bf16 %v10389_v53  ;;  %v10449_v11 = vld [vmem:[%s14821_s5 + $0x4a4] sm:$0xff]  ;;  %v17820_v2 = vld [vmem:[%s14821_s5 + $0x5d0] sm:$0xff] }
 0xee9   : > { %18928 = vst [vmem:[#allocation36_spill] sm:$0xff] %v17732_v6  ;;  %11975 = vmatmul.mubr.f32.gmra.mxu1 %v17724_v57  ;;  %12045 = vmatprep.mubr.f32.mxu0 %v17726_v43  ;;  %v17743_v49 = vrot.slane %v8543_v19, %v15352_v9  ;;  %v17746_v16 = vrot.slane %v8542_v34, %v15352_v9  ;;  %v10766_v22 = vunpack.c.l.bf16 %v10389_v53  ;;  %v10863_v51 = vunpack.c.h.bf16 %v10453_v3  ;;  %v10439_v27 = vld [vmem:[%s14821_s5 + $0x468] sm:$0xff]  ;;  %v10501_v57 = vld [vmem:[%s14821_s5 + $0x5dc] sm:$0xff] }
 0xeea   : > { %12128 = vmatprep.mubr.f32.mxu1 %v17732_v6  ;;  %11997 = vmatprep.subr.mxu0 %v10773_v59  ;;  %v9725_v8 = vrot.slane %v9711_v31, %v15352_v9  ;;  %v9726_v13 = vcombine.high %v9718_v40, %v9718_v40  ;;  %v17753_v19 = vrot.slane %v9718_v40, %v15352_v9  ;;  %v10862_v15 = vunpack.c.l.bf16 %v10453_v3  ;;  %v10383_v31 = vld [vmem:[%s14821_s5 + $0x318] sm:$0xff] }
 0xeeb   : > { %12080 = vmatprep.subr.mxu1 %v10869_v20  ;;  %11998 = vmatpush1.msra.mxu0 %v10772_v50  ;;  %v17756_v34 = vrot.slane %v8544_v48, %v15352_v9  ;;  %v10764_v32 = vunpack.c.h.bf16 %v10387_v63  ;;  %v17760_v28 = vrot.slane %v8625_v35, %v15352_v9  ;;  %v10763_v26 = vunpack.c.l.bf16 %v10387_v63  ;;  %v10447_v40 = vld [vmem:[%s14821_s5 + $0x498] sm:$0xff] }
 0xeec   : > { %12081 = vmatpush1.msra.mxu1 %v10868_v42  ;;  %11999 = vmatprep.subr.mxu0 %v10770_v46  ;;  %v10860_v52 = vunpack.c.h.bf16 %v10451_v4  ;;  %v10859_v59 = vunpack.c.l.bf16 %v10451_v4  ;;  %v10761_v56 = vunpack.c.h.bf16 %v10385_v24  ;;  %v9727_v20 = vcombine.high %v9725_v8, %v9725_v8  ;;  %v10381_v46 = vld [vmem:[%s14821_s5 + $0x30c] sm:$0xff]  ;;  %v10505_v50 = vld [vmem:[%s14821_s5 + $0x5f4] sm:$0xff] }
 0xeed   : > { %12082 = vmatprep.subr.mxu1 %v10866_v37  ;;  %12000 = vmatpush1.msra.mxu0 %v10769_v41  ;;  %v17767_v53 = vrot.slane %v9726_v13, %v15352_v9  ;;  %v10760_v48 = vunpack.c.l.bf16 %v10385_v24  ;;  %v10857_v42 = vunpack.c.h.bf16 %v10449_v11  ;;  %v17772_v3 = vcombine.high %v17753_v19, %v17753_v19  ;;  %v10445_v37 = vld [vmem:[%s14821_s5 + $0x48c] sm:$0xff]  ;;  %v10379_v13 = vld [vmem:[%s14821_s5 + $0x300] sm:$0xff] }
 0xeee   : > { %12083 = vmatpush1.msra.mxu1 %v10865_v29  ;;  %12001 = vmatprep.subr.mxu0 %v10767_v23  ;;  %v10856_v35 = vunpack.c.l.bf16 %v10449_v11  ;;  %v10758_v41 = vunpack.c.h.bf16 %v10383_v31  ;;  %v17778_v63 = vrot.slane %v9725_v8, %v15352_v9  ;;  %v10757_v23 = vunpack.c.l.bf16 %v10383_v31  ;;  %v10441_v31 = vld [vmem:[%s14821_s5 + $0x474] sm:$0xff] }
 0xeef   : > { %12084 = vmatprep.subr.mxu1 %v10863_v51  ;;  %12002 = vmatpush1.msra.mxu0 %v10766_v22  ;;  %v10854_v4 = vunpack.c.h.bf16 %v10447_v40  ;;  %v10108_v22 = vmul.f32 0.70710677, %v17753_v19  ;;  %v8633_v51 = vcombine.high %v17760_v28, %v17760_v28  ;;  %v10853_v24 = vunpack.c.l.bf16 %v10447_v40 }
 0xef0   : > { %12085 = vmatpush1.msra.mxu1 %v10862_v15  ;;  %12003 = vmatprep.subr.mxu0 %v10764_v32  ;;  %v10755_v8 = vunpack.c.h.bf16 %v10381_v46  ;;  %v10443_v15 = vld [vmem:[%s14821_s5 + $0x480] sm:$0xff]  ;;  %v17788_v32 = vrot.slane %v9727_v20, %v15352_v9  ;;  %v10110_v11 = vmul.f32 0.70710677, %v17767_v53  ;;  %v10112_v29 = vmul.f32 0.70710677, %v17772_v3 }
 0xef1   : > { %12086 = vmatprep.subr.mxu1 %v10860_v52  ;;  %12004 = vmatpush1.msra.mxu0 %v10763_v26  ;;  %v10754_v26 = vunpack.c.l.bf16 %v10381_v46  ;;  %v10851_v52 = vunpack.c.h.bf16 %v10445_v37  ;;  %v10752_v40 = vunpack.c.h.bf16 %v10379_v13  ;;  %v17796_v20 = vcombine.high %v17778_v63, %v17778_v63 }
 0xef2   : > { %12087 = vmatpush1.msra.mxu1 %v10859_v59  ;;  %12005 = vmatprep.subr.mxu0 %v10761_v56  ;;  %v10850_v59 = vunpack.c.l.bf16 %v10445_v37  ;;  %v10751_v56 = vunpack.c.l.bf16 %v10379_v13  ;;  %v10848_v46 = vunpack.c.h.bf16 %v10443_v15  ;;  %14613 = verf.f32 %v10108_v22  ;;  %v10503_v13 = vld [vmem:[%s14821_s5 + $0x5e8] sm:$0xff]  ;;  %v17811_v22 = vpop.f32.mrf.mxu1 }
 0xef3   : > { %12088 = vmatprep.subr.mxu1 %v10857_v42  ;;  %12006 = vmatpush1.msra.mxu0 %v10760_v48  ;;  %v10116_v42 = vmul.f32 0.70710677, %v17778_v63  ;;  %v10847_v48 = vunpack.c.l.bf16 %v10443_v15  ;;  %v10845_v37 = vunpack.c.h.bf16 %v10441_v31  ;;  %v17807_v6 = vcombine.high %v17788_v32, %v17788_v32  ;;  %v10437_v15 = vld [vmem:[%s14821_s5 + $0x45c] sm:$0xff] }
 0xef4   : > { %12089 = vmatpush1.msra.mxu1 %v10856_v35  ;;  %12007 = vmatprep.subr.mxu0 %v10758_v41  ;;  %v17802_v35 = vcombine.high %v17767_v53, %v17767_v53  ;;  %v10844_v41 = vunpack.c.l.bf16 %v10441_v31  ;;  %14615 = verf.f32 %v10110_v11  ;;  %v10842_v31 = vunpack.c.h.bf16 %v10439_v27 }
 0xef5   : > { %12090 = vmatprep.subr.mxu1 %v10854_v4  ;;  %12008 = vmatpush1.msra.mxu0 %v10757_v23  ;;  %v10118_v23 = vmul.f32 0.70710677, %v17788_v32  ;;  %v10941_v4 = vunpack.c.h.bf16 %v10505_v50  ;;  %14617 = verf.f32 %v10112_v29  ;;  %v10120_v11 = vmul.f32 0.70710677, %v17796_v20  ;;  %v10435_v29 = vld [vmem:[%s14821_s5 + $0x450] sm:$0xff] }
 0xef6   : > { %12091 = vmatpush1.msra.mxu1 %v10853_v24  ;;  %12009 = vmatprep.subr.mxu0 %v10755_v8  ;;  %v17814_v24 = vrot.slane %v8633_v51, %v15352_v9  ;;  %v10940_v8 = vunpack.c.l.bf16 %v10505_v50  ;;  %14619 = verf.f32 %v10116_v42  ;;  %v10114_v51 = vmul.f32 0.70710677, %v17802_v35 }
 0xef7   : > { %12092 = vmatprep.subr.mxu1 %v10851_v52  ;;  %12010 = vmatpush1.msra.mxu0 %v10754_v26  ;;  %v10841_v26 = vunpack.c.l.bf16 %v10439_v27  ;;  %v10938_v52 = vunpack.c.h.bf16 %v10503_v13  ;;  %v10937_v50 = vunpack.c.l.bf16 %v10503_v13  ;;  %14621 = verf.f32 %v10118_v23 }
 0xef8   : > { %12093 = vmatpush1.msra.mxu1 %v10850_v59  ;;  %12011 = vmatprep.subr.mxu0 %v10752_v40  ;;  %v10838_v59 = vunpack.c.l.bf16 %v10437_v15  ;;  %v10839_v40 = vunpack.c.h.bf16 %v10437_v15  ;;  %v10934_v27 = vunpack.c.l.bf16 %v10501_v57  ;;  %v10935_v42 = vunpack.c.h.bf16 %v10501_v57 }
 0xef9   : > { %12094 = vmatprep.subr.mxu1 %v10848_v46  ;;  %12012 = vmatpush1.msra.mxu0 %v10751_v56  ;;  %v10122_v56 = vmul.f32 0.70710677, %v17807_v6  ;;  %v17831_v46 = vld [vmem:[%s14821_s5 + $0x438] sm:$0xff]  ;;  %v10836_v13 = vunpack.c.h.bf16 %v10435_v29  ;;  %v10931_v15 = vunpack.c.l.bf16 %v17820_v2  ;;  %v10932_v60 = vunpack.c.h.bf16 %v17820_v2 }
 0xefa   : > { %12095 = vmatpush1.msra.mxu1 %v10847_v48  ;;  %12013 = vmatprep.subr.mxu0 %v10845_v37  ;;  %v9452_v48 = vpop.f32.mrf.mxu1  ;;  %v10835_v37 = vunpack.c.l.bf16 %v10435_v29  ;;  %14623 = verf.f32 %v10120_v11  ;;  %v10832_v57 = vunpack.c.l.bf16 %v17824_v38  ;;  %v10928_v23 = vunpack.c.l.bf16 %v17827_v21 }
 0xefb   : > { %12096 = vmatprep.subr.mxu1 %v10941_v4  ;;  %12014 = vmatpush2.msra.mxu0 %v10844_v41  ;;  %v10833_v41 = vunpack.c.h.bf16 %v17824_v38  ;;  %v17842_v4 = vld [vmem:[%s14821_s5 + $0x42c] sm:$0xff]  ;;  %14625 = verf.f32 %v10114_v51  ;;  %v10929_v2 = vunpack.c.h.bf16 %v17827_v21  ;;  %v10829_v11 = vunpack.c.l.bf16 %v17831_v46  ;;  %v17854_v38 = vld [vmem:[%s14821_s5 + $0x5a0] sm:$0xff] }
 0xefc   : > { %12097 = vmatpush2.msra.mxu1 %v10940_v8  ;;  %12015 = vmatprep.subr.mxu0 %v10842_v31  ;;  %v17845_v8 = vld [vmem:[%s14821_s5 + $0x5ac] sm:$0xff]  ;;  %v9533_v31 = vpop.f32.mrf.mxu0  ;;  %14627 = verf.f32 %v10122_v56  ;;  %v18930_v29 = vcombine.low %v17746_v16, %v17756_v34  ;;  %v10925_v51 = vunpack.c.l.bf16 %v17836_v45  ;;  %v10926_v21 = vunpack.c.h.bf16 %v17836_v45 }
 0xefd   : > { %12098 = vmatprep.subr.mxu1 %v10938_v52  ;;  %12016 = vmatpush2.msra.mxu0 %v10841_v26  ;;  %v10830_v26 = vunpack.c.h.bf16 %v17831_v46  ;;  %v17851_v52 = vld [vmem:[%s14821_s5 + $0x420] sm:$0xff]  ;;  %v17867_v46 = vpop.f32.mrf.mxu1  ;;  %v10826_v56 = vunpack.c.l.bf16 %v17842_v4  ;;  %v10827_v16 = vunpack.c.h.bf16 %v17842_v4  ;;  %v10922_v34 = vunpack.c.l.bf16 %v17845_v8 }
 0xefe   : > { %12099 = vmatpush2.msra.mxu1 %v10937_v50  ;;  %12017 = vmatprep.subr.mxu0 %v10839_v40  ;;  %v9453_v10 = vadd.f32 %v9452_v48, %v18930_v29  ;;  %v17862_v50 = vld [vmem:[%s14821_s5 + $0x414] sm:$0xff]  ;;  %18931 = vst [vmem:[#allocation34_spill] sm:$0xff] %v17867_v46  ;;  %v18932_v45 = vcombine.low %v17736_v30, %v17743_v49  ;;  %v17884_v29 = vld [vmem:[%s14821_s5 + $0x588] sm:$0xff]  ;;  %v9535_v12 = vpop.f32.mrf.mxu0  ;;  %v10920_v30 = vunpack.c.h.bf16 %v17854_v38  ;;  %v10080_v44 = vmul.f32 0.5, %v17778_v63 }
 0xeff   : > { %12100 = vmatprep.subr.mxu1 %v10935_v42  ;;  %12018 = vmatpush2.msra.mxu0 %v10838_v59  ;;  %v17865_v40 = vld [vmem:[%s14821_s5 + $0x594] sm:$0xff]  ;;  %v10923_v59 = vunpack.c.h.bf16 %v17845_v8  ;;  %v17874_v42 = vld [vmem:[%s14821_s5 + $0x408] sm:$0xff]  ;;  %v17887_v8 = vld [vmem:[%s14821_s5 + $0x3fc] sm:$0xff]  ;;  %v10821_v49 = vunpack.c.h.bf16 %v17862_v50  ;;  %v9458_v55 = vpop.f32.mrf.mxu1  ;;  %v11342_v63 = vcombine.high %v17553_v7, %v17560_v25  ;;  %v18934_v7 = vunpack.c.l.bf16 %v17862_v50 }
 0xf00   : > { %12101 = vmatpush2.msra.mxu1 %v10934_v27  ;;  %12019 = vmatprep.subr.mxu0 %v10836_v13  ;;  %v9451_v48 = vadd.f32 %v17811_v22, %v18932_v45  ;;  %v10823_v27 = vunpack.c.l.bf16 %v17851_v52  ;;  %v10824_v13 = vunpack.c.h.bf16 %v17851_v52  ;;  %v17897_v52 = vld [vmem:[%s14821_s5 + $0x3f0] sm:$0xff]  ;;  %v14614_v45 = vpop.eup %14613  ;;  %v17899_v4 = vadd.f32 %v9535_v12, %v9453_v10 }
 0xf01   : > { %12102 = vmatprep.subr.mxu1 %v10932_v60  ;;  %12020 = vmatpush2.msra.mxu0 %v10835_v37  ;;  %v17894_v37 = vld [vmem:[%s14821_s5 + $0x57c] sm:$0xff]  ;;  %v17905_v60 = vld [vmem:[%s14821_s5 + $0x570] sm:$0xff]  ;;  %v14616_v22 = vpop.eup %14615  ;;  %v10914_v10 = vunpack.c.h.bf16 %v17884_v29  ;;  %v10180_v46 = vadd.f32 1.0, %v14614_v45  ;;  %v18939_v45 = vunpack.c.h.bf16 %v17887_v8 }
 0xf02   : > { %12103 = vmatpush2.msra.mxu1 %v10931_v15  ;;  %12021 = vmatprep.subr.mxu0 %v10833_v41  ;;  %v10917_v15 = vunpack.c.h.bf16 %v17865_v40  ;;  %v9534_v41 = vadd.f32 %v9533_v31, %v9451_v48  ;;  %v10910_v17 = vunpack.c.l.bf16 %v17894_v37  ;;  %v10911_v43 = vunpack.c.h.bf16 %v17894_v37 }
 0xf03   : > { %12104 = vmatprep.subr.mxu1 %v10929_v2  ;;  %12022 = vmatpush2.msra.mxu0 %v10832_v57  ;;  %v14618_v2 = vpop.eup %14617  ;;  %v10072_v48 = vmul.f32 0.5, %v17753_v19  ;;  %v10182_v12 = vadd.f32 1.0, %v14616_v22  ;;  %v10074_v57 = vmul.f32 0.5, %v17767_v53  ;;  %v18933_v19 = vunpack.c.l.bf16 %v17854_v38 }
 0xf04   : > { %12105 = vmatpush2.msra.mxu1 %v10928_v23  ;;  %12023 = vmatprep.subr.mxu0 %v10830_v26  ;;  %v14620_v23 = vpop.eup %14619  ;;  %v9896_v31 = vcombine.low %v9534_v41, %v17899_v4  ;;  %v10184_v26 = vadd.f32 1.0, %v14618_v2  ;;  %v11344_v53 = vcombine.high %v17562_v39, %v17564_v61  ;;  %v10078_v39 = vmul.f32 0.5, %v17802_v35 }
 0xf05   : > { %12106 = vmatprep.subr.mxu1 %v10926_v21  ;;  %12024 = vmatpush2.msra.mxu0 %v10829_v11  ;;  %v9897_v11 = vcombine.high %v9534_v41, %v17899_v4  ;;  %v17924_v21 = vadd.f32 %v9458_v55, %v17814_v24  ;;  %v10188_v4 = vadd.f32 1.0, %v14620_v23  ;;  %v11340_v55 = vcombine.high %v17540_v62, %v17551_v54 }
 0xf06   : > { %12107 = vmatpush2.msra.mxu1 %v10925_v51  ;;  %12025 = vmatprep.subr.mxu0 %v10827_v16  ;;  %v10809_v51 = vunpack.c.h.bf16 %v17908_v36  ;;  %v14622_v16 = vpop.eup %14621  ;;  %v10082_v62 = vmul.f32 0.5, %v17788_v32  ;;  %v10084_v54 = vmul.f32 0.5, %v17796_v20  ;;  %v17944_v38 = vrot.slane %v9896_v31, %v15352_v9 }
 0xf07   : > { %12108 = vmatprep.subr.mxu1 %v10923_v59  ;;  %12026 = vmatpush2.msra.mxu0 %v10826_v56  ;;  %v14624_v24 = vpop.eup %14623  ;;  %v10076_v56 = vmul.f32 0.5, %v17772_v3  ;;  %v10190_v3 = vadd.f32 1.0, %v14622_v16  ;;  %v17949_v61 = vmul.f32 %v10180_v46, %v10072_v48  ;;  %v18935_v32 = vunpack.c.l.bf16 %v17865_v40  ;;  %v10415_v46 = vld [vmem:[%s14821_s5 + $0x3d8] sm:$0xff] }
 0xf08   : > { %12109 = vmatpush2.msra.mxu1 %v10922_v34  ;;  %12027 = vmatprep.subr.mxu0 %v10824_v13  ;;  %v11346_v34 = vcombine.high %v17574_v58, %v17576_v0  ;;  %v14626_v59 = vpop.eup %14625  ;;  %v17951_v58 = vmul.f32 %v10182_v12, %v10074_v57  ;;  %v17954_v0 = vrot.slane %v9897_v11, %v15352_v9  ;;  %v18936_v20 = vunpack.c.h.bf16 %v17874_v42  ;;  %v10413_v12 = vld [vmem:[%s14821_s5 + $0x3cc] sm:$0xff] }
 0xf09   : > { %12110 = vmatprep.subr.mxu1 %v10920_v30  ;;  %12028 = vmatpush2.msra.mxu0 %v10823_v27  ;;  %v14628_v25 = vpop.eup %14627  ;;  %v10481_v27 = vld [vmem:[%s14821_s5 + $0x564] sm:$0xff]  ;;  %v10192_v50 = vadd.f32 1.0, %v14624_v24  ;;  %v17961_v13 = vmul.f32 %v10184_v26, %v10076_v56  ;;  %v17963_v30 = vmul.f32 %v10188_v4, %v10080_v44  ;;  %v18937_v35 = vunpack.c.l.bf16 %v17874_v42  ;;  %v10477_v11 = vld [vmem:[%s14821_s5 + $0x54c] sm:$0xff] }
 0xf0a   : > { %12111 = vmatpush2.msra.mxu1 %v18933_v19  ;;  %12029 = vmatprep.subr.mxu0 %v10821_v49  ;;  %v17969_v49 = vrot.slane %v11340_v55, %v15352_v9  ;;  %v10086_v40 = vmul.f32 0.5, %v17807_v6  ;;  %v18938_v22 = vunpack.c.l.bf16 %v17884_v29  ;;  %v17978_v44 = vrot.slane %v11342_v63, %v15352_v9  ;;  %v10475_v24 = vld [vmem:[%s14821_s5 + $0x540] sm:$0xff] }
 0xf0b   : > { %12112 = vmatprep.subr.mxu1 %v10917_v15  ;;  %12030 = vmatpush2.msra.mxu0 %v18934_v7  ;;  %v10479_v15 = vld [vmem:[%s14821_s5 + $0x558] sm:$0xff]  ;;  %v17981_v42 = vrot.slane %v11344_v53, %v15352_v9  ;;  %v17984_v41 = vrot.slane %v11346_v34, %v15352_v9  ;;  %v18940_v6 = vunpack.c.l.bf16 %v17887_v8  ;;  %v10905_v29 = vunpack.c.h.bf16 %v10481_v27 }
 0xf0c   : > { %12113 = vmatpush2.msra.mxu1 %v18935_v32  ;;  %12031 = vmatprep.subr.mxu0 %v18936_v20  ;;  %v10186_v57 = vadd.f32 1.0, %v14626_v59  ;;  %v10194_v2 = vadd.f32 1.0, %v14628_v25  ;;  %v11203_v23 = vcombine.low %v17667_v5, %v17670_v1  ;;  %v11207_v26 = vcombine.low %v17673_v47, %v17680_v33  ;;  %v10411_v33 = vld [vmem:[%s14821_s5 + $0x3c0] sm:$0xff]  ;;  %v18029_v7 = vld [vmem:[%s14821_s5 + $0x3b0] ss:$12 sps:$4 sm:$0xff]  }
 0xf0d   : > { %12114 = vmatprep.subr.mxu1 %v10914_v10  ;;  %12032 = vmatpush2.msra.mxu0 %v18937_v35  ;;  %v17986_v10 = vmul.f32 %v10190_v3, %v10082_v62  ;;  %v18941_v31 = vunpack.c.h.bf16 %v17897_v52  ;;  %v10806_v8 = vunpack.c.h.bf16 %v10415_v46  ;;  %v18002_v16 = vmul.f32 %v10192_v50, %v10084_v54  ;;  %v10537_v62 = vld [vmem:[%s14821_s5 + $0x6b4] sm:$0xff]  ;;  %v18026_v3 = vld [vmem:[%s14821_s5 + $0x470] ss:$12 sps:$4 sm:$0xff]   ;;  %v10535_v50 = vld [vmem:[%s14821_s5 + $0x6a8] sm:$0xff] }
 0xf0e   : > { %12115 = vmatpush2.msra.mxu1 %v18938_v22  ;;  %12033 = vmatprep.subr.mxu0 %v18939_v45  ;;  %v18942_v48 = vunpack.c.h.bf16 %v17905_v60  ;;  %v18943_v5 = vunpack.c.l.bf16 %v17897_v52  ;;  %v10805_v1 = vunpack.c.l.bf16 %v10415_v46  ;;  %v10902_v47 = vunpack.c.h.bf16 %v10479_v15  ;;  %v9539_v46 = vpop.f32.mrf.mxu0 }
 0xf0f   : > { %12116 = vmatprep.subr.mxu1 %v10911_v43  ;;  %12034 = vmatpush2.msra.mxu0 %v18940_v6  ;;  %v10904_v43 = vunpack.c.l.bf16 %v10481_v27  ;;  %v18944_v37 = vunpack.c.l.bf16 %v17905_v60  ;;  %v10901_v4 = vunpack.c.l.bf16 %v10479_v15  ;;  %v10803_v55 = vunpack.c.h.bf16 %v10413_v12 }
 0xf10   : > { %12117 = vmatpush2.msra.mxu1 %v10910_v17  ;;  %12035 = vmatprep.subr.mxu0 %v18941_v31  ;;  %v11542_v17 = vcombine.high %v17628_v14, %v17637_v18  ;;  %v11406_v52 = vcombine.high %v17969_v49, %v17978_v44  ;;  %v11410_v56 = vcombine.high %v17981_v42, %v17984_v41  ;;  %v18945_v19 = vunpack.c.l.bf16 %v17908_v36  ;;  %v10533_v31 = vld [vmem:[%s14821_s5 + $0x69c] sm:$0xff] }
 0xf11   : > { %12118 = vmatprep.subr.mxu1 %v18942_v48  ;;  %12036 = vmatpush2.msra.mxu0 %v18943_v5  ;;  %v10802_v14 = vunpack.c.l.bf16 %v10413_v12  ;;  %v10899_v18 = vunpack.c.h.bf16 %v10477_v11  ;;  %v10222_v60 = vmul.f32 %v10186_v57, %v10078_v39  ;;  %v10898_v63 = vunpack.c.l.bf16 %v10477_v11 }
 0xf12   : > { %12119 = vmatpush2.msra.mxu1 %v18944_v37  ;;  %12037 = vmatprep.subr.mxu0 %v10809_v51  ;;  %v10230_v51 = vmul.f32 %v10194_v2, %v10086_v40  ;;  %v10800_v53 = vunpack.c.h.bf16 %v10411_v33  ;;  %v11222_v34 = vrot.slane %v11203_v23, %v15352_v9  ;;  %v11250_v59 = vrot.slane %v11207_v26, %v15352_v9  ;;  %v10531_v37 = vld [vmem:[%s14821_s5 + $0x690] sm:$0xff] }
 0xf13   : > { %12120 = vmatprep.subr.mxu1 %v10905_v29  ;;  %12038 = vmatpush2.msra.mxu0 %v18945_v19  ;;  %v10799_v36 = vunpack.c.l.bf16 %v10411_v33  ;;  %v10896_v54 = vunpack.c.h.bf16 %v10475_v24  ;;  %v11405_v25 = vcombine.low %v17969_v49, %v17978_v44  ;;  %v18034_v39 = vrot.slane %v11542_v17, %v15352_v9  ;;  %v10406_v17 = vld [vmem:[%s14821_s5 + $0x398] ss:$12 sps:$4 sm:$0xff]  }
 0xf14   : > { %12121 = vmatpush2.msra.mxu1 %v10904_v43  ;;  %12039 = vmatprep.subr.mxu0 %v10806_v8  ;;  %v10895_v32 = vunpack.c.l.bf16 %v10475_v24  ;;  %v11438_v20 = vrot.slane %v11406_v52, %v15352_v9  ;;  %v11466_v27 = vrot.slane %v11410_v56, %v15352_v9  ;;  %v11409_v35 = vcombine.low %v17981_v42, %v17984_v41  ;;  %v9541_v43 = vpop.f32.mrf.mxu0 }
 0xf15   : > { %12122 = vmatprep.subr.mxu1 %v10902_v47  ;;  %12040 = vmatpush2.msra.mxu0 %v10805_v1  ;;  %v10988_v40 = vunpack.c.l.bf16 %v10537_v62  ;;  %v10989_v22 = vunpack.c.h.bf16 %v10537_v62  ;;  %v11274_v49 = vcombine.low %v17961_v13, %v10222_v60  ;;  %v11276_v45 = vcombine.low %v18002_v16, %v10230_v51  ;;  %v18947_v16 = vld [vmem:[#allocation34_spill] sm:$0xff] }
 0xf16   : > { %12123 = vmatpush2.msra.mxu1 %v10901_v4  ;;  %12041 = vmatprep.subr.mxu0 %v10803_v55  ;;  %v18043_v15 = vcombine.low %v11222_v34, %v11250_v59  ;;  %v18045_v44 = vcombine.high %v11222_v34, %v11250_v59  ;;  %v10846_v6 = vunpack.c.h.bf16 %v18026_v3  ;;  %v10798_v42 = vunpack.c.h.bf16 %v18029_v7  ;;  %v10529_v34 = vld [vmem:[%s14821_s5 + $0x684] sm:$0xff] }
 0xf17   : > { %12124 = vmatprep.subr.mxu1 %v10899_v18  ;;  %12042 = vmatpush2.msra.mxu0 %v10802_v14  ;;  %v10985_v41 = vunpack.c.l.bf16 %v10535_v50  ;;  %v11558_v13 = vcombine.high %v18034_v39, %v18034_v39  ;;  %v11273_v29 = vcombine.low %v17949_v61, %v17951_v58  ;;  %v11275_v12 = vcombine.low %v17963_v30, %v17986_v10  ;;  %v10438_v30 = vld [vmem:[%s14821_s5 + $0x458] ss:$12 sps:$4 sm:$0xff]  }
 0xf18   : > { %12125 = vmatpush2.msra.mxu1 %v10898_v63  ;;  %12043 = vmatprep.subr.mxu0 %v10800_v53  ;;  %v18056_v57 = vcombine.low %v11438_v20, %v11466_v27  ;;  %v10986_v2 = vunpack.c.h.bf16 %v10535_v50  ;;  %v11424_v23 = vrot.slane %v11405_v25, %v15352_v9  ;;  %v11452_v26 = vrot.slane %v11409_v35, %v15352_v9  ;;  %v10527_v35 = vld [vmem:[%s14821_s5 + $0x678] sm:$0xff] }
 0xf19   : > { %12126 = vmatprep.subr.mxu1 %v10896_v54  ;;  %12044 = vmatpush2.msra.mxu0 %v10799_v36  ;;  %v18062_v61 = vcombine.high %v11438_v20, %v11466_v27  ;;  %v10843_v58 = vunpack.c.l.bf16 %v18026_v3  ;;  %v18067_v10 = vrot.slane %v11274_v49, %v15352_v9  ;;  %v18070_v8 = vrot.slane %v11276_v45, %v15352_v9  ;;  %v10434_v54 = vld [vmem:[%s14821_s5 + $0x440] ss:$12 sps:$4 sm:$0xff]  }
 0xf1a   : > { %12127 = vmatpush2.msra.mxu1 %v10895_v32  ;;  %12046 = vmatmul.mubr.f32.vlgmr.msra.gmra.mxu0 %v18043_v15  ;;  %v18946_v11 = vrot.slane %v17760_v28, %v15352_v9  ;;  %v18077_v5 = vadd.f32 %v9541_v43, %v17924_v21  ;;  %v10795_v1 = vunpack.c.l.bf16 %v18029_v7  ;;  %v10983_v47 = vunpack.c.h.bf16 %v10533_v31  ;;  %v10402_v32 = vld [vmem:[%s14821_s5 + $0x380] ss:$12 sps:$4 sm:$0xff]  }
 0xf1b   : > { %12129 = vmatmul.mubr.f32.vlgmr.msra.gmra.mxu1 %v18045_v44  ;;  %12147 = vmatprep.subr.mxu0 %v10989_v22  ;;  %v18083_v33 = vrot.slane %v11558_v13, %v15352_v9  ;;  %v18088_v28 = vrot.slane %v11273_v29, %v15352_v9  ;;  %v18091_v21 = vrot.slane %v11275_v12, %v15352_v9  ;;  %v10840_v52 = vunpack.c.h.bf16 %v10438_v30  ;;  %v10430_v29 = vld [vmem:[%s14821_s5 + $0x428] ss:$12 sps:$4 sm:$0xff]   ;;  %v10523_v43 = vld [vmem:[%s14821_s5 + $0x660] sm:$0xff] }
 0xf1c   : > { %v9457_v48 = vadd.f32 %v18947_v16, %v18946_v11  ;;  %14187 = vmatprep.subr.mxu1 %v10846_v6  ;;  %12051 = vmatprep.mubr.f32.mxu0 %v18056_v57  ;;  %v9912_v4 = vcombine.high %v17944_v38, %v17944_v38  ;;  %v9913_v55 = vcombine.high %v17954_v0, %v17954_v0  ;;  %v10982_v19 = vunpack.c.l.bf16 %v10533_v31  ;;  %v10398_v31 = vld [vmem:[%s14821_s5 + $0x368] ss:$12 sps:$4 sm:$0xff]  }
 0xf1d   : > { %12134 = vmatprep.mubr.f32.mxu1 %v18062_v61  ;;  %12148 = vmatpush1.msra.mxu0 %v10988_v40  ;;  %v18097_v24 = vcombine.low %v11424_v23, %v11452_v26  ;;  %v18099_v56 = vcombine.high %v11424_v23, %v11452_v26  ;;  %v11306_v14 = vcombine.high %v18088_v28, %v18067_v10  ;;  %v10792_v63 = vunpack.c.h.bf16 %v10406_v17 }
 0xf1e   : > { %14188 = vmatpush3.msra.mxu1 %v10798_v42  ;;  %12149 = vmatprep.subr.mxu0 %v10986_v2  ;;  %v11308_v18 = vcombine.high %v18091_v21, %v18070_v8  ;;  %v18107_v60 = vrot.slane %v17944_v38, %v15352_v9  ;;  %v9540_v51 = vadd.f32 %v9539_v46, %v9457_v48  ;;  %v10980_v53 = vunpack.c.h.bf16 %v10531_v37  ;;  %v10525_v42 = vld [vmem:[%s14821_s5 + $0x66c] sm:$0xff] }
 0xf1f   : > { %14189 = vmatprep.subr.mxu1 %v10843_v58  ;;  %12150 = vmatpush1.msra.mxu0 %v10985_v41  ;;  %v18114_v59 = vcombine.high %v18083_v33, %v18083_v33  ;;  %v10979_v62 = vunpack.c.l.bf16 %v10531_v37  ;;  %v10837_v36 = vunpack.c.l.bf16 %v10438_v30  ;;  %v18118_v38 = vrot.slane %v18034_v39, %v15352_v9  ;;  %v18948_v37 = vld [vmem:[#allocation23_spill] sm:$0xff] }
 0xf20   : > { %14190 = vmatpush3.msra.mxu1 %v10795_v1  ;;  %12052 = vmatmul.mubr.f32.gmra.mxu0 %v18097_v24  ;;  %v18122_v3 = vrot.slane %v9912_v4, %v15352_v9  ;;  %v10012_v7 = vcombine.low %v9540_v51, %v18077_v5  ;;  %v10789_v25 = vunpack.c.l.bf16 %v10406_v17  ;;  %v18128_v20 = vrot.slane %v9913_v55, %v15352_v9 }
 0xf21   : > { %12135 = vmatmul.mubr.f32.gmra.mxu1 %v18099_v56  ;;  %12151 = vmatprep.subr.mxu0 %v10983_v47  ;;  %v10977_v39 = vunpack.c.h.bf16 %v10529_v34  ;;  %v11322_v27 = vrot.slane %v11306_v14, %v15352_v9  ;;  %v11336_v50 = vrot.slane %v11308_v18, %v15352_v9  ;;  %v10976_v46 = vunpack.c.l.bf16 %v10529_v34  ;;  %v10521_v47 = vld [vmem:[%s14821_s5 + $0x654] sm:$0xff] }
 0xf22   : > { %14191 = vmatprep.subr.mxu1 %v10840_v52  ;;  %12057 = vmatprep.mubr.f32.mxu0 %v18083_v33  ;;  %v10834_v40 = vunpack.c.h.bf16 %v10434_v54  ;;  %v18136_v22 = vrot.slane %v17954_v0, %v15352_v9  ;;  %v18140_v49 = vcombine.high %v18107_v60, %v18107_v60  ;;  %v18144_v45 = vcombine.high %v18118_v38, %v18118_v38  ;;  %v10426_v52 = vld [vmem:[%s14821_s5 + $0x410] ss:$12 sps:$4 sm:$0xff]  }
 0xf23   : > { %12140 = vmatprep.mubr.f32.mxu1 %v18114_v59  ;;  %12152 = vmatpush1.msra.mxu0 %v10982_v19  ;;  %v10786_v6 = vunpack.c.h.bf16 %v10402_v32  ;;  %v18149_v41 = vcombine.high %v18122_v3, %v18122_v3  ;;  %v18152_v0 = vrot.slane %v10012_v7, %v15352_v9  ;;  %v10974_v13 = vunpack.c.h.bf16 %v10527_v35 }
 0xf24   : > { %14192 = vmatpush3.msra.mxu1 %v10792_v63  ;;  %12153 = vmatprep.subr.mxu0 %v10980_v53  ;;  %v18158_v12 = vcombine.high %v18128_v20, %v18128_v20  ;;  %v18161_v2 = vcombine.low %v11322_v27, %v11336_v50  ;;  %v10973_v23 = vunpack.c.l.bf16 %v10527_v35  ;;  %v10831_v26 = vunpack.c.l.bf16 %v10434_v54  ;;  %v10394_v63 = vld [vmem:[%s14821_s5 + $0x350] ss:$12 sps:$4 sm:$0xff]   ;;  %v10519_v53 = vld [vmem:[%s14821_s5 + $0x648] sm:$0xff]  ;;  %v10422_v35 = vld [vmem:[%s14821_s5 + $0x3f8] ss:$12 sps:$4 sm:$0xff]  }
 0xf25   : > { %14193 = vmatprep.subr.mxu1 %v10837_v36  ;;  %12154 = vmatpush1.msra.mxu0 %v10979_v62  ;;  %v10126_v58 = vmul.f32 0.70710677, %v18122_v3  ;;  %v10783_v30 = vunpack.c.l.bf16 %v10402_v32  ;;  %v10971_v11 = vunpack.c.h.bf16 %v10525_v42  ;;  %v18168_v16 = vcombine.high %v18136_v22, %v18136_v22  ;;  %v10517_v32 = vld [vmem:[%s14821_s5 + $0x63c] sm:$0xff] }
 0xf26   : > { %14194 = vmatpush3.msra.mxu1 %v10789_v25  ;;  %12058 = vmatmul.mubr.f32.gmra.mxu0 %v18118_v38  ;;  %v10128_v48 = vmul.f32 0.70710677, %v18140_v49  ;;  %v10970_v5 = vunpack.c.l.bf16 %v10525_v42  ;;  %v10828_v1 = vunpack.c.h.bf16 %v10430_v29  ;;  %v10130_v17 = vmul.f32 0.70710677, %v18149_v41  ;;  %v10390_v42 = vld [vmem:[%s14821_s5 + $0x338] ss:$12 sps:$4 sm:$0xff]  }
 0xf27   : > { %12141 = vmatmul.mubr.f32.gmra.mxu1 %v18144_v45  ;;  %12155 = vmatprep.subr.mxu0 %v10977_v39  ;;  %v10780_v4 = vunpack.c.h.bf16 %v10398_v31  ;;  %v10968_v55 = vunpack.c.h.bf16 %v10523_v43  ;;  %v10138_v19 = vmul.f32 0.70710677, %v18158_v12  ;;  %v10020_v14 = vcombine.high %v18152_v0, %v18152_v0 }
 0xf28   : > { %14195 = vmatprep.subr.mxu1 %v10834_v40  ;;  %12156 = vmatpush1.msra.mxu0 %v10976_v46  ;;  %v10967_v18 = vunpack.c.l.bf16 %v10523_v43  ;;  %v10825_v51 = vunpack.c.l.bf16 %v10430_v29  ;;  %v10134_v34 = vmul.f32 0.70710677, %v18128_v20  ;;  %14629 = verf.f32 %v10126_v58  ;;  %v10513_v58 = vld [vmem:[%s14821_s5 + $0x624] sm:$0xff] }
 0xf29   : > { %13856 = vmatprep.mubr.msk.f32.mxu0 %vm11808_vm13, %v18161_v2  ;;  %14196 = vmatpush3.msra.mxu1 %v10786_v6  ;;  %v10777_v62 = vunpack.c.l.bf16 %v10398_v31  ;;  %v10965_v36 = vunpack.c.h.bf16 %v10521_v47  ;;  %v10136_v54 = vmul.f32 0.70710677, %v18168_v16  ;;  %14631 = verf.f32 %v10128_v48 }
 0xf2a   : > { %12454 = vmatprep.mubr.f32.mxu1 %v18948_v37  ;;  %12157 = vmatprep.subr.mxu0 %v10974_v13  ;;  %v10964_v7 = vunpack.c.l.bf16 %v10521_v47  ;;  %v10822_v25 = vunpack.c.h.bf16 %v10426_v52  ;;  %v10124_v39 = vmul.f32 0.70710677, %v18107_v60  ;;  %14633 = verf.f32 %v10130_v17  ;;  %v10515_v13 = vld [vmem:[%s14821_s5 + $0x630] sm:$0xff]  ;;  %v10386_v17 = vld [vmem:[%s14821_s5 + $0x320] ss:$12 sps:$4 sm:$0xff]   ;;  %v10511_v37 = vld [vmem:[%s14821_s5 + $0x618] sm:$0xff] }
 0xf2b   : > { %14197 = vmatprep.subr.mxu1 %v10831_v26  ;;  %12158 = vmatpush1.msra.mxu0 %v10973_v23  ;;  %v10774_v27 = vunpack.c.h.bf16 %v10394_v63  ;;  %v10962_v50 = vunpack.c.h.bf16 %v10519_v53  ;;  %v10132_v46 = vmul.f32 0.70710677, %v18136_v22  ;;  %14635 = verf.f32 %v10138_v19 }
 0xf2c   : > { %14198 = vmatpush3.msra.mxu1 %v10783_v30  ;;  %12159 = vmatprep.subr.mxu0 %v10971_v11  ;;  %v10961_v40 = vunpack.c.l.bf16 %v10519_v53  ;;  %v10819_v6 = vunpack.c.l.bf16 %v10426_v52  ;;  %14637 = verf.f32 %v10134_v34  ;;  %v18191_v29 = vrot.slane %v10020_v14, %v15352_v9  ;;  %v10509_v14 = vld [vmem:[%s14821_s5 + $0x60c] sm:$0xff]  ;;  %v10414_v53 = vld [vmem:[%s14821_s5 + $0x3c8] ss:$12 sps:$4 sm:$0xff]  }
 0xf2d   : > { %14199 = vmatprep.subr.mxu1 %v10828_v1  ;;  %12160 = vmatpush1.msra.mxu0 %v10970_v5  ;;  %v10771_v23 = vunpack.c.l.bf16 %v10394_v63  ;;  %v10959_v26 = vunpack.c.h.bf16 %v10517_v32  ;;  %14639 = verf.f32 %v10136_v54  ;;  %v10958_v31 = vunpack.c.l.bf16 %v10517_v32  ;;  %v10418_v5 = vld [vmem:[%s14821_s5 + $0x3e0] ss:$12 sps:$4 sm:$0xff]  }
 0xf2e   : > { %14200 = vmatpush3.msra.mxu1 %v10780_v4  ;;  %12161 = vmatprep.subr.mxu0 %v10968_v55  ;;  %v10816_v43 = vunpack.c.h.bf16 %v10422_v35  ;;  %14641 = verf.f32 %v10124_v39  ;;  %v18196_v30 = vrot.slane %v18152_v0, %v15352_v9  ;;  %v10768_v11 = vunpack.c.h.bf16 %v10390_v42  ;;  %v10507_v54 = vld [vmem:[%s14821_s5 + $0x600] sm:$0xff] }
 0xf2f   : > { %14201 = vmatprep.subr.mxu1 %v10825_v51  ;;  %12162 = vmatpush1.msra.mxu0 %v10967_v18  ;;  %v10956_v48 = vunpack.c.h.bf16 %v10515_v13  ;;  %14643 = verf.f32 %v10132_v46  ;;  %v10955_v1 = vunpack.c.l.bf16 %v10515_v13  ;;  %v10813_v47 = vunpack.c.l.bf16 %v10422_v35 }
 0xf30   : > { %14202 = vmatpush3.msra.mxu1 %v10777_v62  ;;  %12163 = vmatprep.subr.mxu0 %v10965_v36  ;;  %v10142_v4 = vmul.f32 0.70710677, %v18191_v29  ;;  %v10765_v0 = vunpack.c.l.bf16 %v10390_v42  ;;  %v10953_v55 = vunpack.c.h.bf16 %v10513_v58  ;;  %v10952_v52 = vunpack.c.l.bf16 %v10513_v58  ;;  %v10382_v36 = vld [vmem:[%s14821_s5 + $0x308] ss:$12 sps:$4 sm:$0xff]   ;;  %v10555_v58 = vld [vmem:[%s14821_s5 + $0x720] sm:$0xff] }
 0xf31   : > { %14203 = vmatprep.subr.mxu1 %v10822_v25  ;;  %12164 = vmatpush1.msra.mxu0 %v10964_v7  ;;  %v10810_v19 = vunpack.c.h.bf16 %v10418_v5  ;;  %v10140_v18 = vmul.f32 0.70710677, %v18196_v30  ;;  %v10762_v51 = vunpack.c.h.bf16 %v10386_v17  ;;  %v10950_v63 = vunpack.c.h.bf16 %v10511_v37 }
 0xf32   : > { %14204 = vmatpush3.msra.mxu1 %v10774_v27  ;;  %12165 = vmatprep.subr.mxu0 %v10962_v50  ;;  %v10949_v34 = vunpack.c.l.bf16 %v10511_v37  ;;  %v10807_v62 = vunpack.c.l.bf16 %v10418_v5  ;;  %14645 = verf.f32 %v10142_v4  ;;  %v10759_v7 = vunpack.c.l.bf16 %v10386_v17  ;;  %v10557_v50 = vld [vmem:[%s14821_s5 + $0x72c] sm:$0xff]  ;;  %v10553_v37 = vld [vmem:[%s14821_s5 + $0x714] sm:$0xff] }
 0xf33   : > { %14205 = vmatprep.subr.mxu1 %v10819_v6  ;;  %12166 = vmatpush1.msra.mxu0 %v10961_v40  ;;  %v10947_v25 = vunpack.c.h.bf16 %v10509_v14  ;;  %v10946_v39 = vunpack.c.l.bf16 %v10509_v14  ;;  %v10804_v27 = vunpack.c.h.bf16 %v10414_v53  ;;  %14647 = verf.f32 %v10140_v18 }
 0xf34   : > { %14206 = vmatpush3.msra.mxu1 %v10771_v23  ;;  %12167 = vmatprep.subr.mxu0 %v10959_v26  ;;  %v10756_v46 = vunpack.c.h.bf16 %v10382_v36  ;;  %v10944_v40 = vunpack.c.h.bf16 %v10507_v54  ;;  %v10943_v42 = vunpack.c.l.bf16 %v10507_v54  ;;  %v10801_v13 = vunpack.c.l.bf16 %v10414_v53  ;;  %v10551_v54 = vld [vmem:[%s14821_s5 + $0x708] sm:$0xff] }
 0xf35   : > { %14207 = vmatprep.subr.mxu1 %v10816_v43  ;;  %12168 = vmatpush1.msra.mxu0 %v10958_v31  ;;  %v14630_v32 = vpop.eup %14629  ;;  %v10753_v26 = vunpack.c.l.bf16 %v10382_v36  ;;  %v11019_v31 = vunpack.c.h.bf16 %v10557_v50  ;;  %v10538_v43 = vld [vmem:[%s14821_s5 + $0x6b0] ss:$12 sps:$4 sm:$0xff]   ;;  %v10088_v5 = vmul.f32 0.5, %v18107_v60  ;;  %v11018_v17 = vunpack.c.l.bf16 %v10557_v50  ;;  %v10534_v36 = vld [vmem:[%s14821_s5 + $0x698] ss:$12 sps:$4 sm:$0xff]  }
 0xf36   : > { %14208 = vmatpush3.msra.mxu1 %v10768_v11  ;;  %12169 = vmatprep.subr.mxu0 %v10956_v48  ;;  %v14632_v35 = vpop.eup %14631  ;;  %v10102_v60 = vmul.f32 0.5, %v18158_v12  ;;  %v10198_v18 = vadd.f32 1.0, %v14630_v32  ;;  %v18949_v53 = vmov 0.0   ;;  %v10098_v12 = vmul.f32 0.5, %v18128_v20 }
 0xf37   : > { %14209 = vmatprep.subr.mxu1 %v10813_v47  ;;  %12170 = vmatpush1.msra.mxu0 %v10955_v1  ;;  %v14634_v6 = vpop.eup %14633  ;;  %v10090_v1 = vmul.f32 0.5, %v18122_v3  ;;  %v10094_v47 = vmul.f32 0.5, %v18149_v41  ;;  %v10200_v3 = vadd.f32 1.0, %v14632_v35  ;;  %v11015_v41 = vunpack.c.l.bf16 %v10555_v58 }
 0xf38   : > { %14210 = vmatpush3.msra.mxu1 %v10765_v0  ;;  %12171 = vmatprep.subr.mxu0 %v10953_v55  ;;  %v14636_v23 = vpop.eup %14635  ;;  %v10990_v0 = vunpack.c.h.bf16 %v10538_v43  ;;  %v11016_v55 = vunpack.c.h.bf16 %v10555_v58  ;;  %v10984_v20 = vunpack.c.h.bf16 %v10534_v36 }
 0xf39   : > { %14211 = vmatprep.subr.mxu1 %v10810_v19  ;;  %12172 = vmatpush1.msra.mxu0 %v10952_v52  ;;  %v14638_v11 = vpop.eup %14637  ;;  %v10202_v52 = vadd.f32 1.0, %v14634_v6  ;;  %v10210_v19 = vadd.f32 1.0, %v14636_v23  ;;  %v10530_v23 = vld [vmem:[%s14821_s5 + $0x680] ss:$12 sps:$4 sm:$0xff]  }
 0xf3a   : > { %14212 = vmatpush3.msra.mxu1 %v10762_v51  ;;  %12173 = vmatprep.subr.mxu0 %v10950_v63  ;;  %v14640_v48 = vpop.eup %14639  ;;  %v10206_v51 = vadd.f32 1.0, %v14638_v11 }
 0xf3b   : > { %14213 = vmatprep.subr.mxu1 %v10807_v62  ;;  %12174 = vmatpush1.msra.mxu0 %v10949_v34  ;;  %v14642_v4 = vpop.eup %14641  ;;  %v10208_v63 = vadd.f32 1.0, %v14640_v48  ;;  %v10987_v34 = vunpack.c.l.bf16 %v10538_v43  ;;  %v11013_v62 = vunpack.c.h.bf16 %v10553_v37  ;;  %v10238_v50 = vmul.f32 %v10202_v52, %v10094_v47  ;;  %v10547_v43 = vld [vmem:[%s14821_s5 + $0x6f0] sm:$0xff] }
 0xf3c   : > { %14214 = vmatpush3.msra.mxu1 %v10759_v7  ;;  %12175 = vmatprep.subr.mxu0 %v10947_v25  ;;  %v14644_v14 = vpop.eup %14643  ;;  %v10092_v7 = vmul.f32 0.5, %v18140_v49  ;;  %v10100_v25 = vmul.f32 0.5, %v18168_v16  ;;  %v10196_v32 = vadd.f32 1.0, %v14642_v4  ;;  %v10246_v35 = vmul.f32 %v10210_v19, %v10102_v60  ;;  %v10543_v60 = vld [vmem:[%s14821_s5 + $0x6d8] sm:$0xff] }
 0xf3d   : > { %14215 = vmatprep.subr.mxu1 %v10804_v27  ;;  %12176 = vmatpush1.msra.mxu0 %v10946_v39  ;;  %v10204_v39 = vadd.f32 1.0, %v14644_v14  ;;  %v10549_v27 = vld [vmem:[%s14821_s5 + $0x6fc] sm:$0xff]  ;;  %v11010_v49 = vunpack.c.h.bf16 %v10551_v54  ;;  %v11003_v19 = vunpack.c.l.bf16 %v10547_v43  ;;  %v10526_v14 = vld [vmem:[%s14821_s5 + $0x668] ss:$12 sps:$4 sm:$0xff]  }
 0xf3e   : > { %14216 = vmatpush3.msra.mxu1 %v10756_v46  ;;  %12177 = vmatprep.subr.mxu0 %v10944_v40  ;;  %v10096_v46 = vmul.f32 0.5, %v18136_v22  ;;  %v10234_v40 = vmul.f32 %v10198_v18, %v10090_v1  ;;  %v10236_v6 = vmul.f32 %v10200_v3, %v10092_v7  ;;  %v10981_v22 = vunpack.c.l.bf16 %v10534_v36 }
 0xf3f   : > { %14217 = vmatprep.subr.mxu1 %v10801_v13  ;;  %12178 = vmatpush1.msra.mxu0 %v10943_v42  ;;  %v14646_v16 = vpop.eup %14645  ;;  %v10244_v42 = vmul.f32 %v10208_v63, %v10100_v25  ;;  %v11009_v13 = vunpack.c.l.bf16 %v10551_v54  ;;  %v10975_v18 = vunpack.c.l.bf16 %v10530_v23  ;;  %v11307_v63 = vcombine.low %v18091_v21, %v18070_v8  ;;  %v10539_v21 = vld [vmem:[%s14821_s5 + $0x6c0] sm:$0xff] }
 0xf40   : > { %14218 = vmatpush3.msra.mxu1 %v10753_v26  ;;  %12191 = vmatprep.subr.mxu0 %v11019_v31  ;;  %v10232_v26 = vmul.f32 %v10196_v32, %v10088_v5  ;;  %v11007_v31 = vunpack.c.h.bf16 %v10549_v27  ;;  %v14648_v58 = vpop.eup %14647  ;;  %v10240_v11 = vmul.f32 %v10204_v39, %v10096_v46  ;;  %v11476_v48 = vcombine.low %v10236_v6, %v10238_v50 }
 0xf41   : > { %12455 = vmatmul.mubr.f32.vlgmr.msra.gmra.mxu1 %v18043_v15  ;;  %12550 = vmatprep.subr.mxu1 %v18949_v53  ;;  %v11012_v15 = vunpack.c.l.bf16 %v10553_v37  ;;  %v11478_v1 = vcombine.low %v10244_v42, %v10246_v35  ;;  %v10214_v47 = vadd.f32 1.0, %v14646_v16  ;;  %v11006_v5 = vunpack.c.l.bf16 %v10549_v27 }
 0xf42   : > { %12192 = vmatpush2.msra.mxu0 %v11018_v17  ;;  %12459 = vmatprep.mubr.f32.mxu1 %v18056_v57  ;;  %v10242_v57 = vmul.f32 %v10206_v51, %v10098_v12  ;;  %v10545_v17 = vld [vmem:[%s14821_s5 + $0x6e4] sm:$0xff]  ;;  %v11004_v37 = vunpack.c.h.bf16 %v10547_v43  ;;  %v11475_v4 = vcombine.low %v10232_v26, %v10234_v40  ;;  %v10212_v52 = vadd.f32 1.0, %v14648_v58  ;;  %v10280_v26 = vld [vmem:[%s14821_s5 + $0xb0] ss:$1416 sps:$4 sm:$0xff]  }
 0xf43   : > { %12551 = vmatpush1.msra.mxu1 %v10990_v0  ;;  %12193 = vmatprep.subr.mxu0 %v11016_v55  ;;  %v10104_v55 = vmul.f32 0.5, %v18196_v30  ;;  %v11001_v3 = vunpack.c.h.bf16 %v10545_v17  ;;  %v18243_v30 = vrot.slane %v11478_v1, %v15352_v9  ;;  %v11305_v51 = vcombine.low %v18088_v28, %v18067_v10  ;;  %v10522_v28 = vld [vmem:[%s14821_s5 + $0x650] ss:$12 sps:$4 sm:$0xff]  }
 0xf44   : > { %12552 = vmatprep.subr.mxu1 %v18949_v53  ;;  %12194 = vmatpush2.msra.mxu0 %v11015_v41  ;;  %v11477_v0 = vcombine.low %v10240_v11, %v10242_v57  ;;  %v18240_v41 = vrot.slane %v11476_v48, %v15352_v9  ;;  %v10998_v36 = vunpack.c.h.bf16 %v10543_v60  ;;  %v11485_v54 = vrot.slane %v11475_v4, %v15352_v9  ;;  %v10314_v40 = vld [vmem:[%s14821_s5 + $0x17c] ss:$1224 sps:$4 sm:$0xff]  }
 0xf45   : > { %12553 = vmatpush1.msra.mxu1 %v10987_v34  ;;  %12195 = vmatprep.subr.mxu0 %v11013_v62  ;;  %v10541_v34 = vld [vmem:[%s14821_s5 + $0x6cc] sm:$0xff]  ;;  %v10972_v62 = vunpack.c.h.bf16 %v10526_v14  ;;  %v10248_v10 = vmul.f32 %v10212_v52, %v10104_v55  ;;  %v10997_v8 = vunpack.c.l.bf16 %v10543_v60  ;;  %v10969_v12 = vunpack.c.l.bf16 %v10526_v14  ;;  %v10276_v55 = vld [vmem:[%s14821_s5 + $0x98] ss:$1416 sps:$4 sm:$0xff]  }
 0xf46   : > { %12460 = vmatmul.mubr.f32.gmra.mxu1 %v18097_v24  ;;  %12554 = vmatprep.subr.mxu1 %v18949_v53  ;;  %v10978_v24 = vunpack.c.h.bf16 %v10530_v23  ;;  %v11499_v7 = vrot.slane %v11477_v0, %v15352_v9  ;;  %v10995_v25 = vunpack.c.h.bf16 %v10541_v34  ;;  %v10994_v39 = vunpack.c.l.bf16 %v10541_v34  ;;  %v10306_v60 = vld [vmem:[%s14821_s5 + $0x14c] ss:$1224 sps:$4 sm:$0xff]  }
 0xf47   : > { %12196 = vmatpush2.msra.mxu0 %v11012_v15  ;;  %12464 = vmatprep.mubr.f32.mxu1 %v18083_v33  ;;  %v10106_v33 = vmul.f32 0.5, %v18191_v29  ;;  %v10966_v27 = vunpack.c.h.bf16 %v10522_v28  ;;  %v10992_v50 = vunpack.c.h.bf16 %v10539_v21  ;;  %v11315_v35 = vrot.slane %v11305_v51, %v15352_v9  ;;  %v10272_v51 = vld [vmem:[%s14821_s5 + $0x80] ss:$1416 sps:$4 sm:$0xff]  }
 0xf48   : > { %12555 = vmatpush1.msra.mxu1 %v10984_v20  ;;  %12197 = vmatprep.subr.mxu0 %v11010_v49  ;;  %v11510_v32 = vcombine.high %v11499_v7, %v18243_v30  ;;  %v11329_v46 = vrot.slane %v11307_v63, %v15352_v9  ;;  %v10991_v20 = vunpack.c.l.bf16 %v10539_v21  ;;  %v10282_v49 = vld [vmem:[%s14821_s5 + $0xbc] ss:$180 sps:$4 sm:$0xff]   ;;  %v11507_v16 = vcombine.low %v11485_v54, %v18240_v41  ;;  %v10302_v34 = vld [vmem:[%s14821_s5 + $0x128] ss:$12 sps:$4 sm:$0xff]  }
 0xf49   : > { %12556 = vmatprep.subr.mxu1 %v18949_v53  ;;  %12198 = vmatpush2.msra.mxu0 %v11009_v13  ;;  %v10250_v29 = vmul.f32 %v10214_v47, %v10106_v33  ;;  %v11509_v6 = vcombine.low %v11499_v7, %v18243_v30  ;;  %v10963_v57 = vunpack.c.l.bf16 %v10522_v28  ;;  %v10654_v23 = vunpack.c.l.bf16 %v10314_v40  ;;  %v10310_v47 = vld [vmem:[%s14821_s5 + $0x164] ss:$1224 sps:$4 sm:$0xff]   ;;  %v18950_v21 = vld [vmem:[#allocation25_spill] sm:$0xff] }
 0xf4a   : > { %12557 = vmatpush1.msra.mxu1 %v10981_v22  ;;  %12199 = vmatprep.subr.mxu0 %v11007_v31  ;;  %v11538_v13 = vrot.slane %v11510_v32, %v15352_v9  ;;  %v18272_v31 = vcombine.low %v11315_v35, %v11329_v46  ;;  %v10606_v43 = vunpack.c.l.bf16 %v10282_v49  ;;  %v10960_v58 = vunpack.c.h.bf16 %v10314_v40  ;;  %v10294_v40 = vld [vmem:[%s14821_s5 + $0xf8] ss:$12 sps:$4 sm:$0xff]  }
 0xf4b   : > { %12465 = vmatmul.mubr.f32.gmra.mxu1 %v18118_v38  ;;  %12558 = vmatprep.subr.mxu1 %v18949_v53  ;;  %v11000_v38 = vunpack.c.l.bf16 %v10545_v17  ;;  %v11591_v15 = vcombine.low %v10248_v10, %v10250_v29  ;;  %v10651_v11 = vunpack.c.h.bf16 %v10282_v49  ;;  %v11517_v48 = vrot.slane %v11507_v16, %v15352_v9  ;;  %v10278_v17 = vld [vmem:[%s14821_s5 + $0xa4] ss:$180 sps:$4 sm:$0xff]   ;;  %v10558_v10 = vld [vmem:[%s14821_s5 + $0x728] ss:$12 sps:$4 sm:$0xff]  }
 0xf4c   : > { %12200 = vmatpush2.msra.mxu0 %v11006_v5  ;;  %12559 = vmatpush1.msra.mxu1 %v10978_v24  ;;  %v11531_v1 = vrot.slane %v11509_v6, %v15352_v9  ;;  %v10603_v24 = vunpack.c.l.bf16 %v10280_v26  ;;  %v10648_v0 = vunpack.c.l.bf16 %v10310_v47  ;;  %v10600_v52 = vunpack.c.l.bf16 %v10278_v17  ;;  %v10262_v16 = vld [vmem:[%s14821_s5 + $0x38] ss:$12 sps:$4 sm:$0xff]  }
 0xf4d   : > { %13859 = vmatprep.mubr.msk.f32.mxu1 %vm11808_vm13, %v18161_v2  ;;  %12201 = vmatprep.subr.mxu0 %v11004_v37  ;;  %v11508_v2 = vcombine.high %v11485_v54, %v18240_v41  ;;  %v11598_v22 = vrot.slane %v11591_v15, %v15352_v9  ;;  %v10957_v37 = vunpack.c.h.bf16 %v10280_v26  ;;  %v10645_v14 = vunpack.c.h.bf16 %v10278_v17  ;;  %v10274_v41 = vld [vmem:[%s14821_s5 + $0x8c] ss:$180 sps:$4 sm:$0xff]   ;;  %v10270_v54 = vld [vmem:[%s14821_s5 + $0x68] ss:$12 sps:$4 sm:$0xff]  }
 0xf4e   : > { %12560 = vmatprep.subr.mxu1 %v18949_v53  ;;  %12202 = vmatpush2.msra.mxu0 %v11003_v19  ;;  %v18286_v33 = vcombine.low %v11517_v48, %v11531_v1  ;;  %v10954_v19 = vunpack.c.h.bf16 %v10310_v47  ;;  %v10951_v30 = vunpack.c.h.bf16 %v10276_v55  ;;  %v10642_v29 = vunpack.c.l.bf16 %v10306_v60  ;;  %v10290_v26 = vld [vmem:[%s14821_s5 + $0xe0] ss:$12 sps:$4 sm:$0xff]   ;;  %v10286_v17 = vld [vmem:[%s14821_s5 + $0xc8] ss:$12 sps:$4 sm:$0xff]  }
 0xf4f   : > { %12561 = vmatpush1.msra.mxu1 %v10975_v18  ;;  %12203 = vmatprep.subr.mxu0 %v11001_v3  ;;  %v11524_v42 = vrot.slane %v11508_v2, %v15352_v9  ;;  %v11599_v4 = vcombine.high %v11598_v22, %v11598_v22  ;;  %v10597_v3 = vunpack.c.l.bf16 %v10276_v55  ;;  %v18300_v63 = vrot.slane %v11598_v22, %v15352_v9  ;;  %v10546_v48 = vld [vmem:[%s14821_s5 + $0x6e0] ss:$12 sps:$4 sm:$0xff]  }
 0xf50   : > { %12562 = vmatprep.subr.mxu1 %v18949_v53  ;;  %12204 = vmatpush2.msra.mxu0 %v11000_v38  ;;  %v10594_v38 = vunpack.c.l.bf16 %v10274_v41  ;;  %v10591_v7 = vunpack.c.l.bf16 %v10272_v51  ;;  %v10636_v28 = vunpack.c.h.bf16 %v10302_v34  ;;  %v11020_v2 = vunpack.c.h.bf16 %v10558_v10 }
 0xf51   : > { %12563 = vmatpush1.msra.mxu1 %v10972_v62  ;;  %12205 = vmatprep.subr.mxu0 %v10998_v36  ;;  %v18279_v5 = vcombine.low %v11524_v42, %v11538_v13  ;;  %v18292_v18 = vrot.slane %v11599_v4, %v15352_v9  ;;  %v10948_v62 = vunpack.c.h.bf16 %v10306_v60  ;;  %v10639_v36 = vunpack.c.h.bf16 %v10274_v41 }
 0xf52   : > { %12564 = vmatprep.subr.mxu1 %v18949_v53  ;;  %12206 = vmatpush2.msra.mxu0 %v10997_v8  ;;  %v10945_v8 = vunpack.c.h.bf16 %v10272_v51  ;;  %v10633_v32 = vunpack.c.l.bf16 %v10302_v34  ;;  %v10585_v15 = vunpack.c.l.bf16 %v10270_v54  ;;  %v10624_v13 = vunpack.c.h.bf16 %v10294_v40  ;;  %v10346_v51 = vld [vmem:[%s14821_s5 + $0x230] ss:$12 sps:$4 sm:$0xff]  }
 0xf53   : > { %12565 = vmatpush1.msra.mxu1 %v10969_v12  ;;  %12207 = vmatprep.subr.mxu0 %v10995_v25  ;;  %v10588_v12 = vunpack.c.h.bf16 %v10270_v54  ;;  %v10298_v25 = vld [vmem:[%s14821_s5 + $0x110] ss:$12 sps:$4 sm:$0xff]   ;;  %v10618_v47 = vunpack.c.h.bf16 %v10290_v26  ;;  %v10615_v4 = vunpack.c.l.bf16 %v10290_v26  ;;  %v10609_v41 = vunpack.c.l.bf16 %v10286_v17 }
 0xf54   : > { %12566 = vmatprep.subr.mxu1 %v18949_v53  ;;  %12208 = vmatpush2.msra.mxu0 %v10994_v39  ;;  %v10266_v39 = vld [vmem:[%s14821_s5 + $0x50] ss:$12 sps:$4 sm:$0xff]   ;;  %v10630_v35 = vunpack.c.h.bf16 %v10298_v25  ;;  %v10627_v49 = vunpack.c.l.bf16 %v10298_v25 }
 0xf55   : > { %12567 = vmatpush1.msra.mxu1 %v10966_v27  ;;  %12209 = vmatprep.subr.mxu0 %v10992_v50  ;;  %v10554_v27 = vld [vmem:[%s14821_s5 + $0x710] ss:$12 sps:$4 sm:$0xff]   ;;  %v11017_v50 = vunpack.c.l.bf16 %v10558_v10  ;;  %v10582_v46 = vunpack.c.h.bf16 %v10266_v39  ;;  %v10579_v6 = vunpack.c.l.bf16 %v10266_v39  ;;  %v10699_v10 = vunpack.c.l.bf16 %v10346_v51 }
 0xf56   : > { %12568 = vmatprep.subr.mxu1 %v18949_v53  ;;  %12210 = vmatpush2.msra.mxu0 %v10991_v20  ;;  %v11014_v20 = vunpack.c.h.bf16 %v10554_v27  ;;  %v11011_v42 = vunpack.c.l.bf16 %v10554_v27  ;;  %v18954_v39 = vld [vmem:[#allocation32_spill] sm:$0xff] }
 0xf57   : > { %12569 = vmatpush1.msra.mxu1 %v10963_v57  ;;  %12212 = vmatmul.mubr.f32.vlgmr.msra.gmra.mxu0 %v18272_v31  ;;  %v10550_v57 = vld [vmem:[%s14821_s5 + $0x6f8] ss:$12 sps:$4 sm:$0xff]   ;;  %v10366_v27 = vld [vmem:[%s14821_s5 + $0x2a8] ss:$12 sps:$4 sm:$0xff]  }
 0xf58   : > { %14105 = vmatprep.subr.mxu0 %v10654_v23  ;;  %12570 = vmatprep.subr.mxu1 %v18949_v53  ;;  %v10576_v23 = vunpack.c.h.bf16 %v10262_v16  ;;  %v11008_v22 = vunpack.c.h.bf16 %v10550_v57  ;;  %v11005_v1 = vunpack.c.l.bf16 %v10550_v57  ;;  %v10330_v57 = vld [vmem:[%s14821_s5 + $0x1d0] ss:$12 sps:$4 sm:$0xff]  }
 0xf59   : > { %13857 = vmatprep.mubr.msk.f32.mxu0 %vm11808_vm13, %v18279_v5  ;;  %14106 = vmatpush3.msra.mxu0 %v10606_v43  ;;  %v10621_v43 = vunpack.c.l.bf16 %v10294_v40  ;;  %v13651_v40 = vld [vmem:[%s14826_s23 + $0x5] ss:$8 sm:$0x7] }
 0xf5a   : > { %12571 = vmatpush1.msra.mxu1 %v10960_v58  ;;  %14107 = vmatprep.subr.mxu0 %v10651_v11  ;;  %v10258_v58 = vld [vmem:[%s14821_s5 + $0x20] ss:$12 sps:$4 sm:$0xff]   ;;  %v10573_v11 = vunpack.c.l.bf16 %v10262_v16  ;;  %v10362_v16 = vld [vmem:[%s14821_s5 + $0x290] ss:$12 sps:$4 sm:$0xff]  }
 0xf5b   : > { %12572 = vmatprep.subr.mxu1 %v18949_v53  ;;  %14108 = vmatpush3.msra.mxu0 %v10603_v24  ;;  %v10570_v24 = vunpack.c.h.bf16 %v10258_v58  ;;  %v10567_v55 = vunpack.c.l.bf16 %v10258_v58 }
 0xf5c   : > { %12573 = vmatpush1.msra.mxu1 %v10957_v37  ;;  %12218 = vmatmul.mubr.f32.gmra.mxu0 %v18286_v33  ;;  %v11002_v37 = vunpack.c.h.bf16 %v10546_v48 }
 0xf5d   : > { %14109 = vmatprep.subr.mxu0 %v10648_v0  ;;  %12574 = vmatprep.subr.mxu1 %v18949_v53  ;;  %v10254_v0 = vld [vmem:[%s14821_s5 + $0x8] ss:$12 sps:$4 sm:$0xff]  }
 0xf5e   : > { %13858 = vmatprep.mubr.msk.f32.mxu0 %vm11808_vm13, %v18292_v18  ;;  %14110 = vmatpush3.msra.mxu0 %v10600_v52  ;;  %v10542_v52 = vld [vmem:[%s14821_s5 + $0x6c8] ss:$12 sps:$4 sm:$0xff]   ;;  %v10564_v60 = vunpack.c.h.bf16 %v10254_v0 }
 0xf5f   : > { %12575 = vmatpush1.msra.mxu1 %v10954_v19  ;;  %14111 = vmatprep.subr.mxu0 %v10645_v14  ;;  %v10999_v19 = vunpack.c.l.bf16 %v10546_v48  ;;  %v10612_v14 = vunpack.c.h.bf16 %v10286_v17  ;;  %v10358_v48 = vld [vmem:[%s14821_s5 + $0x278] ss:$12 sps:$4 sm:$0xff]  }
 0xf60   : > { %12576 = vmatprep.subr.mxu1 %v18949_v53  ;;  %14112 = vmatpush3.msra.mxu0 %v10597_v3  ;;  %v10996_v3 = vunpack.c.h.bf16 %v10542_v52 }
 0xf61   : > { %12577 = vmatpush1.msra.mxu1 %v10951_v30  ;;  %12224 = vmatmul.mubr.f32.gmra.mxu0 %v18300_v63  ;;  %v10378_v30 = vld [vmem:[%s14821_s5 + $0x2f0] ss:$12 sps:$4 sm:$0xff]  }
 0xf62   : > { %14113 = vmatprep.subr.mxu0 %v10642_v29  ;;  %12578 = vmatprep.subr.mxu1 %v18949_v53  ;;  %v10561_v29 = vunpack.c.l.bf16 %v10254_v0  ;;  %v10750_v34 = vunpack.c.h.bf16 %v10378_v30  ;;  %v10747_v54 = vunpack.c.l.bf16 %v10378_v30 }
 0xf63   : > { %14114 = vmatpush3.msra.mxu0 %v10594_v38  ;;  %12294 = vmatprep.mubr.f32.mxu0 %v18950_v21  ;;  %v10993_v38 = vunpack.c.l.bf16 %v10542_v52  ;;  %v18952_v21 = vld [vmem:[#allocation30_spill] sm:$0xff]  ;;  %v10717_v52 = vunpack.c.l.bf16 %v10358_v48 }
 0xf64   : > { %12579 = vmatpush1.msra.mxu1 %v10948_v62  ;;  %14115 = vmatprep.subr.mxu0 %v10639_v36  ;;  %v10702_v62 = vunpack.c.h.bf16 %v10346_v51  ;;  %v10374_v36 = vld [vmem:[%s14821_s5 + $0x2d8] ss:$12 sps:$4 sm:$0xff]   ;;  %v10350_v51 = vld [vmem:[%s14821_s5 + $0x248] ss:$12 sps:$4 sm:$0xff]  }
 0xf65   : > { %12580 = vmatprep.subr.mxu1 %v18949_v53  ;;  %14116 = vmatpush3.msra.mxu0 %v10591_v7  ;;  %v18951_v7 = vld [vmem:[#allocation31_spill] sm:$0xff]  ;;  %v10741_v25 = vunpack.c.l.bf16 %v10374_v36 }
 0xf66   : > { %12581 = vmatpush1.msra.mxu1 %v10945_v8  ;;  %14117 = vmatprep.subr.mxu0 %v10636_v28  ;;  %v10342_v8 = vld [vmem:[%s14821_s5 + $0x218] ss:$12 sps:$4 sm:$0xff]   ;;  %v10744_v28 = vunpack.c.h.bf16 %v10374_v36 }
 0xf67   : > { %12594 = vmatprep.subr.mxu1 %v18949_v53  ;;  %14118 = vmatpush3.msra.mxu0 %v10588_v12  ;;  %v10370_v12 = vld [vmem:[%s14821_s5 + $0x2c0] ss:$12 sps:$4 sm:$0xff]  }
 0xf68   : > { %12595 = vmatpush2.msra.mxu1 %v11020_v2  ;;  %14119 = vmatprep.subr.mxu0 %v10633_v32  ;;  %v10338_v2 = vld [vmem:[%s14821_s5 + $0x200] ss:$12 sps:$4 sm:$0xff]   ;;  %v18953_v32 = vld [vmem:[#allocation29_spill] sm:$0xff] }
 0xf69   : > { %12596 = vmatprep.subr.mxu1 %v18949_v53  ;;  %14120 = vmatpush3.msra.mxu0 %v10585_v15  ;;  %v10738_v15 = vunpack.c.h.bf16 %v10370_v12 }
 0xf6a   : > { %12597 = vmatpush2.msra.mxu1 %v11017_v50  ;;  %14121 = vmatprep.subr.mxu0 %v10630_v35  ;;  %v10735_v50 = vunpack.c.l.bf16 %v10370_v12  ;;  %v10334_v35 = vld [vmem:[%s14821_s5 + $0x1e8] ss:$12 sps:$4 sm:$0xff]  }
 0xf6b   : > { %12598 = vmatprep.subr.mxu1 %v18949_v53  ;;  %14122 = vmatpush3.msra.mxu0 %v10582_v46  ;;  %v10687_v46 = vunpack.c.l.bf16 %v10338_v2  ;;  %v10681_v58 = vunpack.c.l.bf16 %v10334_v35 }
 0xf6c   : > { %12599 = vmatpush2.msra.mxu1 %v11014_v20  ;;  %14123 = vmatprep.subr.mxu0 %v10627_v49  ;;  %v18955_v20 = vld [vmem:[#allocation27_spill] sm:$0xff]  ;;  %v10684_v49 = vunpack.c.h.bf16 %v10334_v35 }
 0xf6d   : > { %12600 = vmatprep.subr.mxu1 %v18949_v53  ;;  %14124 = vmatpush3.msra.mxu0 %v10579_v6  ;;  %v10729_v6 = vunpack.c.l.bf16 %v10366_v27 }
 0xf6e   : > { %12601 = vmatpush2.msra.mxu1 %v11011_v42  ;;  %14125 = vmatprep.subr.mxu0 %v10624_v13  ;;  %v18957_v42 = vld [vmem:[#allocation7_spill] sm:$0xff] }
 0xf6f   : > { %12602 = vmatprep.subr.mxu1 %v18949_v53  ;;  %14126 = vmatpush3.msra.mxu0 %v10576_v23  ;;  %v11025_v13 = vrot.slane %v13651_v40, %v18957_v42  ;;  %v18958_v23 = vld [vmem:[#allocation8_spill] sm:$0xff] }
 0xf70   : > { %12603 = vmatpush2.msra.mxu1 %v11008_v22  ;;  %14127 = vmatprep.subr.mxu0 %v10621_v43  ;;  %v11029_v26 = vrot.slane %v13651_v40, %v18958_v23  ;;  %v18959_v22 = vld [vmem:[#allocation9_spill] sm:$0xff]  ;;  %v10466_v42 = vld [vmem:[%s14821_s5 + $0x500] ss:$12 sps:$4 sm:$0xff]  }
 0xf71   : > { %12604 = vmatprep.subr.mxu1 %v18949_v53  ;;  %14128 = vmatpush3.msra.mxu0 %v10573_v11  ;;  %v11033_v43 = vrot.slane %v13651_v40, %v18959_v22  ;;  %v10678_v11 = vunpack.c.h.bf16 %v10330_v57  ;;  %v18962_v22 = vld [vmem:[#allocation28_spill] sm:$0xff] }
 0xf72   : > { %12605 = vmatpush2.msra.mxu1 %v11005_v1  ;;  %14129 = vmatprep.subr.mxu0 %v10618_v47  ;;  %v10723_v1 = vunpack.c.l.bf16 %v10362_v16  ;;  %v10326_v47 = vld [vmem:[%s14821_s5 + $0x1b8] ss:$12 sps:$4 sm:$0xff]  }
 0xf73   : > { %12606 = vmatprep.subr.mxu1 %v18949_v53  ;;  %14130 = vmatpush3.msra.mxu0 %v10570_v24  ;;  %v11035_v24 = vcombine.high %v11025_v13, %v11029_v26  ;;  %v11036_v17 = vcombine.high %v11033_v43, %v11033_v43  ;;  %v10672_v0 = vunpack.c.h.bf16 %v10326_v47  ;;  %v18375_v36 = vrot.slane %v11033_v43, %v15352_v9 }
 0xf74   : > { %12607 = vmatpush2.msra.mxu1 %v11002_v37  ;;  %14131 = vmatprep.subr.mxu0 %v10615_v4  ;;  %v10675_v37 = vunpack.c.l.bf16 %v10330_v57  ;;  %v10720_v4 = vunpack.c.h.bf16 %v10358_v48  ;;  %v10494_v48 = vld [vmem:[%s14821_s5 + $0x5a8] ss:$12 sps:$4 sm:$0xff]  }
 0xf75   : > { %12608 = vmatprep.subr.mxu1 %v18949_v53  ;;  %14132 = vmatpush3.msra.mxu0 %v10567_v55  ;;  %v10354_v55 = vld [vmem:[%s14821_s5 + $0x260] ss:$12 sps:$4 sm:$0xff]  }
 0xf76   : > { %12609 = vmatpush2.msra.mxu1 %v10999_v19  ;;  %14133 = vmatprep.subr.mxu0 %v10612_v14  ;;  %v10322_v19 = vld [vmem:[%s14821_s5 + $0x1a0] ss:$12 sps:$4 sm:$0xff]   ;;  %v11034_v14 = vcombine.low %v11025_v13, %v11029_v26  ;;  %v10714_v30 = vunpack.c.h.bf16 %v10354_v55 }
 0xf77   : > { %12610 = vmatprep.subr.mxu1 %v18949_v53  ;;  %14134 = vmatpush3.msra.mxu0 %v10564_v60  ;;  %v18364_v60 = vrot.slane %v11035_v24, %v15352_v9 }
 0xf78   : > { %12611 = vmatpush2.msra.mxu1 %v10996_v3  ;;  %14135 = vmatprep.subr.mxu0 %v10609_v41  ;;  %v18367_v3 = vrot.slane %v11036_v17, %v15352_v9  ;;  %v10669_v41 = vunpack.c.l.bf16 %v10326_v47  ;;  %v10462_v47 = vld [vmem:[%s14821_s5 + $0x4e8] ss:$12 sps:$4 sm:$0xff]  }
 0xf79   : > { %12612 = vmatprep.subr.mxu1 %v18949_v53  ;;  %14136 = vmatpush3.msra.mxu0 %v10561_v29  ;;  %v10696_v53 = vunpack.c.h.bf16 %v10342_v8  ;;  %v10666_v29 = vunpack.c.h.bf16 %v10322_v19 }
 0xf7a   : > { %12613 = vmatpush2.msra.mxu1 %v10993_v38  ;;  %12295 = vmatmul.mubr.f32.vlgmr.msra.gmra.mxu0 %v18951_v7  ;;  %v10711_v38 = vunpack.c.l.bf16 %v10354_v55  ;;  %v10663_v7 = vunpack.c.l.bf16 %v10322_v19  ;;  %v18965_v19 = vld [vmem:[#allocation36_spill] sm:$0xff] }
 0xf7b   : > { %14146 = vmatprep.subr.mxu0 %v10750_v34  ;;  %12615 = vmatmul.mubr.f32.vlgmr.msra.gmra.mxu1 %v18272_v31  ;;  %v10693_v31 = vunpack.c.l.bf16 %v10342_v8  ;;  %v10318_v34 = vld [vmem:[%s14821_s5 + $0x188] ss:$12 sps:$4 sm:$0xff]  }
 0xf7c   : > { %12299 = vmatprep.mubr.f32.mxu0 %v18952_v21  ;;  %14147 = vmatpush3.msra.mxu0 %v10702_v62  ;;  %v18372_v62 = vrot.slane %v11034_v14, %v15352_v9  ;;  %v10660_v8 = vunpack.c.h.bf16 %v10318_v34  ;;  %v10705_v21 = vunpack.c.l.bf16 %v10350_v51  ;;  %v10876_v14 = vunpack.c.h.bf16 %v10462_v47 }
 0xf7d   : > { %13860 = vmatprep.mubr.msk.f32.mxu1 %vm11808_vm13, %v18279_v5  ;;  %14148 = vmatprep.subr.mxu0 %v10747_v54  ;;  %v10690_v5 = vunpack.c.h.bf16 %v10338_v2  ;;  %v11068_v54 = vcombine.high %v18364_v60, %v18367_v3  ;;  %v10657_v2 = vunpack.c.l.bf16 %v10318_v34 }
 0xf7e   : > { %14149 = vmatpush3.msra.mxu0 %v10699_v10  ;;  %v10708_v10 = vunpack.c.h.bf16 %v10350_v51  ;;  %v11065_v12 = vcombine.low %v18372_v62, %v18375_v36  ;;  %v10458_v51 = vld [vmem:[%s14821_s5 + $0x4d0] ss:$12 sps:$4 sm:$0xff]  }
 0xf7f   : > { %12300 = vmatmul.mubr.f32.gmra.mxu0 %v18953_v32  ;;  %14150 = vmatprep.subr.mxu0 %v10744_v28  ;;  %v10506_v28 = vld [vmem:[%s14821_s5 + $0x5f0] ss:$12 sps:$4 sm:$0xff]  }
 0xf80   : > { %12620 = vmatmul.mubr.f32.gmra.mxu1 %v18286_v33  ;;  %12304 = vmatprep.mubr.f32.mxu0 %v18954_v39  ;;  %v10732_v33 = vunpack.c.h.bf16 %v10366_v27  ;;  %v10942_v32 = vunpack.c.h.bf16 %v10506_v28  ;;  %v10470_v27 = vld [vmem:[%s14821_s5 + $0x518] ss:$12 sps:$4 sm:$0xff]  }
 0xf81   : > { %14151 = vmatpush3.msra.mxu0 %v10696_v53  ;;  %13861 = vmatprep.mubr.msk.f32.mxu1 %vm11808_vm13, %v18292_v18  ;;  %v18956_v18 = vld [vmem:[#allocation33_spill] sm:$0xff]  ;;  %v10885_v26 = vunpack.c.l.bf16 %v10470_v27 }
 0xf82   : > { %14152 = vmatprep.subr.mxu0 %v10741_v25  ;;  %v10474_v53 = vld [vmem:[%s14821_s5 + $0x530] ss:$12 sps:$4 sm:$0xff]   ;;  %v18384_v25 = vrot.slane %v11068_v54, %v15352_v9 }
 0xf83   : > { %14153 = vmatpush3.msra.mxu0 %v10693_v31  ;;  %v10894_v39 = vunpack.c.h.bf16 %v10474_v53  ;;  %v10891_v40 = vunpack.c.l.bf16 %v10474_v53 }
 0xf84   : > { %12305 = vmatmul.mubr.f32.gmra.mxu0 %v18955_v20  ;;  %14154 = vmatprep.subr.mxu0 %v10738_v15  ;;  %v11100_v31 = vcombine.high %v18384_v25, %v18384_v25  ;;  %v10502_v15 = vld [vmem:[%s14821_s5 + $0x5d8] ss:$12 sps:$4 sm:$0xff]  }
 0xf85   : > { %12625 = vmatmul.mubr.f32.gmra.mxu1 %v18300_v63  ;;  %14155 = vmatpush3.msra.mxu0 %v10690_v5  ;;  %v10726_v63 = vunpack.c.h.bf16 %v10362_v16  ;;  %v10939_v5 = vunpack.c.l.bf16 %v10506_v28  ;;  %v18960_v20 = vld [vmem:[#allocation26_spill] sm:$0xff]  ;;  %v18961_v16 = vld [vmem:[#allocation24_spill] sm:$0xff]  ;;  %v10933_v57 = vunpack.c.l.bf16 %v10502_v15 }
 0xf86   : > { %12374 = vmatprep.mubr.f32.mxu0 %v18956_v18  ;;  %14156 = vmatprep.subr.mxu0 %v10735_v50  ;;  %v18391_v50 = vrot.slane %v11065_v12, %v15352_v9  ;;  %v10888_v18 = vunpack.c.h.bf16 %v10470_v27  ;;  %v10454_v12 = vld [vmem:[%s14821_s5 + $0x4b8] ss:$12 sps:$4 sm:$0xff]  }
 0xf87   : > { %14157 = vmatpush3.msra.mxu0 %v10687_v46  ;;  %v10861_v27 = vunpack.c.l.bf16 %v10454_v12 }
 0xf88   : > { %14158 = vmatprep.subr.mxu0 %v10732_v33  ;;  %v10936_v33 = vunpack.c.h.bf16 %v10502_v15 }
 0xf89   : > { %14159 = vmatpush3.msra.mxu0 %v10684_v49  ;;  %v11775_v49 = vcombine.low %v11100_v31, %v18391_v50  ;;  %v10864_v31 = vunpack.c.h.bf16 %v10454_v12 }
 0xf8a   : > { %14160 = vmatprep.subr.mxu0 %v10729_v6  ;;  %v10498_v6 = vld [vmem:[%s14821_s5 + $0x5c0] ss:$12 sps:$4 sm:$0xff]  }
 0xf8b   : > { %14161 = vmatpush3.msra.mxu0 %v10681_v58  ;;  %v10930_v43 = vunpack.c.h.bf16 %v10498_v6  ;;  %v18408_v58 = vrot.slane %v11775_v49, %v15352_v9 }
 0xf8c   : > { %14162 = vmatprep.subr.mxu0 %v10726_v63  ;;  %v18963_v63 = vld [vmem:[#allocation35_spill] sm:$0xff] }
 0xf8d   : > { %14163 = vmatpush3.msra.mxu0 %v10678_v11  ;;  %v10882_v11 = vunpack.c.h.bf16 %v10466_v42 }
 0xf8e   : > { %14164 = vmatprep.subr.mxu0 %v10723_v1  ;;  %v10927_v1 = vunpack.c.l.bf16 %v10498_v6 }
 0xf8f   : > { %14165 = vmatpush3.msra.mxu0 %v10675_v37  ;;  %v18393_v35 = vpop.f32.mrf.mxu0  ;;  %v18395_v46 = vpop.f32.mrf.mxu1  ;;  %v10879_v37 = vunpack.c.l.bf16 %v10466_v42 }
 0xf90   : > { %14166 = vmatprep.subr.mxu0 %v10720_v4  ;;  %v18964_v4 = vld [vmem:[#allocation22_spill] sm:$0xff] }
 0xf91   : > { %14167 = vmatpush3.msra.mxu0 %v10672_v0  ;;  %v18402_v13 = vpop.f32.mrf.mxu0  ;;  %v18404_v23 = vpop.f32.mrf.mxu1  ;;  %v10924_v0 = vunpack.c.h.bf16 %v10494_v48 }
 0xf92   : > { %14168 = vmatprep.subr.mxu0 %v10717_v52  ;;  %v18422_v52 = vrot.slane %v18408_v58, %v15352_v9 }
 0xf93   : > { %14169 = vmatpush3.msra.mxu0 %v10669_v41  ;;  %v10490_v41 = vld [vmem:[%s14821_s5 + $0x590] ss:$12 sps:$4 sm:$0xff]  }
 0xf94   : > { %14170 = vmatprep.subr.mxu0 %v10714_v30  ;;  %v10918_v54 = vunpack.c.h.bf16 %v10490_v41 }
 0xf95   : > { %14171 = vmatpush3.msra.mxu0 %v10666_v29  ;;  %v10921_v29 = vunpack.c.l.bf16 %v10494_v48 }
 0xf96   : > { %14172 = vmatprep.subr.mxu0 %v10711_v38  ;;  %v10873_v38 = vunpack.c.l.bf16 %v10462_v47 }
 0xf97   : > { %14173 = vmatpush3.msra.mxu0 %v10663_v7 }
 0xf98   : > { %14174 = vmatprep.subr.mxu0 %v10708_v10  ;;  %v10870_v10 = vunpack.c.h.bf16 %v10458_v51 }
 0xf99   : > { %14175 = vmatpush3.msra.mxu0 %v10660_v8  ;;  %v10486_v8 = vld [vmem:[%s14821_s5 + $0x578] ss:$12 sps:$4 sm:$0xff]  }
 0xf9a   : > { %14176 = vmatprep.subr.mxu0 %v10705_v21  ;;  %v10915_v21 = vunpack.c.l.bf16 %v10490_v41  ;;  %v10909_v15 = vunpack.c.l.bf16 %v10486_v8 }
 0xf9b   : > { %14177 = vmatpush3.msra.mxu0 %v10657_v2  ;;  %v10867_v2 = vunpack.c.l.bf16 %v10458_v51 }
 0xf9c   : > { %12375 = vmatmul.mubr.f32.vlgmr.msra.gmra.mxu0 %v18960_v20  ;;  %14228 = vmatprep.subr.mxu0 %v10942_v32  ;;  %v10912_v32 = vunpack.c.h.bf16 %v10486_v8 }
 0xf9d   : > { %12379 = vmatprep.mubr.f32.mxu0 %v18961_v16  ;;  %14229 = vmatpush3.msra.mxu0 %v10894_v39  ;;  %v10482_v39 = vld [vmem:[%s14821_s5 + $0x560] ss:$12 sps:$4 sm:$0xff]   ;;  %v10446_v16 = vld [vmem:[%s14821_s5 + $0x488] ss:$12 sps:$4 sm:$0xff]  }
 0xf9e   : > { %14230 = vmatprep.subr.mxu0 %v10939_v5  ;;  %v10450_v5 = vld [vmem:[%s14821_s5 + $0x4a0] ss:$12 sps:$4 sm:$0xff]   ;;  %v10903_v49 = vunpack.c.l.bf16 %v10482_v39 }
 0xf9f   : > { %14231 = vmatpush3.msra.mxu0 %v10891_v40  ;;  %v10906_v40 = vunpack.c.h.bf16 %v10482_v39  ;;  %v10858_v20 = vunpack.c.h.bf16 %v10450_v5 }
 0xfa0   : > { %12380 = vmatmul.mubr.f32.gmra.mxu0 %v18962_v22  ;;  %14232 = vmatprep.subr.mxu0 %v10936_v33  ;;  %v10478_v33 = vld [vmem:[%s14821_s5 + $0x548] ss:$12 sps:$4 sm:$0xff]   ;;  %v11066_v22 = vcombine.high %v18372_v62, %v18375_v36 }
 0xfa1   : > { %12384 = vmatprep.mubr.f32.mxu0 %v18963_v63  ;;  %14233 = vmatpush3.msra.mxu0 %v10888_v18  ;;  %v18413_v24 = vpop.f32.mrf.mxu0  ;;  %v10855_v18 = vunpack.c.l.bf16 %v10450_v5  ;;  %v10900_v6 = vunpack.c.h.bf16 %v10478_v33  ;;  %v10897_v42 = vunpack.c.l.bf16 %v10478_v33 }
 0xfa2   : > { %14234 = vmatprep.subr.mxu0 %v10933_v57  ;;  %v18415_v17 = vpop.f32.mrf.mxu1  ;;  %v10852_v57 = vunpack.c.h.bf16 %v10446_v16 }
 0xfa3   : > { %14235 = vmatpush3.msra.mxu0 %v10885_v26  ;;  %v18418_v55 = vpop.f32.mrf.mxu0  ;;  %v10849_v26 = vunpack.c.l.bf16 %v10446_v16 }
 0xfa4   : > { %12385 = vmatmul.mubr.f32.gmra.mxu0 %v18964_v4  ;;  %14236 = vmatprep.subr.mxu0 %v10930_v43  ;;  %v18426_v30 = vpop.f32.mrf.mxu1  ;;  %v11067_v43 = vcombine.low %v18364_v60, %v18367_v3  ;;  %v11708_v4 = vcombine.low %v18391_v50, %v18391_v50 }
 0xfa5   : > { %14237 = vmatpush3.msra.mxu0 %v10882_v11  ;;  %12534 = vmatprep.mubr.f32.mxu0 %v18965_v19  ;;  %v11089_v11 = vrot.slane %v11066_v22, %v15352_v9 }
 0xfa6   : > { %14238 = vmatprep.subr.mxu0 %v10927_v1  ;;  %v11082_v63 = vrot.slane %v11067_v43, %v15352_v9 }
 0xfa7   : > { %14239 = vmatpush3.msra.mxu0 %v10879_v37  ;;  %v11893_v34 = vpop.f32.mrf.mxu0  ;;  %v11641_v48 = vcombine.low %v18391_v50, %v11089_v11  ;;  %v13854_v62 = vcombine.high %v18391_v50, %v11089_v11  ;;  %v11099_v1 = vcombine.high %v11089_v11, %v11089_v11 }
 0xfa8   : > { %14240 = vmatprep.subr.mxu0 %v10924_v0  ;;  %v11894_v7 = vadd.f32 %v11893_v34, %v18422_v52  ;;  %v11643_v36 = vcombine.low %v11082_v63, %v18384_v25  ;;  %v13855_v60 = vcombine.high %v11082_v63, %v18384_v25  ;;  %v11098_v3 = vcombine.high %v11082_v63, %v11082_v63 }
 0xfa9   : > { %14241 = vmatpush3.msra.mxu0 %v10876_v14  ;;  %v11976_v28 = vpop.f32.mrf.mxu1  ;;  %v11895_v33 = vpop.f32.mrf.mxu0 }
 0xfaa   : > { %14242 = vmatprep.subr.mxu0 %v10921_v29  ;;  %v18431_v53 = vadd.f32 %v11976_v28, %v11894_v7  ;;  %v11665_v47 = vrot.slane %v11643_v36, %v15352_v9  ;;  %v11672_v37 = vrot.slane %v13855_v60, %v15352_v9  ;;  %v11711_v19 = vcombine.low %v18384_v25, %v11098_v3 }
 0xfab   : > { %14243 = vmatpush3.msra.mxu0 %v10873_v38 }
 0xfac   : > { %14244 = vmatprep.subr.mxu0 %v10918_v54  ;;  %v11675_v41 = vcombine.low %v11665_v47, %v11672_v37  ;;  %v11676_v51 = vcombine.high %v11665_v47, %v11672_v37  ;;  %v11739_v54 = vrot.slane %v11711_v19, %v15352_v9 }
 0xfad   : > { %14245 = vmatpush3.msra.mxu0 %v10870_v10 }
 0xfae   : > { %14246 = vmatprep.subr.mxu0 %v10915_v21  ;;  %v11704_v10 = vrot.slane %v11676_v51, %v15352_v9 }
 0xfaf   : > { %14247 = vmatpush3.msra.mxu0 %v10867_v2 }
 0xfb0   : > { %14248 = vmatprep.subr.mxu0 %v10912_v32 }
 0xfb1   : > { %14249 = vmatpush3.msra.mxu0 %v10864_v31 }
 0xfb2   : > { %14250 = vmatprep.subr.mxu0 %v10909_v15 }
 0xfb3   : > { %14251 = vmatpush3.msra.mxu0 %v10861_v27 }
 0xfb4   : > { %14252 = vmatprep.subr.mxu0 %v10906_v40 }
 0xfb5   : > { %14253 = vmatpush3.msra.mxu0 %v10858_v20 }
 0xfb6   : > { %14254 = vmatprep.subr.mxu0 %v10903_v49 }
 0xfb7   : > { %14255 = vmatpush3.msra.mxu0 %v10855_v18  ;;  %v11978_v18 = vpop.f32.mrf.mxu1 }
 0xfb8   : > { %14256 = vmatprep.subr.mxu0 %v10900_v6 }
 0xfb9   : > { %14257 = vmatpush3.msra.mxu0 %v10852_v57 }
 0xfba   : > { %14258 = vmatprep.subr.mxu0 %v10897_v42 }
 0xfbb   : > { %14259 = vmatpush3.msra.mxu0 %v10849_v26 }
 0xfbc   : > { %12535 = vmatmul.mubr.f32.vlgmr.msra.gmra.mxu0 %v18045_v44  ;;  %v11097_v44 = vcombine.high %v18391_v50, %v18391_v50  ;;  %v18470_v50 = vrot.slane %v11675_v41, %v15352_v9 }
 0xfbd   : > { %12539 = vmatprep.mubr.f32.mxu0 %v18062_v61  ;;  %v11651_v61 = vrot.slane %v11641_v48, %v15352_v9 }
 0xfbe   : > { %v11709_v0 = vcombine.low %v11089_v11, %v11097_v44 }
 0xfc0   : > { %12540 = vmatmul.mubr.f32.gmra.mxu0 %v18099_v56  ;;  %v11658_v56 = vrot.slane %v13854_v62, %v15352_v9  ;;  %v11725_v38 = vrot.slane %v11709_v0, %v15352_v9 }
 0xfc1   : > { %12544 = vmatprep.mubr.f32.mxu0 %v18114_v59  ;;  %v11710_v59 = vcombine.low %v11099_v1, %v11082_v63 }
 0xfc2   : > { %v11673_v14 = vcombine.low %v11651_v61, %v11658_v56  ;;  %v11674_v29 = vcombine.high %v11651_v61, %v11658_v56 }
 0xfc3   : > { %v11732_v34 = vrot.slane %v11710_v59, %v15352_v9 }
 0xfc4   : > { %12545 = vmatmul.mubr.f32.gmra.mxu0 %v18144_v45  ;;  %v11718_v45 = vrot.slane %v11708_v4, %v15352_v9  ;;  %v18467_v7 = vrot.slane %v11673_v14, %v15352_v9  ;;  %v11690_v25 = vrot.slane %v11674_v29, %v15352_v9 }
 0xfc5   : > { %v11742_v28 = vcombine.low %v11732_v34, %v11739_v54  ;;  %v11743_v2 = vcombine.high %v11732_v34, %v11739_v54 }
 0xfc6   : > { %v11740_v8 = vcombine.low %v11718_v45, %v11725_v38  ;;  %v11705_v21 = vcombine.low %v18467_v7, %v18470_v50  ;;  %v11741_v12 = vcombine.high %v11718_v45, %v11725_v38  ;;  %v11707_v32 = vcombine.low %v11690_v25, %v11704_v10 }
 0xfc7   : > { %v18480_v39 = vrot.slane %v11742_v28, %v15352_v9  ;;  %v11771_v27 = vrot.slane %v11743_v2, %v15352_v9 }
 0xfc8   : > { %v18477_v31 = vrot.slane %v11740_v8, %v15352_v9  ;;  %v11882_v15 = vadd.f32 %v18393_v35, %v11705_v21  ;;  %v11757_v5 = vrot.slane %v11741_v12, %v15352_v9  ;;  %v11884_v40 = vadd.f32 %v18402_v13, %v11707_v32 }
 0xfc9   : > { %v11783_v35 = vcombine.high %v18408_v58, %v18408_v58 }
 0xfca   : > { %v11772_v20 = vcombine.low %v18477_v31, %v18480_v39  ;;  %v11965_v49 = vadd.f32 %v18395_v46, %v11882_v15  ;;  %v11774_v16 = vcombine.low %v11757_v5, %v11771_v27  ;;  %v11967_v57 = vadd.f32 %v18404_v23, %v11884_v40 }
 0xfcb   : > { %v11797_v62 = vrot.slane %v11783_v35, %v15352_v9 }
 0xfcc   : > { %v11888_v42 = vadd.f32 %v18413_v24, %v11772_v20  ;;  %v11890_v13 = vadd.f32 %v18418_v55, %v11774_v16 }
 0xfcd   : > { %v11896_v58 = vadd.f32 %v11895_v33, %v11797_v62 }
 0xfce   : > { %v11971_v46 = vadd.f32 %v18415_v17, %v11888_v42  ;;  %v11973_v23 = vadd.f32 %v18426_v30, %v11890_v13 }
 0xfcf   : > { %v11979_v37 = vadd.f32 %v11978_v18, %v11896_v58 }
 0xfda   : > { %v12047_v6 = vpop.f32.mrf.mxu0 }
 0xfdb   : > { %v12048_v26 = vadd.f32 %v12047_v6, %v11965_v49  ;;  %v12130_v22 = vpop.f32.mrf.mxu1 }
 0xfdc   : > { %v12049_v43 = vpop.f32.mrf.mxu0 }
 0xfdd   : > { %v12131_v63 = vadd.f32 %v12130_v22, %v12048_v26  ;;  %v12050_v11 = vadd.f32 %v12049_v43, %v11967_v57  ;;  %v12132_v48 = vpop.f32.mrf.mxu1 }
 0xfdf   : > { %v12133_v36 = vadd.f32 %v12132_v48, %v12050_v11 }
 0xfe0   : > { %v12053_v60 = vpop.f32.mrf.mxu0 }
 0xfe1   : > { %v12054_v24 = vadd.f32 %v12053_v60, %v11971_v46  ;;  %v12136_v44 = vpop.f32.mrf.mxu1 }
 0xfe2   : > { %v12055_v3 = vpop.f32.mrf.mxu0 }
 0xfe3   : > { %v12137_v1 = vadd.f32 %v12136_v44, %v12054_v24  ;;  %v12056_v61 = vadd.f32 %v12055_v3, %v11973_v23  ;;  %v12138_v56 = vpop.f32.mrf.mxu1  ;;  %v11706_v44 = vcombine.high %v18467_v7, %v18470_v50 }
 0xfe5   : > { %v12139_v47 = vadd.f32 %v12138_v56, %v12056_v61  ;;  %v11773_v56 = vcombine.high %v18477_v31, %v18480_v39 }
 0xfe6   : > { %v12059_v55 = vpop.f32.mrf.mxu0 }
 0xfe7   : > { %v12060_v4 = vadd.f32 %v12059_v55, %v18431_v53  ;;  %v12142_v0 = vpop.f32.mrf.mxu1 }
 0xfe8   : > { %v12061_v17 = vpop.f32.mrf.mxu0 }
 0xfe9   : > { %v12143_v59 = vadd.f32 %v12142_v0, %v12060_v4  ;;  %v12062_v19 = vadd.f32 %v12061_v17, %v11979_v37  ;;  %v12144_v14 = vpop.f32.mrf.mxu1 }
 0xfeb   : > { %v12145_v41 = vadd.f32 %v12144_v14, %v12062_v19 }
0x1001   : > { %v14219_v29 = vpop.f32.mrf.mxu1 }
0x1003   : > { %v14220_v30 = vpop.f32.mrf.mxu1 }
0x1004   : > { %v14221_v51 = vadd.f32 %v14220_v30, %v14219_v29 }
0x1006   : > { %v14222_v45 = vpop.f32.mrf.mxu1 }
0x1008   : > { %v14223_v38 = vpop.f32.mrf.mxu1 }
0x1009   : > { %v14224_v34 = vadd.f32 %v14223_v38, %v14222_v45 }
0x100b   : > { %v14225_v54 = vpop.f32.mrf.mxu1 }
0x100d   : > { %v14226_v25 = vpop.f32.mrf.mxu1 }
0x100e   : > { %v18498_v10 = vadd.f32 %v14226_v25, %v14225_v54 }
0x1017   : > { %v12213_v8 = vpop.f32.mrf.mxu0 }
0x1018   : > { %v18500_v21 = vadd.f32 %v12213_v8, %v12131_v63 }
0x1019   : > { %v12215_v28 = vpop.f32.mrf.mxu0 }
0x101a   : > { %v18502_v53 = vadd.f32 %v12215_v28, %v12133_v36 }
0x101c   : > { %v12639_v12 = vcombine.low %v18500_v21, %v18502_v53  ;;  %v12640_v2 = vcombine.high %v18500_v21, %v18502_v53  ;;  %v12219_v32 = vpop.f32.mrf.mxu0 }
0x101d   : > { %v18508_v5 = vadd.f32 %v12219_v32, %v12137_v1 }
0x101e   : > { %v12221_v15 = vpop.f32.mrf.mxu0  ;;  %v12648_v21 = vrot.slane %v12639_v12, %v15352_v9 }
0x101f   : > { %v18510_v27 = vadd.f32 %v12221_v15, %v12139_v47  ;;  %v12655_v15 = vrot.slane %v12640_v2, %v15352_v9 }
0x1021   : > { %v12706_v40 = vcombine.low %v18508_v5, %v18510_v27  ;;  %v12707_v20 = vcombine.high %v18508_v5, %v18510_v27  ;;  %v12225_v33 = vpop.f32.mrf.mxu0 }
0x1022   : > { %v18516_v16 = vadd.f32 %v12225_v33, %v12143_v59  ;;  %v11798_v59 = vcombine.high %v18422_v52, %v18422_v52 }
0x1023   : > { %v12227_v49 = vpop.f32.mrf.mxu0  ;;  %v12722_v2 = vrot.slane %v12707_v20, %v15352_v9 }
0x1024   : > { %v18518_v18 = vadd.f32 %v12227_v49, %v12145_v41 }
0x1026   : > { %v12773_v6 = vcombine.low %v18516_v16, %v18518_v18 }
0x103a   : > { %v14137_v13 = vpop.f32.mrf.mxu0 }
0x103b   : > { %v12616_v57 = vpop.f32.mrf.mxu1 }
0x103c   : > { %v14138_v63 = vpop.f32.mrf.mxu0 }
0x103d   : > { %v12618_v42 = vpop.f32.mrf.mxu1  ;;  %v14139_v3 = vadd.f32 %v14138_v63, %v14137_v13 }
0x103f   : > { %v14140_v11 = vpop.f32.mrf.mxu0  ;;  %v12297_v61 = vadd.f32 %v14139_v3, %v11706_v44 }
0x1040   : > { %v12621_v35 = vpop.f32.mrf.mxu1 }
0x1041   : > { %v14141_v48 = vpop.f32.mrf.mxu0 }
0x1042   : > { %v12623_v26 = vpop.f32.mrf.mxu1  ;;  %v14142_v47 = vadd.f32 %v14141_v48, %v14140_v11 }
0x1044   : > { %v14143_v46 = vpop.f32.mrf.mxu0  ;;  %v12302_v17 = vadd.f32 %v14142_v47, %v11773_v56 }
0x1045   : > { %v18522_v22 = vpop.f32.mrf.mxu1 }
0x1046   : > { %v14144_v62 = vpop.f32.mrf.mxu0 }
0x1047   : > { %v12628_v43 = vpop.f32.mrf.mxu1  ;;  %v14145_v19 = vadd.f32 %v14144_v62, %v14143_v46 }
0x1049   : > { %v12307_v38 = vadd.f32 %v14145_v19, %v11798_v59 }
0x105c   : > { %v14178_v36 = vpop.f32.mrf.mxu0 }
0x105e   : > { %v14179_v60 = vpop.f32.mrf.mxu0 }
0x105f   : > { %v14180_v1 = vadd.f32 %v14179_v60, %v14178_v36 }
0x1060   : > { %v14181_v23 = vpop.f32.mrf.mxu0 }
0x1061   : > { %v12377_v37 = vadd.f32 %v14180_v1, %v12297_v61 }
0x1062   : > { %v14182_v24 = vpop.f32.mrf.mxu0 }
0x1063   : > { %v14183_v4 = vadd.f32 %v14182_v24, %v14181_v23  ;;  %v12457_v7 = vadd.f32 %v14221_v51, %v12377_v37 }
0x1064   : > { %v14184_v58 = vpop.f32.mrf.mxu0 }
0x1065   : > { %v12382_v41 = vadd.f32 %v14183_v4, %v12302_v17 }
0x1066   : > { %v14185_v55 = vpop.f32.mrf.mxu0 }
0x1067   : > { %v14186_v29 = vadd.f32 %v14185_v55, %v14184_v58  ;;  %v12462_v39 = vadd.f32 %v14224_v34, %v12382_v41 }
0x1069   : > { %v12387_v8 = vadd.f32 %v14186_v29, %v12307_v38 }
0x106b   : > { %v12467_v34 = vadd.f32 %v18498_v10, %v12387_v8 }
0x107c   : > { %v14260_v0 = vpop.f32.mrf.mxu0 }
0x107e   : > { %v14261_v14 = vpop.f32.mrf.mxu0 }
0x107f   : > { %v14262_v50 = vadd.f32 %v14261_v14, %v14260_v0 }
0x1080   : > { %v14263_v30 = vpop.f32.mrf.mxu0 }
0x1081   : > { %v12537_v45 = vadd.f32 %v14262_v50, %v12457_v7 }
0x1082   : > { %v14264_v54 = vpop.f32.mrf.mxu0 }
0x1083   : > { %v12617_v31 = vadd.f32 %v12616_v57, %v12537_v45  ;;  %v14265_v25 = vadd.f32 %v14264_v54, %v14263_v30  ;;  %v12715_v57 = vrot.slane %v12706_v40, %v15352_v9 }
0x1084   : > { %v14266_v28 = vpop.f32.mrf.mxu0 }
0x1085   : > { %v12641_v53 = vcombine.high %v12617_v31, %v12617_v31  ;;  %v12662_v52 = vrot.slane %v12617_v31, %v15352_v9  ;;  %v12542_v32 = vadd.f32 %v14265_v25, %v12462_v39 }
0x1086   : > { %v14267_v51 = vpop.f32.mrf.mxu0 }
0x1087   : > { %v12669_v33 = vrot.slane %v12641_v53, %v15352_v9  ;;  %v12670_v49 = vcombine.low %v12648_v21, %v12662_v52  ;;  %v12671_v42 = vcombine.high %v12648_v21, %v12662_v52  ;;  %v12622_v26 = vadd.f32 %v12621_v35, %v12542_v32 }
0x1088   : > { %v14268_v43 = vadd.f32 %v14267_v51, %v14266_v28 }
0x1089   : > { %v12672_v13 = vcombine.low %v12655_v15, %v12669_v33  ;;  %v12673_v63 = vcombine.high %v12655_v15, %v12669_v33  ;;  %v12680_v12 = vrot.slane %v12670_v49, %v15352_v9  ;;  %v12694_v11 = vrot.slane %v12671_v42, %v15352_v9  ;;  %v18966_v15 = vld [vmem:[#allocation13_spill] sm:$0xff]  ;;  %v18967_v49 = vld [vmem:[#allocation10_spill] sm:$0xff] }
0x108a   : > { %v12708_v48 = vcombine.high %v12622_v26, %v12622_v26  ;;  %v12729_v46 = vrot.slane %v12622_v26, %v15352_v9  ;;  %v12547_v35 = vadd.f32 %v14268_v43, %v12467_v34  ;;  %v18968_v26 = vld [vmem:[#allocation12_spill] sm:$0xff]  ;;  %v18969_v34 = vld [vmem:[#allocation11_spill] sm:$0xff] }
0x108b   : > { %v12687_v40 = vrot.slane %v12672_v13, %v15352_v9  ;;  %v12701_v10 = vrot.slane %v12673_v63, %v15352_v9  ;;  %v12804_v62 = vcombine.low %v12680_v12, %v12694_v11  ;;  %v13862_v36 = vcombine.high %v12680_v12, %v12694_v11  ;;  %v18970_v12 = vld [vmem:[#allocation14_spill] sm:$0xff] }
0x108c   : > { %v12736_v60 = vrot.slane %v12708_v48, %v15352_v9  ;;  %v12737_v23 = vcombine.low %v12715_v57, %v12729_v46  ;;  %v12738_v24 = vcombine.high %v12715_v57, %v12729_v46  ;;  %v12627_v44 = vadd.f32 %v18522_v22, %v12547_v35 }
0x108d   : > { %v12806_v3 = vcombine.low %v12687_v40, %v12701_v10  ;;  %v13863_v58 = vcombine.high %v12687_v40, %v12701_v10  ;;  %v12814_v5 = vrot.slane %v12804_v62, %v15352_v9  ;;  %v12821_v27 = vrot.slane %v13862_v36, %v15352_v9 }
0x108e   : > { %v12739_v20 = vcombine.low %v12722_v2, %v12736_v60  ;;  %v12740_v1 = vcombine.high %v12722_v2, %v12736_v60  ;;  %v12747_v61 = vrot.slane %v12737_v23, %v15352_v9  ;;  %v12761_v56 = vrot.slane %v12738_v24, %v15352_v9  ;;  %v18971_v2 = vld [vmem:[#allocation15_spill] sm:$0xff] }
0x108f   : > { %v12828_v47 = vrot.slane %v12806_v3, %v15352_v9  ;;  %v12835_v55 = vrot.slane %v13863_v58, %v15352_v9  ;;  %v12836_v37 = vcombine.low %v12814_v5, %v12821_v27  ;;  %v12837_v4 = vcombine.high %v12814_v5, %v12821_v27 }
0x1090   : > { %v12780_v22 = vrot.slane %v12773_v6, %v15352_v9  ;;  %v12754_v0 = vrot.slane %v12739_v20, %v15352_v9  ;;  %v12769_v17 = vcombine.high %v12747_v61, %v12747_v61  ;;  %v12771_v59 = vcombine.high %v12761_v56, %v12761_v56  ;;  %v18972_v20 = vld [vmem:[#allocation16_spill] sm:$0xff] }
0x1091   : > { %v12838_v19 = vcombine.low %v12828_v47, %v12835_v55  ;;  %v12839_v14 = vcombine.high %v12828_v47, %v12835_v55  ;;  %v12846_v41 = vrot.slane %v12836_v37, %v15352_v9  ;;  %v12768_v7 = vrot.slane %v12740_v1, %v15352_v9  ;;  %v18973_v37 = vld [vmem:[#allocation17_spill] sm:$0xff] }
0x1092   : > { %v12770_v50 = vcombine.high %v12754_v0, %v12754_v0  ;;  %v12877_v29 = vrot.slane %v12747_v61, %v15352_v9  ;;  %v12894_v30 = vcombine.low %v12761_v56, %v12769_v17  ;;  %v12895_v45 = vcombine.low %v12771_v59, %v12754_v0 }
0x1093   : > { %v12853_v38 = vrot.slane %v12837_v4, %v15352_v9  ;;  %v12860_v16 = vrot.slane %v12838_v19, %v15352_v9  ;;  %v12867_v18 = vrot.slane %v12839_v14, %v15352_v9  ;;  %v12787_v6 = vrot.slane %v12627_v44, %v15352_v9  ;;  %v18975_v14 = vld [vmem:[#allocation19_spill] sm:$0xff] }
0x1094   : > { %v12878_v54 = vcombine.high %v12877_v29, %v12877_v29  ;;  %v12885_v31 = vrot.slane %v12877_v29, %v15352_v9  ;;  %v12896_v39 = vcombine.low %v12768_v7, %v12770_v50  ;;  %v12904_v25 = vrot.slane %v12894_v30, %v15352_v9  ;;  %v18977_v29 = vld [vmem:[#allocation21_spill] sm:$0xff] }
0x1095   : > { %v12868_v8 = vcombine.low %v12846_v41, %v12860_v16  ;;  %v12869_v28 = vcombine.high %v12846_v41, %v12860_v16  ;;  %v12870_v21 = vcombine.low %v12853_v38, %v12867_v18  ;;  %v12911_v53 = vrot.slane %v12895_v45, %v15352_v9 }
0x1096   : > { %v12892_v52 = vrot.slane %v12878_v54, %v15352_v9  ;;  %v12893_v32 = vcombine.high %v12885_v31, %v12885_v31  ;;  %v12999_v51 = vadd.f32 %v12885_v31, %v18966_v15  ;;  %v12772_v33 = vcombine.high %v12768_v7, %v12768_v7  ;;  %v18976_v7 = vld [vmem:[#allocation20_spill] sm:$0xff] }
0x1097   : > { %v18571_v42 = vadd.f32 %v12868_v8, %v18967_v49  ;;  %v18574_v57 = vadd.f32 %v12870_v21, %v18968_v26  ;;  %v18577_v43 = vadd.f32 %v12869_v28, %v18969_v34  ;;  %v12926_v13 = vcombine.low %v12904_v25, %v12911_v53 }
0x1098   : > { %v12927_v63 = vcombine.high %v12904_v25, %v12911_v53  ;;  %v13000_v11 = vadd.f32 %v12892_v52, %v18970_v12  ;;  %v13001_v48 = vadd.f32 %v12893_v32, %v18971_v2  ;;  %13011 = vst [vmem:[#allocation2 + $0x18] sm:$0x1] %v12999_v51  ;;  %v12788_v46 = vcombine.low %v12780_v22, %v12787_v6 }
0x1099   : > { %13008 = vst [vmem:[#allocation2] sm:$0xff] %v18571_v42  ;;  %13009 = vst [vmem:[#allocation2 + $0x8] sm:$0xff] %v18574_v57  ;;  %v12789_v35 = vcombine.high %v12780_v22, %v12787_v6  ;;  %v12918_v62 = vrot.slane %v12896_v39, %v15352_v9  ;;  %v12936_v61 = vrot.slane %v12926_v13, %v15352_v9  ;;  %v18974_v22 = vld [vmem:[#allocation18_spill] sm:$0xff] }
0x109a   : > { %13010 = vst.msk [vmem:[#allocation2 + $0x10] sm:$0xff] %vm1853_vm6, %v18577_v43  ;;  %13012 = vst [vmem:[#allocation2 + $0x20] sm:$0x1] %v13000_v11  ;;  %v12796_v40 = vrot.slane %v12788_v46, %v15352_v9  ;;  %v12943_v56 = vrot.slane %v12927_v63, %v15352_v9 }
0x109b   : > { %13013 = vst.msk [vmem:[#allocation2 + $0x28] sm:$0x1] %vm1862_vm8, %v13001_v48  ;;  %v12803_v10 = vrot.slane %v12789_v35, %v15352_v9 }
0x109c   : > { %v12897_v36 = vcombine.low %v12772_v33, %v12796_v40 }
0x109d   : > { %v12967_v60 = vrot.slane %v12803_v10, %v15352_v9 }
0x109e   : > { %v12925_v23 = vrot.slane %v12897_v36, %v15352_v9 }
0x109f   : > { %v12968_v24 = vcombine.high %v12967_v60, %v12967_v60  ;;  %v12975_v44 = vrot.slane %v12967_v60, %v15352_v9 }
0x10a0   : > { %v12928_v3 = vcombine.low %v12918_v62, %v12925_v23  ;;  %v12929_v58 = vcombine.high %v12918_v62, %v12925_v23 }
0x10a1   : > { %v12982_v5 = vrot.slane %v12968_v24, %v15352_v9  ;;  %v12983_v27 = vcombine.high %v12975_v44, %v12975_v44  ;;  %v13005_v1 = vadd.f32 %v12975_v44, %v18972_v20 }
0x10a2   : > { %v12950_v47 = vrot.slane %v12928_v3, %v15352_v9  ;;  %v12957_v55 = vrot.slane %v12929_v58, %v15352_v9 }
0x10a3   : > { %v13006_v4 = vadd.f32 %v12982_v5, %v18973_v37  ;;  %v13007_v0 = vadd.f32 %v12983_v27, %v18974_v22  ;;  %13017 = vst [vmem:[#allocation2 + $0x48] sm:$0x1] %v13005_v1 }
0x10a4   : > { %v12958_v17 = vcombine.low %v12936_v61, %v12950_v47  ;;  %v12959_v59 = vcombine.high %v12936_v61, %v12950_v47  ;;  %v12960_v19 = vcombine.low %v12943_v56, %v12957_v55 }
0x10a5   : > { %13018 = vst [vmem:[#allocation2 + $0x50] sm:$0x1] %v13006_v4  ;;  %13019 = vst.msk [vmem:[#allocation2 + $0x58] sm:$0x1] %vm1862_vm8, %v13007_v0  ;;  %13023 = sbr.rel (%p13864_p5) target bundleno = 5124 (0x1404), region = 84 }
0x10a6   : > { %v13002_v41 = vadd.f32 %v12958_v17, %v18975_v14  ;;  %v13003_v50 = vadd.f32 %v12960_v19, %v18976_v7  ;;  %v13004_v30 = vadd.f32 %v12959_v59, %v18977_v29 }
0x10a8   : > { %13014 = vst [vmem:[#allocation2 + $0x30] sm:$0xff] %v13002_v41  ;;  %13015 = vst [vmem:[#allocation2 + $0x38] sm:$0xff] %v13003_v50 }
0x10a9   : > { %13016 = vst.msk [vmem:[#allocation2 + $0x40] sm:$0xff] %vm1853_vm6, %v13004_v30 }
0x10aa   : > { %v13033_v9 = vrot.slane %v13002_v41, 7  ;;  %vm13034_vm14 = vcmask 1041409   ;;  %v13036_v45 = vrot.slane %v13003_v50, 7  ;;  %v13038_v38 = vrot.slane %v13004_v30, 7  ;;  %v18978_v5 = vld [vmem:[#allocation7_spill] sm:$0xff]  ;;  %v18979_v20 = vld [vmem:[#allocation8_spill] sm:$0xff] }
0x10ab   : > { %vm13043_vm15 = vcmask 1041408   ;;  %vm13047_vm0 = vcmask 418816   ;;  %v13024_v44 = vld [vmem:[%s18784_s11] ss:$4 sm:$0x7]  ;;  %v18980_v61 = vld [vmem:[#allocation9_spill] sm:$0xff] }
0x10ac   : > { %v13035_v16 = vsel %vm13034_vm14, %v13033_v9, %v18571_v42  ;;  %v13037_v18 = vsel %vm13034_vm14, %v13036_v45, %v18574_v57  ;;  %v13039_v6 = vsel %vm13034_vm14, %v13038_v38, %v18577_v43  ;;  %v13865_v58 = vld [vmem:[%s18784_s11 + $0x1] ss:$4 sm:$0x7]  ;;  %v13108_v27 = vrot.slane %v13024_v44, %v18978_v5 }
0x10ad   : > { %v13044_v54 = vsel %vm13043_vm15, %v13035_v16, 0.0  ;;  %v13045_v31 = vsel %vm13043_vm15, %v13037_v18, 0.0  ;;  %v13048_v39 = vsel %vm13047_vm0, %v13039_v6, 0.0  ;;  %v13112_v1 = vrot.slane %v13024_v44, %v18979_v20 }
0x10ae   : > { %v13046_v25 = vadd.f32 %v13045_v31, %v13044_v54  ;;  %v13116_v56 = vrot.slane %v13024_v44, %v18980_v61  ;;  %v13130_v59 = vrot.slane %v13865_v58, %v18978_v5  ;;  %v13138_v7 = vrot.slane %v13865_v58, %v18980_v61 }
0x10af   : > { %vm14709_vm1 = vmmov 0   ;;  %vm13514_vm2 = vcmask 295936  }
0x10b0   : > { %v13049_v8 = vadd.f32 %v13048_v39, %v13046_v25 }
0x10b2   : > { %13050 = vadd.xlane.f32.xlu0 %v13049_v8 }
0x113b   : > { %v13051_v28 = vpop.xlane.xlu0 %13050 }
0x113c   : > { %v13052_v21 = vmul.f32 0.0032467532, %v13051_v28 }
0x113e   : > { %v13054_v53 = vrot.slane %v13052_v21, 1  ;;  %v13057_v52 = vsub.f32 %v18571_v42, %v13052_v21  ;;  %v13058_v32 = vsub.f32 %v18574_v57, %v13052_v21  ;;  %v13059_v15 = vsub.f32 %v18577_v43, %v13052_v21 }
0x1140   : > { %v13060_v51 = vsub.f32 %v13002_v41, %v13054_v53  ;;  %v13061_v33 = vsub.f32 %v13003_v50, %v13054_v53  ;;  %v13062_v49 = vsub.f32 %v13004_v30, %v13054_v53  ;;  %v13063_v63 = vmul.f32 %v13057_v52, %v13057_v52 }
0x1141   : > { %v13064_v12 = vmul.f32 %v13058_v32, %v13058_v32  ;;  %v13065_v11 = vmul.f32 %v13059_v15, %v13059_v15  ;;  %v13134_v41 = vrot.slane %v13865_v58, %v18979_v20 }
0x1142   : > { %v13066_v26 = vmul.f32 %v13060_v51, %v13060_v51  ;;  %v13067_v34 = vmul.f32 %v13061_v33, %v13061_v33  ;;  %v13068_v13 = vmul.f32 %v13062_v49, %v13062_v49 }
0x1144   : > { %v13075_v2 = vrot.slane %v13066_v26, 7  ;;  %v13077_v48 = vrot.slane %v13067_v34, 7  ;;  %v13079_v46 = vrot.slane %v13068_v13, 7 }
0x1146   : > { %v13076_v35 = vsel %vm13034_vm14, %v13075_v2, %v13063_v63  ;;  %v13078_v42 = vsel %vm13034_vm14, %v13077_v48, %v13064_v12  ;;  %v13080_v57 = vsel %vm13034_vm14, %v13079_v46, %v13065_v11 }
0x1147   : > { %v13084_v43 = vsel %vm13043_vm15, %v13076_v35, 0.0  ;;  %v13085_v40 = vsel %vm13043_vm15, %v13078_v42, 0.0  ;;  %v13087_v62 = vsel %vm13047_vm0, %v13080_v57, 0.0 }
0x1148   : > { %v13086_v10 = vadd.f32 %v13085_v40, %v13084_v43 }
0x114a   : > { %v13088_v36 = vadd.f32 %v13087_v62, %v13086_v10 }
0x114c   : > { %13089 = vadd.xlane.f32.xlu0 %v13088_v36 }
0x11d5   : > { %v13090_v60 = vpop.xlane.xlu0 %13089 }
0x11d6   : > { %v13091_v23 = vmul.f32 0.0032467532, %v13090_v60 }
0x11d8   : > { %v13092_v24 = vadd.f32 1e-05, %v13091_v23 }
0x11da   : > { %14661 = vrsqrt.f32 %v13092_v24 }
0x11e7   : > { %v14662_v3 = vpop.eup %14661 }
0x11e8   : > { %v13095_v47 = vrot.slane %v14662_v3, 1  ;;  %v13098_v55 = vmul.f32 %v14662_v3, %v13057_v52  ;;  %v13099_v37 = vmul.f32 %v14662_v3, %v13058_v32  ;;  %v13100_v4 = vmul.f32 %v14662_v3, %v13059_v15 }
0x11ea   : > { %v13101_v22 = vmul.f32 %v13095_v47, %v13060_v51  ;;  %v13102_v0 = vmul.f32 %v13095_v47, %v13061_v33  ;;  %v13103_v17 = vmul.f32 %v13095_v47, %v13062_v49  ;;  %v13120_v19 = vmul.f32 %v13108_v27, %v13098_v55  ;;  %v14023_v33 = vld [vmem:[%s18981_s26 + $0x78] sm:$0xff]  }
0x11eb   : > { %v13121_v14 = vmul.f32 %v13112_v1, %v13099_v37  ;;  %v13122_v50 = vmul.f32 %v13116_v56, %v13100_v4  ;;  %v14015_v49 = vld [vmem:[%s18981_s26 + $0x38] sm:$0xff]   ;;  %v13985_v26 = vunpack.c.l.bf16 %v14023_v33  ;;  %v13986_v34 = vunpack.c.h.bf16 %v14023_v33 }
0x11ec   : > { %v13123_v29 = vmul.f32 %v13108_v27, %v13101_v22  ;;  %v13124_v30 = vmul.f32 %v13112_v1, %v13102_v0  ;;  %v13125_v9 = vmul.f32 %v13116_v56, %v13103_v17  ;;  %v13142_v18 = vadd.f32 %v13130_v59, %v13120_v19  ;;  %v14022_v22 = vld [vmem:[%s18981_s26 + $0x70] sm:$0xff]  }
0x11ed   : > { %v13143_v6 = vadd.f32 %v13134_v41, %v13121_v14  ;;  %v13144_v54 = vadd.f32 %v13138_v7, %v13122_v50  ;;  %v13954_v13 = vunpack.c.h.bf16 %v14015_v49  ;;  %v13953_v63 = vunpack.c.l.bf16 %v14015_v49  ;;  %14269 = vmatprep.subr.mxu0 %v13986_v34  ;;  %v14014_v17 = vld [vmem:[%s18981_s26 + $0x30] sm:$0xff]   ;;  %v14020_v50 = vld [vmem:[%s18981_s26 + $0x60] sm:$0xff]  }
0x11ee   : > { %v13145_v45 = vadd.f32 %v13130_v59, %v13123_v29  ;;  %v13146_v38 = vadd.f32 %v13134_v41, %v13124_v30  ;;  %v13147_v16 = vadd.f32 %v13138_v7, %v13125_v9  ;;  %v13982_v0 = vunpack.c.h.bf16 %v14022_v22  ;;  %v14021_v41 = vld [vmem:[%s18981_s26 + $0x68] sm:$0xff]   ;;  %v14018_v49 = vld [vmem:[%s18981_s26 + $0x50] sm:$0xff]  }
0x11ef   : > { %14270 = vmatpush3.msra.mxu0 %v13954_v13  ;;  %v13950_v59 = vunpack.c.h.bf16 %v14014_v17  ;;  %v13981_v19 = vunpack.c.l.bf16 %v14022_v22  ;;  %v13949_v14 = vunpack.c.l.bf16 %v14014_v17  ;;  %v14013_v7 = vld [vmem:[%s18981_s26 + $0x28] sm:$0xff]   ;;  %v13978_v29 = vunpack.c.h.bf16 %v14021_v41  ;;  %v14010_v13 = vld [vmem:[%s18981_s26 + $0x10] sm:$0xff]  }
0x11f0   : > { %v13158_v31 = vrot.slane %v13145_v45, 7  ;;  %v13160_v39 = vrot.slane %v13146_v38, 7  ;;  %v13162_v25 = vrot.slane %v13147_v16, 7  ;;  %14271 = vmatprep.subr.mxu0 %v13985_v26  ;;  %v13946_v30 = vunpack.c.h.bf16 %v14013_v7  ;;  %v14024_v26 = vld [vmem:[%s18981_s26 + $0x80] sm:$0xff]  }
0x11f1   : > { %14272 = vmatpush3.msra.mxu0 %v13953_v63  ;;  %v13977_v9 = vunpack.c.l.bf16 %v14021_v41  ;;  %v13866_v17 = vld [vmem:[%s18784_s11 + $0x2] ss:$4 sm:$0x7] }
0x11f2   : > { %v13159_v8 = vsel %vm13034_vm14, %v13158_v31, %v13142_v18  ;;  %v13161_v28 = vsel %vm13034_vm14, %v13160_v39, %v13143_v6  ;;  %v13163_v21 = vsel %vm13034_vm14, %v13162_v25, %v13144_v54  ;;  %14273 = vmatprep.subr.mxu0 %v13982_v0  ;;  %v14019_v25 = vld [vmem:[%s18981_s26 + $0x58] sm:$0xff]  }
0x11f3   : > { %v13167_v53 = vsel %vm13043_vm15, %v13159_v8, 0.0  ;;  %v13168_v52 = vsel %vm13043_vm15, %v13161_v28, 0.0  ;;  %v13170_v15 = vsel %vm13047_vm0, %v13163_v21, 0.0  ;;  %14274 = vmatpush3.msra.mxu0 %v13950_v59  ;;  %v14025_v28 = vld [vmem:[%s18981_s26 + $0x88] sm:$0xff]   ;;  %v13973_v21 = vunpack.c.l.bf16 %v14020_v50 }
0x11f4   : > { %v13169_v32 = vadd.f32 %v13168_v52, %v13167_v53  ;;  %14275 = vmatprep.subr.mxu0 %v13981_v19  ;;  %v14011_v53 = vld [vmem:[%s18981_s26 + $0x18] sm:$0xff]   ;;  %v13969_v34 = vunpack.c.l.bf16 %v14019_v25  ;;  %v13993_v63 = vunpack.c.l.bf16 %v14025_v28  ;;  %v13234_v19 = vrot.slane %v13866_v17, %v18979_v20 }
0x11f5   : > { %14276 = vmatpush3.msra.mxu0 %v13949_v14  ;;  %v13938_v33 = vunpack.c.h.bf16 %v14011_v53  ;;  %v13867_v14 = vld [vmem:[%s18784_s11 + $0x3] ss:$4 sm:$0x7] }
0x11f6   : > { %v13171_v51 = vadd.f32 %v13170_v15, %v13169_v32  ;;  %14277 = vmatprep.subr.mxu0 %v13978_v29  ;;  %v13970_v15 = vunpack.c.h.bf16 %v14019_v25  ;;  %v13238_v29 = vrot.slane %v13866_v17, %v18980_v61 }
0x11f7   : > { %14278 = vmatpush3.msra.mxu0 %v13946_v30 }
0x11f8   : > { %13172 = vadd.xlane.f32.xlu1 %v13171_v51  ;;  %14279 = vmatprep.subr.mxu0 %v13977_v9  ;;  %v13994_v51 = vunpack.c.h.bf16 %v14025_v28  ;;  %v13230_v9 = vrot.slane %v13866_v17, %v18978_v5 }
0x1281   : > { %v13173_v12 = vpop.xlane.xlu1 %13172 }
0x1282   : > { %v13174_v11 = vmul.f32 0.0032467532, %v13173_v12  ;;  %v13937_v12 = vunpack.c.l.bf16 %v14011_v53 }
0x1284   : > { %v13176_v2 = vrot.slane %v13174_v11, 1  ;;  %v18648_v48 = vsub.f32 %v13142_v18, %v13174_v11  ;;  %v18650_v46 = vsub.f32 %v13143_v6, %v13174_v11  ;;  %v18652_v35 = vsub.f32 %v13144_v54, %v13174_v11  ;;  %v13308_v18 = vld [vmem:[%s18981_s26 + $0x98] sm:$0x3]  ;;  %v14026_v6 = vld [vmem:[%s18981_s26 + $0x90] sm:$0xff]  }
0x1285   : > { %v13974_v54 = vunpack.c.h.bf16 %v14020_v50  ;;  %v13347_v31 = vunpack.c.l.bf16 %v13308_v18  ;;  %v13998_v8 = vunpack.c.h.bf16 %v14026_v6  ;;  %v13997_v52 = vunpack.c.l.bf16 %v14026_v6 }
0x1286   : > { %v18654_v42 = vsub.f32 %v13145_v45, %v13176_v2  ;;  %v18656_v57 = vsub.f32 %v13146_v38, %v13176_v2  ;;  %v18658_v43 = vsub.f32 %v13147_v16, %v13176_v2  ;;  %v13185_v36 = vmul.f32 %v18648_v48, %v18648_v48  ;;  %v14012_v45 = vld [vmem:[%s18981_s26 + $0x20] sm:$0xff]  }
0x1287   : > { %v13186_v60 = vmul.f32 %v18650_v46, %v18650_v46  ;;  %v13187_v23 = vmul.f32 %v18652_v35, %v18652_v35  ;;  %v14708_v38 = vmov 0.0   ;;  %v13945_v16 = vunpack.c.l.bf16 %v14013_v7 }
0x1288   : > { %v13188_v40 = vmul.f32 %v18654_v42, %v18654_v42  ;;  %v13189_v10 = vmul.f32 %v18656_v57, %v18656_v57  ;;  %v13190_v62 = vmul.f32 %v18658_v43, %v18658_v43  ;;  %14462 = vmatprep.subr.mxu1 %v14708_v38  ;;  %14476 = vmatprep.mubr.msk.f32.mxu1 %vm14709_vm1, %v14708_v38  ;;  %v13942_v39 = vunpack.c.h.bf16 %v14012_v45 }
0x1289   : > { %14463 = vmatpush3.msk.msra.mxu1 %vm2491_vm9, %v13347_v31  ;;  %14280 = vmatpush3.msra.mxu0 %v13945_v16  ;;  %v13941_v32 = vunpack.c.l.bf16 %v14012_v45  ;;  %v13966_v11 = vunpack.c.h.bf16 %v14018_v49  ;;  %v13990_v2 = vunpack.c.h.bf16 %v14024_v26  ;;  %v13256_v16 = vrot.slane %v13867_v14, %v18979_v20 }
0x128a   : > { %v13197_v24 = vrot.slane %v13188_v40, 7  ;;  %v13199_v44 = vrot.slane %v13189_v10, 7  ;;  %v13201_v3 = vrot.slane %v13190_v62, 7  ;;  %14464 = vmatprep.subr.mxu1 %v14708_v38  ;;  %14281 = vmatprep.subr.mxu0 %v13974_v54  ;;  %v13934_v40 = vunpack.c.h.bf16 %v14010_v13  ;;  %v14017_v10 = vld [vmem:[%s18981_s26 + $0x48] sm:$0xff]  }
0x128b   : > { %14465 = vmatpush3.msra.mxu1 %v13998_v8  ;;  %14282 = vmatpush3.msra.mxu0 %v13942_v39  ;;  %v13965_v62 = vunpack.c.l.bf16 %v14018_v49  ;;  %v13260_v18 = vrot.slane %v13867_v14, %v18980_v61  ;;  %v13868_v49 = vld [vmem:[%s18982_s19] ss:$0 sm:$0xff] }
0x128c   : > { %v13198_v58 = vsel %vm13034_vm14, %v13197_v24, %v13185_v36  ;;  %v13200_v27 = vsel %vm13034_vm14, %v13199_v44, %v13186_v60  ;;  %v13202_v1 = vsel %vm13034_vm14, %v13201_v3, %v13187_v23  ;;  %14466 = vmatprep.subr.mxu1 %v14708_v38  ;;  %14283 = vmatprep.subr.mxu0 %v13973_v21  ;;  %v14009_v36 = vld [vmem:[%s18981_s26 + $0x8] sm:$0xff]   ;;  %v13989_v60 = vunpack.c.l.bf16 %v14024_v26  ;;  %v14016_v3 = vld [vmem:[%s18981_s26 + $0x40] sm:$0xff]  }
0x128d   : > { %v13206_v56 = vsel %vm13043_vm15, %v13198_v58, 0.0  ;;  %v13207_v47 = vsel %vm13043_vm15, %v13200_v27, 0.0  ;;  %v13209_v37 = vsel %vm13047_vm0, %v13202_v1, 0.0  ;;  %14467 = vmatpush3.msra.mxu1 %v13997_v52  ;;  %14284 = vmatpush3.msra.mxu0 %v13941_v32  ;;  %v13933_v23 = vunpack.c.l.bf16 %v14010_v13  ;;  %v13924_v27 = vld [vmem:[%s18981_s26] sm:$0xff]  }
0x128e   : > { %v13208_v55 = vadd.f32 %v13207_v47, %v13206_v56  ;;  %14468 = vmatprep.subr.mxu1 %v14708_v38  ;;  %14285 = vmatprep.subr.mxu0 %v13970_v15  ;;  %v13962_v24 = vunpack.c.h.bf16 %v14017_v10  ;;  %v13930_v44 = vunpack.c.h.bf16 %v14009_v36  ;;  %v13961_v58 = vunpack.c.l.bf16 %v14017_v10 }
0x128f   : > { %14469 = vmatpush3.msra.mxu1 %v13994_v51  ;;  %14286 = vmatpush3.msra.mxu0 %v13938_v33  ;;  %v13929_v1 = vunpack.c.l.bf16 %v14009_v36  ;;  %v13958_v56 = vunpack.c.h.bf16 %v14016_v3  ;;  %v13926_v47 = vunpack.c.h.bf16 %v13924_v27 }
0x1290   : > { %v13210_v4 = vadd.f32 %v13209_v37, %v13208_v55  ;;  %14470 = vmatprep.subr.mxu1 %v14708_v38  ;;  %14287 = vmatprep.subr.mxu0 %v13969_v34  ;;  %v13957_v55 = vunpack.c.l.bf16 %v14016_v3  ;;  %v13925_v37 = vunpack.c.l.bf16 %v13924_v27 }
0x1291   : > { %14471 = vmatpush3.msra.mxu1 %v13993_v63  ;;  %14288 = vmatpush3.msra.mxu0 %v13937_v12 }
0x1292   : > { %13211 = vadd.xlane.f32.xlu1 %v13210_v4  ;;  %14472 = vmatprep.subr.mxu1 %v14708_v38 }
0x1293   : > { %14289 = vmatprep.subr.mxu0 %v13966_v11  ;;  %14473 = vmatpush3.msra.mxu1 %v13990_v2 }
0x1294   : > { %14290 = vmatpush3.msra.mxu0 %v13934_v40  ;;  %14474 = vmatprep.subr.mxu1 %v14708_v38 }
0x1295   : > { %14291 = vmatprep.subr.mxu0 %v13965_v62  ;;  %14475 = vmatpush3.msra.mxu1 %v13989_v60 }
0x1296   : > { %14292 = vmatpush3.msra.mxu0 %v13933_v23 }
0x1297   : > { %14293 = vmatprep.subr.mxu0 %v13962_v24 }
0x1298   : > { %14294 = vmatpush3.msra.mxu0 %v13930_v44 }
0x1299   : > { %14295 = vmatprep.subr.mxu0 %v13961_v58 }
0x129a   : > { %14296 = vmatpush3.msra.mxu0 %v13929_v1 }
0x129b   : > { %14297 = vmatprep.subr.mxu0 %v13958_v56 }
0x129c   : > { %14298 = vmatpush3.msra.mxu0 %v13926_v47 }
0x129d   : > { %14299 = vmatprep.subr.mxu0 %v13957_v55 }
0x129e   : > { %14300 = vmatpush3.msra.mxu0 %v13925_v37 }
0x131b   : > { %v13212_v4 = vpop.xlane.xlu1 %13211 }
0x131c   : > { %v13213_v22 = vmul.f32 0.0032467532, %v13212_v4 }
0x131e   : > { %v13214_v0 = vadd.f32 1e-05, %v13213_v22 }
0x1320   : > { %14663 = vrsqrt.f32 %v13214_v0 }
0x132d   : > { %v14664_v59 = vpop.eup %14663 }
0x132e   : > { %v13217_v41 = vrot.slane %v14664_v59, 1  ;;  %v13221_v7 = vmul.f32 %v14664_v59, %v18650_v46  ;;  %v13222_v50 = vmul.f32 %v14664_v59, %v18652_v35  ;;  %v13220_v30 = vmul.f32 %v14664_v59, %v18648_v48 }
0x132f   : > { %v13252_v48 = vrot.slane %v13867_v14, %v18978_v5 }
0x1330   : > { %v13224_v45 = vmul.f32 %v13217_v41, %v18656_v57  ;;  %v13225_v38 = vmul.f32 %v13217_v41, %v18658_v43  ;;  %v13223_v6 = vmul.f32 %v13217_v41, %v18654_v42  ;;  %v13243_v54 = vmul.f32 %v13234_v19, %v13221_v7 }
0x1331   : > { %v13244_v31 = vmul.f32 %v13238_v29, %v13222_v50  ;;  %v13242_v39 = vmul.f32 %v13230_v9, %v13220_v30 }
0x1332   : > { %v13246_v46 = vmul.f32 %v13234_v19, %v13224_v45  ;;  %v13247_v35 = vmul.f32 %v13238_v29, %v13225_v38  ;;  %v13245_v25 = vmul.f32 %v13230_v9, %v13223_v6  ;;  %v13265_v57 = vadd.f32 %v13256_v16, %v13243_v54 }
0x1333   : > { %v13266_v43 = vadd.f32 %v13260_v18, %v13244_v31  ;;  %v13264_v20 = vadd.f32 %v13252_v48, %v13242_v39 }
0x1334   : > { %v13268_v8 = vadd.f32 %v13256_v16, %v13246_v46  ;;  %v13269_v28 = vadd.f32 %v13260_v18, %v13247_v35  ;;  %v13267_v21 = vadd.f32 %v13252_v48, %v13245_v25 }
0x1336   : > { %v13363_v53 = vrot.slane %v13268_v8, 7  ;;  %v13365_v52 = vrot.slane %v13269_v28, 7  ;;  %v13361_v32 = vrot.slane %v13267_v21, 7 }
0x1338   : > { %v13364_v61 = vsel %vm13034_vm14, %v13363_v53, %v13265_v57  ;;  %v13366_v42 = vsel %vm13034_vm14, %v13365_v52, %v13266_v43  ;;  %v13362_v15 = vsel %vm13034_vm14, %v13361_v32, %v13264_v20 }
0x1339   : > { %13438 = vmatprep.mubr.f32.mxu0 %v13364_v61  ;;  %14477 = vmatmul.mubr.msk.f32.vlgmr.msra.gmra.mxu1 %vm1853_vm6, %v13366_v42 }
0x133a   : > { %13439 = vmatmul.mubr.f32.vlgmr.msra.gmra.mxu0 %v13362_v15 }
0x13f9   : > { %v13510_v5 = vpop.f32.mrf.mxu1 }
0x13fa   : > { %v14301_v51 = vpop.f32.mrf.mxu0 }
0x13fb   : > { %v14478_v33 = vpop.f32.mrf.mxu1 }
0x13fc   : > { %v14302_v26 = vpop.f32.mrf.mxu0 }
0x13fd   : > { %v14303_v34 = vadd.f32 %v14302_v26, %v14301_v51 }
0x13ff   : > { %v13441_v13 = vadd.f32 %v14303_v34, %v13868_v49 }
0x1401   : > { %v13511_v63 = vadd.f32 %v13510_v5, %v13441_v13 }
0x1403   : > { %13515 = vst.msk [vmem:[#allocation3] sm:$0x3] %vm13514_vm2, %v13511_v63 }
0x1404 PF: > { %p14489_p6 = scmp.eq.s32.totalorder %s14792_s30, 3  ;;  %s14710_s17 = smov [#allocation3]  }
0x1405   : > { %s13523_s22 = sshll.u32 %s14710_s17, 4  ;;  %s13524_s22 = int_to_ptr.vmem [resolvable:$true] %s13523_s22 }
0x1406   : > { %s14665_s20 = scalar_lea.vmem %s13524_s22, 32  ;;  %p14672_p10 = scmp.lt.s32.totalorder %s13524_s22, %s13524_s22 }
0x1407   : > { %p14666_p7 = scmp.ne.s32.totalorder %s13524_s22, %s14665_s20  ;;  %p14673_p11 = scmp.lt.s32.totalorder %s14665_s20, %s14665_s20 }
0x1409   : > { %p14667_p8 = pnand %p14666_p7, %p14489_p6  ;;  %p14674_p12 = por %p14673_p11, %p14672_p10 }
0x140b   : > { %p14668_p9 = pneg %p14667_p8 }
0x140d   : > { %p14675_p13 = pnand %p14674_p12, %p14668_p9 }
0x140f   : > { %14678 = shalt.err (!%p14675_p13)
}
0x1410   : > { %s18983_s24 = sld [smem:[#allocation40_spill]] }
0x1416   : > { %14486 = dma.vmem_to_hbm [thread:$0]  (%p14489_p6), %s13524_s22, 32, %s18983_s24, [#allocation4]  }
0x1417   : > { %14694 = dma.done.wait (%p14489_p6), [#allocation4], 32  }
0x1418   : > { %14696 = vsyncadd (%p14489_p6), [#allocation4], 4294967264 }
0x1419 PF: > { %s18984_s28 = sld [smem:[#allocation6_spill]] }
0x141f   : > { %s25_s29 = sadd.s32 1, %s18984_s28  }
0x1420   : > { %p22_p0 = scmp.ge.s32.totalorder %s25_s29, 6  }
0x1422   :  { %24 = sbr.rel (!%p22_p0) target bundleno = 6 (0x6), region = 136 }
0x1427   :  { %13536 = vsyncpa [#allocation4], 1 }
0x1428   :  { %13538 = vsyncpa [#allocation4 + $0x1], 1 }

</bundles_post_ra>
